<compile_context>
chip_gen: v7x
topology: tpu7x:2x2x1
jax: 0.10.0
libtpu: 0.0.40
codegen_flags: <defaults>
</compile_context>

<pallas_src>
from functools import partial

import jax
import jax.numpy as jnp
from jax.experimental import pallas as pl
from jax.experimental.pallas import tpu as pltpu
from jax.scipy.linalg import block_diag

# ----- model sizes (args) -----
L = 8              # number_of_labels
D = 2 * L          # NTN input dim = 2 * number_labels
T = 16             # args.tensor_neurons (feature_count)
B = 16             # args.bottle_neck_neurons
NPAD = 16          # padded node count per graph (zero rows/cols are exact no-ops)
TD3 = 3 * T * D    # 768: fused NTN inner width (3 heads)

# ----- packed parameter-slab row offsets (all multiples of 8 -> tile aligned) -----
SMAT_OFF = 0                   # (768, 48)  block-diag per-slice block-sum constant
WMB_OFF = SMAT_OFF + TD3       # (96, 48)   block weights: [e1-part ; e2-part]
FC1_OFF = WMB_OFF + 6 * D      # (48, 48)   block-diag T  -> B
FC2_OFF = FC1_OFF + 128        # (48, 24)   block-diag B  -> 8
FC3_OFF = FC2_OFF + 128        # (24, 12)   block-diag 8  -> 4
SCW_OFF = FC3_OFF + 128        # (12,  3)   block-diag 4  -> 1
BIAS_OFF = SCW_OFF + 128       # 5 bias rows at 8-row stride (nb, fc1b, fc2b, fc3b, scb)
SLAB_ROWS = BIAS_OFF + 40      # 1416

# ----- lane layout of the packed per-pair input tile (16 sublanes x 128 lanes) -----
F1_LANE = 0            # f1      : lanes [0, 8)
F2_LANE = L            # f2      : lanes [8, 16)
A1_LANE = 16           # A1      : lanes [16, 32)
A1T_LANE = 32          # A1^T    : lanes [32, 48)
A2_LANE = 48           # A2      : lanes [48, 64)
A2T_LANE = 64          # A2^T    : lanes [64, 80)
PACK_LANES = 128


def tagsim_kernel(x_ref, avgv_ref, wr_ref, slab_ref, out_ref):
    f32 = jnp.float32
    x = x_ref[...].astype(f32)                         # (PB, 16, 128) packed pair tiles

    f1 = x[:, :, F1_LANE:F1_LANE + L]                  # (PB, 16, 8)
    f2 = x[:, :, F2_LANE:F2_LANE + L]
    a1 = x[:, :, A1_LANE:A1_LANE + NPAD]               # (PB, 16, 16)  A[i, j]
    a1t = x[:, :, A1T_LANE:A1T_LANE + NPAD]            # (PB, 16, 16)  A[j, i]
    a2 = x[:, :, A2_LANE:A2_LANE + NPAD]
    a2t = x[:, :, A2T_LANE:A2T_LANE + NPAD]

    def agg(a, at, f):
        # GraphAggregationLayer x2 + node-sum pooling, without any MXU matmuls:
        #   s0 = 1^T f,  s1 = 1^T (A f) = d^T f,  s2 = 1^T (A A f) = (d^T A) f,  d = 1^T A.
        d_lane = jnp.sum(a, axis=1, keepdims=True)     # (PB, 1, 16)  d, node index on lanes
        d_sub = jnp.sum(at, axis=2, keepdims=True)     # (PB, 16, 1)  d, node index on sublanes
        e_sub = jnp.sum(at * d_lane, axis=2, keepdims=True)   # (PB, 16, 1) (d^T A), sublanes
        s0 = jnp.sum(f, axis=1)                        # (PB, 8)
        s1 = jnp.sum(f * d_sub, axis=1)                # (PB, 8)
        s2 = jnp.sum(f * e_sub, axis=1)                # (PB, 8)
        return s0, s1, s2

    s0_1, s1_1, s2_1 = agg(a1, a1t, f1)
    s0_2, s1_2, s2_2 = agg(a2, a2t, f2)

    # Fused head inputs, head order (nc, in, ie) -> lanes [0:16 | 16:32 | 32:48].
    # nc/in use g_01 = [s0, s1]; ie uses g_12 = [s1, s2].
    e1 = jnp.concatenate([s0_1, s1_1, s0_1, s1_1, s1_1, s2_1], axis=1)   # (PB, 48)
    e2 = jnp.concatenate([s0_2, s1_2, s0_2, s1_2, s1_2, s2_2], axis=1)   # (PB, 48)

    wm = wr_ref[0:3 * D, :]          # (48, 768) block-diag bilinear weights
    rmat = wr_ref[3 * D:6 * D, :]    # (48, 768) block-diag lane-replication constant

    # Fused NTN bilinear: s[p, t*T+k] = e1_t @ W_t[:,:,k] @ e2_t^T   (3 heads in one pass).
    g = jnp.dot(e1, wm, preferred_element_type=f32)            # (PB, 768)
    e2t = jnp.dot(e2, rmat, preferred_element_type=f32)        # (PB, 768): e2 tiled per slice
    s = jnp.dot(g * e2t, slab_ref[SMAT_OFF:SMAT_OFF + TD3, :],
                preferred_element_type=f32)                    # (PB, 128), lanes 0..47 live

    comb = jnp.concatenate([e1, e2], axis=1)                   # (PB, 96)
    blk = jnp.dot(comb, slab_ref[WMB_OFF:WMB_OFF + 6 * D, :],
                  preferred_element_type=f32)                  # (PB, 128)

    nb = slab_ref[BIAS_OFF:BIAS_OFF + 1, :]
    h = jax.nn.relu(s + blk + nb)                              # fused NTN output (48 live lanes)

    # Fused MLP heads: block-diagonal T->B->8->4->1, everything padded to 128 lanes.
    h = jax.nn.relu(jnp.dot(h, slab_ref[FC1_OFF:FC1_OFF + 128, :], preferred_element_type=f32)
                    + slab_ref[BIAS_OFF + 8:BIAS_OFF + 9, :])
    h = jax.nn.relu(jnp.dot(h, slab_ref[FC2_OFF:FC2_OFF + 128, :], preferred_element_type=f32)
                    + slab_ref[BIAS_OFF + 16:BIAS_OFF + 17, :])
    h = jax.nn.relu(jnp.dot(h, slab_ref[FC3_OFF:FC3_OFF + 128, :], preferred_element_type=f32)
                    + slab_ref[BIAS_OFF + 24:BIAS_OFF + 25, :])
    logits = (jnp.dot(h, slab_ref[SCW_OFF:SCW_OFF + 128, :], preferred_element_type=f32)
              + slab_ref[BIAS_OFF + 32:BIAS_OFF + 33, :])      # (PB, 128): lanes 0..2 real

    lane = jax.lax.broadcasted_iota(jnp.int32, logits.shape, 1)
    head_mask = lane < 3
    score = jax.nn.sigmoid(logits)
    # target_mode == 'exp': pre_ged = sum(-log(score)) * avg_v, computed as softplus(-logit)
    # so a saturated sigmoid cannot yield -log(0) = inf.
    # TODO(synk): 'linear' target_mode (score * hb) not wired; only 'exp' implemented.
    softp = jnp.maximum(-logits, 0.0) + jnp.log(1.0 + jnp.exp(-jnp.abs(logits)))
    avgv = avgv_ref[...]                                       # (PB, 1)
    pre_ged = jnp.sum(jnp.where(head_mask, softp, 0.0), axis=1, keepdims=True) * avgv

    out = jnp.where(head_mask, score, 0.0)
    out_ref[...] = jnp.where(lane == 3, pre_ged, out)


@partial(jax.jit, static_argnames=("block_pairs",))
def tagsim_forward(packed, avg_v, wr, slab, block_pairs=128):
    P = packed.shape[0]
    pb = block_pairs
    if P <= pb:
        # keep >= 2 grid steps when there is enough work (v7x megacore), pb multiple of 8
        pb = max(8, 8 * ((P + 15) // 16))
    num_blocks = pl.cdiv(P, pb)
    Ppad = num_blocks * pb

    avg2 = avg_v.reshape(P, 1).astype(jnp.float32)
    if Ppad != P:
        packed = jnp.pad(packed, ((0, Ppad - P), (0, 0), (0, 0)))
        avg2 = jnp.pad(avg2, ((0, Ppad - P), (0, 0)))

    weight_bytes = 4 * (6 * D * TD3 + SLAB_ROWS * 128)
    out = pl.pallas_call(
        tagsim_kernel,
        out_shape=jax.ShapeDtypeStruct((Ppad, 128), jnp.float32),
        grid=(num_blocks,),
        in_specs=[
            pl.BlockSpec((pb, NPAD, PACK_LANES), lambda i: (i, 0, 0)),   # packed pair tiles
            pl.BlockSpec((pb, 1), lambda i: (i, 0)),                     # avg_v
            pl.BlockSpec((6 * D, TD3), lambda i: (0, 0)),                # wm|rmat (resident)
            pl.BlockSpec((SLAB_ROWS, 128), lambda i: (0, 0)),            # param slab (resident)
        ],
        out_specs=pl.BlockSpec((pb, 128), lambda i: (i, 0)),
        compiler_params=pltpu.CompilerParams(dimension_semantics=("parallel",)),
        cost_estimate=pl.CostEstimate(
            flops=520_000 * Ppad,
            transcendentals=400 * Ppad,
            bytes_accessed=(2 * NPAD * PACK_LANES + 4 + 512) * Ppad + weight_bytes),
    )(packed, avg2, wr, slab)
    return out[:P, :3], out[:P, 3]


# ----- host-side packing of one graph pair into a single lane-dense (16, 128) tile -----
def pack_pairs(adj1, f1, adj2, f2):
    P = adj1.shape[0]
    bf16 = jnp.bfloat16          # all entries are small exact integers -> bf16 is lossless
    x = jnp.zeros((P, NPAD, PACK_LANES), bf16)
    x = x.at[:, :, F1_LANE:F1_LANE + L].set(f1.astype(bf16))
    x = x.at[:, :, F2_LANE:F2_LANE + L].set(f2.astype(bf16))
    x = x.at[:, :, A1_LANE:A1_LANE + NPAD].set(adj1.astype(bf16))
    x = x.at[:, :, A1T_LANE:A1T_LANE + NPAD].set(jnp.swapaxes(adj1, 1, 2).astype(bf16))
    x = x.at[:, :, A2_LANE:A2_LANE + NPAD].set(adj2.astype(bf16))
    x = x.at[:, :, A2T_LANE:A2T_LANE + NPAD].set(jnp.swapaxes(adj2, 1, 2).astype(bf16))
    return x


# ----- deterministic parameter init (torch shapes) -----
def init_params(key):
    def nrm(k, shape, scale=0.05):
        return scale * jax.random.normal(k, shape, dtype=jnp.float32)
    ks = jax.random.split(key, 11)
    return dict(
        wm=nrm(ks[0], (3, D, D, T)),          # TensorNetworkModule.weight_matrix (per type)
        wmb=nrm(ks[1], (3, T, 2 * D)),        # weight_matrix_block
        nb=nrm(ks[2], (3, T, 1)),             # NTN bias
        fc1w=nrm(ks[3], (3, B, T)), fc1b=nrm(ks[4], (3, B)),
        fc2w=nrm(ks[5], (3, 8, B)), fc2b=nrm(ks[6], (3, 8)),
        fc3w=nrm(ks[7], (3, 4, 8)), fc3b=nrm(ks[8], (3, 4)),
        scw=nrm(ks[9], (3, 1, 4)), scb=nrm(ks[10], (3, 1)),
    )


# ----- host-side packing of parameters into the two kernel weight arrays -----
def to_kernel_layout(p):
    f32 = jnp.float32
    # Bilinear weights: wm (3,D,D,T) -> per-head (D, T*D) with [d1, k*D+d2] = W[d1,d2,k]
    wm_flat = jnp.transpose(p['wm'], (0, 1, 3, 2)).reshape(3, D, T * D)
    wm_bd = block_diag(*[wm_flat[t] for t in range(3)])            # (48, 768)
    rmat = jnp.tile(jnp.eye(D, dtype=f32), (1, T))                 # (D, T*D)
    rmat_bd = block_diag(*([rmat] * 3))                            # (48, 768)
    wr = jnp.concatenate([wm_bd, rmat_bd], axis=0)                 # (96, 768)

    smat = jnp.repeat(jnp.eye(T, dtype=f32), D, axis=0)            # (T*D, T)
    smat_bd = block_diag(*([smat] * 3))                            # (768, 48)

    wmbT = jnp.transpose(p['wmb'], (0, 2, 1))                      # (3, 2D, T)
    wmb_e1 = block_diag(*[wmbT[t, :D, :] for t in range(3)])       # (48, 48)
    wmb_e2 = block_diag(*[wmbT[t, D:, :] for t in range(3)])       # (48, 48)
    wmb_packed = jnp.concatenate([wmb_e1, wmb_e2], axis=0)         # (96, 48)

    fc1_bd = block_diag(*[p['fc1w'][t].T for t in range(3)])       # (48, 48)
    fc2_bd = block_diag(*[p['fc2w'][t].T for t in range(3)])       # (48, 24)
    fc3_bd = block_diag(*[p['fc3w'][t].T for t in range(3)])       # (24, 12)
    scw_bd = block_diag(*[p['scw'][t].T for t in range(3)])        # (12, 3)

    nb_row = p['nb'].reshape(3 * T)
    fc1b = p['fc1b'].reshape(-1)
    fc2b = p['fc2b'].reshape(-1)
    fc3b = p['fc3b'].reshape(-1)
    scb = p['scb'].reshape(-1)

    slab = jnp.zeros((SLAB_ROWS, 128), f32)
    slab = slab.at[SMAT_OFF:SMAT_OFF + TD3, :3 * T].set(smat_bd)
    slab = slab.at[WMB_OFF:WMB_OFF + 6 * D, :3 * T].set(wmb_packed)
    slab = slab.at[FC1_OFF:FC1_OFF + 3 * T, :3 * B].set(fc1_bd)
    slab = slab.at[FC2_OFF:FC2_OFF + 3 * B, :24].set(fc2_bd)
    slab = slab.at[FC3_OFF:FC3_OFF + 24, :12].set(fc3_bd)
    slab = slab.at[SCW_OFF:SCW_OFF + 12, :3].set(scw_bd)
    slab = slab.at[BIAS_OFF + 0, :3 * T].set(nb_row)
    slab = slab.at[BIAS_OFF + 8, :3 * B].set(fc1b)
    slab = slab.at[BIAS_OFF + 16, :24].set(fc2b)
    slab = slab.at[BIAS_OFF + 24, :12].set(fc3b)
    slab = slab.at[BIAS_OFF + 32, :3].set(scb)
    return wr, slab


# ----- pure-JAX reference mirroring the torch module exactly (one pair) -----
def reference_forward(adj1, f1, adj2, f2, p, avg_v):
    g1h1 = adj1 @ f1; g1h2 = adj1 @ g1h1
    g2h1 = adj2 @ f2; g2h2 = adj2 @ g2h1
    g1_01 = jnp.concatenate([f1, g1h1], axis=1).sum(0)[:, None]
    g1_12 = jnp.concatenate([g1h1, g1h2], axis=1).sum(0)[:, None]
    g2_01 = jnp.concatenate([f2, g2h1], axis=1).sum(0)[:, None]
    g2_12 = jnp.concatenate([g2h1, g2h2], axis=1).sum(0)[:, None]

    def ntn(t, e1, e2):
        scoring = (e1.T @ p['wm'][t].reshape(D, D * T)).reshape(D, T)
        scoring = scoring.T @ e2
        comb = jnp.concatenate([e1, e2], axis=0)
        blk = p['wmb'][t] @ comb
        return jax.nn.relu(scoring + blk + p['nb'][t])   # (T, 1)

    def mlp(t, x):  # x (1, T)
        x = jax.nn.relu(x @ p['fc1w'][t].T + p['fc1b'][t])
        x = jax.nn.relu(x @ p['fc2w'][t].T + p['fc2b'][t])
        x = jax.nn.relu(x @ p['fc3w'][t].T + p['fc3b'][t])
        return jax.nn.sigmoid(x @ p['scw'][t].T + p['scb'][t])

    s_nc = mlp(0, ntn(0, g1_01, g2_01).T)
    s_in = mlp(1, ntn(1, g1_01, g2_01).T)
    s_ie = mlp(2, ntn(2, g1_12, g2_12).T)
    score = jnp.concatenate([s_nc.reshape(-1), s_in.reshape(-1), s_ie.reshape(-1)])
    pre_ged = (-jnp.log(score) * avg_v).sum()
    return score, pre_ged


if __name__ == "__main__":
    key = jax.random.PRNGKey(0)
    kpar, kn1, kn2, ka1, ka2, kl1, kl2 = jax.random.split(key, 7)
    params = init_params(kpar)
    wr, slab = to_kernel_layout(params)

    # Batch of P graph pairs, node counts 5..16, padded to NPAD nodes (zero rows/cols no-op).
    P = 64
    n1 = jax.random.randint(kn1, (P,), 5, NPAD + 1)
    n2 = jax.random.randint(kn2, (P,), 5, NPAD + 1)

    def make_graphs(kadj, klab, n):
        mask = (jnp.arange(NPAD)[None, :] < n[:, None]).astype(jnp.float32)   # (P, NPAD)
        a = (jax.random.uniform(kadj, (P, NPAD, NPAD)) < 0.3).astype(jnp.float32)
        a = a * (1.0 - jnp.eye(NPAD, dtype=jnp.float32))[None]
        a = a * mask[:, :, None] * mask[:, None, :]
        lab = jax.random.randint(klab, (P, NPAD), 0, L)
        f = jax.nn.one_hot(lab, L, dtype=jnp.float32) * mask[:, :, None]
        return a, f

    adj1, f1 = make_graphs(ka1, kl1, n1)
    adj2, f2 = make_graphs(ka2, kl2, n2)
    avg_v = (n1 + n2).astype(jnp.float32) / 2.0

    packed = pack_pairs(adj1, f1, adj2, f2)
    scores, pregeds = tagsim_forward(packed, avg_v, wr, slab)
    scores = jax.block_until_ready(scores)
    pregeds = jax.block_until_ready(pregeds)

    ref_fn = jax.vmap(lambda a1, x1, a2, x2, av: reference_forward(a1, x1, a2, x2, params, av))
    ref_scores, ref_pre = ref_fn(adj1, f1, adj2, f2, avg_v)

    assert jnp.allclose(scores, ref_scores, rtol=2e-4, atol=2e-5), \
        (scores[:4], ref_scores[:4])
    assert jnp.allclose(pregeds, ref_pre, rtol=2e-4, atol=1e-3), \
        (pregeds[:4], ref_pre[:4])
    print("KERNEL_OK")
</pallas_src>

<mosaic_0001>
module attributes {stable_mosaic.version = 11 : i64} {
  func.func @tagsim_kernel(%arg0: i32, %arg1: memref<32x16x128xbf16, #tpu.memory_space<vmem>>, %arg2: memref<32x1xf32, #tpu.memory_space<vmem>>, %arg3: memref<96x768xf32, #tpu.memory_space<vmem>>, %arg4: memref<1416x128xf32, #tpu.memory_space<vmem>>, %arg5: memref<32x128xf32, #tpu.memory_space<vmem>>) attributes {dimension_semantics = [#tpu.dimension_semantics<parallel>], iteration_bounds = array<i64: 2>, scalar_prefetch = 0 : i64, scratch_operands = 0 : i64, tpu.core_type = #tpu.core_type<tc>, window_params = [{transform_indices = @transform_0, window_bounds = array<i64: 32, 16, 128>}, {transform_indices = @transform_1, window_bounds = array<i64: 32, 1>}, {pipeline_mode = #tpu.pipeline_mode<synchronous>, transform_indices = @transform_2, window_bounds = array<i64: 96, 768>}, {pipeline_mode = #tpu.pipeline_mode<synchronous>, transform_indices = @transform_3, window_bounds = array<i64: 1416, 128>}, {transform_indices = @transform_4, window_bounds = array<i64: 32, 128>}]} {
    %c0 = arith.constant 0 : index
    %c0_0 = arith.constant 0 : index
    %c0_1 = arith.constant 0 : index
    %0 = vector.load %arg1[%c0, %c0_0, %c0_1] : memref<32x16x128xbf16, #tpu.memory_space<vmem>>, vector<32x16x128xbf16>
    %1 = arith.extf %0 : vector<32x16x128xbf16> to vector<32x16x128xf32>
    %2 = vector.extract_strided_slice %1 {offsets = [0, 0, 0], sizes = [32, 16, 8], strides = [1, 1, 1]} : vector<32x16x128xf32> to vector<32x16x8xf32>
    %3 = vector.extract_strided_slice %1 {offsets = [0, 0, 8], sizes = [32, 16, 8], strides = [1, 1, 1]} : vector<32x16x128xf32> to vector<32x16x8xf32>
    %4 = vector.extract_strided_slice %1 {offsets = [0, 0, 16], sizes = [32, 16, 16], strides = [1, 1, 1]} : vector<32x16x128xf32> to vector<32x16x16xf32>
    %5 = vector.extract_strided_slice %1 {offsets = [0, 0, 32], sizes = [32, 16, 16], strides = [1, 1, 1]} : vector<32x16x128xf32> to vector<32x16x16xf32>
    %6 = vector.extract_strided_slice %1 {offsets = [0, 0, 48], sizes = [32, 16, 16], strides = [1, 1, 1]} : vector<32x16x128xf32> to vector<32x16x16xf32>
    %7 = vector.extract_strided_slice %1 {offsets = [0, 0, 64], sizes = [32, 16, 16], strides = [1, 1, 1]} : vector<32x16x128xf32> to vector<32x16x16xf32>
    %cst = arith.constant dense<0.000000e+00> : vector<32x16xf32>
    %8 = vector.multi_reduction <add>, %4, %cst [1] : vector<32x16x16xf32> to vector<32x16xf32>
    %9 = vector.shape_cast %8 : vector<32x16xf32> to vector<32x1x16xf32>
    %cst_2 = arith.constant dense<0.000000e+00> : vector<32x16xf32>
    %10 = vector.multi_reduction <add>, %5, %cst_2 [2] : vector<32x16x16xf32> to vector<32x16xf32>
    %11 = vector.shape_cast %10 : vector<32x16xf32> to vector<32x16x1xf32>
    %12 = vector.broadcast %9 : vector<32x1x16xf32> to vector<32x16x16xf32>
    %13 = arith.mulf %5, %12 : vector<32x16x16xf32>
    %cst_3 = arith.constant dense<0.000000e+00> : vector<32x16xf32>
    %14 = vector.multi_reduction <add>, %13, %cst_3 [2] : vector<32x16x16xf32> to vector<32x16xf32>
    %15 = vector.shape_cast %14 : vector<32x16xf32> to vector<32x16x1xf32>
    %cst_4 = arith.constant dense<0.000000e+00> : vector<32x8xf32>
    %16 = vector.multi_reduction <add>, %2, %cst_4 [1] : vector<32x16x8xf32> to vector<32x8xf32>
    %17 = vector.broadcast %11 : vector<32x16x1xf32> to vector<32x16x8xf32>
    %18 = arith.mulf %2, %17 : vector<32x16x8xf32>
    %cst_5 = arith.constant dense<0.000000e+00> : vector<32x8xf32>
    %19 = vector.multi_reduction <add>, %18, %cst_5 [1] : vector<32x16x8xf32> to vector<32x8xf32>
    %20 = vector.broadcast %15 : vector<32x16x1xf32> to vector<32x16x8xf32>
    %21 = arith.mulf %2, %20 : vector<32x16x8xf32>
    %cst_6 = arith.constant dense<0.000000e+00> : vector<32x8xf32>
    %22 = vector.multi_reduction <add>, %21, %cst_6 [1] : vector<32x16x8xf32> to vector<32x8xf32>
    %cst_7 = arith.constant dense<0.000000e+00> : vector<32x16xf32>
    %23 = vector.multi_reduction <add>, %6, %cst_7 [1] : vector<32x16x16xf32> to vector<32x16xf32>
    %24 = vector.shape_cast %23 : vector<32x16xf32> to vector<32x1x16xf32>
    %cst_8 = arith.constant dense<0.000000e+00> : vector<32x16xf32>
    %25 = vector.multi_reduction <add>, %7, %cst_8 [2] : vector<32x16x16xf32> to vector<32x16xf32>
    %26 = vector.shape_cast %25 : vector<32x16xf32> to vector<32x16x1xf32>
    %27 = vector.broadcast %24 : vector<32x1x16xf32> to vector<32x16x16xf32>
    %28 = arith.mulf %7, %27 : vector<32x16x16xf32>
    %cst_9 = arith.constant dense<0.000000e+00> : vector<32x16xf32>
    %29 = vector.multi_reduction <add>, %28, %cst_9 [2] : vector<32x16x16xf32> to vector<32x16xf32>
    %30 = vector.shape_cast %29 : vector<32x16xf32> to vector<32x16x1xf32>
    %cst_10 = arith.constant dense<0.000000e+00> : vector<32x8xf32>
    %31 = vector.multi_reduction <add>, %3, %cst_10 [1] : vector<32x16x8xf32> to vector<32x8xf32>
    %32 = vector.broadcast %26 : vector<32x16x1xf32> to vector<32x16x8xf32>
    %33 = arith.mulf %3, %32 : vector<32x16x8xf32>
    %cst_11 = arith.constant dense<0.000000e+00> : vector<32x8xf32>
    %34 = vector.multi_reduction <add>, %33, %cst_11 [1] : vector<32x16x8xf32> to vector<32x8xf32>
    %35 = vector.broadcast %30 : vector<32x16x1xf32> to vector<32x16x8xf32>
    %36 = arith.mulf %3, %35 : vector<32x16x8xf32>
    %cst_12 = arith.constant dense<0.000000e+00> : vector<32x8xf32>
    %37 = vector.multi_reduction <add>, %36, %cst_12 [1] : vector<32x16x8xf32> to vector<32x8xf32>
    %38 = tpu.concatenate %16, %19, %16, %19, %19, %22 in 1 : vector<32x8xf32>, vector<32x8xf32>, vector<32x8xf32>, vector<32x8xf32>, vector<32x8xf32>, vector<32x8xf32> -> vector<32x48xf32>
    %39 = tpu.concatenate %31, %34, %31, %34, %34, %37 in 1 : vector<32x8xf32>, vector<32x8xf32>, vector<32x8xf32>, vector<32x8xf32>, vector<32x8xf32>, vector<32x8xf32> -> vector<32x48xf32>
    %c0_13 = arith.constant 0 : index
    %c0_14 = arith.constant 0 : index
    %40 = vector.load %arg3[%c0_13, %c0_14] : memref<96x768xf32, #tpu.memory_space<vmem>>, vector<48x768xf32>
    %c48 = arith.constant 48 : index
    %c0_15 = arith.constant 0 : index
    %41 = vector.load %arg3[%c48, %c0_15] : memref<96x768xf32, #tpu.memory_space<vmem>>, vector<48x768xf32>
    %cst_16 = arith.constant dense<0.000000e+00> : vector<32x768xf32>
    %42 = tpu.matmul %38, %40, %cst_16 {dimension_numbers = #tpu.dot_dimension_numbers<[1], [0], [0], [1], [0, 0, 1, 1], [], []>} : vector<32x48xf32>, vector<48x768xf32>, vector<32x768xf32> -> vector<32x768xf32>
    %cst_17 = arith.constant dense<0.000000e+00> : vector<32x768xf32>
    %43 = tpu.matmul %39, %41, %cst_17 {dimension_numbers = #tpu.dot_dimension_numbers<[1], [0], [0], [1], [0, 0, 1, 1], [], []>} : vector<32x48xf32>, vector<48x768xf32>, vector<32x768xf32> -> vector<32x768xf32>
    %44 = arith.mulf %42, %43 : vector<32x768xf32>
    %c0_18 = arith.constant 0 : index
    %c0_19 = arith.constant 0 : index
    %45 = vector.load %arg4[%c0_18, %c0_19] : memref<1416x128xf32, #tpu.memory_space<vmem>>, vector<768x128xf32>
    %cst_20 = arith.constant dense<0.000000e+00> : vector<32x128xf32>
    %46 = tpu.matmul %44, %45, %cst_20 {dimension_numbers = #tpu.dot_dimension_numbers<[1], [0], [0], [1], [0, 0, 1, 1], [], []>} : vector<32x768xf32>, vector<768x128xf32>, vector<32x128xf32> -> vector<32x128xf32>
    %47 = tpu.concatenate %38, %39 in 1 : vector<32x48xf32>, vector<32x48xf32> -> vector<32x96xf32>
    %c768 = arith.constant 768 : index
    %c0_21 = arith.constant 0 : index
    %48 = vector.load %arg4[%c768, %c0_21] : memref<1416x128xf32, #tpu.memory_space<vmem>>, vector<96x128xf32>
    %cst_22 = arith.constant dense<0.000000e+00> : vector<32x128xf32>
    %49 = tpu.matmul %47, %48, %cst_22 {dimension_numbers = #tpu.dot_dimension_numbers<[1], [0], [0], [1], [0, 0, 1, 1], [], []>} : vector<32x96xf32>, vector<96x128xf32>, vector<32x128xf32> -> vector<32x128xf32>
    %c1376 = arith.constant 1376 : index
    %c0_23 = arith.constant 0 : index
    %50 = vector.load %arg4[%c1376, %c0_23] : memref<1416x128xf32, #tpu.memory_space<vmem>>, vector<1x128xf32>
    %51 = arith.addf %46, %49 : vector<32x128xf32>
    %52 = vector.broadcast %50 : vector<1x128xf32> to vector<32x128xf32>
    %53 = arith.addf %51, %52 : vector<32x128xf32>
    %cst_24 = arith.constant 0.000000e+00 : f32
    %54 = vector.broadcast %cst_24 : f32 to vector<32x128xf32>
    %55 = arith.maximumf %53, %54 : vector<32x128xf32>
    %c864 = arith.constant 864 : index
    %c0_25 = arith.constant 0 : index
    %56 = vector.load %arg4[%c864, %c0_25] : memref<1416x128xf32, #tpu.memory_space<vmem>>, vector<128x128xf32>
    %cst_26 = arith.constant dense<0.000000e+00> : vector<32x128xf32>
    %57 = tpu.matmul %55, %56, %cst_26 {dimension_numbers = #tpu.dot_dimension_numbers<[1], [0], [0], [1], [0, 0, 1, 1], [], []>} : vector<32x128xf32>, vector<128x128xf32>, vector<32x128xf32> -> vector<32x128xf32>
    %c1384 = arith.constant 1384 : index
    %c0_27 = arith.constant 0 : index
    %58 = vector.load %arg4[%c1384, %c0_27] : memref<1416x128xf32, #tpu.memory_space<vmem>>, vector<1x128xf32>
    %59 = vector.broadcast %58 : vector<1x128xf32> to vector<32x128xf32>
    %60 = arith.addf %57, %59 : vector<32x128xf32>
    %cst_28 = arith.constant 0.000000e+00 : f32
    %61 = vector.broadcast %cst_28 : f32 to vector<32x128xf32>
    %62 = arith.maximumf %60, %61 : vector<32x128xf32>
    %c992 = arith.constant 992 : index
    %c0_29 = arith.constant 0 : index
    %63 = vector.load %arg4[%c992, %c0_29] : memref<1416x128xf32, #tpu.memory_space<vmem>>, vector<128x128xf32>
    %cst_30 = arith.constant dense<0.000000e+00> : vector<32x128xf32>
    %64 = tpu.matmul %62, %63, %cst_30 {dimension_numbers = #tpu.dot_dimension_numbers<[1], [0], [0], [1], [0, 0, 1, 1], [], []>} : vector<32x128xf32>, vector<128x128xf32>, vector<32x128xf32> -> vector<32x128xf32>
    %c1392 = arith.constant 1392 : index
    %c0_31 = arith.constant 0 : index
    %65 = vector.load %arg4[%c1392, %c0_31] : memref<1416x128xf32, #tpu.memory_space<vmem>>, vector<1x128xf32>
    %66 = vector.broadcast %65 : vector<1x128xf32> to vector<32x128xf32>
    %67 = arith.addf %64, %66 : vector<32x128xf32>
    %cst_32 = arith.constant 0.000000e+00 : f32
    %68 = vector.broadcast %cst_32 : f32 to vector<32x128xf32>
    %69 = arith.maximumf %67, %68 : vector<32x128xf32>
    %c1120 = arith.constant 1120 : index
    %c0_33 = arith.constant 0 : index
    %70 = vector.load %arg4[%c1120, %c0_33] : memref<1416x128xf32, #tpu.memory_space<vmem>>, vector<128x128xf32>
    %cst_34 = arith.constant dense<0.000000e+00> : vector<32x128xf32>
    %71 = tpu.matmul %69, %70, %cst_34 {dimension_numbers = #tpu.dot_dimension_numbers<[1], [0], [0], [1], [0, 0, 1, 1], [], []>} : vector<32x128xf32>, vector<128x128xf32>, vector<32x128xf32> -> vector<32x128xf32>
    %c1400 = arith.constant 1400 : index
    %c0_35 = arith.constant 0 : index
    %72 = vector.load %arg4[%c1400, %c0_35] : memref<1416x128xf32, #tpu.memory_space<vmem>>, vector<1x128xf32>
    %73 = vector.broadcast %72 : vector<1x128xf32> to vector<32x128xf32>
    %74 = arith.addf %71, %73 : vector<32x128xf32>
    %cst_36 = arith.constant 0.000000e+00 : f32
    %75 = vector.broadcast %cst_36 : f32 to vector<32x128xf32>
    %76 = arith.maximumf %74, %75 : vector<32x128xf32>
    %c1248 = arith.constant 1248 : index
    %c0_37 = arith.constant 0 : index
    %77 = vector.load %arg4[%c1248, %c0_37] : memref<1416x128xf32, #tpu.memory_space<vmem>>, vector<128x128xf32>
    %cst_38 = arith.constant dense<0.000000e+00> : vector<32x128xf32>
    %78 = tpu.matmul %76, %77, %cst_38 {dimension_numbers = #tpu.dot_dimension_numbers<[1], [0], [0], [1], [0, 0, 1, 1], [], []>} : vector<32x128xf32>, vector<128x128xf32>, vector<32x128xf32> -> vector<32x128xf32>
    %c1408 = arith.constant 1408 : index
    %c0_39 = arith.constant 0 : index
    %79 = vector.load %arg4[%c1408, %c0_39] : memref<1416x128xf32, #tpu.memory_space<vmem>>, vector<1x128xf32>
    %80 = vector.broadcast %79 : vector<1x128xf32> to vector<32x128xf32>
    %81 = arith.addf %78, %80 : vector<32x128xf32>
    %82 = tpu.iota {dimensions = array<i32: 1>} : vector<32x128xi32>
    %c3_i32 = arith.constant 3 : i32
    %83 = vector.broadcast %c3_i32 : i32 to vector<32x128xi32>
    %84 = arith.cmpi slt, %82, %83 : vector<32x128xi32>
    %85 = arith.negf %81 : vector<32x128xf32>
    %86 = math.exp %85 : vector<32x128xf32>
    %cst_40 = arith.constant 1.000000e+00 : f32
    %87 = vector.broadcast %cst_40 : f32 to vector<32x128xf32>
    %88 = arith.addf %87, %86 : vector<32x128xf32>
    %89 = arith.divf %87, %88 : vector<32x128xf32>
    %cst_41 = arith.constant 0.000000e+00 : f32
    %90 = vector.broadcast %cst_41 : f32 to vector<32x128xf32>
    %91 = arith.subf %90, %81 : vector<32x128xf32>
    %cst_42 = arith.constant 0.000000e+00 : f32
    %92 = vector.broadcast %cst_42 : f32 to vector<32x128xf32>
    %93 = arith.maximumf %91, %92 : vector<32x128xf32>
    %94 = math.absf %81 : vector<32x128xf32>
    %cst_43 = arith.constant 0.000000e+00 : f32
    %95 = vector.broadcast %cst_43 : f32 to vector<32x128xf32>
    %96 = arith.subf %95, %94 : vector<32x128xf32>
    %97 = math.exp %96 : vector<32x128xf32>
    %cst_44 = arith.constant 1.000000e+00 : f32
    %98 = vector.broadcast %cst_44 : f32 to vector<32x128xf32>
    %99 = arith.addf %98, %97 : vector<32x128xf32>
    %100 = math.log %99 : vector<32x128xf32>
    %101 = arith.addf %93, %100 : vector<32x128xf32>
    %c0_45 = arith.constant 0 : index
    %c0_46 = arith.constant 0 : index
    %102 = vector.load %arg2[%c0_45, %c0_46] : memref<32x1xf32, #tpu.memory_space<vmem>>, vector<32x1xf32>
    %cst_47 = arith.constant 0.000000e+00 : f32
    %103 = vector.broadcast %cst_47 : f32 to vector<32x128xf32>
    %104 = arith.select %84, %101, %103 : vector<32x128xi1>, vector<32x128xf32>
    %cst_48 = arith.constant dense<0.000000e+00> : vector<32xf32>
    %105 = vector.multi_reduction <add>, %104, %cst_48 [1] : vector<32x128xf32> to vector<32xf32>
    %106 = vector.shape_cast %105 : vector<32xf32> to vector<32x1xf32>
    %107 = arith.mulf %106, %102 : vector<32x1xf32>
    %cst_49 = arith.constant 0.000000e+00 : f32
    %108 = vector.broadcast %cst_49 : f32 to vector<32x128xf32>
    %109 = arith.select %84, %89, %108 : vector<32x128xi1>, vector<32x128xf32>
    %c3_i32_50 = arith.constant 3 : i32
    %110 = vector.broadcast %c3_i32_50 : i32 to vector<32x128xi32>
    %111 = arith.cmpi eq, %82, %110 : vector<32x128xi32>
    %112 = vector.shape_cast %107 : vector<32x1xf32> to vector<32x1xf32>
    %113 = vector.broadcast %112 : vector<32x1xf32> to vector<32x128xf32>
    %114 = arith.select %111, %113, %109 : vector<32x128xi1>, vector<32x128xf32>
    %c0_51 = arith.constant 0 : index
    %c0_52 = arith.constant 0 : index
    %115 = vector.load %arg5[%c0_51, %c0_52] : memref<32x128xf32, #tpu.memory_space<vmem>>, vector<32x128xf32>
    tpu.vector_store %arg5[%c0_51, %c0_52], %114 {strides = array<i32>} : memref<32x128xf32, #tpu.memory_space<vmem>>, vector<32x128xf32>,
    return
  }
  func.func @transform_0(%arg0: i32) -> (i32, i32, i32) {
    %c0_i32 = arith.constant 0 : i32
    %c0_i32_0 = arith.constant 0 : i32
    %c0_i32_1 = arith.constant 0 : i32
    return %arg0, %c0_i32, %c0_i32_0 : i32, i32, i32
  }
  func.func @transform_1(%arg0: i32) -> (i32, i32) {
    %c0_i32 = arith.constant 0 : i32
    %c0_i32_0 = arith.constant 0 : i32
    return %arg0, %c0_i32 : i32, i32
  }
  func.func @transform_2(%arg0: i32) -> (i32, i32) {
    %c0_i32 = arith.constant 0 : i32
    %c0_i32_0 = arith.constant 0 : i32
    %c0_i32_1 = arith.constant 0 : i32
    return %c0_i32, %c0_i32_0 : i32, i32
  }
  func.func @transform_3(%arg0: i32) -> (i32, i32) {
    %c0_i32 = arith.constant 0 : i32
    %c0_i32_0 = arith.constant 0 : i32
    %c0_i32_1 = arith.constant 0 : i32
    return %c0_i32, %c0_i32_0 : i32, i32
  }
  func.func @transform_4(%arg0: i32) -> (i32, i32) {
    %c0_i32 = arith.constant 0 : i32
    %c0_i32_0 = arith.constant 0 : i32
    return %arg0, %c0_i32 : i32, i32
  }
}

</mosaic_0001>

<bundles_post_ra>
// kernel: tagsim_forward.1
= control target key start
LH: loop header
LB: loop body
LE: loop exit
PB: predicated region body
PF: predicated region fallthrough
CT: control target
= control target key end

     0   :  { %9 = vsyncpa [#allocation3], 0  ;;  %s13658_s0 = inlined_call_operand.hbm [shape: bf16[64,16,128], index: 0, kind: input, shape index: {}]   ;;  %s13659_s1 = inlined_call_operand.vmem [shape: f32[64,1], index: 1, kind: input, shape index: {}]   ;;  %s13660_s2 = inlined_call_operand.hbm [shape: f32[96,768], index: 2, kind: input, shape index: {}]   ;;  %s13661_s3 = inlined_call_operand.hbm [shape: f32[1416,128], index: 3, kind: input, shape index: {}]   ;;  %s13662_s4 = inlined_call_operand.vmem [shape: f32[64,128], index: 4, kind: output, shape index: {}]  }
   0x1   :  { %11 = vsyncpa [#allocation3 + $0x1], 0 }
   0x2   :  { %12 = vsyncpa [#allocation5], 0  ;;  %s8964_s15 = smov 0   ;;  %s8966_s16 = smov 0  }
   0x3   :  { %s8968_s17 = smov 0   ;;  %s8970_s18 = smov 0  }
   0x4 LB: > { %s7414_s19 = sadd.s32 4294967295, %s8917_s18   ;;  %p38_p0 = scmp.ne.s32.totalorder %s8909_s16, %s8905_s15  ;;  %s8917_s18 = sphi %s8970_s18, %s15118_s18   ;;  %s8913_s17 = sphi %s8968_s17, %s15117_s17   ;;  %s8909_s16 = sphi %s8966_s16, %s15116_s16   ;;  %s8905_s15 = sphi %s8964_s15, %s15115_s15  }
   0x5   : > { %p8986_p1 = scmp.eq.s32.totalorder %s7414_s19, 0  ;;  %p7416_p2 = scmp.ge.s32.totalorder %s8917_s18, 1 }
   0x6   : > { %p143_p3 = scmp.lt.s32.totalorder %s8917_s18, 3  ;;  %s8919_s23 = smov [#allocation4]  }
   0x7   : > { %s14042_s20 = scalar_select %p8986_p1, 1, 0 }
   0x8   : > { %p8994_p4 = por %p8986_p1, %p38_p0  ;;  %p8998_p5 = pnand %p7416_p2, %p143_p3 }
   0x9   : > { %s155_s24 = sshll.u32 %s8919_s23, 4  ;;  %s8920_s26 = smov [#allocation6]   ;;  %s156_s24 = int_to_ptr.vmem [resolvable:$true] %s155_s24 }
   0xa   : > { %s14043_s21 = scalar_select %p8994_p4, 1, 0 }
   0xb   : > { %s14044_s22 = scalar_select %p8998_p5, 1, 0 }
   0xc   : > { %p8372_p6 = pneg %p8998_p5  ;;  %s168_s27 = sshll.u32 %s8920_s26, 4  ;;  %s9010_s27 = int_to_ptr.vmem [resolvable:$true] %s168_s27 }
   0xd   : > { %s8793_s30 = scalar_lea.hbm %s13660_s2, 9216 }
   0xe   : > { %p9006_p7 = pnand %p8372_p6, %p8986_p1  ;;  %p8794_p8 = scmp.ne.s32.totalorder %s13660_s2, %s8793_s30 }
   0xf   : > { %p8800_p12 = scmp.lt.u32.totalorder %s8793_s30, %s13660_s2 }
  0x10   : > { %p8795_p9 = pneg %p9006_p7 }
  0x12   : > { %p8796_p10 = pnand %p8795_p9, %p8794_p8 }
  0x14   : > { %p8797_p11 = pneg %p8796_p10 }
  0x16   : > { %p8802_p13 = pnand %p8800_p12, %p8797_p11 }
  0x18   : > { %8805 = shalt.err (!%p8802_p13)
}
  0x19   : > { %s8806_s9 = scalar_lea.vmem %s156_s24, 9216  ;;  %p8814_p6 = scmp.lt.s32.totalorder %s156_s24, %s156_s24 }
  0x1a   : > { %p8807_p0 = scmp.ne.s32.totalorder %s156_s24, %s8806_s9  ;;  %p8815_p1 = scmp.lt.s32.totalorder %s8806_s9, %s8806_s9 }
  0x1c   : > { %p8809_p2 = pnand %p8807_p0, %p8795_p9  ;;  %p8816_p4 = por %p8815_p1, %p8814_p6 }
  0x1e   : > { %p8810_p3 = pneg %p8809_p2 }
  0x20   : > { %p8817_p5 = pnand %p8816_p4, %p8810_p3 }
  0x22   : > { %8820 = shalt.err (!%p8817_p5)
}
  0x23   : > { %s8921_s10 = smov 768   ;;  %s8922_s11 = smov 48  }
  0x24   : > { %8375 = dma.hbm_to_vmem [thread:$0]  (!%p9006_p7), %s13660_s2, 9216, %s156_s24, [#allocation5], %s8921_s10, %s8921_s10, %s8922_s11  }
  0x25   : > { %s8821_s23 = scalar_lea.hbm %s13661_s3, 22656 }
  0x26   : > { %p8822_p8 = scmp.ne.s32.totalorder %s13661_s3, %s8821_s23  ;;  %p8828_p5 = scmp.lt.u32.totalorder %s8821_s23, %s13661_s3 }
  0x28   : > { %p8824_p1 = pnand %p8822_p8, %p8795_p9 }
  0x2a   : > { %p8825_p4 = pneg %p8824_p1 }
  0x2c   : > { %p8830_p10 = pnand %p8828_p5, %p8825_p4 }
  0x2e   : > { %8833 = shalt.err (!%p8830_p10)
}
  0x2f   : > { %s8834_s24 = scalar_lea.vmem %s9010_s27, 22656  ;;  %p8842_p0 = scmp.lt.s32.totalorder %s9010_s27, %s9010_s27 }
  0x30   : > { %p8835_p11 = scmp.ne.s32.totalorder %s9010_s27, %s8834_s24  ;;  %p8843_p2 = scmp.lt.s32.totalorder %s8834_s24, %s8834_s24 }
  0x32   : > { %p8837_p12 = pnand %p8835_p11, %p8795_p9  ;;  %p8844_p3 = por %p8843_p2, %p8842_p0 }
  0x34   : > { %p8838_p13 = pneg %p8837_p12 }
  0x36   : > { %p8845_p6 = pnand %p8844_p3, %p8838_p13 }
  0x38   : > { %8848 = shalt.err (!%p8845_p6)
}
  0x39   : > { %s8923_s5 = smov 128   ;;  %s8924_s6 = smov 8  }
  0x3a   : > { %8378 = dma.hbm_to_vmem [thread:$0]  (!%p9006_p7), %s13661_s3, 22656, %s9010_s27, [#allocation5], %s8923_s5, %s8923_s5, %s8924_s6  }
  0x3b   : > { %s9060_s9 = sadd.s32 1, %s8917_s18   ;;  %s25_s11 = sadd.s32 1, %s8913_s17 }
  0x3c   : > { %s22_s10 = ssub.s32 %s8917_s18, %s9060_s9  ;;  %p32_p8 = scmp.ne.s32.totalorder %s8913_s17, %s8909_s16 }
  0x3d   : > { %p23_p9 = scmp.eq.s32.totalorder %s22_s10, 0  ;;  %p33_p1 = scmp.eq.s32.totalorder %s8917_s18, 0 }
  0x3e   : > { %p8385_p5 = scmp.lt.s32.totalorder %s8917_s18, 2  ;;  %s182_s13 = sand.u32 1, %s8913_s17  }
  0x3f   : > { %s9069_s12 = scalar_select %p23_p9, %s8913_s17, %s25_s11  }
  0x40   : > { %p34_p4 = por %p33_p1, %p32_p8  ;;  %s7472_s14 = sshll.u32 %s8917_s18, 12 }
  0x41   : > { %s7420_s15 = sshll.u32 %s182_s13, 8  ;;  %s9077_s26 = scalar_lea.hbm %s13658_s0, %s7472_s14 }
  0x42   : > { %s186_s27 = scalar_lea.vmem [#allocation2], %s7420_s15  ;;  %p9079_p7 = pnand %p8385_p5, %p34_p4 }
  0x43   : > { %s194_s28 = sshll.u32 %s186_s27, 4  ;;  %s9085_s30 = scalar_lea.sflag [#allocation3], %s182_s13  ;;  %s9083_s28 = int_to_ptr.vmem [resolvable:$true] %s194_s28 }
  0x44   : > { %s8849_s24 = scalar_lea.hbm %s9077_s26, 4096  ;;  %p8851_p11 = pneg %p9079_p7 }
  0x45   : > { %p8850_p10 = scmp.ne.s32.totalorder %s9077_s26, %s8849_s24  ;;  %s8854_s7 = scalar_lea.hbm %s13658_s0, 8192 }
  0x46   : > { %p8855_p0 = scmp.lt.u32.totalorder %s9077_s26, %s13658_s0  ;;  %p8856_p2 = scmp.lt.u32.totalorder %s8854_s7, %s8849_s24 }
  0x47   : > { %p8852_p12 = pnand %p8851_p11, %p8850_p10  ;;  %p8858_p6 = scmp.lt.u32.totalorder %s8849_s24, %s9077_s26 }
  0x48   : > { %p8857_p3 = por %p8856_p2, %p8855_p0 }
  0x49   : > { %p8853_p13 = pneg %p8852_p12 }
  0x4a   : > { %p8859_p9 = por %p8858_p6, %p8857_p3 }
  0x4c   : > { %p8860_p8 = pnand %p8859_p9, %p8853_p13 }
  0x4e   : > { %8863 = shalt.err (!%p8860_p8)
}
  0x4f   : > { %s8864_s11 = scalar_lea.vmem %s9083_s28, 4096  ;;  %s8925_s13 = smov [#allocation2]  }
  0x50   : > { %p8865_p1 = scmp.ne.s32.totalorder %s9083_s28, %s8864_s11  ;;  %s8869_s14 = sshll.u32 %s8925_s13, 4  ;;  %s8870_s14 = int_to_ptr.vmem [resolvable:$false] %s8869_s14 }
  0x51   : > { %s8871_s15 = scalar_lea.vmem %s8870_s14, 8192  ;;  %p8872_p10 = scmp.lt.s32.totalorder %s9083_s28, %s8870_s14 }
  0x52   : > { %p8867_p4 = pnand %p8865_p1, %p8851_p11  ;;  %p8873_p12 = scmp.lt.s32.totalorder %s8871_s15, %s8864_s11 }
  0x54   : > { %p8868_p5 = pneg %p8867_p4  ;;  %p8874_p0 = por %p8873_p12, %p8872_p10 }
  0x56   : > { %p8875_p2 = pnand %p8874_p0, %p8868_p5 }
  0x58   : > { %8878 = shalt.err (!%p8875_p2)
}
  0x59   : > { %s8926_s25 = smov 64   ;;  %s8927_s23 = smov 4  }
  0x5a   : > { %8382 = dma.hbm_to_vmem [thread:$0]  (!%p9079_p7), %s9077_s26, 4096, %s9083_s28, %s9085_s30, %s8926_s25, %s8926_s25, %s8927_s23  }
  0x5b   : > { %p14047_p11 = scmp.ne.s32.totalorder %s14044_s22, 0 }
  0x5d   : > { %215 = sbr.rel (%p14047_p11) target bundleno = 3207 (0xc87), region = 36 }
  0x64   : > { %s217_s27 = sand.u32 1, %s8909_s16   ;;  %p14048_p13 = scmp.ne.s32.totalorder %s14043_s21, 0 }
  0x65   : > { %s7425_s24 = sshll.u32 %s217_s27, 8  ;;  %s218_s5 = scalar_lea.sflag [#allocation3], %s217_s27 }
  0x66   : > { %s9116_s6 = scalar_lea.vmem [#allocation2], %s7425_s24 }
  0x67   : > { %8896 = dma.done.wait (%p14048_p13), %s218_s5, 4096  }
  0x68   : > { %8898 = vsyncadd (%p14048_p13), %s218_s5, 4294963200  ;;  %p14049_p3 = scmp.ne.s32.totalorder %s14042_s20, 0 }
  0x6a   : > { %8900 = dma.done.wait (%p14049_p3), [#allocation5], 31872  }
  0x6b   : > { %8902 = vsyncadd (%p14049_p3), [#allocation5], 4294935424  ;;  %v7602_v0 = vld [vmem:[%s9116_s6 + $0x10] sm:$0xff]   ;;  %vm400_vm0 = vcmask 261248   ;;  %v7474_v1 = vld [vmem:[%s9116_s6] sm:$0xff]   ;;  %s8928_s20 = smov 16  }
  0x6c   : > { %v7603_v2 = vld [vmem:[%s9116_s6 + $0x18] sm:$0xff]   ;;  %v9129_v3 = vunpack.c.l.bf16 %v7602_v0  ;;  %v9131_v4 = vunpack.c.h.bf16 %v7602_v0  ;;  %v9133_v5 = vunpack.c.l.bf16 %v7474_v1  ;;  %v9135_v6 = vunpack.c.h.bf16 %v7474_v1  ;;  %v7601_v7 = vld [vmem:[%s9116_s6 + $0x8] sm:$0xff]   ;;  %v7604_v21 = vld [vmem:[%s9116_s6 + $0x20] sm:$0xff]   ;;  %s8929_s21 = smov 96   ;;  %s8930_s22 = smov 64  }
  0x6d   : > { %v9138_v8 = vunpack.c.l.bf16 %v7603_v2  ;;  %v9140_v9 = vunpack.c.h.bf16 %v7603_v2  ;;  %v9142_v10 = vunpack.c.l.bf16 %v7601_v7  ;;  %v9144_v11 = vunpack.c.h.bf16 %v7601_v7  ;;  %v7605_v12 = vld [vmem:[%s9116_s6 + $0x28] sm:$0xff]   ;;  %v7608_v55 = vld [vmem:[%s9116_s6 + $0x40] sm:$0xff]   ;;  %s8931_s26 = smov 8   ;;  %s8932_s28 = smov 24  }
  0x6e   : > { %14050 = vst [vmem:[#allocation9_spill] sm:$0xff] %v9129_v3  ;;  %14051 = vst [vmem:[#allocation10_spill] sm:$0xff] %v9131_v4  ;;  %v419_v13 = vsel %vm400_vm0, %v9129_v3, 0.0  ;;  %v420_v14 = vsel %vm400_vm0, %v9131_v4, 0.0  ;;  %v401_v15 = vsel %vm400_vm0, %v9133_v5, 0.0  ;;  %v402_v16 = vsel %vm400_vm0, %v9135_v6, 0.0 }
  0x6f   : > { %14052 = vst [vmem:[#allocation11_spill] sm:$0xff] %v9133_v5  ;;  %14053 = vst [vmem:[#allocation12_spill] sm:$0xff] %v9135_v6  ;;  %v421_v17 = vadd.f32 %v420_v14, %v419_v13  ;;  %v403_v18 = vadd.f32 %v402_v16, %v401_v15  ;;  %v428_v19 = vsel %vm400_vm0, %v9138_v8, 0.0  ;;  %v429_v20 = vsel %vm400_vm0, %v9140_v9, 0.0  ;;  %v7609_v38 = vld [vmem:[%s9116_s6 + $0x48] sm:$0xff]   ;;  %s8933_s29 = smov 32  }
  0x70   : > { %14054 = vst [vmem:[#allocation13_spill] sm:$0xff] %v9138_v8  ;;  %14055 = vst [vmem:[#allocation14_spill] sm:$0xff] %v9140_v9  ;;  %v430_v22 = vadd.f32 %v429_v20, %v428_v19  ;;  %v410_v23 = vsel %vm400_vm0, %v9142_v10, 0.0  ;;  %v411_v24 = vsel %vm400_vm0, %v9144_v11, 0.0  ;;  %v9164_v25 = vunpack.c.l.bf16 %v7605_v12  ;;  %s8934_s30 = smov 40   ;;  %s8935_s7 = smov 120  }
  0x71   : > { %14056 = vst [vmem:[#allocation15_spill] sm:$0xff] %v9142_v10  ;;  %14057 = vst [vmem:[#allocation16_spill] sm:$0xff] %v9144_v11  ;;  %v422_v26 = vrot.slane %v421_v17, 4  ;;  %v404_v27 = vrot.slane %v403_v18, 4  ;;  %v412_v28 = vadd.f32 %v411_v24, %v410_v23  ;;  %v9166_v29 = vunpack.c.h.bf16 %v7605_v12  ;;  %v7610_v12 = vld [vmem:[%s9116_s6 + $0x50] sm:$0xff]   ;;  %s8937_s8 = smov 48  }
  0x72   : > { %14058 = vst [vmem:[#allocation17_spill] sm:$0xff] %v9164_v25  ;;  %v431_v30 = vrot.slane %v430_v22, 4  ;;  %v446_v31 = vsel %vm400_vm0, %v9164_v25, 0.0  ;;  %v9170_v32 = vunpack.c.l.bf16 %v7604_v21  ;;  %v9172_v33 = vunpack.c.h.bf16 %v7604_v21  ;;  %v7606_v21 = vld [vmem:[%s9116_s6 + $0x30] sm:$0xff]   ;;  %s7428_s10 = sshll.u32 %s7414_s19, 2 }
  0x73   : > { %14059 = vst [vmem:[#allocation18_spill] sm:$0xff] %v9166_v29  ;;  %v423_v34 = vadd.f32 %v422_v26, %v421_v17  ;;  %v405_v35 = vadd.f32 %v404_v27, %v403_v18  ;;  %v413_v36 = vrot.slane %v412_v28, 4  ;;  %v447_v37 = vsel %vm400_vm0, %v9166_v29, 0.0  ;;  %p261_p7 = scmp.lt.s32.totalorder %s7428_s10, 7 }
  0x74   : > { %14060 = vst [vmem:[#allocation19_spill] sm:$0xff] %v9170_v32  ;;  %14061 = vst [vmem:[#allocation20_spill] sm:$0xff] %v9172_v33  ;;  %v432_v39 = vadd.f32 %v431_v30, %v430_v22  ;;  %v448_v40 = vadd.f32 %v447_v37, %v446_v31  ;;  %v437_v41 = vsel %vm400_vm0, %v9170_v32, 0.0  ;;  %v438_v42 = vsel %vm400_vm0, %v9172_v33, 0.0 }
  0x75   : > { %v424_v43 = vrot.slane %v423_v34, 2  ;;  %v406_v44 = vrot.slane %v405_v35, 2  ;;  %v414_v45 = vadd.f32 %v413_v36, %v412_v28  ;;  %v439_v46 = vadd.f32 %v438_v42, %v437_v41  ;;  %s15120_s10 = smov (!%p261_p7, %s7428_s10), 7 }
  0x76   : > { %v433_v47 = vrot.slane %v432_v39, 2  ;;  %v449_v48 = vrot.slane %v448_v40, 4  ;;  %v9181_v49 = vunpack.c.l.bf16 %v7609_v38  ;;  %v9183_v50 = vunpack.c.h.bf16 %v7609_v38  ;;  %v7611_v38 = vld [vmem:[%s9116_s6 + $0x58] sm:$0xff]   ;;  %s7429_s11 = sshll.u32 %s15120_s10, 3 }
  0x77   : > { %v425_v51 = vadd.f32 %v424_v43, %v423_v34  ;;  %v407_v52 = vadd.f32 %v406_v44, %v405_v35  ;;  %v415_v53 = vrot.slane %v414_v45, 2  ;;  %v440_v54 = vrot.slane %v439_v46, 4  ;;  %v7607_v43 = vld [vmem:[%s9116_s6 + $0x38] sm:$0xff]   ;;  %s264_s15 = scalar_lea.vmem %s13659_s1, %s7429_s11  ;;  %s270_s25 = scalar_lea.vmem %s13662_s4, %s7429_s11 }
  0x78   : > { %14062 = vst [vmem:[#allocation21_spill] sm:$0xff] %v9181_v49  ;;  %14063 = vst [vmem:[#allocation22_spill] sm:$0xff] %v9183_v50  ;;  %v434_v56 = vadd.f32 %v433_v47, %v432_v39  ;;  %v450_v57 = vadd.f32 %v449_v48, %v448_v40  ;;  %v482_v58 = vsel %vm400_vm0, %v9181_v49, 0.0  ;;  %v483_v59 = vsel %vm400_vm0, %v9183_v50, 0.0 }
  0x79   : > { %v426_v60 = vrot.slane %v425_v51, 1  ;;  %v408_v61 = vrot.slane %v407_v52, 1  ;;  %v416_v62 = vadd.f32 %v415_v53, %v414_v45  ;;  %v441_v63 = vadd.f32 %v440_v54, %v439_v46 }
  0x7a   : > { %v435_v0 = vrot.slane %v434_v56, 1  ;;  %v451_v1 = vrot.slane %v450_v57, 2  ;;  %v484_v2 = vadd.f32 %v483_v59, %v482_v58  ;;  %v9190_v7 = vunpack.c.l.bf16 %v7608_v55  ;;  %v7613_v58 = vld [vmem:[%s9116_s6 + $0x68] sm:$0xff]  }
  0x7b   : > { %v427_v13 = vadd.f32 %v426_v60, %v425_v51  ;;  %v409_v14 = vadd.f32 %v408_v61, %v407_v52  ;;  %v417_v15 = vrot.slane %v416_v62, 1  ;;  %v442_v16 = vrot.slane %v441_v63, 2 }
  0x7c   : > { %14064 = vst [vmem:[#allocation23_spill] sm:$0xff] %v9190_v7  ;;  %v436_v17 = vadd.f32 %v435_v0, %v434_v56  ;;  %v452_v18 = vadd.f32 %v451_v1, %v450_v57  ;;  %v485_v19 = vrot.slane %v484_v2, 4  ;;  %v9193_v20 = vunpack.c.h.bf16 %v7608_v55 }
  0x7d   : > { %1174 = vrot.lane.b32.xlu1 %v427_v13, %s8928_s20  ;;  %1170 = vrot.lane.b32.xlu0 %v409_v14, %s8928_s20  ;;  %v418_v22 = vadd.f32 %v417_v15, %v416_v62  ;;  %v443_v23 = vadd.f32 %v442_v16, %v441_v63  ;;  %v473_v24 = vsel %vm400_vm0, %v9190_v7, 0.0  ;;  %v9200_v26 = vunpack.c.l.bf16 %v7610_v12 }
  0x7e   : > { %14065 = vst [vmem:[#allocation24_spill] sm:$0xff] %v9193_v20  ;;  %v453_v27 = vrot.slane %v452_v18, 1  ;;  %v486_v28 = vadd.f32 %v485_v19, %v484_v2  ;;  %v474_v30 = vsel %vm400_vm0, %v9193_v20, 0.0  ;;  %v9204_v31 = vunpack.c.h.bf16 %v7610_v12  ;;  %v7612_v12 = vld [vmem:[%s9116_s6 + $0x60] sm:$0xff]  }
  0x7f   : > { %14066 = vst [vmem:[#allocation25_spill] sm:$0xff] %v9200_v26  ;;  %v444_v34 = vrot.slane %v443_v23, 1  ;;  %v475_v35 = vadd.f32 %v474_v30, %v473_v24  ;;  %v491_v36 = vsel %vm400_vm0, %v9200_v26, 0.0  ;;  %v9208_v37 = vunpack.c.l.bf16 %v7606_v21 }
  0x80   : > { %14067 = vst [vmem:[#allocation26_spill] sm:$0xff] %v9204_v31  ;;  %v454_v39 = vadd.f32 %v453_v27, %v452_v18  ;;  %v487_v40 = vrot.slane %v486_v28, 2  ;;  %v492_v41 = vsel %vm400_vm0, %v9204_v31, 0.0  ;;  %v9213_v42 = vunpack.c.h.bf16 %v7606_v21 }
  0x81   : > { %14068 = vst [vmem:[#allocation27_spill] sm:$0xff] %v9208_v37  ;;  %1176 = vrot.lane.b32.xlu1 %v436_v17, %s8928_s20  ;;  %1172 = vrot.lane.b32.xlu0 %v418_v22, %s8928_s20  ;;  %v445_v44 = vadd.f32 %v444_v34, %v443_v23  ;;  %v476_v45 = vrot.slane %v475_v35, 4  ;;  %v493_v46 = vadd.f32 %v492_v41, %v491_v36  ;;  %v455_v47 = vsel %vm400_vm0, %v9208_v37, 0.0  ;;  %v7617_v36 = vld [vmem:[%s9116_s6 + $0x88] sm:$0xff]  }
  0x82   : > { %14069 = vst [vmem:[#allocation28_spill] sm:$0xff] %v9213_v42  ;;  %v488_v48 = vadd.f32 %v487_v40, %v486_v28  ;;  %v456_v51 = vsel %vm400_vm0, %v9213_v42, 0.0  ;;  %v9222_v52 = vunpack.c.l.bf16 %v7611_v38  ;;  %v9224_v53 = vunpack.c.h.bf16 %v7611_v38 }
  0x83   : > { %v477_v54 = vadd.f32 %v476_v45, %v475_v35  ;;  %v494_v55 = vrot.slane %v493_v46, 4  ;;  %v457_v56 = vadd.f32 %v456_v51, %v455_v47  ;;  %v9226_v57 = vunpack.c.l.bf16 %v7607_v43 }
  0x84   : > { %14070 = vst [vmem:[#allocation29_spill] sm:$0xff] %v9222_v52  ;;  %14071 = vst [vmem:[#allocation30_spill] sm:$0xff] %v9224_v53  ;;  %v489_v59 = vrot.slane %v488_v48, 1  ;;  %v500_v60 = vsel %vm400_vm0, %v9222_v52, 0.0  ;;  %v501_v61 = vsel %vm400_vm0, %v9224_v53, 0.0  ;;  %v9233_v62 = vunpack.c.h.bf16 %v7607_v43 }
  0x85   : > { %14072 = vst [vmem:[#allocation31_spill] sm:$0xff] %v9226_v57  ;;  %1180 = vrot.lane.b32.xlu1 %v454_v39, %s8928_s20  ;;  %1178 = vrot.lane.b32.xlu0 %v445_v44, %s8928_s20  ;;  %v478_v63 = vrot.slane %v477_v54, 2  ;;  %v495_v0 = vadd.f32 %v494_v55, %v493_v46  ;;  %v458_v1 = vrot.slane %v457_v56, 4  ;;  %v502_v2 = vadd.f32 %v501_v61, %v500_v60  ;;  %v7616_v55 = vld [vmem:[%s9116_s6 + $0x80] sm:$0xff]  }
  0x86   : > { %14073 = vst [vmem:[#allocation32_spill] sm:$0xff] %v9233_v62  ;;  %v490_v13 = vadd.f32 %v489_v59, %v488_v48  ;;  %v464_v14 = vsel %vm400_vm0, %v9226_v57, 0.0  ;;  %v465_v15 = vsel %vm400_vm0, %v9233_v62, 0.0  ;;  %v9242_v16 = vunpack.c.l.bf16 %v7613_v58 }
  0x87   : > { %v479_v17 = vadd.f32 %v478_v63, %v477_v54  ;;  %v496_v18 = vrot.slane %v495_v0, 2  ;;  %v459_v19 = vadd.f32 %v458_v1, %v457_v56  ;;  %v503_v21 = vrot.slane %v502_v2, 4 }
  0x88   : > { %14074 = vst [vmem:[#allocation33_spill] sm:$0xff] %v9242_v16  ;;  %v466_v22 = vadd.f32 %v465_v15, %v464_v14  ;;  %v9244_v23 = vunpack.c.h.bf16 %v7613_v58  ;;  %v518_v24 = vsel %vm400_vm0, %v9242_v16, 0.0  ;;  %v9248_v27 = vunpack.c.l.bf16 %v7612_v12  ;;  %v7618_v15 = vld [vmem:[%s9116_s6 + $0x90] sm:$0xff]  }
  0x89   : > { %1188 = vrot.lane.b32.xlu1 %v490_v13, %s8928_s20  ;;  %v480_v28 = vrot.slane %v479_v17, 1  ;;  %v497_v30 = vadd.f32 %v496_v18, %v495_v0  ;;  %v460_v34 = vrot.slane %v459_v19, 2  ;;  %v504_v35 = vadd.f32 %v503_v21, %v502_v2 }
  0x8a   : > { %14075 = vst [vmem:[#allocation34_spill] sm:$0xff] %v9244_v23  ;;  %14076 = vst [vmem:[#allocation35_spill] sm:$0xff] %v9248_v27  ;;  %v467_v38 = vrot.slane %v466_v22, 4  ;;  %v519_v39 = vsel %vm400_vm0, %v9244_v23, 0.0  ;;  %v9254_v40 = vunpack.c.h.bf16 %v7612_v12  ;;  %v509_v41 = vsel %vm400_vm0, %v9248_v27, 0.0 }
  0x8b   : > { %v481_v43 = vadd.f32 %v480_v28, %v479_v17  ;;  %v498_v44 = vrot.slane %v497_v30, 1  ;;  %v461_v45 = vadd.f32 %v460_v34, %v459_v19  ;;  %v505_v46 = vrot.slane %v504_v35, 2  ;;  %v7614_v34 = vld [vmem:[%s9116_s6 + $0x70] sm:$0xff]  }
  0x8c   : > { %14077 = vst [vmem:[#allocation36_spill] sm:$0xff] %v9254_v40  ;;  %v468_v47 = vadd.f32 %v467_v38, %v466_v22  ;;  %v520_v48 = vadd.f32 %v519_v39, %v518_v24  ;;  %v510_v51 = vsel %vm400_vm0, %v9254_v40, 0.0  ;;  %v9260_v54 = vunpack.c.l.bf16 %v7617_v36 }
  0x8d   : > { %1186 = vrot.lane.b32.xlu0 %v481_v43, %s8928_s20  ;;  %v499_v56 = vadd.f32 %v498_v44, %v497_v30  ;;  %v462_v58 = vrot.slane %v461_v45, 1  ;;  %v506_v59 = vadd.f32 %v505_v46, %v504_v35  ;;  %v511_v60 = vadd.f32 %v510_v51, %v509_v41 }
  0x8e   : > { %14078 = vst [vmem:[#allocation37_spill] sm:$0xff] %v9260_v54  ;;  %v469_v61 = vrot.slane %v468_v47, 2  ;;  %v521_v63 = vrot.slane %v520_v48, 4  ;;  %v9264_v0 = vunpack.c.h.bf16 %v7617_v36  ;;  %v554_v1 = vsel %vm400_vm0, %v9260_v54, 0.0 }
  0x8f   : > { %1190 = vrot.lane.b32.xlu1 %v499_v56, %s8928_s20  ;;  %v463_v2 = vadd.f32 %v462_v58, %v461_v45  ;;  %v507_v12 = vrot.slane %v506_v59, 1  ;;  %v512_v13 = vrot.slane %v511_v60, 4  ;;  %v9269_v14 = vunpack.c.l.bf16 %v7616_v55 }
  0x90   : > { %14079 = vst [vmem:[#allocation38_spill] sm:$0xff] %v9264_v0  ;;  %v470_v17 = vadd.f32 %v469_v61, %v468_v47  ;;  %v522_v18 = vadd.f32 %v521_v63, %v520_v48  ;;  %v555_v19 = vsel %vm400_vm0, %v9264_v0, 0.0  ;;  %v9274_v21 = vunpack.c.h.bf16 %v7616_v55  ;;  %v7619_v55 = vld [vmem:[%s9116_s6 + $0x98] sm:$0xff]  }
  0x91   : > { %14080 = vst [vmem:[#allocation39_spill] sm:$0xff] %v9269_v14  ;;  %1182 = vrot.lane.b32.xlu0 %v463_v2, %s8928_s20  ;;  %v508_v22 = vadd.f32 %v507_v12, %v506_v59  ;;  %v513_v24 = vadd.f32 %v512_v13, %v511_v60  ;;  %v556_v28 = vadd.f32 %v555_v19, %v554_v1  ;;  %v545_v30 = vsel %vm400_vm0, %v9269_v14, 0.0 }
  0x92   : > { %14081 = vst [vmem:[#allocation40_spill] sm:$0xff] %v9274_v21  ;;  %v471_v35 = vrot.slane %v470_v17, 1  ;;  %v523_v36 = vrot.slane %v522_v18, 2  ;;  %v546_v38 = vsel %vm400_vm0, %v9274_v21, 0.0  ;;  %v9282_v39 = vunpack.c.l.bf16 %v7618_v15 }
  0x93   : > { %1192 = vrot.lane.b32.xlu1 %v508_v22, %s8928_s20  ;;  %v514_v41 = vrot.slane %v513_v24, 2  ;;  %v557_v43 = vrot.slane %v556_v28, 4  ;;  %v547_v44 = vadd.f32 %v546_v38, %v545_v30  ;;  %v9285_v45 = vunpack.c.h.bf16 %v7618_v15  ;;  %v7621_v38 = vld [vmem:[%s9116_s6 + $0xa8] sm:$0xff]  }
  0x94   : > { %14082 = vst [vmem:[#allocation41_spill] sm:$0xff] %v9282_v39  ;;  %v472_v46 = vadd.f32 %v471_v35, %v470_v17  ;;  %v524_v47 = vadd.f32 %v523_v36, %v522_v18  ;;  %v563_v48 = vsel %vm400_vm0, %v9282_v39, 0.0  ;;  %v9289_v51 = vunpack.c.l.bf16 %v7614_v34  ;;  %v7615_v18 = vld [vmem:[%s9116_s6 + $0x78] sm:$0xff]  }
  0x95   : > { %14083 = vst [vmem:[#allocation42_spill] sm:$0xff] %v9285_v45  ;;  %v515_v56 = vadd.f32 %v514_v41, %v513_v24  ;;  %v558_v58 = vadd.f32 %v557_v43, %v556_v28  ;;  %v548_v59 = vrot.slane %v547_v44, 4  ;;  %v564_v60 = vsel %vm400_vm0, %v9285_v45, 0.0 }
  0x96   : > { %14084 = vst [vmem:[#allocation43_spill] sm:$0xff] %v9289_v51  ;;  %1184 = vrot.lane.b32.xlu0 %v472_v46, %s8928_s20  ;;  %v525_v61 = vrot.slane %v524_v47, 1  ;;  %v565_v63 = vadd.f32 %v564_v60, %v563_v48  ;;  %v9295_v1 = vunpack.c.h.bf16 %v7614_v34  ;;  %v527_v2 = vsel %vm400_vm0, %v9289_v51, 0.0 }
  0x97   : > { %v516_v12 = vrot.slane %v515_v56, 1  ;;  %v559_v13 = vrot.slane %v558_v58, 2  ;;  %v549_v15 = vadd.f32 %v548_v59, %v547_v44  ;;  %v9299_v17 = vunpack.c.l.bf16 %v7619_v55 }
  0x98   : > { %14085 = vst [vmem:[#allocation44_spill] sm:$0xff] %v9295_v1  ;;  %v526_v19 = vadd.f32 %v525_v61, %v524_v47  ;;  %v566_v22 = vrot.slane %v565_v63, 4  ;;  %v528_v24 = vsel %vm400_vm0, %v9295_v1, 0.0  ;;  %v9304_v28 = vunpack.c.h.bf16 %v7619_v55 }
  0x99   : > { %14086 = vst [vmem:[#allocation45_spill] sm:$0xff] %v9299_v17  ;;  %v517_v30 = vadd.f32 %v516_v12, %v515_v56  ;;  %v560_v35 = vadd.f32 %v559_v13, %v558_v58  ;;  %v550_v34 = vrot.slane %v549_v15, 2  ;;  %v529_v36 = vadd.f32 %v528_v24, %v527_v2 }
  0x9a   : > { %14087 = vst [vmem:[#allocation46_spill] sm:$0xff] %v9304_v28  ;;  %1196 = vrot.lane.b32.xlu1 %v526_v19, %s8928_s20  ;;  %v567_v41 = vadd.f32 %v566_v22, %v565_v63  ;;  %v572_v43 = vsel %vm400_vm0, %v9299_v17, 0.0  ;;  %v573_v44 = vsel %vm400_vm0, %v9304_v28, 0.0  ;;  %v9312_v46 = vunpack.c.l.bf16 %v7615_v18  ;;  %v7620_v19 = vld [vmem:[%s9116_s6 + $0xa0] sm:$0xff]  }
  0x9b   : > { %1194 = vrot.lane.b32.xlu0 %v517_v30, %s8928_s20  ;;  %v561_v47 = vrot.slane %v560_v35, 1  ;;  %v551_v48 = vadd.f32 %v550_v34, %v549_v15  ;;  %v530_v55 = vrot.slane %v529_v36, 4  ;;  %v574_v56 = vadd.f32 %v573_v44, %v572_v43  ;;  %v7625_v44 = vld [vmem:[%s9116_s6 + $0xc8] sm:$0xff]  }
  0x9c   : > { %14088 = vst [vmem:[#allocation47_spill] sm:$0xff] %v9312_v46  ;;  %v568_v58 = vrot.slane %v567_v41, 2  ;;  %v9315_v59 = vunpack.c.h.bf16 %v7615_v18  ;;  %v536_v60 = vsel %vm400_vm0, %v9312_v46, 0.0  ;;  %v9319_v61 = vunpack.c.l.bf16 %v7621_v38 }
  0x9d   : > { %v562_v63 = vadd.f32 %v561_v47, %v560_v35  ;;  %v552_v2 = vrot.slane %v551_v48, 1  ;;  %v531_v12 = vadd.f32 %v530_v55, %v529_v36  ;;  %v575_v13 = vrot.slane %v574_v56, 4 }
  0x9e   : > { %14089 = vst [vmem:[#allocation48_spill] sm:$0xff] %v9315_v59  ;;  %14090 = vst [vmem:[#allocation49_spill] sm:$0xff] %v9319_v61  ;;  %v569_v22 = vadd.f32 %v568_v58, %v567_v41  ;;  %v537_v15 = vsel %vm400_vm0, %v9315_v59, 0.0  ;;  %v9324_v24 = vunpack.c.h.bf16 %v7621_v38  ;;  %v590_v18 = vsel %vm400_vm0, %v9319_v61, 0.0 }
  0x9f   : > { %1204 = vrot.lane.b32.xlu1 %v562_v63, %s8928_s20  ;;  %v553_v30 = vadd.f32 %v552_v2, %v551_v48  ;;  %v532_v34 = vrot.slane %v531_v12, 2  ;;  %v576_v43 = vadd.f32 %v575_v13, %v574_v56  ;;  %v538_v35 = vadd.f32 %v537_v15, %v536_v60  ;;  %v7624_v63 = vld [vmem:[%s9116_s6 + $0xc0] sm:$0xff]  }
  0xa0   : > { %14091 = vst [vmem:[#allocation50_spill] sm:$0xff] %v9324_v24  ;;  %v570_v36 = vrot.slane %v569_v22, 1  ;;  %v591_v41 = vsel %vm400_vm0, %v9324_v24, 0.0  ;;  %v9332_v47 = vunpack.c.l.bf16 %v7620_v19  ;;  %v9334_v55 = vunpack.c.h.bf16 %v7620_v19 }
  0xa1   : > { %1202 = vrot.lane.b32.xlu0 %v553_v30, %s8928_s20  ;;  %v533_v38 = vadd.f32 %v532_v34, %v531_v12  ;;  %v577_v58 = vrot.slane %v576_v43, 2  ;;  %v539_v61 = vrot.slane %v538_v35, 4  ;;  %v592_v59 = vadd.f32 %v591_v41, %v590_v18 }
  0xa2   : > { %14092 = vst [vmem:[#allocation51_spill] sm:$0xff] %v9332_v47  ;;  %14093 = vst [vmem:[#allocation52_spill] sm:$0xff] %v9334_v55  ;;  %v571_v48 = vadd.f32 %v570_v36, %v569_v22  ;;  %v581_v56 = vsel %vm400_vm0, %v9332_v47, 0.0  ;;  %v582_v60 = vsel %vm400_vm0, %v9334_v55, 0.0  ;;  %v9342_v2 = vunpack.c.l.bf16 %v7625_v44  ;;  %v7626_v47 = vld [vmem:[%s9116_s6 + $0xd0] sm:$0xff]  }
  0xa3   : > { %v534_v13 = vrot.slane %v533_v38, 1  ;;  %v578_v19 = vadd.f32 %v577_v58, %v576_v43  ;;  %v540_v15 = vadd.f32 %v539_v61, %v538_v35  ;;  %v593_v24 = vrot.slane %v592_v59, 4 }
  0xa4   : > { %14094 = vst [vmem:[#allocation53_spill] sm:$0xff] %v9342_v2  ;;  %1206 = vrot.lane.b32.xlu1 %v571_v48, %s8928_s20  ;;  %v583_v12 = vadd.f32 %v582_v60, %v581_v56  ;;  %v9345_v30 = vunpack.c.h.bf16 %v7625_v44  ;;  %v626_v22 = vsel %vm400_vm0, %v9342_v2, 0.0  ;;  %v9349_v18 = vunpack.c.l.bf16 %v7624_v63  ;;  %v7622_v56 = vld [vmem:[%s9116_s6 + $0xb0] sm:$0xff]   ;;  %v7623_v2 = vld [vmem:[%s9116_s6 + $0xb8] sm:$0xff]  }
  0xa5   : > { %v535_v34 = vadd.f32 %v534_v13, %v533_v38  ;;  %v579_v36 = vrot.slane %v578_v19, 1  ;;  %v541_v41 = vrot.slane %v540_v15, 2  ;;  %v594_v55 = vadd.f32 %v593_v24, %v592_v59 }
  0xa6   : > { %14095 = vst [vmem:[#allocation54_spill] sm:$0xff] %v9345_v30  ;;  %14096 = vst [vmem:[#allocation55_spill] sm:$0xff] %v9349_v18  ;;  %v584_v46 = vrot.slane %v583_v12, 4  ;;  %v627_v61 = vsel %vm400_vm0, %v9345_v30, 0.0  ;;  %v9354_v43 = vunpack.c.h.bf16 %v7624_v63  ;;  %v617_v35 = vsel %vm400_vm0, %v9349_v18, 0.0 }
  0xa7   : > { %1198 = vrot.lane.b32.xlu0 %v535_v34, %s8928_s20  ;;  %v580_v44 = vadd.f32 %v579_v36, %v578_v19  ;;  %v542_v58 = vadd.f32 %v541_v41, %v540_v15  ;;  %v595_v48 = vrot.slane %v594_v55, 2  ;;  %v628_v38 = vadd.f32 %v627_v61, %v626_v22  ;;  %v7627_v22 = vld [vmem:[%s9116_s6 + $0xd8] sm:$0xff]  }
  0xa8   : > { %14097 = vst [vmem:[#allocation56_spill] sm:$0xff] %v9354_v43  ;;  %v585_v60 = vadd.f32 %v584_v46, %v583_v12  ;;  %v618_v59 = vsel %vm400_vm0, %v9354_v43, 0.0  ;;  %v9362_v24 = vunpack.c.l.bf16 %v7626_v47  ;;  %v9364_v13 = vunpack.c.h.bf16 %v7626_v47 }
  0xa9   : > { %1208 = vrot.lane.b32.xlu1 %v580_v44, %s8928_s20  ;;  %v543_v63 = vrot.slane %v542_v58, 1  ;;  %v596_v18 = vadd.f32 %v595_v48, %v594_v55  ;;  %v629_v30 = vrot.slane %v628_v38, 4  ;;  %v619_v34 = vadd.f32 %v618_v59, %v617_v35 }
  0xaa   : > { %14098 = vst [vmem:[#allocation57_spill] sm:$0xff] %v9362_v24  ;;  %14099 = vst [vmem:[#allocation58_spill] sm:$0xff] %v9364_v13  ;;  %v586_v19 = vrot.slane %v585_v60, 2  ;;  %v635_v15 = vsel %vm400_vm0, %v9362_v24, 0.0  ;;  %v636_v46 = vsel %vm400_vm0, %v9364_v13, 0.0  ;;  %v9371_v12 = vunpack.c.l.bf16 %v7622_v56 }
  0xab   : > { %v544_v36 = vadd.f32 %v543_v63, %v542_v58  ;;  %v597_v47 = vrot.slane %v596_v18, 1  ;;  %v630_v41 = vadd.f32 %v629_v30, %v628_v38  ;;  %v620_v61 = vrot.slane %v619_v34, 4 }
  0xac   : > { %14100 = vst [vmem:[#allocation59_spill] sm:$0xff] %v9371_v12  ;;  %v587_v44 = vadd.f32 %v586_v19, %v585_v60  ;;  %v637_v43 = vadd.f32 %v636_v46, %v635_v15  ;;  %v9374_v55 = vunpack.c.h.bf16 %v7622_v56  ;;  %v599_v35 = vsel %vm400_vm0, %v9371_v12, 0.0 }
  0xad   : > { %1200 = vrot.lane.b32.xlu0 %v544_v36, %s8928_s20  ;;  %v598_v48 = vadd.f32 %v597_v47, %v596_v18  ;;  %v631_v59 = vrot.slane %v630_v41, 2  ;;  %v621_v13 = vadd.f32 %v620_v61, %v619_v34  ;;  %v9379_v24 = vunpack.c.l.bf16 %v7627_v22  ;;  %v7629_v34 = vld [vmem:[%s9116_s6 + $0xe8] sm:$0xff]  }
  0xae   : > { %14101 = vst [vmem:[#allocation60_spill] sm:$0xff] %v9374_v55  ;;  %vm2771_vm1 = vcmask 523648   ;;  %v588_v58 = vrot.slane %v587_v44, 1  ;;  %v638_v30 = vrot.slane %v637_v43, 4  ;;  %v600_v38 = vsel %vm400_vm0, %v9374_v55, 0.0 }
  0xaf   : > { %14102 = vst [vmem:[#allocation61_spill] sm:$0xff] %v9379_v24  ;;  %v9384_v56 = vunpack.c.h.bf16 %v7627_v22  ;;  %1212 = vrot.lane.b32.xlu1 %v598_v48, %s8928_s20  ;;  %v632_v60 = vadd.f32 %v631_v59, %v630_v41  ;;  %v622_v63 = vrot.slane %v621_v13, 2  ;;  %v601_v19 = vadd.f32 %v600_v38, %v599_v35  ;;  %v7628_v38 = vld [vmem:[%s9116_s6 + $0xe0] sm:$0xff]  }
  0xb0   : > { %v644_v18 = vsel %vm400_vm0, %v9379_v24, 0.0  ;;  %v589_v15 = vadd.f32 %v588_v58, %v587_v44  ;;  %v639_v46 = vadd.f32 %v638_v30, %v637_v43  ;;  %v9392_v47 = vunpack.c.l.bf16 %v7623_v2 }
  0xb1   : > { %14103 = vst [vmem:[#allocation62_spill] sm:$0xff] %v9384_v56  ;;  %v645_v36 = vsel %vm400_vm0, %v9384_v56, 0.0  ;;  %v633_v61 = vrot.slane %v632_v60, 1  ;;  %v623_v22 = vadd.f32 %v622_v63, %v621_v13  ;;  %v602_v55 = vrot.slane %v601_v19, 4 }
  0xb2   : > { %14104 = vst [vmem:[#allocation63_spill] sm:$0xff] %v9392_v47  ;;  %v646_v12 = vadd.f32 %v645_v36, %v644_v18  ;;  %1210 = vrot.lane.b32.xlu0 %v589_v15, %s8928_s20  ;;  %v640_v41 = vrot.slane %v639_v46, 2  ;;  %v9395_v35 = vunpack.c.h.bf16 %v7623_v2  ;;  %v608_v48 = vsel %vm400_vm0, %v9392_v47, 0.0 }
  0xb3   : > { %v9399_v44 = vunpack.c.l.bf16 %v7629_v34  ;;  %v634_v43 = vadd.f32 %v633_v61, %v632_v60  ;;  %v624_v59 = vrot.slane %v623_v22, 1  ;;  %v603_v58 = vadd.f32 %v602_v55, %v601_v19 }
  0xb4   : > { %14105 = vst [vmem:[#allocation64_spill] sm:$0xff] %v9395_v35  ;;  %v647_v30 = vrot.slane %v646_v12, 4  ;;  %v641_v56 = vadd.f32 %v640_v41, %v639_v46  ;;  %v609_v13 = vsel %vm400_vm0, %v9395_v35, 0.0  ;;  %v9404_v63 = vunpack.c.h.bf16 %v7629_v34 }
  0xb5   : > { %14106 = vst [vmem:[#allocation65_spill] sm:$0xff] %v9399_v44  ;;  %v662_v2 = vsel %vm400_vm0, %v9399_v44, 0.0  ;;  %1220 = vrot.lane.b32.xlu1 %v634_v43, %s8928_s20  ;;  %v625_v18 = vadd.f32 %v624_v59, %v623_v22  ;;  %v604_v15 = vrot.slane %v603_v58, 2  ;;  %v610_v47 = vadd.f32 %v609_v13, %v608_v48 }
  0xb6   : > { %14107 = vst [vmem:[#allocation66_spill] sm:$0xff] %v9404_v63  ;;  %v648_v36 = vadd.f32 %v647_v30, %v646_v12  ;;  %v642_v60 = vrot.slane %v641_v56, 1  ;;  %v663_v55 = vsel %vm400_vm0, %v9404_v63, 0.0  ;;  %v9411_v19 = vunpack.c.l.bf16 %v7628_v38 }
  0xb7   : > { %v9413_v46 = vunpack.c.h.bf16 %v7628_v38  ;;  %1218 = vrot.lane.b32.xlu0 %v625_v18, %s8928_s20  ;;  %v605_v34 = vadd.f32 %v604_v15, %v603_v58  ;;  %v611_v41 = vrot.slane %v610_v47, 4  ;;  %v664_v44 = vadd.f32 %v663_v55, %v662_v2 }
  0xb8   : > { %14108 = vst [vmem:[#allocation67_spill] sm:$0xff] %v9411_v19  ;;  %v649_v61 = vrot.slane %v648_v36, 2  ;;  %v643_v35 = vadd.f32 %v642_v60, %v641_v56  ;;  %v653_v22 = vsel %vm400_vm0, %v9411_v19, 0.0  ;;  %v2781_v48 = vsel %vm2771_vm1, %v9142_v10, 0.0 }
  0xb9   : > { %14109 = vst [vmem:[#allocation68_spill] sm:$0xff] %v9413_v46  ;;  %v654_v12 = vsel %vm400_vm0, %v9413_v46, 0.0  ;;  %v606_v43 = vrot.slane %v605_v34, 1  ;;  %v612_v30 = vadd.f32 %v611_v41, %v610_v47  ;;  %v665_v38 = vrot.slane %v664_v44, 4  ;;  %v7630_v41 = vld [vmem:[%s9116_s6 + $0xf0] sm:$0xff]  }
  0xba   : > { %v650_v59 = vadd.f32 %v649_v61, %v648_v36  ;;  %1222 = vrot.lane.b32.xlu1 %v643_v35, %s8928_s20  ;;  %v655_v58 = vadd.f32 %v654_v12, %v653_v22  ;;  %v2782_v56 = vsel %vm2771_vm1, %v9144_v11, 0.0  ;;  %v2772_v13 = vsel %vm2771_vm1, %v9133_v5, 0.0 }
  0xbb   : > { %v2773_v2 = vsel %vm2771_vm1, %v9135_v6, 0.0  ;;  %v607_v18 = vadd.f32 %v606_v43, %v605_v34  ;;  %v613_v60 = vrot.slane %v612_v30, 2  ;;  %v666_v55 = vadd.f32 %v665_v38, %v664_v44 }
  0xbc   : > { %v651_v15 = vrot.slane %v650_v59, 1  ;;  %v656_v36 = vrot.slane %v655_v58, 4  ;;  %v2783_v61 = vadd.f32 %v2782_v56, %v2781_v48  ;;  %v2774_v47 = vadd.f32 %v2773_v2, %v2772_v13 }
  0xbd   : > { %v2790_v35 = vsel %vm2771_vm1, %v9129_v3, 0.0  ;;  %1214 = vrot.lane.b32.xlu0 %v607_v18, %s8928_s20  ;;  %v614_v12 = vadd.f32 %v613_v60, %v612_v30  ;;  %v667_v11 = vrot.slane %v666_v55, 2  ;;  %v2791_v5 = vsel %vm2771_vm1, %v9131_v4, 0.0 }
  0xbe   : > { %v652_v22 = vadd.f32 %v651_v15, %v650_v59  ;;  %v657_v6 = vadd.f32 %v656_v36, %v655_v58  ;;  %v2784_v34 = vrot.slane %v2783_v61, 4  ;;  %v2775_v43 = vrot.slane %v2774_v47, 4 }
  0xbf   : > { %v2792_v10 = vadd.f32 %v2791_v5, %v2790_v35  ;;  %v615_v44 = vrot.slane %v614_v12, 1  ;;  %v668_v48 = vadd.f32 %v667_v11, %v666_v55  ;;  %v9436_v38 = vunpack.c.l.bf16 %v7630_v41  ;;  %v7631_v55 = vld [vmem:[%s9116_s6 + $0xf8] sm:$0xff]  }
  0xc0   : > { %1224 = vrot.lane.b32.xlu1 %v652_v22, %s8928_s20  ;;  %v9438_v56 = vunpack.c.h.bf16 %v7630_v41  ;;  %v658_v13 = vrot.slane %v657_v6, 2  ;;  %v2785_v59 = vadd.f32 %v2784_v34, %v2783_v61  ;;  %v2776_v30 = vadd.f32 %v2775_v43, %v2774_v47 }
  0xc1   : > { %14110 = vst [vmem:[#allocation69_spill] sm:$0xff] %v9436_v38  ;;  %v2793_v2 = vrot.slane %v2792_v10, 4  ;;  %v616_v18 = vadd.f32 %v615_v44, %v614_v12  ;;  %v669_v15 = vrot.slane %v668_v48, 1  ;;  %v671_v58 = vsel %vm400_vm0, %v9436_v38, 0.0 }
  0xc2   : > { %14111 = vst [vmem:[#allocation70_spill] sm:$0xff] %v9438_v56  ;;  %v672_v5 = vsel %vm400_vm0, %v9438_v56, 0.0  ;;  %v659_v60 = vadd.f32 %v658_v13, %v657_v6  ;;  %v2786_v36 = vrot.slane %v2785_v59, 2  ;;  %v2777_v35 = vrot.slane %v2776_v30, 2 }
  0xc3   : > { %v2794_v11 = vadd.f32 %v2793_v2, %v2792_v10  ;;  %1216 = vrot.lane.b32.xlu0 %v616_v18, %s8928_s20  ;;  %v670_v41 = vadd.f32 %v669_v15, %v668_v48  ;;  %v673_v22 = vadd.f32 %v672_v5, %v671_v58  ;;  %v2799_v61 = vsel %vm2771_vm1, %v9138_v8, 0.0 }
  0xc4   : > { %v2800_v47 = vsel %vm2771_vm1, %v9140_v9, 0.0  ;;  %v660_v12 = vrot.slane %v659_v60, 1  ;;  %v2787_v34 = vadd.f32 %v2786_v36, %v2785_v59  ;;  %v2778_v43 = vadd.f32 %v2777_v35, %v2776_v30 }
  0xc5   : > { %v2795_v44 = vrot.slane %v2794_v11, 2  ;;  %1228 = vrot.lane.b32.xlu1 %v670_v41, %s8928_s20  ;;  %v674_v6 = vrot.slane %v673_v22, 4  ;;  %v2801_v13 = vadd.f32 %v2800_v47, %v2799_v61  ;;  %v9451_v10 = vunpack.c.l.bf16 %v7631_v55 }
  0xc6   : > { %v9453_v2 = vunpack.c.h.bf16 %v7631_v55  ;;  %v661_v48 = vadd.f32 %v660_v12, %v659_v60  ;;  %v2788_v18 = vrot.slane %v2787_v34, 1  ;;  %v2779_v15 = vrot.slane %v2778_v43, 1 }
  0xc7   : > { %14112 = vst [vmem:[#allocation71_spill] sm:$0xff] %v9451_v10  ;;  %v2796_v58 = vadd.f32 %v2795_v44, %v2794_v11  ;;  %v675_v5 = vadd.f32 %v674_v6, %v673_v22  ;;  %v2802_v4 = vrot.slane %v2801_v13, 4  ;;  %v680_v3 = vsel %vm400_vm0, %v9451_v10, 0.0 }
  0xc8   : > { %14113 = vst [vmem:[#allocation72_spill] sm:$0xff] %v9453_v2  ;;  %v681_v59 = vsel %vm400_vm0, %v9453_v2, 0.0  ;;  %1226 = vrot.lane.b32.xlu0 %v661_v48, %s8928_s20  ;;  %v2789_v30 = vadd.f32 %v2788_v18, %v2787_v34  ;;  %v2780_v36 = vadd.f32 %v2779_v15, %v2778_v43  ;;  %v2817_v60 = vsel %vm2771_vm1, %v9164_v25, 0.0 }
  0xc9   : > { %v2797_v35 = vrot.slane %v2796_v58, 1  ;;  %v682_v41 = vadd.f32 %v681_v59, %v680_v3  ;;  %v676_v55 = vrot.slane %v675_v5, 2  ;;  %v2803_v61 = vadd.f32 %v2802_v4, %v2801_v13 }
  0xca   : > { %v2818_v11 = vsel %vm2771_vm1, %v9166_v29, 0.0  ;;  %3478 = vrot.lane.b32.xlu1 %v2789_v30, %s8928_s20  ;;  %v2808_v44 = vsel %vm2771_vm1, %v9170_v32, 0.0  ;;  %v2809_v3 = vsel %vm2771_vm1, %v9172_v33, 0.0  ;;  %v2835_v4 = vsel %vm2771_vm1, %v9226_v57, 0.0 }
  0xcb   : > { %v2798_v22 = vadd.f32 %v2797_v35, %v2796_v58  ;;  %v683_v47 = vrot.slane %v682_v41, 4  ;;  %v2819_v12 = vadd.f32 %v2818_v11, %v2817_v60  ;;  %v677_v34 = vadd.f32 %v676_v55, %v675_v5 }
  0xcc   : > { %v2804_v43 = vrot.slane %v2803_v61, 2  ;;  %3476 = vrot.lane.b32.xlu0 %v2780_v36, %s8928_s20  ;;  %v2810_v48 = vadd.f32 %v2809_v3, %v2808_v44  ;;  %v2836_v18 = vsel %vm2771_vm1, %v9233_v62, 0.0  ;;  %v2826_v5 = vsel %vm2771_vm1, %v9208_v37, 0.0 }
  0xcd   : > { %v684_v6 = vadd.f32 %v683_v47, %v682_v41  ;;  %v2820_v13 = vrot.slane %v2819_v12, 4  ;;  %v678_v15 = vrot.slane %v677_v34, 1  ;;  %v2837_v59 = vadd.f32 %v2836_v18, %v2835_v4 }
  0xce   : > { %v2805_v58 = vadd.f32 %v2804_v43, %v2803_v61  ;;  %3480 = vrot.lane.b32.xlu1 %v2798_v22, %s8928_s20  ;;  %v2811_v55 = vrot.slane %v2810_v48, 4  ;;  %v2827_v36 = vsel %vm2771_vm1, %v9213_v42, 0.0  ;;  %v2853_v61 = vsel %vm2771_vm1, %v9181_v49, 0.0 }
  0xcf   : > { %v685_v30 = vrot.slane %v684_v6, 2  ;;  %v2821_v35 = vadd.f32 %v2820_v13, %v2819_v12  ;;  %v679_v41 = vadd.f32 %v678_v15, %v677_v34  ;;  %v2838_v11 = vrot.slane %v2837_v59, 4 }
  0xd0   : > { %v2806_v60 = vrot.slane %v2805_v58, 1  ;;  %v2828_v47 = vadd.f32 %v2827_v36, %v2826_v5  ;;  %v2812_v62 = vadd.f32 %v2811_v55, %v2810_v48  ;;  %v2854_v12 = vsel %vm2771_vm1, %v9183_v50, 0.0 }
  0xd1   : > { %v686_v44 = vadd.f32 %v685_v30, %v684_v6  ;;  %v2822_v3 = vrot.slane %v2821_v35, 2  ;;  %1230 = vrot.lane.b32.xlu0 %v679_v41, %s8928_s20  ;;  %v2839_v22 = vadd.f32 %v2838_v11, %v2837_v59  ;;  %v2855_v15 = vadd.f32 %v2854_v12, %v2853_v61 }
  0xd2   : > { %v2807_v43 = vadd.f32 %v2806_v60, %v2805_v58  ;;  %v2829_v4 = vrot.slane %v2828_v47, 4  ;;  %v2813_v34 = vrot.slane %v2812_v62, 2  ;;  %v2844_v48 = vsel %vm2771_vm1, %v9190_v7, 0.0 }
  0xd3   : > { %v687_v13 = vrot.slane %v686_v44, 1  ;;  %v2823_v18 = vadd.f32 %v2822_v3, %v2821_v35  ;;  %v2840_v6 = vrot.slane %v2839_v22, 2  ;;  %v2845_v30 = vsel %vm2771_vm1, %v9193_v20, 0.0 }
  0xd4   : > { %3482 = vrot.lane.b32.xlu1 %v2807_v43, %s8928_s20  ;;  %v2830_v5 = vadd.f32 %v2829_v4, %v2828_v47  ;;  %v2814_v55 = vadd.f32 %v2813_v34, %v2812_v62  ;;  %v2856_v36 = vrot.slane %v2855_v15, 4  ;;  %v2846_v11 = vadd.f32 %v2845_v30, %v2844_v48 }
  0xd5   : > { %v688_v58 = vadd.f32 %v687_v13, %v686_v44  ;;  %v2824_v59 = vrot.slane %v2823_v18, 1  ;;  %v2841_v41 = vadd.f32 %v2840_v6, %v2839_v22  ;;  %v2871_v35 = vsel %vm2771_vm1, %v9222_v52, 0.0 }
  0xd6   : > { %v2831_v60 = vrot.slane %v2830_v5, 2  ;;  %v2815_v47 = vrot.slane %v2814_v55, 1  ;;  %v2857_v61 = vadd.f32 %v2856_v36, %v2855_v15  ;;  %v2872_v43 = vsel %vm2771_vm1, %v9224_v53, 0.0 }
  0xd7   : > { %1232 = vrot.lane.b32.xlu0 %v688_v58, %s8928_s20  ;;  %v2825_v3 = vadd.f32 %v2824_v59, %v2823_v18  ;;  %v2842_v4 = vrot.slane %v2841_v41, 1  ;;  %v2847_v44 = vrot.slane %v2846_v11, 4  ;;  %v2873_v13 = vadd.f32 %v2872_v43, %v2871_v35 }
  0xd8   : > { %v2832_v12 = vadd.f32 %v2831_v60, %v2830_v5  ;;  %v2816_v62 = vadd.f32 %v2815_v47, %v2814_v55  ;;  %v2858_v22 = vrot.slane %v2857_v61, 2  ;;  %v2862_v34 = vsel %vm2771_vm1, %v9200_v26, 0.0 }
  0xd9   : > { %3486 = vrot.lane.b32.xlu1 %v2825_v3, %s8928_s20  ;;  %v2863_v6 = vsel %vm2771_vm1, %v9204_v31, 0.0  ;;  %v2843_v18 = vadd.f32 %v2842_v4, %v2841_v41  ;;  %v2848_v15 = vadd.f32 %v2847_v44, %v2846_v11  ;;  %v2874_v30 = vrot.slane %v2873_v13, 4 }
  0xda   : > { %v2833_v48 = vrot.slane %v2832_v12, 1  ;;  %v2859_v58 = vadd.f32 %v2858_v22, %v2857_v61  ;;  %v2864_v5 = vadd.f32 %v2863_v6, %v2862_v34  ;;  %v2889_v59 = vsel %vm2771_vm1, %v9242_v16, 0.0 }
  0xdb   : > { %3484 = vrot.lane.b32.xlu0 %v2816_v62, %s8928_s20  ;;  %v2890_v55 = vsel %vm2771_vm1, %v9244_v23, 0.0  ;;  %v2849_v60 = vrot.slane %v2848_v15, 2  ;;  %v2875_v35 = vadd.f32 %v2874_v30, %v2873_v13  ;;  %v2880_v11 = vsel %vm2771_vm1, %v9248_v27, 0.0 }
  0xdc   : > { %v2834_v36 = vadd.f32 %v2833_v48, %v2832_v12  ;;  %v2891_v3 = vadd.f32 %v2890_v55, %v2889_v59  ;;  %v2860_v41 = vrot.slane %v2859_v58, 1  ;;  %v2865_v47 = vrot.slane %v2864_v5, 4 }
  0xdd   : > { %3490 = vrot.lane.b32.xlu1 %v2843_v18, %s8928_s20  ;;  %v2881_v61 = vsel %vm2771_vm1, %v9254_v40, 0.0  ;;  %v2850_v43 = vadd.f32 %v2849_v60, %v2848_v15  ;;  %v2876_v4 = vrot.slane %v2875_v35, 2  ;;  %v2925_v13 = vsel %vm2771_vm1, %v9260_v54, 0.0 }
  0xde   : > { %v2892_v44 = vrot.slane %v2891_v3, 4  ;;  %v2882_v62 = vadd.f32 %v2881_v61, %v2880_v11  ;;  %v2861_v12 = vadd.f32 %v2860_v41, %v2859_v58  ;;  %v2866_v22 = vadd.f32 %v2865_v47, %v2864_v5 }
  0xdf   : > { %3488 = vrot.lane.b32.xlu0 %v2834_v36, %s8928_s20  ;;  %v2926_v34 = vsel %vm2771_vm1, %v9264_v0, 0.0  ;;  %v2851_v6 = vrot.slane %v2850_v43, 1  ;;  %v2877_v18 = vadd.f32 %v2876_v4, %v2875_v35  ;;  %v2916_v55 = vsel %vm2771_vm1, %v9269_v14, 0.0 }
  0xe0   : > { %v2893_v48 = vadd.f32 %v2892_v44, %v2891_v3  ;;  %v2883_v30 = vrot.slane %v2882_v62, 4  ;;  %v2867_v15 = vrot.slane %v2866_v22, 2  ;;  %v2927_v59 = vadd.f32 %v2926_v34, %v2925_v13 }
  0xe1   : > { %3494 = vrot.lane.b32.xlu1 %v2861_v12, %s8928_s20  ;;  %v2917_v58 = vsel %vm2771_vm1, %v9274_v21, 0.0  ;;  %v2852_v5 = vadd.f32 %v2851_v6, %v2850_v43  ;;  %v2878_v36 = vrot.slane %v2877_v18, 1  ;;  %v2934_v35 = vsel %vm2771_vm1, %v9282_v39, 0.0  ;;  %v14132_v39 = vld [vmem:[#allocation65_spill] sm:$0xff] }
  0xe2   : > { %v2894_v60 = vrot.slane %v2893_v48, 2  ;;  %v2884_v41 = vadd.f32 %v2883_v30, %v2882_v62  ;;  %v2868_v47 = vadd.f32 %v2867_v15, %v2866_v22  ;;  %v2928_v11 = vrot.slane %v2927_v59, 4 }
  0xe3   : > { %v2918_v61 = vadd.f32 %v2917_v58, %v2916_v55  ;;  %3492 = vrot.lane.b32.xlu0 %v2852_v5, %s8928_s20  ;;  %v2879_v3 = vadd.f32 %v2878_v36, %v2877_v18  ;;  %v2935_v12 = vsel %vm2771_vm1, %v9285_v45, 0.0  ;;  %v2898_v30 = vsel %vm2771_vm1, %v9289_v51, 0.0 }
  0xe4   : > { %v2895_v4 = vadd.f32 %v2894_v60, %v2893_v48  ;;  %v2885_v44 = vrot.slane %v2884_v41, 2  ;;  %v2869_v13 = vrot.slane %v2868_v47, 1  ;;  %v2929_v34 = vadd.f32 %v2928_v11, %v2927_v59 }
  0xe5   : > { %v2919_v43 = vrot.slane %v2918_v61, 4  ;;  %v2936_v6 = vadd.f32 %v2935_v12, %v2934_v35  ;;  %3498 = vrot.lane.b32.xlu1 %v2879_v3, %s8928_s20  ;;  %v2899_v15 = vsel %vm2771_vm1, %v9295_v1, 0.0  ;;  %v2943_v59 = vsel %vm2771_vm1, %v9299_v17, 0.0  ;;  %v14114_v12 = vld [vmem:[#allocation47_spill] sm:$0xff] }
  0xe6   : > { %v2896_v62 = vrot.slane %v2895_v4, 1  ;;  %v2886_v22 = vadd.f32 %v2885_v44, %v2884_v41  ;;  %v2870_v18 = vadd.f32 %v2869_v13, %v2868_v47  ;;  %v2930_v48 = vrot.slane %v2929_v34, 2 }
  0xe7   : > { %v2920_v55 = vadd.f32 %v2919_v43, %v2918_v61  ;;  %v2937_v58 = vrot.slane %v2936_v6, 4  ;;  %v2900_v60 = vadd.f32 %v2899_v15, %v2898_v30  ;;  %v2944_v3 = vsel %vm2771_vm1, %v9304_v28, 0.0  ;;  %v14115_v30 = vld [vmem:[#allocation48_spill] sm:$0xff] }
  0xe8   : > { %v2897_v5 = vadd.f32 %v2896_v62, %v2895_v4  ;;  %v2887_v36 = vrot.slane %v2886_v22, 1  ;;  %3496 = vrot.lane.b32.xlu0 %v2870_v18, %s8928_s20  ;;  %v2931_v11 = vadd.f32 %v2930_v48, %v2929_v34  ;;  %v2945_v61 = vadd.f32 %v2944_v3, %v2943_v59  ;;  %v14116_v48 = vld [vmem:[#allocation49_spill] sm:$0xff]  ;;  %v14117_v59 = vld [vmem:[#allocation50_spill] sm:$0xff] }
  0xe9   : > { %v2921_v41 = vrot.slane %v2920_v55, 2  ;;  %v2938_v35 = vadd.f32 %v2937_v58, %v2936_v6  ;;  %v2901_v44 = vrot.slane %v2900_v60, 4  ;;  %v2907_v4 = vsel %vm2771_vm1, %v14114_v12, 0.0 }
  0xea   : > { %3502 = vrot.lane.b32.xlu1 %v2897_v5, %s8928_s20  ;;  %v2888_v47 = vadd.f32 %v2887_v36, %v2886_v22  ;;  %v2932_v13 = vrot.slane %v2931_v11, 1  ;;  %v2908_v15 = vsel %vm2771_vm1, %v14115_v30, 0.0  ;;  %v2946_v18 = vrot.slane %v2945_v61, 4 }
  0xeb   : > { %v2922_v43 = vadd.f32 %v2921_v41, %v2920_v55  ;;  %v2939_v62 = vrot.slane %v2938_v35, 2  ;;  %v2902_v34 = vadd.f32 %v2901_v44, %v2900_v60  ;;  %v2909_v6 = vadd.f32 %v2908_v15, %v2907_v4  ;;  %v14118_v4 = vld [vmem:[#allocation51_spill] sm:$0xff] }
  0xec   : > { %v2961_v58 = vsel %vm2771_vm1, %v14116_v48, 0.0  ;;  %3500 = vrot.lane.b32.xlu0 %v2888_v47, %s8928_s20  ;;  %v2933_v22 = vadd.f32 %v2932_v13, %v2931_v11  ;;  %v2962_v3 = vsel %vm2771_vm1, %v14117_v59, 0.0  ;;  %v2947_v55 = vadd.f32 %v2946_v18, %v2945_v61  ;;  %v14119_v48 = vld [vmem:[#allocation52_spill] sm:$0xff] }
  0xed   : > { %v2923_v5 = vrot.slane %v2922_v43, 1  ;;  %v2940_v36 = vadd.f32 %v2939_v62, %v2938_v35  ;;  %v2903_v12 = vrot.slane %v2902_v34, 2  ;;  %v2910_v41 = vrot.slane %v2909_v6, 4 }
  0xee   : > { %v2963_v28 = vadd.f32 %v2962_v3, %v2961_v58  ;;  %3510 = vrot.lane.b32.xlu1 %v2933_v22, %s8928_s20  ;;  %v2952_v15 = vsel %vm2771_vm1, %v14118_v4, 0.0  ;;  %v2953_v47 = vsel %vm2771_vm1, %v14119_v48, 0.0  ;;  %v2948_v13 = vrot.slane %v2947_v55, 2  ;;  %v14121_v22 = vld [vmem:[#allocation54_spill] sm:$0xff]  ;;  %v14122_v4 = vld [vmem:[#allocation55_spill] sm:$0xff] }
  0xef   : > { %v2924_v60 = vadd.f32 %v2923_v5, %v2922_v43  ;;  %v2941_v44 = vrot.slane %v2940_v36, 1  ;;  %v2904_v11 = vadd.f32 %v2903_v12, %v2902_v34  ;;  %v2911_v35 = vadd.f32 %v2910_v41, %v2909_v6  ;;  %v9549_v30 = vpop.permute.xlu1 %1174  ;;  %v9551_v59 = vpop.permute.xlu0 %1170  ;;  %v14120_v43 = vld [vmem:[#allocation53_spill] sm:$0xff] }
  0xf0   : > { %v2964_v62 = vrot.slane %v2963_v28, 4  ;;  %v2954_v18 = vadd.f32 %v2953_v47, %v2952_v15  ;;  %v2997_v58 = vsel %vm2771_vm1, %v14120_v43, 0.0  ;;  %v2998_v5 = vsel %vm2771_vm1, %v14121_v22, 0.0 }
  0xf1   : > { %3508 = vrot.lane.b32.xlu0 %v2924_v60, %s8928_s20  ;;  %v2942_v61 = vadd.f32 %v2941_v44, %v2940_v36  ;;  %v2905_v3 = vrot.slane %v2904_v11, 1  ;;  %v2949_v48 = vadd.f32 %v2948_v13, %v2947_v55  ;;  %v2912_v12 = vrot.slane %v2911_v35, 2  ;;  %v14123_v60 = vld [vmem:[#allocation56_spill] sm:$0xff] }
  0xf2   : > { %v2965_v34 = vadd.f32 %v2964_v62, %v2963_v28  ;;  %v2955_v6 = vrot.slane %v2954_v18, 4  ;;  %v2999_v41 = vadd.f32 %v2998_v5, %v2997_v58  ;;  %v2988_v17 = vsel %vm2771_vm1, %v14122_v4, 0.0  ;;  %v14124_v62 = vld [vmem:[#allocation57_spill] sm:$0xff] }
  0xf3   : > { %3512 = vrot.lane.b32.xlu1 %v2942_v61, %s8928_s20  ;;  %v2989_v36 = vsel %vm2771_vm1, %v14123_v60, 0.0  ;;  %v2906_v44 = vadd.f32 %v2905_v3, %v2904_v11  ;;  %v2950_v15 = vrot.slane %v2949_v48, 1  ;;  %v2913_v47 = vadd.f32 %v2912_v12, %v2911_v35  ;;  %v9563_v1 = vpop.permute.xlu1 %1176  ;;  %v9565_v22 = vpop.permute.xlu0 %1172  ;;  %v14125_v60 = vld [vmem:[#allocation58_spill] sm:$0xff] }
  0xf4   : > { %v2966_v43 = vrot.slane %v2965_v34, 2  ;;  %v2956_v55 = vadd.f32 %v2955_v6, %v2954_v18  ;;  %v3000_v28 = vrot.slane %v2999_v41, 4  ;;  %v2990_v13 = vadd.f32 %v2989_v36, %v2988_v17  ;;  %v14126_v17 = vld [vmem:[#allocation59_spill] sm:$0xff] }
  0xf5   : > { %v3006_v61 = vsel %vm2771_vm1, %v14124_v62, 0.0  ;;  %3504 = vrot.lane.b32.xlu0 %v2906_v44, %s8928_s20  ;;  %v2951_v58 = vadd.f32 %v2950_v15, %v2949_v48  ;;  %v2914_v5 = vrot.slane %v2913_v47, 1  ;;  %v3007_v11 = vsel %vm2771_vm1, %v14125_v60, 0.0  ;;  %v14127_v62 = vld [vmem:[#allocation60_spill] sm:$0xff] }
  0xf6   : > { %v2967_v4 = vadd.f32 %v2966_v43, %v2965_v34  ;;  %v2957_v35 = vrot.slane %v2956_v55, 2  ;;  %v3001_v3 = vadd.f32 %v3000_v28, %v2999_v41  ;;  %v2991_v12 = vrot.slane %v2990_v13, 4 }
  0xf7   : > { %v3008_v51 = vadd.f32 %v3007_v11, %v3006_v61  ;;  %3514 = vrot.lane.b32.xlu1 %v2951_v58, %s8928_s20  ;;  %v2915_v18 = vadd.f32 %v2914_v5, %v2913_v47  ;;  %v2970_v36 = vsel %vm2771_vm1, %v14126_v17, 0.0  ;;  %v2971_v44 = vsel %vm2771_vm1, %v14127_v62, 0.0  ;;  %v9577_v48 = vpop.permute.xlu1 %1180  ;;  %v9580_v61 = vpop.permute.xlu0 %1178 }
  0xf8   : > { %v2968_v6 = vrot.slane %v2967_v4, 1  ;;  %v2958_v43 = vadd.f32 %v2957_v35, %v2956_v55  ;;  %v3002_v34 = vrot.slane %v3001_v3, 2  ;;  %v2992_v15 = vadd.f32 %v2991_v12, %v2990_v13 }
  0xf9   : > { %v3009_v60 = vrot.slane %v3008_v51, 4  ;;  %3506 = vrot.lane.b32.xlu0 %v2915_v18, %s8928_s20  ;;  %v2972_v28 = vadd.f32 %v2971_v44, %v2970_v36  ;;  %v3015_v62 = vsel %vm2771_vm1, %v9379_v24, 0.0  ;;  %v14130_v44 = vld [vmem:[#allocation63_spill] sm:$0xff]  ;;  %vm945_vm2 = vcmask 130048  }
  0xfa   : > { %v2969_v41 = vadd.f32 %v2968_v6, %v2967_v4  ;;  %v2959_v47 = vrot.slane %v2958_v43, 1  ;;  %v3003_v58 = vadd.f32 %v3002_v34, %v3001_v3  ;;  %v2993_v5 = vrot.slane %v2992_v15, 2  ;;  %v14129_v6 = vld [vmem:[#allocation62_spill] sm:$0xff] }
  0xfb   : > { %v3010_v11 = vadd.f32 %v3009_v60, %v3008_v51  ;;  %v2973_v17 = vrot.slane %v2972_v28, 4  ;;  %v9585_v55 = vpop.permute.xlu1 %1188  ;;  %v3016_v36 = vsel %vm2771_vm1, %v14129_v6, 0.0  ;;  %v2979_v3 = vsel %vm2771_vm1, %v14130_v44, 0.0  ;;  %v14131_v51 = vld [vmem:[#allocation64_spill] sm:$0xff] }
  0xfc   : > { %3518 = vrot.lane.b32.xlu1 %v2969_v41, %s8928_s20  ;;  %14128 = vst [vmem:[#allocation73_spill] sm:$0xff] %v9585_v55  ;;  %v2960_v13 = vadd.f32 %v2959_v47, %v2958_v43  ;;  %v3004_v35 = vrot.slane %v3003_v58, 1  ;;  %v2994_v12 = vadd.f32 %v2993_v5, %v2992_v15  ;;  %v2980_v60 = vsel %vm2771_vm1, %v14131_v51, 0.0 }
  0xfd   : > { %v3011_v18 = vrot.slane %v3010_v11, 2  ;;  %v2974_v4 = vadd.f32 %v2973_v17, %v2972_v28  ;;  %v3017_v45 = vadd.f32 %v3016_v36, %v3015_v62  ;;  %v2981_v47 = vadd.f32 %v2980_v60, %v2979_v3 }
  0xfe   : > { %3516 = vrot.lane.b32.xlu0 %v2960_v13, %s8928_s20  ;;  %v3005_v34 = vadd.f32 %v3004_v35, %v3003_v58  ;;  %v2995_v41 = vrot.slane %v2994_v12, 1  ;;  %v3033_v51 = vsel %vm2771_vm1, %v14132_v39, 0.0  ;;  %v3024_v13 = vsel %vm2771_vm1, %v9411_v19, 0.0 }
  0xff   : > { %v3012_v24 = vadd.f32 %v3011_v18, %v3010_v11  ;;  %v2975_v43 = vrot.slane %v2974_v4, 2  ;;  %v9594_v15 = vpop.permute.xlu0 %1186  ;;  %v3018_v5 = vrot.slane %v3017_v45, 4  ;;  %v2982_v44 = vrot.slane %v2981_v47, 4 }
 0x100   : > { %3526 = vrot.lane.b32.xlu1 %v3005_v34, %s8928_s20  ;;  %v2996_v17 = vadd.f32 %v2995_v41, %v2994_v12  ;;  %v3034_v11 = vsel %vm2771_vm1, %v9404_v63, 0.0  ;;  %vm1778_vm3 = vcmask 64512   ;;  %vm5109_vm4 = vcmask 1041409  }
 0x101   : > { %v3013_v28 = vrot.slane %v3012_v24, 1  ;;  %v2976_v6 = vadd.f32 %v2975_v43, %v2974_v4  ;;  %v9599_v55 = vpop.permute.xlu1 %1190  ;;  %v3019_v62 = vadd.f32 %v3018_v5, %v3017_v45  ;;  %v2983_v12 = vadd.f32 %v2982_v44, %v2981_v47 }
 0x102   : > { %3524 = vrot.lane.b32.xlu0 %v2996_v17, %s8928_s20  ;;  %v3035_v18 = vadd.f32 %v3034_v11, %v3033_v51  ;;  %v3025_v4 = vsel %vm2771_vm1, %v9413_v46, 0.0  ;;  %v3051_v17 = vsel %vm2771_vm1, %v9451_v10, 0.0  ;;  %v3052_v47 = vsel %vm2771_vm1, %v9453_v2, 0.0 }
 0x103   : > { %v3014_v58 = vadd.f32 %v3013_v28, %v3012_v24  ;;  %v2977_v35 = vrot.slane %v2976_v6, 1  ;;  %v9608_v36 = vpop.permute.xlu0 %1182  ;;  %v3020_v3 = vrot.slane %v3019_v62, 2  ;;  %v3026_v60 = vadd.f32 %v3025_v4, %v3024_v13 }
 0x104   : > { %v2984_v45 = vrot.slane %v2983_v12, 2  ;;  %v3036_v34 = vrot.slane %v3035_v18, 4  ;;  %v3042_v5 = vsel %vm2771_vm1, %v9436_v38, 0.0  ;;  %v3053_v11 = vadd.f32 %v3052_v47, %v3051_v17 }
 0x105   : > { %3528 = vrot.lane.b32.xlu1 %v3014_v58, %s8928_s20  ;;  %v2978_v24 = vadd.f32 %v2977_v35, %v2976_v6  ;;  %v3021_v41 = vadd.f32 %v3020_v3, %v3019_v62  ;;  %v3027_v43 = vrot.slane %v3026_v60, 4  ;;  %v9613_v28 = vpop.permute.xlu1 %1192  ;;  %v3043_v62 = vsel %vm2771_vm1, %v9438_v56, 0.0 }
 0x106   : > { %v2985_v44 = vadd.f32 %v2984_v45, %v2983_v12  ;;  %v3037_v51 = vadd.f32 %v3036_v34, %v3035_v18  ;;  %v3044_v3 = vadd.f32 %v3043_v62, %v3042_v5  ;;  %v3054_v18 = vrot.slane %v3053_v11, 4 }
 0x107   : > { %3520 = vrot.lane.b32.xlu0 %v2978_v24, %s8928_s20  ;;  %v3022_v6 = vrot.slane %v3021_v41, 1  ;;  %v3028_v58 = vadd.f32 %v3027_v43, %v3026_v60  ;;  %vm5111_vm5 = vcmask 1042434   ;;  %vm5113_vm6 = vcmask 1043459  }
 0x108   : > { %v9622_v13 = vpop.permute.xlu0 %1184  ;;  %v2986_v35 = vrot.slane %v2985_v44, 1  ;;  %v3038_v4 = vrot.slane %v3037_v51, 2  ;;  %v3045_v2 = vrot.slane %v3044_v3, 4  ;;  %v3055_v38 = vadd.f32 %v3054_v18, %v3053_v11 }
 0x109   : > { %v3023_v24 = vadd.f32 %v3022_v6, %v3021_v41  ;;  %v3029_v12 = vrot.slane %v3028_v58, 2  ;;  %vm5115_vm7 = vcmask 1044484   ;;  %vm5117_vm8 = vcmask 1045509  }
 0x10a   : > { %v2987_v45 = vadd.f32 %v2986_v35, %v2985_v44  ;;  %v3039_v34 = vadd.f32 %v3038_v4, %v3037_v51  ;;  %v3046_v17 = vadd.f32 %v3045_v2, %v3044_v3  ;;  %v3056_v5 = vrot.slane %v3055_v38, 2 }
 0x10b   : > { %3530 = vrot.lane.b32.xlu1 %v3023_v24, %s8928_s20  ;;  %v3030_v10 = vadd.f32 %v3029_v12, %v3028_v58  ;;  %v14133_v24 = vld [vmem:[#allocation15_spill] sm:$0xff]  ;;  %v14134_v12 = vld [vmem:[#allocation16_spill] sm:$0xff]  ;;  %vm5119_vm9 = vcmask 1046534   ;;  %vm5121_vm10 = vcmask 1047559   ;;  %vm4084_vm11 = vcmask 130112  }
 0x10c   : > { %v9625_v60 = vpop.permute.xlu1 %1196  ;;  %3522 = vrot.lane.b32.xlu0 %v2987_v45, %s8928_s20  ;;  %v3040_v43 = vrot.slane %v3039_v34, 1  ;;  %v3047_v6 = vrot.slane %v3046_v17, 2  ;;  %v3057_v44 = vadd.f32 %v3056_v5, %v3055_v38  ;;  %v9639_v18 = vpack.i.bf16 %v14134_v12, %v14133_v24  ;;  %v14140_v5 = vld [vmem:[#allocation10_spill] sm:$0xff] }
 0x10d   : > { %v9628_v47 = vpop.permute.xlu0 %1194  ;;  %v3031_v56 = vrot.slane %v3030_v10, 1  ;;  %vm5336_vm12 = vcmask 195584   ;;  %vm5341_vm13 = vcmask 261120   ;;  %vm5346_vm14 = vcmask 326656  }
 0x10e   : > { %v3041_v41 = vadd.f32 %v3040_v43, %v3039_v34  ;;  %v3048_v51 = vadd.f32 %v3047_v6, %v3046_v17  ;;  %v3058_v58 = vrot.slane %v3057_v44, 1  ;;  %v9654_v43 = vpack.i.bf16 %v9140_v9, %v9138_v8  ;;  %v14139_v17 = vld [vmem:[#allocation9_spill] sm:$0xff] }
 0x10f   : > { %v3032_v62 = vadd.f32 %v3031_v56, %v3030_v10  ;;  %v14135_v56 = vld [vmem:[#allocation11_spill] sm:$0xff]  ;;  %v14136_v10 = vld [vmem:[#allocation12_spill] sm:$0xff]  ;;  %vm5687_vm15 = vcmask 392192   ;;  %vm6394_vm0 = vcmask 785408  }
 0x110   : > { %3534 = vrot.lane.b32.xlu1 %v3041_v41, %s8928_s20  ;;  %v3049_v11 = vrot.slane %v3048_v51, 1  ;;  %v3059_v2 = vadd.f32 %v3058_v58, %v3057_v44  ;;  %v9646_v45 = vpack.i.bf16 %v14136_v10, %v14135_v56  ;;  %14138 = vst [vmem:[#allocation75_spill] sm:$0xff] %v9654_v43  ;;  %v9660_v41 = vpack.i.bf16 %v14140_v5, %v14139_v17 }
 0x111   : > { %v9631_v35 = vpop.permute.xlu1 %1204  ;;  %3532 = vrot.lane.b32.xlu0 %v3032_v62, %s8928_s20  ;;  %v9668_v62 = vpack.i.bf16 %v9166_v29, %v9164_v25  ;;  %v9674_v44 = vpack.i.bf16 %v9172_v33, %v9170_v32 }
 0x112   : > { %v3050_v3 = vadd.f32 %v3049_v11, %v3048_v51  ;;  %14137 = vst [vmem:[#allocation74_spill] sm:$0xff] %v9646_v45  ;;  %14141 = vst [vmem:[#allocation76_spill] sm:$0xff] %v9660_v41  ;;  %v9684_v11 = vpack.i.bf16 %v9183_v50, %v9181_v49 }
 0x113   : > { %v9634_v4 = vpop.permute.xlu0 %1202  ;;  %14142 = vst [vmem:[#allocation77_spill] sm:$0xff] %v9668_v62  ;;  %14143 = vst [vmem:[#allocation78_spill] sm:$0xff] %v9674_v44 }
 0x114   : > { %3538 = vrot.lane.b32.xlu1 %v3059_v2, %s8928_s20  ;;  %14144 = vst [vmem:[#allocation79_spill] sm:$0xff] %v9684_v11  ;;  %v9690_v2 = vpack.i.bf16 %v9193_v20, %v9190_v7 }
 0x115   : > { %3536 = vrot.lane.b32.xlu0 %v3050_v3, %s8928_s20 }
 0x116   : > { %v9641_v38 = vpop.permute.xlu1 %1206  ;;  %14145 = vst [vmem:[#allocation80_spill] sm:$0xff] %v9690_v2 }
 0x118   : > { %8445 = vrot.lane.b32.xlu1 %v9639_v18, %s8929_s21 }
 0x119   : > { %v9648_v34 = vpop.permute.xlu0 %1198  ;;  %8440 = vrot.lane.b32.xlu0 %v9646_v45, %s8929_s21 }
 0x11b   : > { %v9662_v6 = vpop.permute.xlu1 %1208 }
 0x11c   : > { %8455 = vrot.lane.b32.xlu1 %v9654_v43, %s8929_s21  ;;  %v1267_v43 = vmul.f32 %v14136_v10, %v9551_v59  ;;  %v9717_v10 = vpack.i.bf16 %v9204_v31, %v9200_v26 }
 0x11d   : > { %8450 = vrot.lane.b32.xlu0 %v9660_v41, %s8929_s21 }
 0x11e   : > { %14146 = vst [vmem:[#allocation81_spill] sm:$0xff] %v9717_v10 }
 0x11f   : > { %v9676_v51 = vpop.permute.xlu0 %1200 }
 0x120   : > { %8465 = vrot.lane.b32.xlu1 %v9668_v62, %s8929_s21 }
 0x121   : > { %v9678_v58 = vpop.permute.xlu1 %1212  ;;  %8460 = vrot.lane.b32.xlu0 %v9674_v44, %s8929_s21  ;;  %v1266_v44 = vmul.f32 %v14135_v56, %v9551_v59  ;;  %v9722_v59 = vpack.i.bf16 %v9213_v42, %v9208_v37 }
 0x123   : > { %14147 = vst [vmem:[#allocation82_spill] sm:$0xff] %v9722_v59 }
 0x124   : > { %v9692_v3 = vpop.permute.xlu0 %1210  ;;  %8475 = vrot.lane.b32.xlu1 %v9684_v11, %s8929_s21  ;;  %v1269_v11 = vmul.f32 %v14134_v12, %v9565_v22 }
 0x125   : > { %8470 = vrot.lane.b32.xlu0 %v9690_v2, %s8929_s21  ;;  %v1268_v2 = vmul.f32 %v14133_v24, %v9565_v22  ;;  %v1271_v22 = vmul.f32 %v14140_v5, %v9549_v30  ;;  %v9741_v24 = vpack.i.bf16 %v9224_v53, %v9222_v52 }
 0x127   : > { %v9698_v62 = vpop.permute.xlu1 %1220  ;;  %14148 = vst [vmem:[#allocation83_spill] sm:$0xff] %v9741_v24 }
 0x128   : > { %1396 = vrot.lane.b32.xlu1 %v1267_v43, %s8929_s21 }
 0x129   : > { %v9704_v41 = vpop.permute.xlu0 %1218  ;;  %1394 = vrot.lane.b32.xlu0 %v1266_v44, %s8929_s21 }
 0x12c   : > { %v9710_v45 = vpop.permute.xlu1 %1222  ;;  %1400 = vrot.lane.b32.xlu1 %v1269_v11, %s8929_s21  ;;  %v1270_v11 = vmul.f32 %v14139_v17, %v9549_v30 }
 0x12d   : > { %1398 = vrot.lane.b32.xlu0 %v1268_v2, %s8929_s21 }
 0x12f   : > { %v9724_v43 = vpop.permute.xlu0 %1214 }
 0x130   : > { %8485 = vrot.lane.b32.xlu1 %v9717_v10, %s8929_s21  ;;  %v14149_v10 = vld [vmem:[#allocation32_spill] sm:$0xff] }
 0x131   : > { %8480 = vrot.lane.b32.xlu0 %v9722_v59, %s8929_s21  ;;  %v9746_v12 = vpack.i.bf16 %v14149_v10, %v9226_v57 }
 0x132   : > { %v9726_v44 = vpop.permute.xlu1 %1224 }
 0x133   : > { %14150 = vst [vmem:[#allocation84_spill] sm:$0xff] %v9746_v12 }
 0x134   : > { %1404 = vrot.lane.b32.xlu1 %v1271_v22, %s8929_s21  ;;  %v1273_v22 = vmul.f32 %v9140_v9, %v9563_v1 }
 0x135   : > { %v9736_v2 = vpop.permute.xlu0 %1216  ;;  %1402 = vrot.lane.b32.xlu0 %v1270_v11, %s8929_s21  ;;  %v1272_v11 = vmul.f32 %v9138_v8, %v9563_v1  ;;  %v9777_v1 = vpack.i.bf16 %v9244_v23, %v9242_v16 }
 0x137   : > { %v9748_v59 = vpop.permute.xlu1 %1228  ;;  %14152 = vst [vmem:[#allocation86_spill] sm:$0xff] %v9777_v1 }
 0x138   : > { %8495 = vrot.lane.b32.xlu1 %v9741_v24, %s8929_s21  ;;  %v9768_v24 = vpack.i.bf16 %v9254_v40, %v9248_v27 }
 0x139   : > { %8490 = vrot.lane.b32.xlu0 %v9746_v12, %s8929_s21  ;;  %v1274_v12 = vmul.f32 %v9170_v32, %v9580_v61  ;;  %v9796_v32 = vpack.i.bf16 %v9274_v21, %v9269_v14 }
 0x13a   : > { %v9752_v30 = vpop.permute.xlu0 %1226  ;;  %14151 = vst [vmem:[#allocation85_spill] sm:$0xff] %v9768_v24 }
 0x13b   : > { %14154 = vst [vmem:[#allocation88_spill] sm:$0xff] %v9796_v32 }
 0x13c   : > { %v9758_v5 = vpop.permute.xlu1 %3478  ;;  %1408 = vrot.lane.b32.xlu1 %v1273_v22, %s8929_s21 }
 0x13d   : > { %1406 = vrot.lane.b32.xlu0 %v1272_v11, %s8929_s21  ;;  %v1275_v11 = vmul.f32 %v9172_v33, %v9580_v61 }
 0x13e   : > { %v9763_v17 = vpop.permute.xlu0 %3476 }
 0x140   : > { %v9772_v56 = vpop.permute.xlu1 %3480  ;;  %1410 = vrot.lane.b32.xlu1 %v1274_v12, %s8929_s21  ;;  %v9791_v12 = vpack.i.bf16 %v9264_v0, %v9260_v54 }
 0x141   : > { %8500 = vrot.lane.b32.xlu0 %v9768_v24, %s8929_s21 }
 0x142   : > { %14153 = vst [vmem:[#allocation87_spill] sm:$0xff] %v9791_v12 }
 0x143   : > { %v9781_v22 = vpop.permute.xlu0 %1230 }
 0x144   : > { %8505 = vrot.lane.b32.xlu1 %v9777_v1, %s8929_s21  ;;  %v1277_v1 = vmul.f32 %v9166_v29, %v9577_v48 }
 0x145   : > { %1412 = vrot.lane.b32.xlu0 %v1275_v11, %s8929_s21  ;;  %v1276_v11 = vmul.f32 %v9164_v25, %v9577_v48  ;;  %v14159_v48 = vld [vmem:[#allocation73_spill] sm:$0xff] }
 0x146   : > { %v9785_v8 = vpop.permute.xlu1 %3482 }
 0x148   : > { %8515 = vrot.lane.b32.xlu1 %v9791_v12, %s8929_s21  ;;  %v1283_v12 = vmul.f32 %v9193_v20, %v9594_v15  ;;  %v14161_v20 = vld [vmem:[#allocation41_spill] sm:$0xff] }
 0x149   : > { %v9798_v24 = vpop.permute.xlu0 %1232  ;;  %8510 = vrot.lane.b32.xlu0 %v9796_v32, %s8929_s21  ;;  %v1282_v32 = vmul.f32 %v9190_v7, %v9594_v15  ;;  %v14164_v15 = vld [vmem:[#allocation43_spill] sm:$0xff] }
 0x14b   : > { %v9802_v61 = vpop.permute.xlu1 %3486 }
 0x14c   : > { %14155 = vst [vmem:[#allocation89_spill] sm:$0xff] %v9802_v61  ;;  %1416 = vrot.lane.b32.xlu1 %v1277_v1, %s8929_s21  ;;  %v1285_v1 = vmul.f32 %v9183_v50, %v14159_v48 }
 0x14d   : > { %v9808_v33 = vpop.permute.xlu0 %3484  ;;  %1414 = vrot.lane.b32.xlu0 %v1276_v11, %s8929_s21  ;;  %v1284_v11 = vmul.f32 %v9181_v49, %v14159_v48  ;;  %v1279_v49 = vmul.f32 %v9213_v42, %v9608_v36 }
 0x14f   : > { %v9813_v9 = vpop.permute.xlu1 %3490 }
 0x150   : > { %14156 = vst [vmem:[#allocation90_spill] sm:$0xff] %v9813_v9  ;;  %1428 = vrot.lane.b32.xlu1 %v1283_v12, %s8929_s21  ;;  %v14165_v12 = vld [vmem:[#allocation44_spill] sm:$0xff] }
 0x151   : > { %v9818_v61 = vpop.permute.xlu0 %3488  ;;  %1426 = vrot.lane.b32.xlu0 %v1282_v32, %s8929_s21 }
 0x152   : > { %14157 = vst [vmem:[#allocation91_spill] sm:$0xff] %v9818_v61  ;;  %v14162_v61 = vld [vmem:[#allocation42_spill] sm:$0xff] }
 0x153   : > { %v9823_v29 = vpop.permute.xlu1 %3494  ;;  %v9835_v25 = vpack.i.bf16 %v14162_v61, %v14161_v20 }
 0x154   : > { %14158 = vst [vmem:[#allocation92_spill] sm:$0xff] %v9823_v29  ;;  %1432 = vrot.lane.b32.xlu1 %v1285_v1, %s8929_s21  ;;  %v9840_v29 = vpack.i.bf16 %v14165_v12, %v14164_v15 }
 0x155   : > { %v9830_v9 = vpop.permute.xlu0 %3492  ;;  %14163 = vst [vmem:[#allocation93_spill] sm:$0xff] %v9835_v25  ;;  %1430 = vrot.lane.b32.xlu0 %v1284_v11, %s8929_s21  ;;  %v1278_v11 = vmul.f32 %v9208_v37, %v9608_v36 }
 0x156   : > { %14160 = vst [vmem:[#allocation73_spill] sm:$0xff] %v9830_v9  ;;  %14166 = vst [vmem:[#allocation94_spill] sm:$0xff] %v9840_v29 }
 0x157   : > { %v9842_v32 = vpop.permute.xlu1 %3498 }
 0x158   : > { %14167 = vst [vmem:[#allocation95_spill] sm:$0xff] %v9842_v32  ;;  %8525 = vrot.lane.b32.xlu1 %v9835_v25, %s8929_s21  ;;  %v1287_v25 = vmul.f32 %v9204_v31, %v9599_v55 }
 0x159   : > { %8520 = vrot.lane.b32.xlu0 %v9840_v29, %s8929_s21  ;;  %v14172_v29 = vld [vmem:[#allocation45_spill] sm:$0xff] }
 0x15a   : > { %v9846_v48 = vpop.permute.xlu0 %3496 }
 0x15b   : > { %14168 = vst [vmem:[#allocation96_spill] sm:$0xff] %v9846_v48  ;;  %v14173_v48 = vld [vmem:[#allocation46_spill] sm:$0xff] }
 0x15c   : > { %v9850_v1 = vpop.permute.xlu1 %3502  ;;  %1420 = vrot.lane.b32.xlu1 %v1279_v49, %s8929_s21  ;;  %v9869_v7 = vpack.i.bf16 %v14173_v48, %v14172_v29  ;;  %v14176_v49 = vld [vmem:[#allocation47_spill] sm:$0xff] }
 0x15d   : > { %14169 = vst [vmem:[#allocation97_spill] sm:$0xff] %v9850_v1  ;;  %1418 = vrot.lane.b32.xlu0 %v1278_v11, %s8929_s21  ;;  %v1286_v1 = vmul.f32 %v9200_v26, %v9599_v55  ;;  %v14177_v11 = vld [vmem:[#allocation48_spill] sm:$0xff]  ;;  %v1281_v55 = vmul.f32 %v14149_v10, %v9622_v13 }
 0x15e   : > { %v9857_v50 = vpop.permute.xlu0 %3500  ;;  %14174 = vst [vmem:[#allocation100_spill] sm:$0xff] %v9869_v7  ;;  %v14197_v26 = vld [vmem:[#allocation56_spill] sm:$0xff] }
 0x15f   : > { %14170 = vst [vmem:[#allocation98_spill] sm:$0xff] %v9857_v50  ;;  %v9876_v50 = vpack.i.bf16 %v14177_v11, %v14176_v49 }
 0x160   : > { %v9862_v32 = vpop.permute.xlu1 %3510  ;;  %1436 = vrot.lane.b32.xlu1 %v1287_v25, %s8929_s21 }
 0x161   : > { %14171 = vst [vmem:[#allocation99_spill] sm:$0xff] %v9862_v32  ;;  %1434 = vrot.lane.b32.xlu0 %v1286_v1, %s8929_s21  ;;  %14178 = vst [vmem:[#allocation102_spill] sm:$0xff] %v9876_v50  ;;  %v1280_v1 = vmul.f32 %v9226_v57, %v9622_v13  ;;  %v14184_v13 = vld [vmem:[#allocation51_spill] sm:$0xff] }
 0x163   : > { %v9871_v36 = vpop.permute.xlu0 %3508 }
 0x164   : > { %14175 = vst [vmem:[#allocation101_spill] sm:$0xff] %v9871_v36  ;;  %8535 = vrot.lane.b32.xlu1 %v9869_v7, %s8929_s21  ;;  %v1289_v36 = vmul.f32 %v9224_v53, %v9613_v28  ;;  %v14189_v53 = vld [vmem:[#allocation50_spill] sm:$0xff] }
 0x165   : > { %v9878_v31 = vpop.permute.xlu1 %3512  ;;  %8530 = vrot.lane.b32.xlu0 %v9876_v50, %s8929_s21 }
 0x166   : > { %14179 = vst [vmem:[#allocation103_spill] sm:$0xff] %v9878_v31 }
 0x167   : > { %v9884_v25 = vpop.permute.xlu0 %3504 }
 0x168   : > { %14180 = vst [vmem:[#allocation104_spill] sm:$0xff] %v9884_v25  ;;  %1424 = vrot.lane.b32.xlu1 %v1281_v55, %s8929_s21  ;;  %v1288_v25 = vmul.f32 %v9222_v52, %v9613_v28  ;;  %v1290_v55 = vmul.f32 %v9248_v27, %v9628_v47  ;;  %v14194_v27 = vld [vmem:[#allocation54_spill] sm:$0xff]  ;;  %v14196_v52 = vld [vmem:[#allocation55_spill] sm:$0xff] }
 0x169   : > { %v9890_v32 = vpop.permute.xlu1 %3514  ;;  %1422 = vrot.lane.b32.xlu0 %v1280_v1, %s8929_s21 }
 0x16a   : > { %14181 = vst [vmem:[#allocation105_spill] sm:$0xff] %v9890_v32  ;;  %v14185_v32 = vld [vmem:[#allocation52_spill] sm:$0xff] }
 0x16b   : > { %v9894_v31 = vpop.permute.xlu0 %3506  ;;  %v9906_v7 = vpack.i.bf16 %v14185_v32, %v14184_v13 }
 0x16c   : > { %14182 = vst [vmem:[#allocation106_spill] sm:$0xff] %v9894_v31  ;;  %1440 = vrot.lane.b32.xlu1 %v1289_v36, %s8929_s21  ;;  %v14188_v31 = vld [vmem:[#allocation49_spill] sm:$0xff] }
 0x16d   : > { %1438 = vrot.lane.b32.xlu0 %v1288_v25, %s8929_s21  ;;  %14186 = vst [vmem:[#allocation108_spill] sm:$0xff] %v9906_v7  ;;  %v9915_v28 = vpack.i.bf16 %v14189_v53, %v14188_v31  ;;  %v1291_v25 = vmul.f32 %v9254_v40, %v9628_v47  ;;  %v1293_v47 = vmul.f32 %v9244_v23, %v9625_v60 }
 0x16e   : > { %v9900_v50 = vpop.permute.xlu1 %3518 }
 0x16f   : > { %14183 = vst [vmem:[#allocation107_spill] sm:$0xff] %v9900_v50  ;;  %14190 = vst [vmem:[#allocation110_spill] sm:$0xff] %v9915_v28 }
 0x170   : > { %v9910_v1 = vpop.permute.xlu0 %3516  ;;  %1442 = vrot.lane.b32.xlu1 %v1290_v55, %s8929_s21 }
 0x171   : > { %14187 = vst [vmem:[#allocation109_spill] sm:$0xff] %v9910_v1  ;;  %8540 = vrot.lane.b32.xlu0 %v9906_v7, %s8929_s21  ;;  %v14193_v1 = vld [vmem:[#allocation53_spill] sm:$0xff] }
 0x172   : > { %v9917_v50 = vpop.permute.xlu1 %3526  ;;  %v9929_v55 = vpack.i.bf16 %v14194_v27, %v14193_v1 }
 0x173   : > { %14191 = vst [vmem:[#allocation111_spill] sm:$0xff] %v9917_v50  ;;  %v9934_v50 = vpack.i.bf16 %v14197_v26, %v14196_v52 }
 0x174   : > { %v9921_v36 = vpop.permute.xlu0 %3524  ;;  %8545 = vrot.lane.b32.xlu1 %v9915_v28, %s8929_s21  ;;  %14195 = vst [vmem:[#allocation113_spill] sm:$0xff] %v9929_v55 }
 0x175   : > { %14192 = vst [vmem:[#allocation112_spill] sm:$0xff] %v9921_v36  ;;  %1444 = vrot.lane.b32.xlu0 %v1291_v25, %s8929_s21  ;;  %14198 = vst [vmem:[#allocation114_spill] sm:$0xff] %v9934_v50  ;;  %v1292_v25 = vmul.f32 %v9242_v16, %v9625_v60  ;;  %v1301_v60 = vmul.f32 %v9264_v0, %v9631_v35 }
 0x177   : > { %v9936_v9 = vpop.permute.xlu1 %3528 }
 0x178   : > { %14199 = vst [vmem:[#allocation115_spill] sm:$0xff] %v9936_v9  ;;  %8555 = vrot.lane.b32.xlu1 %v9929_v55, %s8929_s21 }
 0x179   : > { %v9938_v7 = vpop.permute.xlu0 %3520  ;;  %8550 = vrot.lane.b32.xlu0 %v9934_v50, %s8929_s21  ;;  %v1298_v50 = vmul.f32 %v9269_v14, %v9634_v4 }
 0x17a   : > { %14200 = vst [vmem:[#allocation116_spill] sm:$0xff] %v9938_v7  ;;  %v1299_v7 = vmul.f32 %v9274_v21, %v9634_v4 }
 0x17c   : > { %1448 = vrot.lane.b32.xlu1 %v1293_v47, %s8929_s21 }
 0x17d   : > { %v9949_v36 = vpop.permute.xlu1 %3530  ;;  %1446 = vrot.lane.b32.xlu0 %v1292_v25, %s8929_s21  ;;  %v1300_v25 = vmul.f32 %v9260_v54, %v9631_v35  ;;  %v1295_v35 = vmul.f32 %v14165_v12, %v9648_v34 }
 0x17e   : > { %14201 = vst [vmem:[#allocation117_spill] sm:$0xff] %v9949_v36  ;;  %v9952_v9 = vpop.permute.xlu0 %3522  ;;  %v14205_v36 = vld [vmem:[#allocation57_spill] sm:$0xff] }
 0x17f   : > { %14202 = vst [vmem:[#allocation118_spill] sm:$0xff] %v9952_v9  ;;  %v14206_v9 = vld [vmem:[#allocation58_spill] sm:$0xff] }
 0x180   : > { %1460 = vrot.lane.b32.xlu1 %v1299_v7, %s8929_s21  ;;  %v9971_v28 = vpack.i.bf16 %v14206_v9, %v14205_v36  ;;  %v14208_v7 = vld [vmem:[#allocation59_spill] sm:$0xff] }
 0x181   : > { %1458 = vrot.lane.b32.xlu0 %v1298_v50, %s8929_s21  ;;  %v14209_v50 = vld [vmem:[#allocation60_spill] sm:$0xff] }
 0x182   : > { %v9960_v55 = vpop.permute.xlu1 %3534  ;;  %14207 = vst [vmem:[#allocation121_spill] sm:$0xff] %v9971_v28  ;;  %v9976_v4 = vpack.i.bf16 %v14209_v50, %v14208_v7 }
 0x183   : > { %14203 = vst [vmem:[#allocation119_spill] sm:$0xff] %v9960_v55  ;;  %v9964_v47 = vpop.permute.xlu0 %3532 }
 0x184   : > { %14204 = vst [vmem:[#allocation120_spill] sm:$0xff] %v9964_v47  ;;  %1464 = vrot.lane.b32.xlu1 %v1301_v60, %s8929_s21  ;;  %14210 = vst [vmem:[#allocation122_spill] sm:$0xff] %v9976_v4 }
 0x185   : > { %1462 = vrot.lane.b32.xlu0 %v1300_v25, %s8929_s21  ;;  %v1294_v25 = vmul.f32 %v14164_v15, %v9648_v34  ;;  %v14218_v34 = vld [vmem:[#allocation62_spill] sm:$0xff] }
 0x186   : > { %v9978_v55 = vpop.permute.xlu1 %3538 }
 0x187   : > { %14211 = vst [vmem:[#allocation123_spill] sm:$0xff] %v9978_v55  ;;  %v9980_v0 = vpop.permute.xlu0 %3536  ;;  %v1303_v55 = vmul.f32 %v14162_v61, %v9641_v38 }
 0x188   : > { %14212 = vst [vmem:[#allocation124_spill] sm:$0xff] %v9980_v0  ;;  %8565 = vrot.lane.b32.xlu1 %v9971_v28, %s8929_s21 }
 0x189   : > { %8560 = vrot.lane.b32.xlu0 %v9976_v4, %s8929_s21  ;;  %v1302_v4 = vmul.f32 %v14161_v20, %v9641_v38  ;;  %v1297_v38 = vmul.f32 %v14177_v11, %v9676_v51 }
 0x18a   : > { %v9988_v60 = vpop.permute.xlu1 %8445 }
 0x18b   : > { %14213 = vst [vmem:[#allocation125_spill] sm:$0xff] %v9988_v60  ;;  %v9992_v47 = vpop.permute.xlu0 %8440  ;;  %v14217_v60 = vld [vmem:[#allocation61_spill] sm:$0xff] }
 0x18c   : > { %14214 = vst [vmem:[#allocation126_spill] sm:$0xff] %v9992_v47  ;;  %1452 = vrot.lane.b32.xlu1 %v1295_v35, %s8929_s21  ;;  %v10007_v12 = vpack.i.bf16 %v14218_v34, %v14217_v60  ;;  %v14220_v35 = vld [vmem:[#allocation63_spill] sm:$0xff] }
 0x18d   : > { %1450 = vrot.lane.b32.xlu0 %v1294_v25, %s8929_s21  ;;  %v14221_v25 = vld [vmem:[#allocation64_spill] sm:$0xff] }
 0x18e   : > { %v9998_v0 = vpop.permute.xlu1 %8455  ;;  %14219 = vst [vmem:[#allocation129_spill] sm:$0xff] %v10007_v12  ;;  %v10012_v47 = vpack.i.bf16 %v14221_v25, %v14220_v35 }
 0x18f   : > { %14215 = vst [vmem:[#allocation127_spill] sm:$0xff] %v9998_v0  ;;  %v10002_v28 = vpop.permute.xlu0 %8450 }
 0x190   : > { %14216 = vst [vmem:[#allocation128_spill] sm:$0xff] %v10002_v28  ;;  %1468 = vrot.lane.b32.xlu1 %v1303_v55, %s8929_s21  ;;  %14222 = vst [vmem:[#allocation130_spill] sm:$0xff] %v10012_v47 }
 0x191   : > { %1466 = vrot.lane.b32.xlu0 %v1302_v4, %s8929_s21  ;;  %v1296_v4 = vmul.f32 %v14176_v49, %v9676_v51  ;;  %v10044_v51 = vpack.i.bf16 %v9413_v46, %v9411_v19 }
 0x192   : > { %v10014_v61 = vpop.permute.xlu1 %8465 }
 0x193   : > { %14223 = vst [vmem:[#allocation131_spill] sm:$0xff] %v10014_v61  ;;  %v10016_v0 = vpop.permute.xlu0 %8460  ;;  %v1305_v61 = vmul.f32 %v14173_v48, %v9662_v6 }
 0x194   : > { %14224 = vst [vmem:[#allocation132_spill] sm:$0xff] %v10016_v0  ;;  %8575 = vrot.lane.b32.xlu1 %v10007_v12, %s8929_s21 }
 0x195   : > { %8570 = vrot.lane.b32.xlu0 %v10012_v47, %s8929_s21  ;;  %v1304_v47 = vmul.f32 %v14172_v29, %v9662_v6  ;;  %v10055_v6 = vpack.i.bf16 %v9404_v63, %v14132_v39 }
 0x196   : > { %v10024_v55 = vpop.permute.xlu1 %8475 }
 0x197   : > { %14225 = vst [vmem:[#allocation133_spill] sm:$0xff] %v10024_v55  ;;  %v10028_v28 = vpop.permute.xlu0 %8470 }
 0x198   : > { %14226 = vst [vmem:[#allocation134_spill] sm:$0xff] %v10028_v28  ;;  %1456 = vrot.lane.b32.xlu1 %v1297_v38, %s8929_s21  ;;  %v1306_v38 = vmul.f32 %v14184_v13, %v9692_v3  ;;  %v1319_v28 = vmul.f32 %v14206_v9, %v9710_v45 }
 0x199   : > { %1454 = vrot.lane.b32.xlu0 %v1296_v4, %s8929_s21 }
 0x19a   : > { %v10034_v0 = vpop.permute.xlu1 %1396 }
 0x19b   : > { %14227 = vst [vmem:[#allocation135_spill] sm:$0xff] %v10034_v0  ;;  %v10038_v12 = vpop.permute.xlu0 %1394 }
 0x19c   : > { %14228 = vst [vmem:[#allocation136_spill] sm:$0xff] %v10038_v12  ;;  %1472 = vrot.lane.b32.xlu1 %v1305_v61, %s8929_s21 }
 0x19d   : > { %1470 = vrot.lane.b32.xlu0 %v1304_v47, %s8929_s21  ;;  %v1307_v47 = vmul.f32 %v14185_v32, %v9692_v3  ;;  %v1315_v3 = vmul.f32 %v14197_v26, %v9704_v41 }
 0x19e   : > { %v10048_v4 = vpop.permute.xlu1 %1400 }
 0x19f   : > { %14229 = vst [vmem:[#allocation137_spill] sm:$0xff] %v10048_v4  ;;  %v10050_v55 = vpop.permute.xlu0 %1398 }
 0x1a0   : > { %14230 = vst [vmem:[#allocation138_spill] sm:$0xff] %v10050_v55  ;;  %1474 = vrot.lane.b32.xlu1 %v1306_v38, %s8929_s21  ;;  %v1309_v38 = vmul.f32 %v14189_v53, %v9678_v58  ;;  %v1308_v55 = vmul.f32 %v14188_v31, %v9678_v58  ;;  %v1317_v58 = vmul.f32 %v14194_v27, %v9698_v62 }
 0x1a1   : > { %8580 = vrot.lane.b32.xlu0 %v10044_v51, %s8929_s21 }
 0x1a2   : > { %v10059_v61 = vpop.permute.xlu1 %8485 }
 0x1a3   : > { %14231 = vst [vmem:[#allocation139_spill] sm:$0xff] %v10059_v61  ;;  %v10063_v0 = vpop.permute.xlu0 %8480 }
 0x1a4   : > { %14232 = vst [vmem:[#allocation140_spill] sm:$0xff] %v10063_v0  ;;  %8585 = vrot.lane.b32.xlu1 %v10055_v6, %s8929_s21 }
 0x1a5   : > { %1476 = vrot.lane.b32.xlu0 %v1307_v47, %s8929_s21  ;;  %v1314_v47 = vmul.f32 %v14196_v52, %v9704_v41  ;;  %v14239_v41 = vld [vmem:[#allocation69_spill] sm:$0xff] }
 0x1a6   : > { %v10070_v4 = vpop.permute.xlu1 %1404 }
 0x1a7   : > { %14233 = vst [vmem:[#allocation141_spill] sm:$0xff] %v10070_v4  ;;  %v10074_v12 = vpop.permute.xlu0 %1402 }
 0x1a8   : > { %14234 = vst [vmem:[#allocation142_spill] sm:$0xff] %v10074_v12  ;;  %1480 = vrot.lane.b32.xlu1 %v1309_v38, %s8929_s21 }
 0x1a9   : > { %1478 = vrot.lane.b32.xlu0 %v1308_v55, %s8929_s21  ;;  %v1316_v55 = vmul.f32 %v14193_v1, %v9698_v62  ;;  %v1318_v62 = vmul.f32 %v14205_v36, %v9710_v45  ;;  %v1321_v45 = vmul.f32 %v14218_v34, %v9726_v44 }
 0x1aa   : > { %v10080_v61 = vpop.permute.xlu1 %8495 }
 0x1ab   : > { %14235 = vst [vmem:[#allocation143_spill] sm:$0xff] %v10080_v61  ;;  %v10084_v0 = vpop.permute.xlu0 %8490  ;;  %v14240_v61 = vld [vmem:[#allocation70_spill] sm:$0xff] }
 0x1ac   : > { %14236 = vst [vmem:[#allocation144_spill] sm:$0xff] %v10084_v0  ;;  %1492 = vrot.lane.b32.xlu1 %v1315_v3, %s8929_s21  ;;  %v10100_v12 = vpack.i.bf16 %v14240_v61, %v14239_v41  ;;  %v1310_v3 = vmul.f32 %v14208_v7, %v9724_v43 }
 0x1ad   : > { %1490 = vrot.lane.b32.xlu0 %v1314_v47, %s8929_s21 }
 0x1ae   : > { %v10090_v38 = vpop.permute.xlu1 %1408  ;;  %14241 = vst [vmem:[#allocation147_spill] sm:$0xff] %v10100_v12 }
 0x1af   : > { %14237 = vst [vmem:[#allocation145_spill] sm:$0xff] %v10090_v38  ;;  %v10094_v4 = vpop.permute.xlu0 %1406 }
 0x1b0   : > { %14238 = vst [vmem:[#allocation146_spill] sm:$0xff] %v10094_v4  ;;  %1496 = vrot.lane.b32.xlu1 %v1317_v58, %s8929_s21  ;;  %v14246_v4 = vld [vmem:[#allocation72_spill] sm:$0xff] }
 0x1b1   : > { %1494 = vrot.lane.b32.xlu0 %v1316_v55, %s8929_s21  ;;  %v1311_v55 = vmul.f32 %v14209_v50, %v9724_v43  ;;  %v1313_v43 = vmul.f32 %v14221_v25, %v9736_v2 }
 0x1b2   : > { %v10104_v47 = vpop.permute.xlu1 %1410 }
 0x1b3   : > { %14242 = vst [vmem:[#allocation148_spill] sm:$0xff] %v10104_v47  ;;  %v10106_v0 = vpop.permute.xlu0 %8500  ;;  %v14245_v47 = vld [vmem:[#allocation71_spill] sm:$0xff] }
 0x1b4   : > { %14243 = vst [vmem:[#allocation149_spill] sm:$0xff] %v10106_v0  ;;  %1482 = vrot.lane.b32.xlu1 %v1310_v3, %s8929_s21  ;;  %v10122_v0 = vpack.i.bf16 %v14246_v4, %v14245_v47 }
 0x1b5   : > { %8590 = vrot.lane.b32.xlu0 %v10100_v12, %s8929_s21 }
 0x1b6   : > { %v10113_v58 = vpop.permute.xlu1 %8505 }
 0x1b7   : > { %v10117_v38 = vpop.permute.xlu0 %1412 }
 0x1b8   : > { %14244 = vst [vmem:[#allocation150_spill] sm:$0xff] %v10117_v38  ;;  %1498 = vrot.lane.b32.xlu1 %v1318_v62, %s8929_s21 }
 0x1b9   : > { %1484 = vrot.lane.b32.xlu0 %v1311_v55, %s8929_s21  ;;  %v1312_v55 = vmul.f32 %v14220_v35, %v9736_v2 }
 0x1ba   : > { %v10125_v3 = vpop.permute.xlu1 %8515 }
 0x1bb   : > { %14247 = vst [vmem:[#allocation151_spill] sm:$0xff] %v10125_v3  ;;  %v10129_v12 = vpop.permute.xlu0 %8510 }
 0x1bc   : > { %14248 = vst [vmem:[#allocation152_spill] sm:$0xff] %v10129_v12  ;;  %8595 = vrot.lane.b32.xlu1 %v10122_v0, %s8929_s21 }
 0x1bd   : > { %1500 = vrot.lane.b32.xlu0 %v1319_v28, %s8929_s21  ;;  %v1320_v28 = vmul.f32 %v14217_v60, %v9726_v44  ;;  %v1323_v44 = vmul.f32 %v9413_v46, %v9752_v30 }
 0x1be   : > { %v10136_v62 = vpop.permute.xlu1 %1416 }
 0x1bf   : > { %14249 = vst [vmem:[#allocation153_spill] sm:$0xff] %v10136_v62  ;;  %v10140_v38 = vpop.permute.xlu0 %1414 }
 0x1c0   : > { %1488 = vrot.lane.b32.xlu1 %v1313_v43, %s8929_s21  ;;  %v14253_v43 = vld [vmem:[#allocation74_spill] sm:$0xff] }
 0x1c1   : > { %1486 = vrot.lane.b32.xlu0 %v1312_v55, %s8929_s21 }
 0x1c2   : > { %v10146_v3 = vpop.permute.xlu1 %1428 }
 0x1c3   : > { %14250 = vst [vmem:[#allocation154_spill] sm:$0xff] %v10146_v3  ;;  %v10150_v12 = vpop.permute.xlu0 %1426 }
 0x1c4   : > { %1504 = vrot.lane.b32.xlu1 %v1321_v45, %s8929_s21  ;;  %v1322_v45 = vmul.f32 %v9411_v19, %v9752_v30  ;;  %v1325_v30 = vmul.f32 %v9404_v63, %v9748_v59 }
 0x1c5   : > { %1502 = vrot.lane.b32.xlu0 %v1320_v28, %s8929_s21 }
 0x1c6   : > { %v10154_v2 = vpop.permute.xlu1 %1432 }
 0x1c7   : > { %14251 = vst [vmem:[#allocation155_spill] sm:$0xff] %v10154_v2  ;;  %v10156_v62 = vpop.permute.xlu0 %1430 }
 0x1c8   : > { %14252 = vst [vmem:[#allocation156_spill] sm:$0xff] %v10156_v62  ;;  %8605 = vrot.lane.b32.xlu1 %v9639_v18, %s8930_s22  ;;  %v1324_v18 = vmul.f32 %v14132_v39, %v9748_v59  ;;  %v14264_v59 = vld [vmem:[#allocation16_spill] sm:$0xff] }
 0x1c9   : > { %8600 = vrot.lane.b32.xlu0 %v14253_v43, %s8930_s22 }
 0x1ca   : > { %v10164_v55 = vpop.permute.xlu1 %8525 }
 0x1cb   : > { %14254 = vst [vmem:[#allocation74_spill] sm:$0xff] %v10164_v55  ;;  %v10168_v28 = vpop.permute.xlu0 %8520  ;;  %v14258_v55 = vld [vmem:[#allocation76_spill] sm:$0xff] }
 0x1cc   : > { %14255 = vst [vmem:[#allocation157_spill] sm:$0xff] %v10168_v28  ;;  %1508 = vrot.lane.b32.xlu1 %v1323_v44, %s8929_s21 }
 0x1cd   : > { %1506 = vrot.lane.b32.xlu0 %v1322_v45, %s8929_s21  ;;  %v14261_v45 = vld [vmem:[#allocation75_spill] sm:$0xff] }
 0x1ce   : > { %v10174_v2 = vpop.permute.xlu1 %1420 }
 0x1cf   : > { %14256 = vst [vmem:[#allocation158_spill] sm:$0xff] %v10174_v2  ;;  %v10176_v43 = vpop.permute.xlu0 %1418  ;;  %v14262_v2 = vld [vmem:[#allocation12_spill] sm:$0xff] }
 0x1d0   : > { %14257 = vst [vmem:[#allocation159_spill] sm:$0xff] %v10176_v43  ;;  %1510 = vrot.lane.b32.xlu1 %v1324_v18, %s8929_s21  ;;  %v3573_v43 = vmul.f32 %v14262_v2, %v9763_v17  ;;  %v14263_v18 = vld [vmem:[#allocation11_spill] sm:$0xff] }
 0x1d1   : > { %8610 = vrot.lane.b32.xlu0 %v14258_v55, %s8930_s22  ;;  %v3572_v55 = vmul.f32 %v14263_v18, %v9763_v17  ;;  %v1327_v17 = vmul.f32 %v14240_v61, %v9781_v22  ;;  %v14270_v18 = vld [vmem:[#allocation78_spill] sm:$0xff] }
 0x1d2   : > { %v10181_v62 = vpop.permute.xlu1 %1436 }
 0x1d3   : > { %14259 = vst [vmem:[#allocation76_spill] sm:$0xff] %v10181_v62  ;;  %v10185_v44 = vpop.permute.xlu0 %1434  ;;  %v3575_v62 = vmul.f32 %v14264_v59, %v9758_v5 }
 0x1d4   : > { %14260 = vst [vmem:[#allocation160_spill] sm:$0xff] %v10185_v44  ;;  %8615 = vrot.lane.b32.xlu1 %v14261_v45, %s8930_s22 }
 0x1d5   : > { %1512 = vrot.lane.b32.xlu0 %v1325_v30, %s8929_s21  ;;  %v14265_v30 = vld [vmem:[#allocation15_spill] sm:$0xff] }
 0x1d6   : > { %v10192_v3 = vpop.permute.xlu1 %8535  ;;  %v3574_v44 = vmul.f32 %v14265_v30, %v9758_v5  ;;  %v14268_v5 = vld [vmem:[#allocation9_spill] sm:$0xff] }
 0x1d7   : > { %v10196_v28 = vpop.permute.xlu0 %8530  ;;  %v3576_v30 = vmul.f32 %v14268_v5, %v9772_v56 }
 0x1d8   : > { %3702 = vrot.lane.b32.xlu1 %v3573_v43, %s8930_s22 }
 0x1d9   : > { %3700 = vrot.lane.b32.xlu0 %v3572_v55, %s8930_s22  ;;  %v1326_v55 = vmul.f32 %v14239_v41, %v9781_v22  ;;  %v1328_v22 = vmul.f32 %v14245_v47, %v9798_v24 }
 0x1da   : > { %v10202_v45 = vpop.permute.xlu1 %1424 }
 0x1db   : > { %v10206_v2 = vpop.permute.xlu0 %1422 }
 0x1dc   : > { %3706 = vrot.lane.b32.xlu1 %v3575_v62, %s8930_s22 }
 0x1dd   : > { %3704 = vrot.lane.b32.xlu0 %v3574_v44, %s8930_s22 }
 0x1de   : > { %v10212_v43 = vpop.permute.xlu1 %1440 }
 0x1df   : > { %14266 = vst [vmem:[#allocation75_spill] sm:$0xff] %v10212_v43  ;;  %v10216_v59 = vpop.permute.xlu0 %1438 }
 0x1e0   : > { %14267 = vst [vmem:[#allocation161_spill] sm:$0xff] %v10216_v59  ;;  %1516 = vrot.lane.b32.xlu1 %v1327_v17, %s8929_s21  ;;  %v14272_v17 = vld [vmem:[#allocation10_spill] sm:$0xff] }
 0x1e1   : > { %1514 = vrot.lane.b32.xlu0 %v1326_v55, %s8929_s21  ;;  %v3577_v55 = vmul.f32 %v14272_v17, %v9772_v56  ;;  %v14277_v56 = vld [vmem:[#allocation14_spill] sm:$0xff] }
 0x1e2   : > { %v10222_v62 = vpop.permute.xlu1 %1442  ;;  %v3579_v17 = vmul.f32 %v14277_v56, %v9785_v8  ;;  %v14284_v56 = vld [vmem:[#allocation82_spill] sm:$0xff] }
 0x1e3   : > { %14269 = vst [vmem:[#allocation162_spill] sm:$0xff] %v10222_v62  ;;  %v10224_v44 = vpop.permute.xlu0 %8540  ;;  %v14276_v62 = vld [vmem:[#allocation77_spill] sm:$0xff] }
 0x1e4   : > { %3708 = vrot.lane.b32.xlu1 %v3576_v30, %s8930_s22  ;;  %v1329_v30 = vmul.f32 %v14246_v4, %v9798_v24  ;;  %v14281_v24 = vld [vmem:[#allocation19_spill] sm:$0xff] }
 0x1e5   : > { %8620 = vrot.lane.b32.xlu0 %v14270_v18, %s8930_s22 }
 0x1e6   : > { %v10231_v43 = vpop.permute.xlu1 %8545 }
 0x1e7   : > { %14271 = vst [vmem:[#allocation78_spill] sm:$0xff] %v10231_v43  ;;  %v10235_v59 = vpop.permute.xlu0 %1444 }
 0x1e8   : > { %14273 = vst [vmem:[#allocation163_spill] sm:$0xff] %v10235_v59  ;;  %1518 = vrot.lane.b32.xlu1 %v1328_v22, %s8929_s21  ;;  %v14279_v22 = vld [vmem:[#allocation13_spill] sm:$0xff] }
 0x1e9   : > { %3710 = vrot.lane.b32.xlu0 %v3577_v55, %s8930_s22  ;;  %v3578_v55 = vmul.f32 %v14279_v22, %v9785_v8  ;;  %v14285_v8 = vld [vmem:[#allocation20_spill] sm:$0xff] }
 0x1ea   : > { %v10239_v5 = vpop.permute.xlu1 %8555  ;;  %v3581_v22 = vmul.f32 %v14285_v8, %v9808_v33 }
 0x1eb   : > { %14274 = vst [vmem:[#allocation164_spill] sm:$0xff] %v10239_v5  ;;  %v10243_v18 = vpop.permute.xlu0 %8550  ;;  %v3580_v5 = vmul.f32 %v14281_v24, %v9808_v33  ;;  %v14287_v24 = vld [vmem:[#allocation89_spill] sm:$0xff]  ;;  %v14290_v33 = vld [vmem:[#allocation91_spill] sm:$0xff] }
 0x1ec   : > { %14275 = vst [vmem:[#allocation165_spill] sm:$0xff] %v10243_v18  ;;  %8625 = vrot.lane.b32.xlu1 %v14276_v62, %s8930_s22  ;;  %v3585_v8 = vmul.f32 %v9213_v42, %v14290_v33 }
 0x1ed   : > { %1520 = vrot.lane.b32.xlu0 %v1329_v30, %s8929_s21 }
 0x1ee   : > { %v10250_v59 = vpop.permute.xlu1 %1448 }
 0x1ef   : > { %14278 = vst [vmem:[#allocation77_spill] sm:$0xff] %v10250_v59  ;;  %v10254_v43 = vpop.permute.xlu0 %1446 }
 0x1f0   : > { %14280 = vst [vmem:[#allocation166_spill] sm:$0xff] %v10254_v43  ;;  %3714 = vrot.lane.b32.xlu1 %v3579_v17, %s8930_s22 }
 0x1f1   : > { %3712 = vrot.lane.b32.xlu0 %v3578_v55, %s8930_s22  ;;  %v14286_v55 = vld [vmem:[#allocation84_spill] sm:$0xff] }
 0x1f2   : > { %v10260_v62 = vpop.permute.xlu1 %1460 }
 0x1f3   : > { %14282 = vst [vmem:[#allocation167_spill] sm:$0xff] %v10260_v62  ;;  %v10262_v30 = vpop.permute.xlu0 %1458  ;;  %v14288_v62 = vld [vmem:[#allocation18_spill] sm:$0xff] }
 0x1f4   : > { %14283 = vst [vmem:[#allocation168_spill] sm:$0xff] %v10262_v30  ;;  %3716 = vrot.lane.b32.xlu1 %v3580_v5, %s8930_s22  ;;  %v3583_v30 = vmul.f32 %v14288_v62, %v14287_v24  ;;  %v14289_v5 = vld [vmem:[#allocation17_spill] sm:$0xff] }
 0x1f5   : > { %8630 = vrot.lane.b32.xlu0 %v14284_v56, %s8930_s22  ;;  %v3582_v56 = vmul.f32 %v14289_v5, %v14287_v24  ;;  %v14293_v24 = vld [vmem:[#allocation90_spill] sm:$0xff] }
 0x1f6   : > { %v10267_v59 = vpop.permute.xlu1 %1464  ;;  %v3587_v5 = vmul.f32 %v14149_v10, %v14293_v24 }
 0x1f7   : > { %v10271_v17 = vpop.permute.xlu0 %1462 }
 0x1f8   : > { %8635 = vrot.lane.b32.xlu1 %v14286_v55, %s8930_s22 }
 0x1f9   : > { %3718 = vrot.lane.b32.xlu0 %v3581_v22, %s8930_s22  ;;  %v3584_v22 = vmul.f32 %v9208_v37, %v14290_v33 }
 0x1fa   : > { %v10278_v43 = vpop.permute.xlu1 %8565 }
 0x1fb   : > { %v10282_v18 = vpop.permute.xlu0 %8560 }
 0x1fc   : > { %3722 = vrot.lane.b32.xlu1 %v3583_v30, %s8930_s22 }
 0x1fd   : > { %3720 = vrot.lane.b32.xlu0 %v3582_v56, %s8930_s22  ;;  %v3586_v56 = vmul.f32 %v9226_v57, %v14293_v24  ;;  %v14302_v24 = vld [vmem:[#allocation83_spill] sm:$0xff]  ;;  %v14305_v57 = vld [vmem:[#allocation24_spill] sm:$0xff] }
 0x1fe   : > { %v10288_v55 = vpop.permute.xlu1 %1452 }
 0x1ff   : > { %14291 = vst [vmem:[#allocation82_spill] sm:$0xff] %v10288_v55  ;;  %v10292_v62 = vpop.permute.xlu0 %1450 }
 0x200   : > { %14292 = vst [vmem:[#allocation84_spill] sm:$0xff] %v10292_v62  ;;  %3726 = vrot.lane.b32.xlu1 %v3585_v8, %s8930_s22  ;;  %v14298_v8 = vld [vmem:[#allocation79_spill] sm:$0xff] }
 0x201   : > { %3724 = vrot.lane.b32.xlu0 %v3584_v22, %s8930_s22  ;;  %v14299_v22 = vld [vmem:[#allocation80_spill] sm:$0xff] }
 0x202   : > { %v10298_v30 = vpop.permute.xlu1 %1468 }
 0x203   : > { %14294 = vst [vmem:[#allocation89_spill] sm:$0xff] %v10298_v30  ;;  %v10302_v42 = vpop.permute.xlu0 %1466 }
 0x204   : > { %14295 = vst [vmem:[#allocation91_spill] sm:$0xff] %v10302_v42  ;;  %3730 = vrot.lane.b32.xlu1 %v3587_v5, %s8930_s22  ;;  %v14303_v5 = vld [vmem:[#allocation81_spill] sm:$0xff] }
 0x205   : > { %3728 = vrot.lane.b32.xlu0 %v3586_v56, %s8930_s22  ;;  %v14304_v56 = vld [vmem:[#allocation73_spill] sm:$0xff] }
 0x206   : > { %v10306_v33 = vpop.permute.xlu1 %8575  ;;  %v3589_v42 = vmul.f32 %v14305_v57, %v14304_v56 }
 0x207   : > { %14296 = vst [vmem:[#allocation90_spill] sm:$0xff] %v10306_v33  ;;  %v10308_v37 = vpop.permute.xlu0 %8570 }
 0x208   : > { %14297 = vst [vmem:[#allocation169_spill] sm:$0xff] %v10308_v37  ;;  %8645 = vrot.lane.b32.xlu1 %v14298_v8, %s8930_s22  ;;  %v14307_v8 = vld [vmem:[#allocation23_spill] sm:$0xff] }
 0x209   : > { %8640 = vrot.lane.b32.xlu0 %v14299_v22, %s8930_s22  ;;  %v3588_v55 = vmul.f32 %v14307_v8, %v14304_v56  ;;  %v14309_v22 = vld [vmem:[#allocation92_spill] sm:$0xff]  ;;  %v14314_v8 = vld [vmem:[#allocation25_spill] sm:$0xff] }
 0x20a   : > { %v10314_v10 = vpop.permute.xlu1 %1456  ;;  %v14313_v56 = vld [vmem:[#allocation96_spill] sm:$0xff] }
 0x20b   : > { %14300 = vst [vmem:[#allocation79_spill] sm:$0xff] %v10314_v10  ;;  %v10316_v30 = vpop.permute.xlu0 %1454 }
 0x20c   : > { %14301 = vst [vmem:[#allocation80_spill] sm:$0xff] %v10316_v30  ;;  %8655 = vrot.lane.b32.xlu1 %v14302_v24, %s8930_s22  ;;  %v14310_v30 = vld [vmem:[#allocation22_spill] sm:$0xff] }
 0x20d   : > { %8650 = vrot.lane.b32.xlu0 %v14303_v5, %s8930_s22  ;;  %v3591_v24 = vmul.f32 %v14310_v30, %v14309_v22  ;;  %v14312_v5 = vld [vmem:[#allocation21_spill] sm:$0xff] }
 0x20e   : > { %v10324_v62 = vpop.permute.xlu1 %1472  ;;  %v3590_v33 = vmul.f32 %v14312_v5, %v14309_v22  ;;  %v14317_v30 = vld [vmem:[#allocation85_spill] sm:$0xff]  ;;  %v14319_v22 = vld [vmem:[#allocation26_spill] sm:$0xff] }
 0x20f   : > { %14306 = vst [vmem:[#allocation83_spill] sm:$0xff] %v10324_v62  ;;  %v10328_v37 = vpop.permute.xlu0 %1470  ;;  %v3593_v5 = vmul.f32 %v14319_v22, %v14313_v56 }
 0x210   : > { %14308 = vst [vmem:[#allocation81_spill] sm:$0xff] %v10328_v37  ;;  %3734 = vrot.lane.b32.xlu1 %v3589_v42, %s8930_s22  ;;  %v3592_v37 = vmul.f32 %v14314_v8, %v14313_v56 }
 0x211   : > { %3732 = vrot.lane.b32.xlu0 %v3588_v55, %s8930_s22 }
 0x212   : > { %v10334_v10 = vpop.permute.xlu1 %1474 }
 0x213   : > { %14311 = vst [vmem:[#allocation73_spill] sm:$0xff] %v10334_v10  ;;  %v10338_v57 = vpop.permute.xlu0 %8580 }
 0x214   : > { %3738 = vrot.lane.b32.xlu1 %v3591_v24, %s8930_s22 }
 0x215   : > { %3736 = vrot.lane.b32.xlu0 %v3590_v33, %s8930_s22  ;;  %v14321_v33 = vld [vmem:[#allocation86_spill] sm:$0xff] }
 0x216   : > { %v10344_v42 = vpop.permute.xlu1 %8585 }
 0x217   : > { %14315 = vst [vmem:[#allocation92_spill] sm:$0xff] %v10344_v42  ;;  %v10346_v55 = vpop.permute.xlu0 %1476  ;;  %v14326_v42 = vld [vmem:[#allocation30_spill] sm:$0xff] }
 0x218   : > { %14316 = vst [vmem:[#allocation96_spill] sm:$0xff] %v10346_v55  ;;  %3740 = vrot.lane.b32.xlu1 %v3592_v37, %s8930_s22  ;;  %v14323_v37 = vld [vmem:[#allocation87_spill] sm:$0xff] }
 0x219   : > { %8660 = vrot.lane.b32.xlu0 %v14317_v30, %s8930_s22  ;;  %v14324_v30 = vld [vmem:[#allocation88_spill] sm:$0xff] }
 0x21a   : > { %v10351_v10 = vpop.permute.xlu1 %1480 }
 0x21b   : > { %14318 = vst [vmem:[#allocation85_spill] sm:$0xff] %v10351_v10  ;;  %v10355_v24 = vpop.permute.xlu0 %1478  ;;  %v14325_v10 = vld [vmem:[#allocation95_spill] sm:$0xff] }
 0x21c   : > { %14320 = vst [vmem:[#allocation170_spill] sm:$0xff] %v10355_v24  ;;  %8665 = vrot.lane.b32.xlu1 %v14321_v33, %s8930_s22  ;;  %v3595_v56 = vmul.f32 %v14326_v42, %v14325_v10  ;;  %v14328_v24 = vld [vmem:[#allocation29_spill] sm:$0xff]  ;;  %v14332_v42 = vld [vmem:[#allocation94_spill] sm:$0xff] }
 0x21d   : > { %3742 = vrot.lane.b32.xlu0 %v3593_v5, %s8930_s22  ;;  %v3594_v33 = vmul.f32 %v14328_v24, %v14325_v10  ;;  %v14335_v24 = vld [vmem:[#allocation35_spill] sm:$0xff] }
 0x21e   : > { %v10360_v8 = vpop.permute.xlu1 %1492 }
 0x21f   : > { %v10362_v55 = vpop.permute.xlu0 %1490 }
 0x220   : > { %14322 = vst [vmem:[#allocation86_spill] sm:$0xff] %v10362_v55  ;;  %8675 = vrot.lane.b32.xlu1 %v14323_v37, %s8930_s22 }
 0x221   : > { %8670 = vrot.lane.b32.xlu0 %v14324_v30, %s8930_s22  ;;  %v14331_v30 = vld [vmem:[#allocation93_spill] sm:$0xff] }
 0x222   : > { %v10370_v22 = vpop.permute.xlu1 %1496 }
 0x223   : > { %14327 = vst [vmem:[#allocation87_spill] sm:$0xff] %v10370_v22  ;;  %v10374_v62 = vpop.permute.xlu0 %1494  ;;  %v14333_v22 = vld [vmem:[#allocation98_spill] sm:$0xff] }
 0x224   : > { %14329 = vst [vmem:[#allocation88_spill] sm:$0xff] %v10374_v62  ;;  %3746 = vrot.lane.b32.xlu1 %v3595_v56, %s8930_s22  ;;  %v3597_v55 = vmul.f32 %v9254_v40, %v14333_v22  ;;  %v3596_v56 = vmul.f32 %v14335_v24, %v14333_v22  ;;  %v14338_v40 = vld [vmem:[#allocation102_spill] sm:$0xff] }
 0x225   : > { %3744 = vrot.lane.b32.xlu0 %v3594_v33, %s8930_s22 }
 0x226   : > { %v10378_v5 = vpop.permute.xlu1 %1482 }
 0x227   : > { %14330 = vst [vmem:[#allocation95_spill] sm:$0xff] %v10378_v5  ;;  %v10380_v37 = vpop.permute.xlu0 %8590 }
 0x228   : > { %8685 = vrot.lane.b32.xlu1 %v14331_v30, %s8930_s22 }
 0x229   : > { %8680 = vrot.lane.b32.xlu0 %v14332_v42, %s8930_s22  ;;  %v14337_v42 = vld [vmem:[#allocation100_spill] sm:$0xff] }
 0x22a   : > { %v10388_v10 = vpop.permute.xlu1 %1498 }
 0x22b   : > { %14334 = vst [vmem:[#allocation93_spill] sm:$0xff] %v10388_v10  ;;  %v10392_v62 = vpop.permute.xlu0 %1484  ;;  %v14339_v10 = vld [vmem:[#allocation97_spill] sm:$0xff] }
 0x22c   : > { %3750 = vrot.lane.b32.xlu1 %v3597_v55, %s8930_s22  ;;  %v3599_v5 = vmul.f32 %v9244_v23, %v14339_v10  ;;  %v3598_v55 = vmul.f32 %v9242_v16, %v14339_v10  ;;  %v14343_v10 = vld [vmem:[#allocation99_spill] sm:$0xff]  ;;  %v14344_v16 = vld [vmem:[#allocation38_spill] sm:$0xff] }
 0x22d   : > { %3748 = vrot.lane.b32.xlu0 %v3596_v56, %s8930_s22  ;;  %v14341_v56 = vld [vmem:[#allocation101_spill] sm:$0xff] }
 0x22e   : > { %v10396_v33 = vpop.permute.xlu1 %8595 }
 0x22f   : > { %v10398_v30 = vpop.permute.xlu0 %1500 }
 0x230   : > { %14336 = vst [vmem:[#allocation94_spill] sm:$0xff] %v10398_v30  ;;  %8695 = vrot.lane.b32.xlu1 %v14337_v42, %s8930_s22  ;;  %v3605_v42 = vmul.f32 %v9274_v21, %v14341_v56 }
 0x231   : > { %8690 = vrot.lane.b32.xlu0 %v14338_v40, %s8930_s22  ;;  %v3604_v40 = vmul.f32 %v9269_v14, %v14341_v56  ;;  %v14346_v56 = vld [vmem:[#allocation104_spill] sm:$0xff] }
 0x232   : > { %v10406_v22 = vpop.permute.xlu1 %1488  ;;  %v3600_v14 = vmul.f32 %v14164_v15, %v14346_v56 }
 0x233   : > { %v10410_v24 = vpop.permute.xlu0 %1486 }
 0x234   : > { %14340 = vst [vmem:[#allocation98_spill] sm:$0xff] %v10410_v24  ;;  %3754 = vrot.lane.b32.xlu1 %v3599_v5, %s8930_s22  ;;  %v3607_v24 = vmul.f32 %v14344_v16, %v14343_v10  ;;  %v14348_v16 = vld [vmem:[#allocation108_spill] sm:$0xff] }
 0x235   : > { %3752 = vrot.lane.b32.xlu0 %v3598_v55, %s8930_s22  ;;  %v3606_v55 = vmul.f32 %v9260_v54, %v14343_v10 }
 0x236   : > { %v10416_v30 = vpop.permute.xlu1 %1504 }
 0x237   : > { %14342 = vst [vmem:[#allocation100_spill] sm:$0xff] %v10416_v30  ;;  %v10420_v23 = vpop.permute.xlu0 %1502  ;;  %v14349_v30 = vld [vmem:[#allocation103_spill] sm:$0xff] }
 0x238   : > { %3766 = vrot.lane.b32.xlu1 %v3605_v42, %s8930_s22  ;;  %v3608_v10 = vmul.f32 %v14161_v20, %v14349_v30  ;;  %v14354_v20 = vld [vmem:[#allocation110_spill] sm:$0xff] }
 0x239   : > { %3764 = vrot.lane.b32.xlu0 %v3604_v40, %s8930_s22 }
 0x23a   : > { %v10426_v5 = vpop.permute.xlu1 %8605 }
 0x23b   : > { %v10430_v21 = vpop.permute.xlu0 %8600 }
 0x23c   : > { %14345 = vst [vmem:[#allocation102_spill] sm:$0xff] %v10430_v21  ;;  %3770 = vrot.lane.b32.xlu1 %v3607_v24, %s8930_s22  ;;  %v14351_v24 = vld [vmem:[#allocation44_spill] sm:$0xff] }
 0x23d   : > { %3768 = vrot.lane.b32.xlu0 %v3606_v55, %s8930_s22  ;;  %v3601_v55 = vmul.f32 %v14351_v24, %v14346_v56  ;;  %v14358_v24 = vld [vmem:[#allocation106_spill] sm:$0xff] }
 0x23e   : > { %v10436_v42 = vpop.permute.xlu1 %1508 }
 0x23f   : > { %v10438_v40 = vpop.permute.xlu0 %1506 }
 0x240   : > { %14347 = vst [vmem:[#allocation97_spill] sm:$0xff] %v10438_v40  ;;  %3756 = vrot.lane.b32.xlu1 %v3600_v14, %s8930_s22  ;;  %v14352_v14 = vld [vmem:[#allocation42_spill] sm:$0xff] }
 0x241   : > { %8700 = vrot.lane.b32.xlu0 %v14348_v16, %s8930_s22  ;;  %v3609_v40 = vmul.f32 %v14352_v14, %v14349_v30  ;;  %v3603_v30 = vmul.f32 %v14177_v11, %v14358_v24 }
 0x242   : > { %v10445_v54 = vpop.permute.xlu1 %1510 }
 0x243   : > { %14350 = vst [vmem:[#allocation101_spill] sm:$0xff] %v10445_v54  ;;  %v10449_v21 = vpop.permute.xlu0 %8610 }
 0x244   : > { %3772 = vrot.lane.b32.xlu1 %v3608_v10, %s8930_s22  ;;  %v14356_v10 = vld [vmem:[#allocation113_spill] sm:$0xff] }
 0x245   : > { %3758 = vrot.lane.b32.xlu0 %v3601_v55, %s8930_s22  ;;  %v14357_v55 = vld [vmem:[#allocation114_spill] sm:$0xff] }
 0x246   : > { %v10453_v15 = vpop.permute.xlu1 %8615 }
 0x247   : > { %v10457_v16 = vpop.permute.xlu0 %1512 }
 0x248   : > { %14353 = vst [vmem:[#allocation99_spill] sm:$0xff] %v10457_v16  ;;  %8705 = vrot.lane.b32.xlu1 %v14354_v20, %s8930_s22  ;;  %v3602_v20 = vmul.f32 %v14176_v49, %v14358_v24 }
 0x249   : > { %3774 = vrot.lane.b32.xlu0 %v3609_v40, %s8930_s22  ;;  %v14360_v40 = vld [vmem:[#allocation105_spill] sm:$0xff] }
 0x24a   : > { %v10462_v54 = vpop.permute.xlu1 %3702 }
 0x24b   : > { %14355 = vst [vmem:[#allocation104_spill] sm:$0xff] %v10462_v54  ;;  %v10464_v56 = vpop.permute.xlu0 %3700 }
 0x24c   : > { %8715 = vrot.lane.b32.xlu1 %v14356_v10, %s8930_s22  ;;  %v3611_v10 = vmul.f32 %v14173_v48, %v14360_v40  ;;  %v14367_v48 = vld [vmem:[#allocation109_spill] sm:$0xff] }
 0x24d   : > { %8710 = vrot.lane.b32.xlu0 %v14357_v55, %s8930_s22  ;;  %v3610_v55 = vmul.f32 %v14172_v29, %v14360_v40 }
 0x24e   : > { %v10472_v14 = vpop.permute.xlu1 %3706 }
 0x24f   : > { %v10476_v16 = vpop.permute.xlu0 %3704 }
 0x250   : > { %14359 = vst [vmem:[#allocation108_spill] sm:$0xff] %v10476_v16  ;;  %3762 = vrot.lane.b32.xlu1 %v3603_v30, %s8930_s22  ;;  %v14365_v30 = vld [vmem:[#allocation121_spill] sm:$0xff] }
 0x251   : > { %3760 = vrot.lane.b32.xlu0 %v3602_v20, %s8930_s22  ;;  %v14366_v20 = vld [vmem:[#allocation122_spill] sm:$0xff] }
 0x252   : > { %v10482_v54 = vpop.permute.xlu1 %1516 }
 0x253   : > { %14361 = vst [vmem:[#allocation103_spill] sm:$0xff] %v10482_v54  ;;  %v10486_v11 = vpop.permute.xlu0 %1514  ;;  %v3613_v54 = vmul.f32 %v14185_v32, %v14367_v48  ;;  %v14373_v32 = vld [vmem:[#allocation130_spill] sm:$0xff] }
 0x254   : > { %14362 = vst [vmem:[#allocation110_spill] sm:$0xff] %v10486_v11  ;;  %3778 = vrot.lane.b32.xlu1 %v3611_v10, %s8930_s22  ;;  %v3612_v10 = vmul.f32 %v14184_v13, %v14367_v48 }
 0x255   : > { %3776 = vrot.lane.b32.xlu0 %v3610_v55, %s8930_s22 }
 0x256   : > { %v10490_v24 = vpop.permute.xlu1 %3708 }
 0x257   : > { %14363 = vst [vmem:[#allocation113_spill] sm:$0xff] %v10490_v24  ;;  %v10492_v49 = vpop.permute.xlu0 %8620 }
 0x258   : > { %14364 = vst [vmem:[#allocation114_spill] sm:$0xff] %v10492_v49  ;;  %8725 = vrot.lane.b32.xlu1 %v14365_v30, %s8930_s22  ;;  %v14538_v49 = vld [vmem:[#allocation92_spill] sm:$0xff] }
 0x259   : > { %8720 = vrot.lane.b32.xlu0 %v14366_v20, %s8930_s22  ;;  %v14372_v20 = vld [vmem:[#allocation129_spill] sm:$0xff]  ;;  %v8588_v16 = vunpack.i.h.bf16 %v14538_v49 }
 0x25a   : > { %v10500_v40 = vpop.permute.xlu1 %1518 }
 0x25b   : > { %14368 = vst [vmem:[#allocation106_spill] sm:$0xff] %v10500_v40  ;;  %v10504_v29 = vpop.permute.xlu0 %3710  ;;  %v14374_v40 = vld [vmem:[#allocation107_spill] sm:$0xff] }
 0x25c   : > { %14369 = vst [vmem:[#allocation105_spill] sm:$0xff] %v10504_v29  ;;  %3782 = vrot.lane.b32.xlu1 %v3613_v54, %s8930_s22  ;;  %v3615_v24 = vmul.f32 %v14189_v53, %v14374_v40  ;;  %v3614_v54 = vmul.f32 %v14188_v31, %v14374_v40  ;;  %v14380_v40 = vld [vmem:[#allocation111_spill] sm:$0xff]  ;;  %v14535_v29 = vld [vmem:[#allocation20_spill] sm:$0xff] }
 0x25d   : > { %3780 = vrot.lane.b32.xlu0 %v3612_v10, %s8930_s22  ;;  %v14377_v10 = vld [vmem:[#allocation112_spill] sm:$0xff]  ;;  %v3623_v31 = vmul.f32 %v14194_v27, %v14380_v40  ;;  %v14386_v27 = vld [vmem:[#allocation115_spill] sm:$0xff] }
 0x25e   : > { %v10508_v55 = vpop.permute.xlu1 %8625 }
 0x25f   : > { %14370 = vst [vmem:[#allocation121_spill] sm:$0xff] %v10508_v55  ;;  %v10510_v30 = vpop.permute.xlu0 %1520 }
 0x260   : > { %14371 = vst [vmem:[#allocation122_spill] sm:$0xff] %v10510_v30  ;;  %8735 = vrot.lane.b32.xlu1 %v14372_v20, %s8930_s22  ;;  %v3621_v20 = vmul.f32 %v14197_v26, %v14377_v10 }
 0x261   : > { %8730 = vrot.lane.b32.xlu0 %v14373_v32, %s8930_s22  ;;  %v3620_v32 = vmul.f32 %v14196_v52, %v14377_v10  ;;  %v14383_v10 = vld [vmem:[#allocation116_spill] sm:$0xff] }
 0x262   : > { %v10518_v48 = vpop.permute.xlu1 %3714  ;;  %v3616_v52 = vmul.f32 %v14208_v7, %v14383_v10 }
 0x263   : > { %14375 = vst [vmem:[#allocation109_spill] sm:$0xff] %v10518_v48  ;;  %v10522_v13 = vpop.permute.xlu0 %3712 }
 0x264   : > { %14376 = vst [vmem:[#allocation129_spill] sm:$0xff] %v10522_v13  ;;  %3786 = vrot.lane.b32.xlu1 %v3615_v24, %s8930_s22 }
 0x265   : > { %3784 = vrot.lane.b32.xlu0 %v3614_v54, %s8930_s22  ;;  %v3622_v54 = vmul.f32 %v14193_v1, %v14380_v40  ;;  %v3624_v40 = vmul.f32 %v14205_v36, %v14386_v27  ;;  %v14391_v36 = vld [vmem:[#allocation118_spill] sm:$0xff] }
 0x266   : > { %v10528_v30 = vpop.permute.xlu1 %3716 }
 0x267   : > { %14378 = vst [vmem:[#allocation130_spill] sm:$0xff] %v10528_v30  ;;  %v10532_v53 = vpop.permute.xlu0 %8630 }
 0x268   : > { %14379 = vst [vmem:[#allocation107_spill] sm:$0xff] %v10532_v53  ;;  %3798 = vrot.lane.b32.xlu1 %v3621_v20, %s8930_s22 }
 0x269   : > { %3796 = vrot.lane.b32.xlu0 %v3620_v32, %s8930_s22 }
 0x26a   : > { %v10538_v24 = vpop.permute.xlu1 %8635 }
 0x26b   : > { %14381 = vst [vmem:[#allocation112_spill] sm:$0xff] %v10538_v24  ;;  %v10542_v26 = vpop.permute.xlu0 %3718 }
 0x26c   : > { %14382 = vst [vmem:[#allocation111_spill] sm:$0xff] %v10542_v26  ;;  %3802 = vrot.lane.b32.xlu1 %v3623_v31, %s8930_s22  ;;  %v3617_v31 = vmul.f32 %v14209_v50, %v14383_v10  ;;  %v3619_v10 = vmul.f32 %v14221_v25, %v14391_v36 }
 0x26d   : > { %3800 = vrot.lane.b32.xlu0 %v3622_v54, %s8930_s22 }
 0x26e   : > { %v10548_v20 = vpop.permute.xlu1 %3722 }
 0x26f   : > { %14384 = vst [vmem:[#allocation116_spill] sm:$0xff] %v10548_v20  ;;  %v10550_v32 = vpop.permute.xlu0 %3720 }
 0x270   : > { %14385 = vst [vmem:[#allocation171_spill] sm:$0xff] %v10550_v32  ;;  %3788 = vrot.lane.b32.xlu1 %v3616_v52, %s8930_s22  ;;  %v3625_v52 = vmul.f32 %v14206_v9, %v14386_v27  ;;  %v14394_v27 = vld [vmem:[#allocation117_spill] sm:$0xff] }
 0x271   : > { %8740 = vrot.lane.b32.xlu0 %v10044_v51, %s8930_s22  ;;  %v3627_v9 = vmul.f32 %v14218_v34, %v14394_v27  ;;  %v14400_v34 = vld [vmem:[#allocation147_spill] sm:$0xff] }
 0x272   : > { %v10557_v1 = vpop.permute.xlu1 %3726 }
 0x273   : > { %14387 = vst [vmem:[#allocation115_spill] sm:$0xff] %v10557_v1  ;;  %v10561_v54 = vpop.permute.xlu0 %3724 }
 0x274   : > { %14388 = vst [vmem:[#allocation172_spill] sm:$0xff] %v10561_v54  ;;  %3804 = vrot.lane.b32.xlu1 %v3624_v40, %s8930_s22  ;;  %v3618_v40 = vmul.f32 %v14220_v35, %v14391_v36  ;;  %v14397_v36 = vld [vmem:[#allocation120_spill] sm:$0xff] }
 0x275   : > { %3790 = vrot.lane.b32.xlu0 %v3617_v31, %s8930_s22  ;;  %v3628_v35 = vmul.f32 %v9411_v19, %v14397_v36 }
 0x276   : > { %v10565_v7 = vpop.permute.xlu1 %3730 }
 0x277   : > { %14389 = vst [vmem:[#allocation173_spill] sm:$0xff] %v10565_v7  ;;  %v10569_v51 = vpop.permute.xlu0 %3728  ;;  %v14524_v7 = vld [vmem:[#allocation10_spill] sm:$0xff] }
 0x278   : > { %14390 = vst [vmem:[#allocation174_spill] sm:$0xff] %v10569_v51  ;;  %8745 = vrot.lane.b32.xlu1 %v10055_v6, %s8930_s22  ;;  %v14525_v51 = vld [vmem:[#allocation84_spill] sm:$0xff] }
 0x279   : > { %3806 = vrot.lane.b32.xlu0 %v3625_v52, %s8930_s22  ;;  %v3626_v52 = vmul.f32 %v14217_v60, %v14394_v27  ;;  %v3629_v27 = vmul.f32 %v9413_v46, %v14397_v36  ;;  %v14406_v36 = vld [vmem:[#allocation124_spill] sm:$0xff] }
 0x27a   : > { %v10576_v50 = vpop.permute.xlu1 %8645  ;;  %v3633_v46 = vmul.f32 %v14240_v61, %v14406_v36 }
 0x27b   : > { %14392 = vst [vmem:[#allocation118_spill] sm:$0xff] %v10576_v50  ;;  %v10580_v31 = vpop.permute.xlu0 %8640 }
 0x27c   : > { %14393 = vst [vmem:[#allocation175_spill] sm:$0xff] %v10580_v31  ;;  %3794 = vrot.lane.b32.xlu1 %v3619_v10, %s8930_s22 }
 0x27d   : > { %3792 = vrot.lane.b32.xlu0 %v3618_v40, %s8930_s22 }
 0x27e   : > { %v10586_v6 = vpop.permute.xlu1 %8655 }
 0x27f   : > { %14395 = vst [vmem:[#allocation117_spill] sm:$0xff] %v10586_v6  ;;  %v10590_v25 = vpop.permute.xlu0 %8650 }
 0x280   : > { %14396 = vst [vmem:[#allocation176_spill] sm:$0xff] %v10590_v25  ;;  %3810 = vrot.lane.b32.xlu1 %v3627_v9, %s8930_s22 }
 0x281   : > { %3808 = vrot.lane.b32.xlu0 %v3626_v52, %s8930_s22  ;;  %v14403_v52 = vld [vmem:[#allocation119_spill] sm:$0xff] }
 0x282   : > { %v10596_v10 = vpop.permute.xlu1 %3734  ;;  %v3631_v19 = vmul.f32 %v9404_v63, %v14403_v52 }
 0x283   : > { %14398 = vst [vmem:[#allocation120_spill] sm:$0xff] %v10596_v10  ;;  %v10598_v40 = vpop.permute.xlu0 %3732 }
 0x284   : > { %14399 = vst [vmem:[#allocation177_spill] sm:$0xff] %v10598_v40  ;;  %3812 = vrot.lane.b32.xlu1 %v3628_v35, %s8930_s22 }
 0x285   : > { %8750 = vrot.lane.b32.xlu0 %v14400_v34, %s8930_s22  ;;  %v3630_v34 = vmul.f32 %v14132_v39, %v14403_v52  ;;  %v14409_v52 = vld [vmem:[#allocation123_spill] sm:$0xff] }
 0x286   : > { %v10603_v6 = vpop.permute.xlu1 %3738  ;;  %v3635_v39 = vmul.f32 %v14246_v4, %v14409_v52 }
 0x287   : > { %14401 = vst [vmem:[#allocation147_spill] sm:$0xff] %v10603_v6  ;;  %v10607_v9 = vpop.permute.xlu0 %3736 }
 0x288   : > { %14402 = vst [vmem:[#allocation178_spill] sm:$0xff] %v10607_v9  ;;  %8755 = vrot.lane.b32.xlu1 %v10122_v0, %s8930_s22  ;;  %v14521_v9 = vld [vmem:[#allocation9_spill] sm:$0xff] }
 0x289   : > { %3814 = vrot.lane.b32.xlu0 %v3629_v27, %s8930_s22  ;;  %v3632_v27 = vmul.f32 %v14239_v41, %v14406_v36 }
 0x28a   : > { %v10614_v60 = vpop.permute.xlu1 %3740 }
 0x28b   : > { %14404 = vst [vmem:[#allocation119_spill] sm:$0xff] %v10614_v60  ;;  %v10618_v35 = vpop.permute.xlu0 %8660 }
 0x28c   : > { %14405 = vst [vmem:[#allocation179_spill] sm:$0xff] %v10618_v35  ;;  %3818 = vrot.lane.b32.xlu1 %v3631_v19, %s8930_s22  ;;  %v3634_v19 = vmul.f32 %v14245_v47, %v14409_v52 }
 0x28d   : > { %3816 = vrot.lane.b32.xlu0 %v3630_v34, %s8930_s22 }
 0x28e   : > { %v10624_v0 = vpop.permute.xlu1 %8665 }
 0x28f   : > { %14407 = vst [vmem:[#allocation124_spill] sm:$0xff] %v10624_v0  ;;  %v10628_v63 = vpop.permute.xlu0 %3742 }
 0x290   : > { %14408 = vst [vmem:[#allocation180_spill] sm:$0xff] %v10628_v63  ;;  %3822 = vrot.lane.b32.xlu1 %v3633_v46, %s8930_s22 }
 0x291   : > { %3820 = vrot.lane.b32.xlu0 %v3632_v27, %s8930_s22 }
 0x292   : > { %v10636_v34 = vpop.permute.xlu1 %8675 }
 0x293   : > { %14410 = vst [vmem:[#allocation123_spill] sm:$0xff] %v10636_v34  ;;  %v10638_v61 = vpop.permute.xlu0 %8670 }
 0x294   : > { %14411 = vst [vmem:[#allocation181_spill] sm:$0xff] %v10638_v61  ;;  %3826 = vrot.lane.b32.xlu1 %v3635_v39, %s8930_s22  ;;  %v14421_v39 = vld [vmem:[#allocation126_spill] sm:$0xff] }
 0x295   : > { %3824 = vrot.lane.b32.xlu0 %v3634_v19, %s8930_s22  ;;  %v8442_v19 = vunpack.i.l.bf16 %v14421_v39 }
 0x296   : > { %v10644_v41 = vpop.permute.xlu1 %3746 }
 0x297   : > { %v10642_v36 = vpop.permute.xlu0 %3744  ;;  %14413 = vst [vmem:[#allocation183_spill] sm:$0xff] %v10644_v41  ;;  %v14423_v41 = vld [vmem:[#allocation125_spill] sm:$0xff] }
 0x298   : > { %14412 = vst [vmem:[#allocation182_spill] sm:$0xff] %v10642_v36  ;;  %v8447_v34 = vunpack.i.l.bf16 %v14423_v41 }
 0x29a   : > { %v10648_v27 = vpop.permute.xlu1 %8685 }
 0x29b   : > { %v10646_v46 = vpop.permute.xlu0 %8680  ;;  %14415 = vst [vmem:[#allocation185_spill] sm:$0xff] %v10648_v27 }
 0x29c   : > { %14414 = vst [vmem:[#allocation184_spill] sm:$0xff] %v10646_v46  ;;  %v8443_v46 = vunpack.i.h.bf16 %v14421_v39  ;;  %v14428_v39 = vld [vmem:[#allocation127_spill] sm:$0xff] }
 0x29d   : > { %v8457_v6 = vunpack.i.l.bf16 %v14428_v39 }
 0x29e   : > { %v10652_v63 = vpop.permute.xlu1 %3750  ;;  %v949_v60 = vsel %vm945_vm2, %v8443_v46, 0.0 }
 0x29f   : > { %v10650_v4 = vpop.permute.xlu0 %3748  ;;  %14417 = vst [vmem:[#allocation187_spill] sm:$0xff] %v10652_v63  ;;  %v14425_v63 = vld [vmem:[#allocation128_spill] sm:$0xff] }
 0x2a0   : > { %14416 = vst [vmem:[#allocation186_spill] sm:$0xff] %v10650_v4  ;;  %v946_v4 = vsel %vm945_vm2, %v8442_v19, 0.0 }
 0x2a2   : > { %v10656_v47 = vpop.permute.xlu1 %8695 }
 0x2a3   : > { %v10654_v52 = vpop.permute.xlu0 %8690  ;;  %14419 = vst [vmem:[#allocation189_spill] sm:$0xff] %v10656_v47  ;;  %v8452_v47 = vunpack.i.l.bf16 %v14425_v63 }
 0x2a4   : > { %14418 = vst [vmem:[#allocation188_spill] sm:$0xff] %v10654_v52  ;;  %v8448_v52 = vunpack.i.h.bf16 %v14423_v41 }
 0x2a5   : > { %v958_v41 = vsel %vm945_vm2, %v8452_v47, 0.0 }
 0x2a6   : > { %v10661_v36 = vpop.permute.xlu1 %3754 }
 0x2a7   : > { %v10658_v61 = vpop.permute.xlu0 %3752  ;;  %14422 = vst [vmem:[#allocation126_spill] sm:$0xff] %v10661_v36 }
 0x2a8   : > { %14420 = vst [vmem:[#allocation190_spill] sm:$0xff] %v10658_v61  ;;  %v952_v61 = vsel %vm945_vm2, %v8447_v34, 0.0  ;;  %v8458_v34 = vunpack.i.h.bf16 %v14428_v39 }
 0x2aa   : > { %v10670_v0 = vpop.permute.xlu1 %3766 }
 0x2ab   : > { %v10665_v27 = vpop.permute.xlu0 %3764  ;;  %14426 = vst [vmem:[#allocation128_spill] sm:$0xff] %v10670_v0  ;;  %v14430_v0 = vld [vmem:[#allocation132_spill] sm:$0xff] }
 0x2ac   : > { %14424 = vst [vmem:[#allocation125_spill] sm:$0xff] %v10665_v27  ;;  %v8453_v27 = vunpack.i.h.bf16 %v14425_v63  ;;  %v8462_v46 = vunpack.i.l.bf16 %v14430_v0  ;;  %v14432_v63 = vld [vmem:[#allocation131_spill] sm:$0xff]  ;;  %v8463_v47 = vunpack.i.h.bf16 %v14430_v0 }
 0x2ae   : > { %v10680_v19 = vpop.permute.xlu1 %3770  ;;  %v970_v39 = vsel %vm945_vm2, %v8462_v46, 0.0 }
 0x2af   : > { %v10674_v36 = vpop.permute.xlu0 %3768  ;;  %14429 = vst [vmem:[#allocation127_spill] sm:$0xff] %v10680_v19 }
 0x2b0   : > { %14427 = vst [vmem:[#allocation191_spill] sm:$0xff] %v10674_v36  ;;  %v964_v36 = vsel %vm945_vm2, %v8457_v6, 0.0 }
 0x2b4   : > { %947 = vadd.xlane.f32.xlu0 %v946_v4  ;;  %v955_v4 = vsel %vm945_vm2, %v8448_v52, 0.0  ;;  %v8467_v52 = vunpack.i.l.bf16 %v14432_v63 }
 0x2b8   : > { %953 = vadd.xlane.f32.xlu0 %v952_v61  ;;  %950 = vadd.xlane.f32.xlu1 %v949_v60  ;;  %v10684_v61 = vpop.permute.xlu0 %8700  ;;  %v961_v60 = vsel %vm945_vm2, %v8453_v27, 0.0  ;;  %v8468_v27 = vunpack.i.h.bf16 %v14432_v63 }
 0x2b9   : > { %14431 = vst [vmem:[#allocation132_spill] sm:$0xff] %v10684_v61  ;;  %v14435_v61 = vld [vmem:[#allocation134_spill] sm:$0xff] }
 0x2ba   : > { %v8472_v6 = vunpack.i.l.bf16 %v14435_v61  ;;  %v8473_v46 = vunpack.i.h.bf16 %v14435_v61 }
 0x2bc   : > { %956 = vadd.xlane.f32.xlu0 %v955_v4  ;;  %959 = vadd.xlane.f32.xlu1 %v958_v41  ;;  %v10690_v4 = vpop.permute.xlu1 %3756  ;;  %v967_v41 = vsel %vm945_vm2, %v8458_v34, 0.0  ;;  %v10694_v19 = vpop.permute.xlu0 %3758  ;;  %v994_v63 = vsel %vm945_vm2, %v8472_v6, 0.0 }
 0x2bd   : > { %14433 = vst [vmem:[#allocation131_spill] sm:$0xff] %v10690_v4  ;;  %14434 = vst [vmem:[#allocation192_spill] sm:$0xff] %v10694_v19  ;;  %v14437_v4 = vld [vmem:[#allocation133_spill] sm:$0xff] }
 0x2be   : > { %v8477_v34 = vunpack.i.l.bf16 %v14437_v4 }
 0x2c0   : > { %962 = vadd.xlane.f32.xlu0 %v961_v60  ;;  %965 = vadd.xlane.f32.xlu1 %v964_v36  ;;  %v973_v36 = vsel %vm945_vm2, %v8463_v47, 0.0  ;;  %v976_v60 = vsel %vm945_vm2, %v8467_v52, 0.0  ;;  %v10700_v0 = vpop.permute.xlu1 %3772  ;;  %v8478_v47 = vunpack.i.h.bf16 %v14437_v4  ;;  %v997_v52 = vsel %vm945_vm2, %v8473_v46, 0.0  ;;  %v14443_v4 = vld [vmem:[#allocation140_spill] sm:$0xff]  ;;  %v14445_v46 = vld [vmem:[#allocation135_spill] sm:$0xff] }
 0x2c1   : > { %14436 = vst [vmem:[#allocation134_spill] sm:$0xff] %v10700_v0 }
 0x2c2   : > { %v1003_v61 = vsel %vm945_vm2, %v8478_v47, 0.0  ;;  %v14447_v47 = vld [vmem:[#allocation139_spill] sm:$0xff] }
 0x2c4   : > { %968 = vadd.xlane.f32.xlu0 %v967_v41  ;;  %971 = vadd.xlane.f32.xlu1 %v970_v39  ;;  %v10704_v41 = vpop.permute.xlu0 %3774  ;;  %v979_v39 = vsel %vm945_vm2, %v8468_v27, 0.0  ;;  %v10709_v19 = vpop.permute.xlu1 %8705 }
 0x2c5   : > { %14438 = vst [vmem:[#allocation133_spill] sm:$0xff] %v10704_v41  ;;  %14439 = vst [vmem:[#allocation193_spill] sm:$0xff] %v10709_v19  ;;  %v14441_v41 = vld [vmem:[#allocation136_spill] sm:$0xff] }
 0x2c6   : > { %v1586_v27 = vsel %vm945_vm2, %v14441_v41, 0.0  ;;  %v8483_v41 = vunpack.i.h.bf16 %v14443_v4 }
 0x2c8   : > { %974 = vadd.xlane.f32.xlu0 %v973_v36  ;;  %977 = vadd.xlane.f32.xlu1 %v976_v60  ;;  %v1000_v36 = vsel %vm945_vm2, %v8477_v34, 0.0  ;;  %v10713_v60 = vpop.permute.xlu0 %8710  ;;  %v10718_v6 = vpop.permute.xlu1 %8715  ;;  %v1589_v34 = vsel %vm945_vm2, %v14445_v46, 0.0  ;;  %v8488_v46 = vunpack.i.h.bf16 %v14447_v47 }
 0x2c9   : > { %14440 = vst [vmem:[#allocation194_spill] sm:$0xff] %v10713_v60  ;;  %14442 = vst [vmem:[#allocation136_spill] sm:$0xff] %v10718_v6  ;;  %v8487_v60 = vunpack.i.l.bf16 %v14447_v47  ;;  %v14455_v47 = vld [vmem:[#allocation143_spill] sm:$0xff] }
 0x2cc   : > { %980 = vadd.xlane.f32.xlu0 %v979_v39  ;;  %995 = vadd.xlane.f32.xlu1 %v994_v63  ;;  %v8482_v39 = vunpack.i.l.bf16 %v14443_v4  ;;  %v10721_v63 = vpop.permute.xlu0 %3760 }
 0x2cd   : > { %14444 = vst [vmem:[#allocation140_spill] sm:$0xff] %v10721_v63 }
 0x2ce   : > { %v982_v19 = vsel %vm945_vm2, %v8482_v39, 0.0  ;;  %v1009_v39 = vsel %vm945_vm2, %v8488_v46, 0.0  ;;  %v8498_v46 = vunpack.i.h.bf16 %v14455_v47 }
 0x2d0   : > { %998 = vadd.xlane.f32.xlu0 %v997_v52  ;;  %1001 = vadd.xlane.f32.xlu1 %v1000_v36  ;;  %v14446_v52 = vld [vmem:[#allocation138_spill] sm:$0xff]  ;;  %v10734_v63 = vpop.permute.xlu0 %3776 }
 0x2d1   : > { %v1592_v36 = vsel %vm945_vm2, %v14446_v52, 0.0  ;;  %14450 = vst [vmem:[#allocation138_spill] sm:$0xff] %v10734_v63  ;;  %v1006_v52 = vsel %vm945_vm2, %v8487_v60, 0.0 }
 0x2d4   : > { %1004 = vadd.xlane.f32.xlu0 %v1003_v61  ;;  %1587 = vadd.xlane.f32.xlu1 %v1586_v27  ;;  %v10729_v61 = vpop.permute.xlu1 %3762  ;;  %v14449_v27 = vld [vmem:[#allocation137_spill] sm:$0xff]  ;;  %v10742_v0 = vpop.permute.xlu0 %8720 }
 0x2d5   : > { %14448 = vst [vmem:[#allocation135_spill] sm:$0xff] %v10729_v61  ;;  %v1595_v6 = vsel %vm945_vm2, %v14449_v27, 0.0  ;;  %14453 = vst [vmem:[#allocation137_spill] sm:$0xff] %v10742_v0  ;;  %v8497_v27 = vunpack.i.l.bf16 %v14455_v47 }
 0x2d8   : > { %1590 = vadd.xlane.f32.xlu0 %v1589_v34  ;;  %1593 = vadd.xlane.f32.xlu1 %v1592_v36  ;;  %v985_v34 = vsel %vm945_vm2, %v8483_v41, 0.0  ;;  %v10739_v4 = vpop.permute.xlu1 %3778  ;;  %v14452_v36 = vld [vmem:[#allocation144_spill] sm:$0xff]  ;;  %v10754_v0 = vpop.permute.xlu0 %3780 }
 0x2d9   : > { %14451 = vst [vmem:[#allocation139_spill] sm:$0xff] %v10739_v4  ;;  %v8492_v61 = vunpack.i.l.bf16 %v14452_v36  ;;  %v8493_v41 = vunpack.i.h.bf16 %v14452_v36 }
 0x2db   : > { %v988_v63 = vsel %vm945_vm2, %v8492_v61, 0.0  ;;  %v1015_v61 = vsel %vm945_vm2, %v8498_v46, 0.0  ;;  %v8507_v46 = vunpack.i.l.bf16 %v10113_v58 }
 0x2dc   : > { %1596 = vadd.xlane.f32.xlu0 %v1595_v6  ;;  %983 = vadd.xlane.f32.xlu1 %v982_v19  ;;  %v14454_v6 = vld [vmem:[#allocation142_spill] sm:$0xff]  ;;  %v10749_v60 = vpop.permute.xlu1 %8725 }
 0x2dd   : > { %v1598_v19 = vsel %vm945_vm2, %v14454_v6, 0.0  ;;  %14456 = vst [vmem:[#allocation144_spill] sm:$0xff] %v10749_v60  ;;  %14458 = vst [vmem:[#allocation142_spill] sm:$0xff] %v10754_v0  ;;  %v1012_v6 = vsel %vm945_vm2, %v8497_v27, 0.0  ;;  %v10762_v60 = vpop.permute.xlu0 %8730  ;;  %v14464_v27 = vld [vmem:[#allocation145_spill] sm:$0xff] }
 0x2e0   : > { %986 = vadd.xlane.f32.xlu0 %v985_v34  ;;  %1007 = vadd.xlane.f32.xlu1 %v1006_v52  ;;  %v14457_v34 = vld [vmem:[#allocation141_spill] sm:$0xff]  ;;  %v10759_v36 = vpop.permute.xlu1 %3782 }
 0x2e1   : > { %v1601_v52 = vsel %vm945_vm2, %v14457_v34, 0.0  ;;  %14459 = vst [vmem:[#allocation143_spill] sm:$0xff] %v10759_v36  ;;  %14461 = vst [vmem:[#allocation141_spill] sm:$0xff] %v10762_v60  ;;  %v14462_v34 = vld [vmem:[#allocation146_spill] sm:$0xff] }
 0x2e4   : > { %1010 = vadd.xlane.f32.xlu0 %v1009_v39  ;;  %1599 = vadd.xlane.f32.xlu1 %v1598_v19  ;;  %v991_v39 = vsel %vm945_vm2, %v8493_v41, 0.0  ;;  %v14460_v19 = vld [vmem:[#allocation149_spill] sm:$0xff]  ;;  %v10768_v41 = vpop.permute.xlu1 %8735 }
 0x2e5   : > { %v8502_v4 = vunpack.i.l.bf16 %v14460_v19  ;;  %v8503_v47 = vunpack.i.h.bf16 %v14460_v19  ;;  %14463 = vst [vmem:[#allocation149_spill] sm:$0xff] %v10768_v41 }
 0x2e7   : > { %v1021_v36 = vsel %vm945_vm2, %v8503_v47, 0.0  ;;  %v14471_v47 = vld [vmem:[#allocation151_spill] sm:$0xff] }
 0x2e8   : > { %1602 = vadd.xlane.f32.xlu0 %v1601_v52  ;;  %989 = vadd.xlane.f32.xlu1 %v988_v63  ;;  %v1604_v63 = vsel %vm945_vm2, %v14462_v34, 0.0  ;;  %v1607_v52 = vsel %vm945_vm2, %v14464_v27, 0.0  ;;  %v14466_v34 = vld [vmem:[#allocation148_spill] sm:$0xff]  ;;  %v10779_v19 = vpop.permute.xlu1 %3786  ;;  %v8517_v60 = vunpack.i.l.bf16 %v14471_v47 }
 0x2e9   : > { %14467 = vst [vmem:[#allocation145_spill] sm:$0xff] %v10779_v19  ;;  %v14468_v27 = vld [vmem:[#allocation152_spill] sm:$0xff]  ;;  %v14518_v19 = vld [vmem:[#allocation167_spill] sm:$0xff] }
 0x2ea   : > { %v8512_v0 = vunpack.i.l.bf16 %v14468_v27 }
 0x2ec   : > { %992 = vadd.xlane.f32.xlu0 %v991_v39  ;;  %1013 = vadd.xlane.f32.xlu1 %v1012_v6  ;;  %v1018_v39 = vsel %vm945_vm2, %v8502_v4, 0.0  ;;  %v10773_v6 = vpop.permute.xlu0 %3784 }
 0x2ed   : > { %14465 = vst [vmem:[#allocation146_spill] sm:$0xff] %v10773_v6  ;;  %v1024_v6 = vsel %vm945_vm2, %v8507_v46, 0.0 }
 0x2f0   : > { %1016 = vadd.xlane.f32.xlu0 %v1015_v61  ;;  %1605 = vadd.xlane.f32.xlu1 %v1604_v63  ;;  %v1610_v61 = vsel %vm945_vm2, %v14466_v34, 0.0  ;;  %v8508_v63 = vunpack.i.h.bf16 %v10113_v58  ;;  %v10783_v4 = vpop.permute.xlu0 %3796  ;;  %v10790_v34 = vpop.permute.xlu1 %3798  ;;  %v1042_v58 = vsel %vm945_vm2, %v8512_v0, 0.0  ;;  %v1616_v0 = vsel %vm945_vm2, %v10140_v38, 0.0  ;;  %v14481_v38 = vld [vmem:[#allocation156_spill] sm:$0xff] }
 0x2f1   : > { %14469 = vst [vmem:[#allocation148_spill] sm:$0xff] %v10783_v4  ;;  %14472 = vst [vmem:[#allocation152_spill] sm:$0xff] %v10790_v34 }
 0x2f4   : > { %1608 = vadd.xlane.f32.xlu0 %v1607_v52  ;;  %1019 = vadd.xlane.f32.xlu1 %v1018_v39  ;;  %v14470_v52 = vld [vmem:[#allocation150_spill] sm:$0xff]  ;;  %v10794_v4 = vpop.permute.xlu0 %3800 }
 0x2f5   : > { %v1613_v39 = vsel %vm945_vm2, %v14470_v52, 0.0  ;;  %14473 = vst [vmem:[#allocation150_spill] sm:$0xff] %v10794_v4  ;;  %v8518_v52 = vunpack.i.h.bf16 %v14471_v47  ;;  %v14477_v47 = vld [vmem:[#allocation153_spill] sm:$0xff] }
 0x2f8   : > { %1022 = vadd.xlane.f32.xlu0 %v1021_v36  ;;  %1611 = vadd.xlane.f32.xlu1 %v1610_v61  ;;  %v8513_v36 = vunpack.i.h.bf16 %v14468_v27  ;;  %v1027_v61 = vsel %vm945_vm2, %v8508_v63, 0.0  ;;  %v10801_v27 = vpop.permute.xlu0 %8740  ;;  %v1051_v63 = vsel %vm945_vm2, %v8518_v52, 0.0  ;;  %v14480_v52 = vld [vmem:[#allocation154_spill] sm:$0xff] }
 0x2f9   : > { %14475 = vst [vmem:[#allocation195_spill] sm:$0xff] %v10801_v27  ;;  %v1637_v4 = vsel %vm945_vm2, %v14480_v52, 0.0 }
 0x2fa   : > { %v1045_v46 = vsel %vm945_vm2, %v8513_v36, 0.0  ;;  %v1619_v36 = vsel %vm945_vm2, %v14477_v47, 0.0  ;;  %v14483_v47 = vld [vmem:[#allocation74_spill] sm:$0xff] }
 0x2fb   : > { %v8528_v52 = vunpack.i.h.bf16 %v14483_v47 }
 0x2fc   : > { %1614 = vadd.xlane.f32.xlu0 %v1613_v39  ;;  %1025 = vadd.xlane.f32.xlu1 %v1024_v6  ;;  %v1048_v6 = vsel %vm945_vm2, %v8517_v60, 0.0  ;;  %v10799_v39 = vpop.permute.xlu1 %3802  ;;  %v1634_v60 = vsel %vm945_vm2, %v10150_v12, 0.0 }
 0x2fd   : > { %14474 = vst [vmem:[#allocation151_spill] sm:$0xff] %v10799_v39 }
 0x300   : > { %1028 = vadd.xlane.f32.xlu0 %v1027_v61  ;;  %1043 = vadd.xlane.f32.xlu1 %v1042_v58  ;;  %v10806_v61 = vpop.permute.xlu1 %3788  ;;  %v10812_v58 = vpop.permute.xlu0 %3790 }
 0x301   : > { %14476 = vst [vmem:[#allocation196_spill] sm:$0xff] %v10806_v61  ;;  %14478 = vst [vmem:[#allocation153_spill] sm:$0xff] %v10812_v58  ;;  %v8527_v61 = vunpack.i.l.bf16 %v14483_v47  ;;  %v14491_v47 = vld [vmem:[#allocation158_spill] sm:$0xff] }
 0x304   : > { %1046 = vadd.xlane.f32.xlu0 %v1045_v46  ;;  %1049 = vadd.xlane.f32.xlu1 %v1048_v6  ;;  %v14479_v46 = vld [vmem:[#allocation157_spill] sm:$0xff] }
 0x305   : > { %v8522_v6 = vunpack.i.l.bf16 %v14479_v46  ;;  %v8523_v12 = vunpack.i.h.bf16 %v14479_v46 }
 0x307   : > { %v1030_v39 = vsel %vm945_vm2, %v8522_v6, 0.0 }
 0x308   : > { %1052 = vadd.xlane.f32.xlu0 %v1051_v63  ;;  %1617 = vadd.xlane.f32.xlu1 %v1616_v0  ;;  %v1640_v63 = vsel %vm945_vm2, %v14481_v38, 0.0  ;;  %v10819_v0 = vpop.permute.xlu1 %3804 }
 0x309   : > { %14482 = vst [vmem:[#allocation157_spill] sm:$0xff] %v10819_v0  ;;  %v14488_v0 = vld [vmem:[#allocation159_spill] sm:$0xff] }
 0x30c   : > { %1620 = vadd.xlane.f32.xlu0 %v1619_v36  ;;  %1635 = vadd.xlane.f32.xlu1 %v1634_v60  ;;  %v10823_v36 = vpop.permute.xlu0 %3806  ;;  %v14485_v60 = vld [vmem:[#allocation155_spill] sm:$0xff]  ;;  %v10829_v38 = vpop.permute.xlu1 %8745 }
 0x30d   : > { %14484 = vst [vmem:[#allocation154_spill] sm:$0xff] %v10823_v36  ;;  %v1643_v58 = vsel %vm945_vm2, %v14485_v60, 0.0  ;;  %14486 = vst [vmem:[#allocation156_spill] sm:$0xff] %v10829_v38  ;;  %v1057_v36 = vsel %vm945_vm2, %v8528_v52, 0.0  ;;  %v1622_v60 = vsel %vm945_vm2, %v14488_v0, 0.0  ;;  %v8537_v52 = vunpack.i.l.bf16 %v10192_v3 }
 0x30e   : > { %v8533_v0 = vunpack.i.h.bf16 %v10196_v28 }
 0x310   : > { %1638 = vadd.xlane.f32.xlu0 %v1637_v4  ;;  %1641 = vadd.xlane.f32.xlu1 %v1640_v63  ;;  %v1033_v4 = vsel %vm945_vm2, %v8523_v12, 0.0  ;;  %v1054_v63 = vsel %vm945_vm2, %v8527_v61, 0.0  ;;  %v10833_v46 = vpop.permute.xlu0 %3792  ;;  %v1625_v61 = vsel %vm945_vm2, %v14491_v47, 0.0  ;;  %v14492_v12 = vld [vmem:[#allocation160_spill] sm:$0xff]  ;;  %v8538_v47 = vunpack.i.h.bf16 %v10192_v3 }
 0x311   : > { %14487 = vst [vmem:[#allocation74_spill] sm:$0xff] %v10833_v46 }
 0x314   : > { %1644 = vadd.xlane.f32.xlu0 %v1643_v58  ;;  %1031 = vadd.xlane.f32.xlu1 %v1030_v39  ;;  %v10838_v39 = vpop.permute.xlu1 %3794  ;;  %v8532_v58 = vunpack.i.l.bf16 %v10196_v28  ;;  %v10841_v6 = vpop.permute.xlu0 %3808 }
 0x315   : > { %14489 = vst [vmem:[#allocation155_spill] sm:$0xff] %v10838_v39  ;;  %14490 = vst [vmem:[#allocation159_spill] sm:$0xff] %v10841_v6 }
 0x316   : > { %v1036_v46 = vsel %vm945_vm2, %v8532_v58, 0.0  ;;  %v1628_v58 = vsel %vm945_vm2, %v10206_v2, 0.0 }
 0x318   : > { %1034 = vadd.xlane.f32.xlu0 %v1033_v4  ;;  %1055 = vadd.xlane.f32.xlu1 %v1054_v63  ;;  %v1646_v4 = vsel %vm945_vm2, %v14492_v12, 0.0  ;;  %v14494_v63 = vld [vmem:[#allocation76_spill] sm:$0xff]  ;;  %v10854_v6 = vpop.permute.xlu0 %8750  ;;  %v1060_v12 = vsel %vm945_vm2, %v8537_v52, 0.0  ;;  %v1631_v52 = vsel %vm945_vm2, %v10202_v45, 0.0 }
 0x319   : > { %14495 = vst [vmem:[#allocation160_spill] sm:$0xff] %v10854_v6 }
 0x31c   : > { %1058 = vadd.xlane.f32.xlu0 %v1057_v36  ;;  %1623 = vadd.xlane.f32.xlu1 %v1622_v60  ;;  %v10849_v36 = vpop.permute.xlu1 %3810  ;;  %v1649_v60 = vsel %vm945_vm2, %v14494_v63, 0.0  ;;  %v1063_v63 = vsel %vm945_vm2, %v8538_v47, 0.0  ;;  %v8543_v47 = vunpack.i.h.bf16 %v10224_v44 }
 0x31d   : > { %14493 = vst [vmem:[#allocation158_spill] sm:$0xff] %v10849_v36 }
 0x320   : > { %1626 = vadd.xlane.f32.xlu0 %v1625_v61  ;;  %1647 = vadd.xlane.f32.xlu1 %v1646_v4  ;;  %v1039_v61 = vsel %vm945_vm2, %v8533_v0, 0.0  ;;  %v10859_v28 = vpop.permute.xlu1 %3812  ;;  %v10861_v4 = vpop.permute.xlu0 %3814  ;;  %v14499_v0 = vld [vmem:[#allocation161_spill] sm:$0xff] }
 0x321   : > { %14496 = vst [vmem:[#allocation76_spill] sm:$0xff] %v10859_v28  ;;  %14497 = vst [vmem:[#allocation197_spill] sm:$0xff] %v10861_v4  ;;  %v14503_v4 = vld [vmem:[#allocation78_spill] sm:$0xff] }
 0x322   : > { %v8547_v45 = vunpack.i.l.bf16 %v14503_v4 }
 0x324   : > { %1650 = vadd.xlane.f32.xlu0 %v1649_v60  ;;  %1037 = vadd.xlane.f32.xlu1 %v1036_v46  ;;  %v8542_v46 = vunpack.i.l.bf16 %v10224_v44  ;;  %v10867_v3 = vpop.permute.xlu1 %8755  ;;  %v1652_v60 = vsel %vm945_vm2, %v14499_v0, 0.0  ;;  %v14505_v0 = vld [vmem:[#allocation162_spill] sm:$0xff]  ;;  %v8548_v44 = vunpack.i.h.bf16 %v14503_v4 }
 0x325   : > { %14498 = vst [vmem:[#allocation198_spill] sm:$0xff] %v10867_v3  ;;  %v8563_v3 = vunpack.i.h.bf16 %v10282_v18 }
 0x328   : > { %1040 = vadd.xlane.f32.xlu0 %v1039_v61  ;;  %1061 = vadd.xlane.f32.xlu1 %v1060_v12  ;;  %v10873_v61 = vpop.permute.xlu0 %3816  ;;  %v14501_v12 = vld [vmem:[#allocation75_spill] sm:$0xff] }
 0x329   : > { %14500 = vst [vmem:[#allocation161_spill] sm:$0xff] %v10873_v61  ;;  %v1655_v2 = vsel %vm945_vm2, %v14501_v12, 0.0  ;;  %v14506_v12 = vld [vmem:[#allocation165_spill] sm:$0xff] }
 0x32a   : > { %v8552_v61 = vunpack.i.l.bf16 %v14506_v12 }
 0x32c   : > { %1064 = vadd.xlane.f32.xlu0 %v1063_v63  ;;  %1629 = vadd.xlane.f32.xlu1 %v1628_v58  ;;  %v1066_v63 = vsel %vm945_vm2, %v8542_v46, 0.0  ;;  %v10879_v58 = vpop.permute.xlu1 %3818  ;;  %v10882_v28 = vpop.permute.xlu0 %3820  ;;  %v1090_v4 = vsel %vm945_vm2, %v8552_v61, 0.0  ;;  %v8568_v61 = vunpack.i.h.bf16 %v10278_v43 }
 0x32d   : > { %14502 = vst [vmem:[#allocation75_spill] sm:$0xff] %v10879_v58  ;;  %14504 = vst [vmem:[#allocation78_spill] sm:$0xff] %v10882_v28  ;;  %v1072_v58 = vsel %vm945_vm2, %v8547_v45, 0.0 }
 0x330   : > { %1632 = vadd.xlane.f32.xlu0 %v1631_v52  ;;  %1653 = vadd.xlane.f32.xlu1 %v1652_v60  ;;  %v1069_v52 = vsel %vm945_vm2, %v8543_v47, 0.0  ;;  %v1658_v60 = vsel %vm945_vm2, %v14505_v0, 0.0  ;;  %v10889_v46 = vpop.permute.xlu1 %3822  ;;  %v10894_v28 = vpop.permute.xlu0 %3824  ;;  %v14510_v47 = vld [vmem:[#allocation164_spill] sm:$0xff]  ;;  %v1075_v0 = vsel %vm945_vm2, %v8548_v44, 0.0 }
 0x331   : > { %14507 = vst [vmem:[#allocation162_spill] sm:$0xff] %v10889_v46  ;;  %14509 = vst [vmem:[#allocation165_spill] sm:$0xff] %v10894_v28  ;;  %v8557_v36 = vunpack.i.l.bf16 %v14510_v47 }
 0x334   : > { %1656 = vadd.xlane.f32.xlu0 %v1655_v2  ;;  %1067 = vadd.xlane.f32.xlu1 %v1066_v63  ;;  %v14508_v2 = vld [vmem:[#allocation163_spill] sm:$0xff] }
 0x335   : > { %v1661_v63 = vsel %vm945_vm2, %v14508_v2, 0.0  ;;  %v8558_v2 = vunpack.i.h.bf16 %v14510_v47  ;;  %v8562_v47 = vunpack.i.l.bf16 %v10282_v18  ;;  %v14517_v18 = vld [vmem:[#allocation168_spill] sm:$0xff] }
 0x338   : > { %1070 = vadd.xlane.f32.xlu0 %v1069_v52  ;;  %1659 = vadd.xlane.f32.xlu1 %v1658_v60  ;;  %v8553_v52 = vunpack.i.h.bf16 %v14506_v12  ;;  %v10900_v60 = vpop.permute.xlu1 %3826 }
 0x339   : > { %14511 = vst [vmem:[#allocation163_spill] sm:$0xff] %v10900_v60 }
 0x33a   : > { %v1093_v45 = vsel %vm945_vm2, %v8553_v52, 0.0  ;;  %v1099_v52 = vsel %vm945_vm2, %v8558_v2, 0.0  ;;  %v1682_v2 = vsel %vm945_vm2, %v14517_v18, 0.0  ;;  %v1078_v18 = vsel %vm945_vm2, %v8562_v47, 0.0  ;;  %v14523_v47 = vld [vmem:[#allocation82_spill] sm:$0xff] }
 0x33c   : > { %1662 = vadd.xlane.f32.xlu0 %v1661_v63  ;;  %1073 = vadd.xlane.f32.xlu1 %v1072_v58  ;;  %v1096_v58 = vsel %vm945_vm2, %v8557_v36, 0.0  ;;  %v14512_v63 = vld [vmem:[#allocation11_spill] sm:$0xff]  ;;  %v14514_v36 = vld [vmem:[#allocation166_spill] sm:$0xff] }
 0x340   : > { %1076 = vadd.xlane.f32.xlu0 %v1075_v0  ;;  %1091 = vadd.xlane.f32.xlu1 %v1090_v4  ;;  %v8567_v0 = vunpack.i.l.bf16 %v10278_v43  ;;  %v14513_v4 = vld [vmem:[#allocation12_spill] sm:$0xff]  ;;  %v14516_v43 = vld [vmem:[#allocation77_spill] sm:$0xff] }
 0x341   : > { %v948_v46 = vpop.xlane.xlu0 %947 }
 0x342   : > { %v2067_v28 = vmul.f32 %v14512_v63, %v948_v46  ;;  %v1664_v46 = vsel %vm945_vm2, %v14514_v36, 0.0  ;;  %v1685_v36 = vsel %vm945_vm2, %v14518_v19, 0.0  ;;  %v10937_v19 = vsel %vm945_vm2, %v8563_v3, 0.0 }
 0x343   : > { %v10946_v3 = vsel %vm945_vm2, %v14523_v47, 0.0  ;;  %v14528_v47 = vld [vmem:[#allocation13_spill] sm:$0xff] }
 0x344   : > { %1094 = vadd.xlane.f32.xlu0 %v1093_v45  ;;  %1097 = vadd.xlane.f32.xlu1 %v1096_v58  ;;  %v2131_v45 = vsel %vm1778_vm3, %v2067_v28, 0.0  ;;  %v14515_v58 = vld [vmem:[#allocation15_spill] sm:$0xff]  ;;  %v1691_v28 = vsel %vm945_vm2, %v10267_v59, 0.0 }
 0x345   : > { %v954_v12 = vpop.xlane.xlu0 %953  ;;  %v951_v44 = vpop.xlane.xlu1 %950 }
 0x346   : > { %v2068_v60 = vmul.f32 %v14513_v4, %v951_v44  ;;  %v2069_v39 = vmul.f32 %v14515_v58, %v954_v12  ;;  %v1667_v44 = vsel %vm945_vm2, %v14516_v43, 0.0  ;;  %v14519_v12 = vld [vmem:[#allocation16_spill] sm:$0xff] }
 0x348   : > { %v2132_v6 = vsel %vm1778_vm3, %v2068_v60, 0.0  ;;  %1100 = vadd.xlane.f32.xlu0 %v1099_v52  ;;  %1665 = vadd.xlane.f32.xlu1 %v1664_v46  ;;  %v1688_v60 = vsel %vm945_vm2, %v10271_v17, 0.0  ;;  %v10929_v52 = vsel %vm945_vm2, %v8567_v0, 0.0  ;;  %v14520_v46 = vld [vmem:[#allocation90_spill] sm:$0xff] }
 0x349   : > { %v2133_v38 = vadd.f32 %v2132_v6, %v2131_v45  ;;  %v957_v27 = vpop.xlane.xlu0 %956  ;;  %v960_v34 = vpop.xlane.xlu1 %959  ;;  %v10932_v6 = vsel %vm945_vm2, %v8568_v61, 0.0  ;;  %v8577_v45 = vunpack.i.l.bf16 %v14520_v46  ;;  %v8578_v59 = vunpack.i.h.bf16 %v14520_v46  ;;  %v14522_v61 = vld [vmem:[#allocation169_spill] sm:$0xff] }
 0x34a   : > { %v2070_v41 = vmul.f32 %v14519_v12, %v957_v27  ;;  %v2140_v27 = vsel %vm1778_vm3, %v2069_v39, 0.0  ;;  %v2071_v0 = vmul.f32 %v14521_v9, %v960_v34  ;;  %v8572_v35 = vunpack.i.l.bf16 %v14522_v61  ;;  %v14526_v34 = vld [vmem:[#allocation89_spill] sm:$0xff] }
 0x34b   : > { %v2134_v43 = vrot.slane %v2133_v38, 4  ;;  %v8573_v46 = vunpack.i.h.bf16 %v14522_v61 }
 0x34c   : > { %v2141_v17 = vsel %vm1778_vm3, %v2070_v41, 0.0  ;;  %1668 = vadd.xlane.f32.xlu0 %v1667_v44  ;;  %1683 = vadd.xlane.f32.xlu1 %v1682_v2  ;;  %v10952_v41 = vsel %vm945_vm2, %v14525_v51, 0.0  ;;  %v10956_v44 = vsel %vm945_vm2, %v14526_v34, 0.0  ;;  %v2149_v61 = vsel %vm1778_vm3, %v2071_v0, 0.0  ;;  %v14529_v0 = vld [vmem:[#allocation14_spill] sm:$0xff] }
 0x34d   : > { %v2135_v40 = vadd.f32 %v2134_v43, %v2133_v38  ;;  %v2142_v10 = vadd.f32 %v2141_v17, %v2140_v27  ;;  %v963_v25 = vpop.xlane.xlu0 %962  ;;  %v966_v31 = vpop.xlane.xlu1 %965  ;;  %v14527_v43 = vld [vmem:[#allocation91_spill] sm:$0xff]  ;;  %v10963_v17 = vsel %vm945_vm2, %v8577_v45, 0.0  ;;  %v10969_v34 = vsel %vm945_vm2, %v8578_v59, 0.0 }
 0x34e   : > { %v2072_v39 = vmul.f32 %v14524_v7, %v963_v25  ;;  %v10960_v27 = vsel %vm945_vm2, %v14527_v43, 0.0  ;;  %v2073_v51 = vmul.f32 %v14528_v47, %v966_v31  ;;  %v10972_v32 = vsel %vm945_vm2, %v8572_v35, 0.0  ;;  %v14530_v31 = vld [vmem:[#allocation79_spill] sm:$0xff] }
 0x34f   : > { %v2136_v38 = vrot.slane %v2135_v40, 2  ;;  %v2143_v2 = vrot.slane %v2142_v10, 4  ;;  %v8582_v45 = vunpack.i.l.bf16 %v10338_v57 }
 0x350   : > { %v2150_v25 = vsel %vm1778_vm3, %v2072_v39, 0.0  ;;  %1686 = vadd.xlane.f32.xlu0 %v1685_v36  ;;  %1689 = vadd.xlane.f32.xlu1 %v1688_v60  ;;  %v10977_v39 = vsel %vm945_vm2, %v8573_v46, 0.0  ;;  %v10981_v36 = vsel %vm945_vm2, %v14530_v31, 0.0 }
 0x351   : > { %v2137_v50 = vadd.f32 %v2136_v38, %v2135_v40  ;;  %v2144_v54 = vadd.f32 %v2143_v2, %v2142_v10  ;;  %v2151_v1 = vadd.f32 %v2150_v25, %v2149_v61  ;;  %v969_v20 = vpop.xlane.xlu0 %968  ;;  %v972_v43 = vpop.xlane.xlu1 %971  ;;  %v14531_v10 = vld [vmem:[#allocation80_spill] sm:$0xff]  ;;  %v14532_v38 = vld [vmem:[#allocation83_spill] sm:$0xff] }
 0x352   : > { %v2074_v26 = vmul.f32 %v14529_v0, %v969_v20  ;;  %v10985_v59 = vsel %vm945_vm2, %v14531_v10, 0.0  ;;  %v10989_v35 = vsel %vm945_vm2, %v14532_v38, 0.0  ;;  %v2158_v20 = vsel %vm1778_vm3, %v2073_v51, 0.0  ;;  %v14533_v61 = vld [vmem:[#allocation19_spill] sm:$0xff]  ;;  %v14534_v10 = vld [vmem:[#allocation81_spill] sm:$0xff] }
 0x353   : > { %v2145_v60 = vrot.slane %v2144_v54, 2  ;;  %v2152_v40 = vrot.slane %v2151_v1, 4  ;;  %v2138_v2 = vrot.slane %v2137_v50, 1  ;;  %v2075_v25 = vmul.f32 %v14533_v61, %v972_v43 }
 0x354   : > { %v2159_v46 = vsel %vm1778_vm3, %v2074_v26, 0.0  ;;  %1692 = vadd.xlane.f32.xlu0 %v1691_v28  ;;  %1079 = vadd.xlane.f32.xlu1 %v1078_v18  ;;  %v10996_v53 = vsel %vm945_vm2, %v14534_v10, 0.0  ;;  %v8583_v38 = vunpack.i.h.bf16 %v10338_v57  ;;  %v11001_v51 = vsel %vm945_vm2, %v8582_v45, 0.0  ;;  %v14536_v26 = vld [vmem:[#allocation73_spill] sm:$0xff] }
 0x355   : > { %v2146_v31 = vadd.f32 %v2145_v60, %v2144_v54  ;;  %v2153_v24 = vadd.f32 %v2152_v40, %v2151_v1  ;;  %v2160_v30 = vadd.f32 %v2159_v46, %v2158_v20  ;;  %v975_v13 = vpop.xlane.xlu0 %974  ;;  %v978_v48 = vpop.xlane.xlu1 %977  ;;  %v11005_v28 = vsel %vm945_vm2, %v14536_v26, 0.0  ;;  %v14537_v20 = vld [vmem:[#allocation17_spill] sm:$0xff] }
 0x356   : > { %v2076_v55 = vmul.f32 %v14535_v29, %v975_v13  ;;  %v2139_v43 = vadd.f32 %v2138_v2, %v2137_v50  ;;  %v2167_v60 = vsel %vm1778_vm3, %v2075_v25, 0.0  ;;  %v2077_v57 = vmul.f32 %v14537_v20, %v978_v48  ;;  %v14539_v2 = vld [vmem:[#allocation18_spill] sm:$0xff] }
 0x357   : > { %v2147_v1 = vrot.slane %v2146_v31, 1  ;;  %v2154_v54 = vrot.slane %v2153_v24, 2  ;;  %v2161_v18 = vrot.slane %v2160_v30, 4  ;;  %v8587_v50 = vunpack.i.l.bf16 %v14538_v49 }
 0x358   : > { %v2168_v40 = vsel %vm1778_vm3, %v2076_v55, 0.0  ;;  %1082 = vadd.xlane.f32.xlu0 %v10937_v19  ;;  %1103 = vadd.xlane.f32.xlu1 %v10929_v52  ;;  %v11016_v55 = vsel %vm945_vm2, %v8583_v38, 0.0 }
 0x359   : > { %v2148_v13 = vadd.f32 %v2147_v1, %v2146_v31  ;;  %v2155_v45 = vadd.f32 %v2154_v54, %v2153_v24  ;;  %v2162_v46 = vadd.f32 %v2161_v18, %v2160_v30  ;;  %v2169_v10 = vadd.f32 %v2168_v40, %v2167_v60  ;;  %v981_v26 = vpop.xlane.xlu0 %980  ;;  %v996_v11 = vpop.xlane.xlu1 %995  ;;  %v14540_v31 = vld [vmem:[#allocation23_spill] sm:$0xff]  ;;  %v14541_v40 = vld [vmem:[#allocation24_spill] sm:$0xff] }
 0x35a   : > { %v2078_v25 = vmul.f32 %v14539_v2, %v981_v26  ;;  %v2176_v24 = vsel %vm1778_vm3, %v2077_v57, 0.0  ;;  %v2083_v1 = vmul.f32 %v14540_v31, %v996_v11  ;;  %v14542_v26 = vld [vmem:[#allocation96_spill] sm:$0xff]  ;;  %v11033_v11 = vsel %vm945_vm2, %v8588_v16, 0.0 }
 0x35b   : > { %v5180_v48 = vsel %vm5109_vm4, %v2148_v13, %v2139_v43  ;;  %v2156_v19 = vrot.slane %v2155_v45, 1  ;;  %v2163_v20 = vrot.slane %v2162_v46, 2  ;;  %v2170_v52 = vrot.slane %v2169_v10, 4 }
 0x35c   : > { %v2177_v30 = vsel %vm1778_vm3, %v2078_v25, 0.0  ;;  %1106 = vadd.xlane.f32.xlu0 %v10932_v6  ;;  %1671 = vadd.xlane.f32.xlu1 %v10952_v41  ;;  %v11027_v57 = vsel %vm945_vm2, %v14542_v26, 0.0  ;;  %v11030_v25 = vsel %vm945_vm2, %v8587_v50, 0.0 }
 0x35d   : > { %v2157_v49 = vadd.f32 %v2156_v19, %v2155_v45  ;;  %v2164_v54 = vadd.f32 %v2163_v20, %v2162_v46  ;;  %v2171_v38 = vadd.f32 %v2170_v52, %v2169_v10  ;;  %v2178_v18 = vadd.f32 %v2177_v30, %v2176_v24  ;;  %v999_v60 = vpop.xlane.xlu0 %998  ;;  %v1002_v43 = vpop.xlane.xlu1 %1001  ;;  %v14543_v19 = vld [vmem:[#allocation21_spill] sm:$0xff] }
 0x35e   : > { %v2084_v13 = vmul.f32 %v14541_v40, %v999_v60  ;;  %v2203_v46 = vsel %vm1778_vm3, %v2083_v1, 0.0  ;;  %v2085_v52 = vmul.f32 %v14543_v19, %v1002_v43  ;;  %v14544_v40 = vld [vmem:[#allocation22_spill] sm:$0xff] }
 0x35f   : > { %v2165_v6 = vrot.slane %v2164_v54, 1  ;;  %v2172_v41 = vrot.slane %v2171_v38, 2  ;;  %v2179_v45 = vrot.slane %v2178_v18, 4  ;;  %v5181_v20 = vsel %vm5111_vm5, %v2157_v49, %v5180_v48  ;;  %v14545_v48 = vld [vmem:[#allocation170_spill] sm:$0xff]  ;;  %v14546_v49 = vld [vmem:[#allocation85_spill] sm:$0xff] }
 0x360   : > { %v2204_v10 = vsel %vm1778_vm3, %v2084_v13, 0.0  ;;  %1674 = vadd.xlane.f32.xlu0 %v10946_v3  ;;  %1695 = vadd.xlane.f32.xlu1 %v10960_v27  ;;  %v11044_v1 = vsel %vm945_vm2, %v14545_v48, 0.0  ;;  %v11048_v43 = vsel %vm945_vm2, %v14546_v49, 0.0  ;;  %v11052_v3 = vsel %vm945_vm2, %v10360_v8, 0.0 }
 0x361   : > { %v2166_v50 = vadd.f32 %v2165_v6, %v2164_v54  ;;  %v2173_v24 = vadd.f32 %v2172_v41, %v2171_v38  ;;  %v2180_v16 = vadd.f32 %v2179_v45, %v2178_v18  ;;  %v2205_v30 = vadd.f32 %v2204_v10, %v2203_v46  ;;  %v1005_v60 = vpop.xlane.xlu0 %1004  ;;  %v1588_v26 = vpop.xlane.xlu1 %1587 }
 0x362   : > { %v2086_v31 = vmul.f32 %v14544_v40, %v1005_v60  ;;  %v2212_v13 = vsel %vm1778_vm3, %v2085_v52, 0.0  ;;  %v2419_v41 = vmul.f32 %v14512_v63, %v1588_v26  ;;  %v8593_v49 = vunpack.i.h.bf16 %v10380_v37  ;;  %v14556_v40 = vld [vmem:[#allocation94_spill] sm:$0xff] }
 0x363   : > { %v2174_v27 = vrot.slane %v2173_v24, 1  ;;  %v2181_v54 = vrot.slane %v2180_v16, 2  ;;  %v2206_v38 = vrot.slane %v2205_v30, 4  ;;  %v5182_v18 = vsel %vm5113_vm6, %v2166_v50, %v5181_v20 }
 0x364   : > { %v2213_v6 = vsel %vm1778_vm3, %v2086_v31, 0.0  ;;  %1698 = vadd.xlane.f32.xlu0 %v10956_v44  ;;  %1085 = vadd.xlane.f32.xlu1 %v10972_v32  ;;  %v8592_v20 = vunpack.i.l.bf16 %v10380_v37  ;;  %v14547_v31 = vld [vmem:[#allocation86_spill] sm:$0xff] }
 0x365   : > { %v2175_v45 = vadd.f32 %v2174_v27, %v2173_v24  ;;  %v2182_v46 = vadd.f32 %v2181_v54, %v2180_v16  ;;  %v2207_v8 = vadd.f32 %v2206_v38, %v2205_v30  ;;  %v2214_v10 = vadd.f32 %v2213_v6, %v2212_v13  ;;  %v1591_v60 = vpop.xlane.xlu0 %1590  ;;  %v1594_v48 = vpop.xlane.xlu1 %1593 }
 0x366   : > { %v2420_v52 = vmul.f32 %v14513_v4, %v1591_v60  ;;  %v11065_v50 = vsel %vm945_vm2, %v14547_v31, 0.0  ;;  %v2483_v16 = vsel %vm1778_vm3, %v2419_v41, 0.0  ;;  %v2421_v27 = vmul.f32 %v14515_v58, %v1594_v48  ;;  %v14553_v58 = vld [vmem:[#allocation93_spill] sm:$0xff] }
 0x367   : > { %v2183_v44 = vrot.slane %v2182_v46, 1  ;;  %v2208_v26 = vrot.slane %v2207_v8, 2  ;;  %v2215_v32 = vrot.slane %v2214_v10, 4  ;;  %v5183_v24 = vsel %vm5115_vm7, %v2175_v45, %v5182_v18  ;;  %v14548_v18 = vld [vmem:[#allocation88_spill] sm:$0xff]  ;;  %v14549_v45 = vld [vmem:[#allocation87_spill] sm:$0xff] }
 0x368   : > { %v2484_v30 = vsel %vm1778_vm3, %v2420_v52, 0.0  ;;  %1088 = vadd.xlane.f32.xlu0 %v10977_v39  ;;  %1109 = vadd.xlane.f32.xlu1 %v10963_v17  ;;  %v11076_v41 = vsel %vm945_vm2, %v14548_v18, 0.0  ;;  %v11080_v48 = vsel %vm945_vm2, %v14549_v45, 0.0  ;;  %v14550_v39 = vld [vmem:[#allocation95_spill] sm:$0xff] }
 0x369   : > { %v2184_v37 = vadd.f32 %v2183_v44, %v2182_v46  ;;  %v2209_v54 = vadd.f32 %v2208_v26, %v2207_v8  ;;  %v2216_v38 = vadd.f32 %v2215_v32, %v2214_v10  ;;  %v2485_v13 = vadd.f32 %v2484_v30, %v2483_v16  ;;  %v1597_v6 = vpop.xlane.xlu0 %1596  ;;  %v984_v60 = vpop.xlane.xlu1 %983  ;;  %v14551_v16 = vld [vmem:[#allocation27_spill] sm:$0xff] }
 0x36a   : > { %v2422_v31 = vmul.f32 %v14519_v12, %v1597_v6  ;;  %v11084_v17 = vsel %vm945_vm2, %v14550_v39, 0.0  ;;  %v11087_v10 = vsel %vm945_vm2, %v8592_v20, 0.0  ;;  %v2492_v26 = vsel %vm1778_vm3, %v2421_v27, 0.0 }
 0x36b   : > { %v2217_v46 = vrot.slane %v2216_v38, 2  ;;  %v2486_v8 = vrot.slane %v2485_v13, 4  ;;  %v11090_v52 = vsel %vm5117_vm8, %v2184_v37, %v5183_v24  ;;  %v2210_v44 = vrot.slane %v2209_v54, 1  ;;  %v14552_v37 = vld [vmem:[#allocation28_spill] sm:$0xff] }
 0x36c   : > { %v2493_v32 = vsel %vm1778_vm3, %v2422_v31, 0.0  ;;  %v2079_v30 = vmul.f32 %v14551_v16, %v984_v60  ;;  %1112 = vadd.xlane.f32.xlu0 %v10969_v34  ;;  %1677 = vadd.xlane.f32.xlu1 %v10985_v59  ;;  %v11098_v12 = vsel %vm945_vm2, %v8593_v49, 0.0  ;;  %v8598_v24 = vunpack.i.h.bf16 %v10396_v33  ;;  %v14555_v16 = vld [vmem:[#allocation26_spill] sm:$0xff] }
 0x36d   : > { %v2218_v6 = vadd.f32 %v2217_v46, %v2216_v38  ;;  %v2487_v18 = vadd.f32 %v2486_v8, %v2485_v13  ;;  %v2494_v45 = vadd.f32 %v2493_v32, %v2492_v26  ;;  %v987_v39 = vpop.xlane.xlu0 %986  ;;  %v1008_v20 = vpop.xlane.xlu1 %1007  ;;  %v8597_v27 = vunpack.i.l.bf16 %v10396_v33  ;;  %v14554_v26 = vld [vmem:[#allocation25_spill] sm:$0xff] }
 0x36e   : > { %v2080_v31 = vmul.f32 %v14552_v37, %v987_v39  ;;  %v11105_v60 = vsel %vm945_vm2, %v14553_v58, 0.0  ;;  %v11109_v13 = vsel %vm945_vm2, %v10392_v62, 0.0  ;;  %v2211_v46 = vadd.f32 %v2210_v44, %v2209_v54 }
 0x36f   : > { %v2219_v34 = vrot.slane %v2218_v6, 1  ;;  %v2488_v59 = vrot.slane %v2487_v18, 2  ;;  %v2495_v38 = vrot.slane %v2494_v45, 4  ;;  %v2185_v49 = vsel %vm1778_vm3, %v2079_v30, 0.0 }
 0x370   : > { %v2186_v8 = vsel %vm1778_vm3, %v2080_v31, 0.0  ;;  %v2087_v33 = vmul.f32 %v14554_v26, %v1008_v20  ;;  %1680 = vadd.xlane.f32.xlu0 %v10981_v36  ;;  %1701 = vadd.xlane.f32.xlu1 %v10996_v53  ;;  %v11119_v54 = vsel %vm945_vm2, %v14556_v40, 0.0  ;;  %v11122_v44 = vsel %vm945_vm2, %v8597_v27, 0.0 }
 0x371   : > { %v2220_v58 = vadd.f32 %v2219_v34, %v2218_v6  ;;  %v2489_v32 = vadd.f32 %v2488_v59, %v2487_v18  ;;  %v2496_v39 = vadd.f32 %v2495_v38, %v2494_v45  ;;  %v2187_v4 = vadd.f32 %v2186_v8, %v2185_v49  ;;  %v1011_v63 = vpop.xlane.xlu0 %1010  ;;  %v1600_v37 = vpop.xlane.xlu1 %1599  ;;  %v14557_v38 = vld [vmem:[#allocation98_spill] sm:$0xff] }
 0x372   : > { %v2088_v62 = vmul.f32 %v14555_v16, %v1011_v63  ;;  %v11125_v30 = vsel %vm945_vm2, %v8598_v24, 0.0  ;;  %v11132_v18 = vsel %vm945_vm2, %v10406_v22, 0.0  ;;  %v2221_v45 = vsel %vm1778_vm3, %v2087_v33, 0.0 }
 0x373   : > { %v11128_v53 = vsel %vm5109_vm4, %v2220_v58, %v2211_v46  ;;  %v2497_v36 = vrot.slane %v2496_v39, 2  ;;  %v2188_v6 = vrot.slane %v2187_v4, 4  ;;  %v2490_v63 = vrot.slane %v2489_v32, 1 }
 0x374   : > { %v2222_v40 = vsel %vm1778_vm3, %v2088_v62, 0.0  ;;  %v2423_v20 = vmul.f32 %v14521_v9, %v1600_v37  ;;  %1704 = vadd.xlane.f32.xlu0 %v10989_v35  ;;  %1115 = vadd.xlane.f32.xlu1 %v11001_v51  ;;  %v11141_v22 = vsel %vm945_vm2, %v14557_v38, 0.0  ;;  %v8607_v46 = vunpack.i.l.bf16 %v10426_v5  ;;  %v14558_v35 = vld [vmem:[#allocation100_spill] sm:$0xff] }
 0x375   : > { %v2498_v24 = vadd.f32 %v2497_v36, %v2496_v39  ;;  %v2189_v27 = vadd.f32 %v2188_v6, %v2187_v4  ;;  %v2223_v31 = vadd.f32 %v2222_v40, %v2221_v45  ;;  %v1603_v34 = vpop.xlane.xlu0 %1602  ;;  %v990_v59 = vpop.xlane.xlu1 %989  ;;  %v11147_v37 = vsel %vm945_vm2, %v10420_v23, 0.0  ;;  %v14559_v6 = vld [vmem:[#allocation31_spill] sm:$0xff] }
 0x376   : > { %v2424_v49 = vmul.f32 %v14524_v7, %v1603_v34  ;;  %v11151_v51 = vsel %vm945_vm2, %v14558_v35, 0.0  ;;  %v8608_v4 = vunpack.i.h.bf16 %v10426_v5  ;;  %v2491_v39 = vadd.f32 %v2490_v63, %v2489_v32  ;;  %v14560_v7 = vld [vmem:[#allocation102_spill] sm:$0xff]  ;;  %v14561_v63 = vld [vmem:[#allocation32_spill] sm:$0xff] }
 0x377   : > { %v2499_v8 = vrot.slane %v2498_v24, 1  ;;  %v2190_v33 = vrot.slane %v2189_v27, 2  ;;  %v2224_v58 = vrot.slane %v2223_v31, 4  ;;  %v2501_v62 = vsel %vm1778_vm3, %v2423_v20, 0.0 }
 0x378   : > { %v2502_v36 = vsel %vm1778_vm3, %v2424_v49, 0.0  ;;  %v2081_v45 = vmul.f32 %v14559_v6, %v990_v59  ;;  %1118 = vadd.xlane.f32.xlu0 %v11016_v55  ;;  %1707 = vadd.xlane.f32.xlu1 %v11005_v28  ;;  %v8603_v9 = vunpack.i.h.bf16 %v14560_v7  ;;  %v8602_v32 = vunpack.i.l.bf16 %v14560_v7 }
 0x379   : > { %v2500_v23 = vadd.f32 %v2499_v8, %v2498_v24  ;;  %v2191_v40 = vadd.f32 %v2190_v33, %v2189_v27  ;;  %v2225_v34 = vadd.f32 %v2224_v58, %v2223_v31  ;;  %v2503_v38 = vadd.f32 %v2502_v36, %v2501_v62  ;;  %v993_v35 = vpop.xlane.xlu0 %992  ;;  %v1014_v5 = vpop.xlane.xlu1 %1013  ;;  %v14562_v8 = vld [vmem:[#allocation29_spill] sm:$0xff] }
 0x37a   : > { %v2082_v20 = vmul.f32 %v14561_v63, %v993_v35  ;;  %v11163_v49 = vsel %vm945_vm2, %v8607_v46, 0.0  ;;  %v2194_v27 = vsel %vm1778_vm3, %v2081_v45, 0.0  ;;  %v2089_v33 = vmul.f32 %v14562_v8, %v1014_v5 }
 0x37b   : > { %v11166_v59 = vsel %vm5109_vm4, %v2500_v23, %v2491_v39  ;;  %v2192_v55 = vrot.slane %v2191_v40, 1  ;;  %v2226_v28 = vrot.slane %v2225_v34, 2  ;;  %v2504_v24 = vrot.slane %v2503_v38, 4  ;;  %v14563_v23 = vld [vmem:[#allocation30_spill] sm:$0xff] }
 0x37c   : > { %v2195_v31 = vsel %vm1778_vm3, %v2082_v20, 0.0  ;;  %1710 = vadd.xlane.f32.xlu0 %v11027_v57  ;;  %1121 = vadd.xlane.f32.xlu1 %v11030_v25  ;;  %v11175_v63 = vsel %vm945_vm2, %v8602_v32, 0.0  ;;  %v11178_v45 = vsel %vm945_vm2, %v8603_v9, 0.0  ;;  %v11181_v5 = vsel %vm945_vm2, %v8608_v4, 0.0 }
 0x37d   : > { %v2227_v7 = vadd.f32 %v2226_v28, %v2225_v34  ;;  %v2505_v46 = vadd.f32 %v2504_v24, %v2503_v38  ;;  %v2196_v58 = vadd.f32 %v2195_v31, %v2194_v27  ;;  %v1017_v62 = vpop.xlane.xlu0 %1016  ;;  %v1606_v39 = vpop.xlane.xlu1 %1605  ;;  %v2193_v36 = vadd.f32 %v2192_v55, %v2191_v40 }
 0x37e   : > { %v2090_v35 = vmul.f32 %v14563_v23, %v1017_v62  ;;  %v2230_v38 = vsel %vm1778_vm3, %v2089_v33, 0.0  ;;  %v2425_v55 = vmul.f32 %v14528_v47, %v1606_v39  ;;  %v11192_v9 = vsel %vm945_vm2, %v10436_v42, 0.0  ;;  %v14564_v62 = vld [vmem:[#allocation97_spill] sm:$0xff] }
 0x37f   : > { %v2228_v57 = vrot.slane %v2227_v7, 1  ;;  %v2506_v25 = vrot.slane %v2505_v46, 2  ;;  %v2197_v20 = vrot.slane %v2196_v58, 4  ;;  %v5185_v34 = vsel %vm5119_vm9, %v2193_v36, %v11090_v52 }
 0x380   : > { %v2231_v40 = vsel %vm1778_vm3, %v2090_v35, 0.0  ;;  %1124 = vadd.xlane.f32.xlu0 %v11033_v11  ;;  %1713 = vadd.xlane.f32.xlu1 %v11044_v1  ;;  %v8612_v31 = vunpack.i.l.bf16 %v10449_v21  ;;  %v11198_v39 = vsel %vm945_vm2, %v14564_v62, 0.0  ;;  %v14565_v11 = vld [vmem:[#allocation101_spill] sm:$0xff]  ;;  %v2510_v35 = vsel %vm1778_vm3, %v2425_v55, 0.0 }
 0x381   : > { %v2229_v4 = vadd.f32 %v2228_v57, %v2227_v7  ;;  %v2507_v32 = vadd.f32 %v2506_v25, %v2505_v46  ;;  %v2198_v28 = vadd.f32 %v2197_v20, %v2196_v58  ;;  %v2232_v24 = vadd.f32 %v2231_v40, %v2230_v38  ;;  %v1609_v27 = vpop.xlane.xlu0 %1608  ;;  %v1020_v52 = vpop.xlane.xlu1 %1019  ;;  %v14566_v25 = vld [vmem:[#allocation35_spill] sm:$0xff] }
 0x382   : > { %v2426_v33 = vmul.f32 %v14529_v0, %v1609_v27  ;;  %v11202_v1 = vsel %vm945_vm2, %v14565_v11, 0.0  ;;  %v8613_v58 = vunpack.i.h.bf16 %v10449_v21  ;;  %v2091_v20 = vmul.f32 %v14566_v25, %v1020_v52 }
 0x383   : > { %v2508_v42 = vrot.slane %v2507_v32, 1  ;;  %v2199_v36 = vrot.slane %v2198_v28, 2  ;;  %v2233_v7 = vrot.slane %v2232_v24, 4  ;;  %v5188_v46 = vsel %vm5111_vm5, %v2229_v4, %v11128_v53  ;;  %v14567_v4 = vld [vmem:[#allocation36_spill] sm:$0xff] }
 0x384   : > { %v2511_v57 = vsel %vm1778_vm3, %v2426_v33, 0.0  ;;  %1716 = vadd.xlane.f32.xlu0 %v11048_v43  ;;  %1731 = vadd.xlane.f32.xlu1 %v11065_v50  ;;  %v8618_v53 = vunpack.i.h.bf16 %v10453_v15  ;;  %v8617_v21 = vunpack.i.l.bf16 %v10453_v15  ;;  %v11216_v33 = vsel %vm945_vm2, %v8612_v31, 0.0 }
 0x385   : > { %v2509_v38 = vadd.f32 %v2508_v42, %v2507_v32  ;;  %v2200_v40 = vadd.f32 %v2199_v36, %v2198_v28  ;;  %v2234_v27 = vadd.f32 %v2233_v7, %v2232_v24  ;;  %v2512_v62 = vadd.f32 %v2511_v57, %v2510_v35  ;;  %v1023_v11 = vpop.xlane.xlu0 %1022  ;;  %v1612_v0 = vpop.xlane.xlu1 %1611 }
 0x386   : > { %v2092_v55 = vmul.f32 %v14567_v4, %v1023_v11  ;;  %v2239_v32 = vsel %vm1778_vm3, %v2091_v20, 0.0  ;;  %v2427_v24 = vmul.f32 %v14533_v61, %v1612_v0  ;;  %v14568_v20 = vld [vmem:[#allocation99_spill] sm:$0xff]  ;;  %v11234_v0 = vsel %vm945_vm2, %v8617_v21, 0.0  ;;  %v14570_v11 = vld [vmem:[#allocation33_spill] sm:$0xff] }
 0x387   : > { %v2235_v52 = vrot.slane %v2234_v27, 2  ;;  %v2513_v47 = vrot.slane %v2512_v62, 4  ;;  %v2201_v43 = vrot.slane %v2200_v40, 1  ;;  %v5289_v50 = vsel %vm5111_vm5, %v2509_v38, %v11166_v59 }
 0x388   : > { %v2240_v28 = vsel %vm1778_vm3, %v2092_v55, 0.0  ;;  %1734 = vadd.xlane.f32.xlu0 %v11052_v3  ;;  %1737 = vadd.xlane.f32.xlu1 %v11076_v41  ;;  %v11227_v59 = vsel %vm945_vm2, %v8613_v58, 0.0  ;;  %v11231_v38 = vsel %vm945_vm2, %v14568_v20, 0.0  ;;  %v11245_v55 = vsel %vm945_vm2, %v8618_v53, 0.0 }
 0x389   : > { %v2236_v15 = vadd.f32 %v2235_v52, %v2234_v27  ;;  %v2514_v31 = vadd.f32 %v2513_v47, %v2512_v62  ;;  %v2241_v42 = vadd.f32 %v2240_v28, %v2239_v32  ;;  %v1615_v36 = vpop.xlane.xlu0 %1614  ;;  %v1026_v7 = vpop.xlane.xlu1 %1025  ;;  %v2202_v35 = vadd.f32 %v2201_v43, %v2200_v40 }
 0x38a   : > { %v2428_v57 = vmul.f32 %v14535_v29, %v1615_v36  ;;  %v2519_v40 = vsel %vm1778_vm3, %v2427_v24, 0.0  ;;  %v2093_v58 = vmul.f32 %v14570_v11, %v1026_v7  ;;  %v14571_v36 = vld [vmem:[#allocation34_spill] sm:$0xff]  ;;  %v11250_v24 = vsel %vm945_vm2, %v10464_v56, 0.0  ;;  %v14572_v7 = vld [vmem:[#allocation104_spill] sm:$0xff]  ;;  %v14577_v29 = vld [vmem:[#allocation103_spill] sm:$0xff] }
 0x38b   : > { %v2237_v3 = vrot.slane %v2236_v15, 1  ;;  %v2515_v41 = vrot.slane %v2514_v31, 2  ;;  %v2242_v27 = vrot.slane %v2241_v42, 4  ;;  %v11237_v47 = vsel %vm5121_vm10, %v2202_v35, %v5185_v34 }
 0x38c   : > { %14569 = vst [vmem:[#allocation164_spill] sm:$0xff] %v11237_v47  ;;  %v2520_v62 = vsel %vm1778_vm3, %v2428_v57, 0.0  ;;  %1740 = vadd.xlane.f32.xlu0 %v11080_v48  ;;  %1127 = vadd.xlane.f32.xlu1 %v11087_v10  ;;  %v11254_v48 = vsel %vm945_vm2, %v14572_v7, 0.0  ;;  %v11258_v10 = vsel %vm945_vm2, %v10472_v14, 0.0  ;;  %v2248_v57 = vsel %vm1778_vm3, %v2093_v58, 0.0  ;;  %v14576_v47 = vld [vmem:[#allocation40_spill] sm:$0xff] }
 0x38d   : > { %v2238_v21 = vadd.f32 %v2237_v3, %v2236_v15  ;;  %v2516_v52 = vadd.f32 %v2515_v41, %v2514_v31  ;;  %v2243_v43 = vadd.f32 %v2242_v27, %v2241_v42  ;;  %v2521_v32 = vadd.f32 %v2520_v62, %v2519_v40  ;;  %v1029_v28 = vpop.xlane.xlu0 %1028  ;;  %v1044_v34 = vpop.xlane.xlu1 %1043  ;;  %v14573_v3 = vld [vmem:[#allocation39_spill] sm:$0xff]  ;;  %v14574_v41 = vld [vmem:[#allocation108_spill] sm:$0xff] }
 0x38e   : > { %v2094_v35 = vmul.f32 %v14571_v36, %v1029_v28  ;;  %v2099_v56 = vmul.f32 %v14573_v3, %v1044_v34  ;;  %v11268_v27 = vsel %vm945_vm2, %v14574_v41, 0.0  ;;  %v14589_v36 = vld [vmem:[#allocation24_spill] sm:$0xff] }
 0x38f   : > { %v2517_v53 = vrot.slane %v2516_v52, 1  ;;  %v2244_v15 = vrot.slane %v2243_v43, 2  ;;  %v2522_v31 = vrot.slane %v2521_v32, 4  ;;  %v5189_v42 = vsel %vm5113_vm6, %v2238_v21, %v5188_v46  ;;  %v14575_v21 = vld [vmem:[#allocation114_spill] sm:$0xff] }
 0x390   : > { %v2249_v20 = vsel %vm1778_vm3, %v2094_v35, 0.0  ;;  %1130 = vadd.xlane.f32.xlu0 %v11098_v12  ;;  %1719 = vadd.xlane.f32.xlu1 %v11084_v17  ;;  %v8623_v58 = vunpack.i.h.bf16 %v14575_v21  ;;  %v8622_v35 = vunpack.i.l.bf16 %v14575_v21  ;;  %v11275_v12 = vsel %vm945_vm2, %v14577_v29, 0.0 }
 0x391   : > { %v2518_v14 = vadd.f32 %v2517_v53, %v2516_v52  ;;  %v2245_v40 = vadd.f32 %v2244_v15, %v2243_v43  ;;  %v2523_v62 = vadd.f32 %v2522_v31, %v2521_v32  ;;  %v2250_v28 = vadd.f32 %v2249_v20, %v2248_v57  ;;  %v1047_v7 = vpop.xlane.xlu0 %1046  ;;  %v1050_v46 = vpop.xlane.xlu1 %1049  ;;  %v14578_v53 = vld [vmem:[#allocation37_spill] sm:$0xff]  ;;  %v14579_v31 = vld [vmem:[#allocation110_spill] sm:$0xff] }
 0x392   : > { %v2100_v34 = vmul.f32 %v14576_v47, %v1047_v7  ;;  %v2275_v43 = vsel %vm1778_vm3, %v2099_v56, 0.0  ;;  %v2101_v15 = vmul.f32 %v14578_v53, %v1050_v46  ;;  %v11285_v57 = vsel %vm945_vm2, %v14579_v31, 0.0 }
 0x393   : > { %v2246_v17 = vrot.slane %v2245_v40, 1  ;;  %v2524_v61 = vrot.slane %v2523_v62, 2  ;;  %v2251_v41 = vrot.slane %v2250_v28, 4  ;;  %v5290_v52 = vsel %vm5113_vm6, %v2518_v14, %v5289_v50  ;;  %v14580_v14 = vld [vmem:[#allocation38_spill] sm:$0xff] }
 0x394   : > { %v2276_v32 = vsel %vm1778_vm3, %v2100_v34, 0.0  ;;  %1722 = vadd.xlane.f32.xlu0 %v11109_v13  ;;  %1743 = vadd.xlane.f32.xlu1 %v11105_v60  ;;  %v11289_v34 = vsel %vm945_vm2, %v8622_v35, 0.0  ;;  %v11292_v46 = vsel %vm945_vm2, %v8623_v58, 0.0  ;;  %v14581_v13 = vld [vmem:[#allocation113_spill] sm:$0xff]  ;;  %v14583_v58 = vld [vmem:[#allocation106_spill] sm:$0xff] }
 0x395   : > { %v2247_v29 = vadd.f32 %v2246_v17, %v2245_v40  ;;  %v2525_v20 = vadd.f32 %v2524_v61, %v2523_v62  ;;  %v2252_v7 = vadd.f32 %v2251_v41, %v2250_v28  ;;  %v2277_v21 = vadd.f32 %v2276_v32, %v2275_v43  ;;  %v1053_v47 = vpop.xlane.xlu0 %1052  ;;  %v1618_v50 = vpop.xlane.xlu1 %1617 }
 0x396   : > { %v2102_v56 = vmul.f32 %v14580_v14, %v1053_v47  ;;  %v11296_v60 = vsel %vm945_vm2, %v14581_v13, 0.0  ;;  %v2284_v62 = vsel %vm1778_vm3, %v2101_v15, 0.0  ;;  %v14582_v47 = vld [vmem:[#allocation17_spill] sm:$0xff]  ;;  %v11306_v35 = vsel %vm945_vm2, %v14583_v58, 0.0 }
 0x397   : > { %v2526_v31 = vrot.slane %v2525_v20, 1  ;;  %v2253_v53 = vrot.slane %v2252_v7, 2  ;;  %v2278_v40 = vrot.slane %v2277_v21, 4  ;;  %v5190_v61 = vsel %vm5115_vm7, %v2247_v29, %v5189_v42  ;;  %v14584_v29 = vld [vmem:[#allocation121_spill] sm:$0xff] }
 0x398   : > { %v2285_v28 = vsel %vm1778_vm3, %v2102_v56, 0.0  ;;  %v2429_v17 = vmul.f32 %v14582_v47, %v1618_v50  ;;  %1746 = vadd.xlane.f32.xlu0 %v11119_v54  ;;  %1133 = vadd.xlane.f32.xlu1 %v11122_v44  ;;  %v8628_v15 = vunpack.i.h.bf16 %v14584_v29  ;;  %v8627_v56 = vunpack.i.l.bf16 %v14584_v29  ;;  %v14585_v47 = vld [vmem:[#allocation105_spill] sm:$0xff] }
 0x399   : > { %v2527_v41 = vadd.f32 %v2526_v31, %v2525_v20  ;;  %v2254_v43 = vadd.f32 %v2253_v53, %v2252_v7  ;;  %v2279_v32 = vadd.f32 %v2278_v40, %v2277_v21  ;;  %v2286_v13 = vadd.f32 %v2285_v28, %v2284_v62  ;;  %v1621_v14 = vpop.xlane.xlu0 %1620  ;;  %v1636_v42 = vpop.xlane.xlu1 %1635  ;;  %v14586_v21 = vld [vmem:[#allocation23_spill] sm:$0xff] }
 0x39a   : > { %v2430_v50 = vmul.f32 %v14539_v2, %v1621_v14  ;;  %v11313_v54 = vsel %vm945_vm2, %v14585_v47, 0.0  ;;  %v2528_v53 = vsel %vm1778_vm3, %v2429_v17, 0.0  ;;  %v2435_v31 = vmul.f32 %v14586_v21, %v1636_v42  ;;  %v14587_v14 = vld [vmem:[#allocation122_spill] sm:$0xff]  ;;  %v14588_v2 = vld [vmem:[#allocation107_spill] sm:$0xff] }
 0x39b   : > { %v2255_v44 = vrot.slane %v2254_v43, 1  ;;  %v2280_v3 = vrot.slane %v2279_v32, 2  ;;  %v2287_v58 = vrot.slane %v2286_v13, 4  ;;  %v11316_v20 = vsel %vm5115_vm7, %v2527_v41, %v5290_v52 }
 0x39c   : > { %v2529_v7 = vsel %vm1778_vm3, %v2430_v50, 0.0  ;;  %1136 = vadd.xlane.f32.xlu0 %v11125_v30  ;;  %1725 = vadd.xlane.f32.xlu1 %v11141_v22  ;;  %v11325_v40 = vsel %vm945_vm2, %v14587_v14, 0.0  ;;  %v8632_v17 = vunpack.i.l.bf16 %v14588_v2  ;;  %v11330_v42 = vsel %vm945_vm2, %v8627_v56, 0.0  ;;  %v14590_v14 = vld [vmem:[#allocation109_spill] sm:$0xff] }
 0x39d   : > { %v2256_v62 = vadd.f32 %v2255_v44, %v2254_v43  ;;  %v2281_v28 = vadd.f32 %v2280_v3, %v2279_v32  ;;  %v2288_v47 = vadd.f32 %v2287_v58, %v2286_v13  ;;  %v2530_v29 = vadd.f32 %v2529_v7, %v2528_v53  ;;  %v1639_v52 = vpop.xlane.xlu0 %1638  ;;  %v1642_v41 = vpop.xlane.xlu1 %1641 }
 0x39e   : > { %v2436_v50 = vmul.f32 %v14589_v36, %v1639_v52  ;;  %v11333_v30 = vsel %vm945_vm2, %v8628_v15, 0.0  ;;  %v11337_v43 = vsel %vm945_vm2, %v14590_v14, 0.0  ;;  %v2555_v13 = vsel %vm1778_vm3, %v2435_v31, 0.0  ;;  %v14592_v14 = vld [vmem:[#allocation129_spill] sm:$0xff]  ;;  %v14594_v31 = vld [vmem:[#allocation22_spill] sm:$0xff] }
 0x39f   : > { %v2289_v22 = vrot.slane %v2288_v47, 2  ;;  %v2531_v21 = vrot.slane %v2530_v29, 4  ;;  %14591 = vst [vmem:[#allocation166_spill] sm:$0xff] %v11337_v43  ;;  %v11340_v3 = vsel %vm5117_vm8, %v2256_v62, %v5190_v61  ;;  %v2282_v32 = vrot.slane %v2281_v28, 1 }
 0x3a0   : > { %v2556_v44 = vsel %vm1778_vm3, %v2436_v50, 0.0  ;;  %v2437_v56 = vmul.f32 %v14543_v19, %v1642_v41  ;;  %1728 = vadd.xlane.f32.xlu0 %v11132_v18  ;;  %1749 = vadd.xlane.f32.xlu1 %v11147_v37  ;;  %v11349_v61 = vsel %vm945_vm2, %v14592_v14, 0.0  ;;  %v8633_v62 = vunpack.i.h.bf16 %v14588_v2  ;;  %v14596_v41 = vld [vmem:[#allocation130_spill] sm:$0xff]  ;;  %v14598_v37 = vld [vmem:[#allocation112_spill] sm:$0xff]  ;;  %v14599_v2 = vld [vmem:[#allocation43_spill] sm:$0xff] }
 0x3a1   : > { %v2290_v15 = vadd.f32 %v2289_v22, %v2288_v47  ;;  %v2532_v58 = vadd.f32 %v2531_v21, %v2530_v29  ;;  %v2557_v53 = vadd.f32 %v2556_v44, %v2555_v13  ;;  %v1645_v7 = vpop.xlane.xlu0 %1644  ;;  %v1032_v52 = vpop.xlane.xlu1 %1031  ;;  %14593 = vst [vmem:[#allocation77_spill] sm:$0xff] %v11349_v61  ;;  %v11354_v50 = vsel %vm945_vm2, %v8632_v17, 0.0  ;;  %v14600_v61 = vld [vmem:[#allocation44_spill] sm:$0xff] }
 0x3a2   : > { %v2438_v36 = vmul.f32 %v14594_v31, %v1645_v7  ;;  %14595 = vst [vmem:[#allocation168_spill] sm:$0xff] %v11354_v50  ;;  %v11358_v18 = vsel %vm945_vm2, %v14596_v41, 0.0  ;;  %v8637_v21 = vunpack.i.l.bf16 %v14598_v37  ;;  %v2283_v13 = vadd.f32 %v2282_v32, %v2281_v28 }
 0x3a3   : > { %14597 = vst [vmem:[#allocation167_spill] sm:$0xff] %v11358_v18  ;;  %v2291_v47 = vrot.slane %v2290_v15, 1  ;;  %v2533_v29 = vrot.slane %v2532_v58, 2  ;;  %v2558_v22 = vrot.slane %v2557_v53, 4  ;;  %v2564_v44 = vsel %vm1778_vm3, %v2437_v56, 0.0 }
 0x3a4   : > { %v2565_v14 = vsel %vm1778_vm3, %v2438_v36, 0.0  ;;  %v2095_v19 = vmul.f32 %v14599_v2, %v1032_v52  ;;  %1752 = vadd.xlane.f32.xlu0 %v11151_v51  ;;  %3253 = vadd.xlane.f32.xlu1 %v11175_v63  ;;  %v8638_v43 = vunpack.i.h.bf16 %v14598_v37  ;;  %v11369_v32 = vsel %vm945_vm2, %v8633_v62, 0.0  ;;  %v14601_v36 = vld [vmem:[#allocation111_spill] sm:$0xff]  ;;  %v14602_v37 = vld [vmem:[#allocation41_spill] sm:$0xff] }
 0x3a5   : > { %v2292_v17 = vadd.f32 %v2291_v47, %v2290_v15  ;;  %v2534_v7 = vadd.f32 %v2533_v29, %v2532_v58  ;;  %v2559_v41 = vadd.f32 %v2558_v22, %v2557_v53  ;;  %v2566_v31 = vadd.f32 %v2565_v14, %v2564_v44  ;;  %v1035_v18 = vpop.xlane.xlu0 %1034  ;;  %v1056_v50 = vpop.xlane.xlu1 %1055 }
 0x3a6   : > { %v2096_v28 = vmul.f32 %v14600_v61, %v1035_v18  ;;  %v11373_v56 = vsel %vm945_vm2, %v14601_v36, 0.0  ;;  %v2257_v53 = vsel %vm1778_vm3, %v2095_v19, 0.0  ;;  %v2103_v47 = vmul.f32 %v14602_v37, %v1056_v50 }
 0x3a7   : > { %v11376_v51 = vsel %vm5109_vm4, %v2292_v17, %v2283_v13  ;;  %v2535_v63 = vrot.slane %v2534_v7, 1  ;;  %v2560_v15 = vrot.slane %v2559_v41, 2  ;;  %v2567_v58 = vrot.slane %v2566_v31, 4  ;;  %v14603_v17 = vld [vmem:[#allocation42_spill] sm:$0xff] }
 0x3a8   : > { %v2258_v52 = vsel %vm1778_vm3, %v2096_v28, 0.0  ;;  %3256 = vadd.xlane.f32.xlu0 %v11178_v45  ;;  %3259 = vadd.xlane.f32.xlu1 %v11163_v49  ;;  %v11384_v62 = vsel %vm945_vm2, %v8637_v21, 0.0  ;;  %v11388_v19 = vsel %vm945_vm2, %v8638_v43, 0.0  ;;  %v14604_v28 = vld [vmem:[#allocation171_spill] sm:$0xff]  ;;  %v14605_v45 = vld [vmem:[#allocation116_spill] sm:$0xff] }
 0x3a9   : > { %v2536_v18 = vadd.f32 %v2535_v63, %v2534_v7  ;;  %v2561_v29 = vadd.f32 %v2560_v15, %v2559_v41  ;;  %v2568_v22 = vadd.f32 %v2567_v58, %v2566_v31  ;;  %v2259_v13 = vadd.f32 %v2258_v52, %v2257_v53  ;;  %v1059_v44 = vpop.xlane.xlu0 %1058  ;;  %v1624_v14 = vpop.xlane.xlu1 %1623  ;;  %v14606_v41 = vld [vmem:[#allocation115_spill] sm:$0xff] }
 0x3aa   : > { %v2104_v36 = vmul.f32 %v14603_v17, %v1059_v44  ;;  %v11392_v50 = vsel %vm945_vm2, %v14604_v28, 0.0  ;;  %v11396_v49 = vsel %vm945_vm2, %v14605_v45, 0.0  ;;  %v11400_v31 = vsel %vm945_vm2, %v14606_v41, 0.0  ;;  %v14608_v53 = vld [vmem:[#allocation27_spill] sm:$0xff] }
 0x3ab   : > { %v2569_v21 = vrot.slane %v2568_v22, 2  ;;  %v2260_v7 = vrot.slane %v2259_v13, 4  ;;  %14607 = vst [vmem:[#allocation90_spill] sm:$0xff] %v11400_v31  ;;  %v11404_v63 = vsel %vm5117_vm8, %v2536_v18, %v11316_v20  ;;  %v2562_v43 = vrot.slane %v2561_v29, 1  ;;  %v14609_v31 = vld [vmem:[#allocation172_spill] sm:$0xff]  ;;  %v14611_v18 = vld [vmem:[#allocation118_spill] sm:$0xff] }
 0x3ac   : > { %v2293_v15 = vsel %vm1778_vm3, %v2103_v47, 0.0  ;;  %v2294_v58 = vsel %vm1778_vm3, %v2104_v36, 0.0  ;;  %v2431_v52 = vmul.f32 %v14608_v53, %v1624_v14  ;;  %3262 = vadd.xlane.f32.xlu0 %v11181_v5  ;;  %1755 = vadd.xlane.f32.xlu1 %v11198_v39  ;;  %v11413_v20 = vsel %vm945_vm2, %v14609_v31, 0.0  ;;  %v14612_v47 = vld [vmem:[#allocation28_spill] sm:$0xff]  ;;  %v14613_v36 = vld [vmem:[#allocation174_spill] sm:$0xff]  ;;  %v14615_v5 = vld [vmem:[#allocation173_spill] sm:$0xff] }
 0x3ad   : > { %v2570_v44 = vadd.f32 %v2569_v21, %v2568_v22  ;;  %v2261_v28 = vadd.f32 %v2260_v7, %v2259_v13  ;;  %v2295_v45 = vadd.f32 %v2294_v58, %v2293_v15  ;;  %v1627_v41 = vpop.xlane.xlu0 %1626  ;;  %v1648_v17 = vpop.xlane.xlu1 %1647  ;;  %14610 = vst [vmem:[#allocation169_spill] sm:$0xff] %v11413_v20  ;;  %v8647_v37 = vunpack.i.l.bf16 %v14611_v18 }
 0x3ae   : > { %v2432_v61 = vmul.f32 %v14612_v47, %v1627_v41  ;;  %v11419_v14 = vsel %vm945_vm2, %v14613_v36, 0.0  ;;  %v11423_v39 = vsel %vm945_vm2, %v14615_v5, 0.0  ;;  %v8648_v22 = vunpack.i.h.bf16 %v14611_v18 }
 0x3af   : > { %14614 = vst [vmem:[#allocation82_spill] sm:$0xff] %v11419_v14  ;;  %14616 = vst [vmem:[#allocation84_spill] sm:$0xff] %v11423_v39  ;;  %v2571_v13 = vrot.slane %v2570_v44, 1  ;;  %v2262_v21 = vrot.slane %v2261_v28, 2  ;;  %v2296_v7 = vrot.slane %v2295_v45, 4  ;;  %v2563_v15 = vadd.f32 %v2562_v43, %v2561_v29  ;;  %v14617_v14 = vld [vmem:[#allocation175_spill] sm:$0xff] }
 0x3b0   : > { %v2537_v31 = vsel %vm1778_vm3, %v2431_v52, 0.0  ;;  %v2538_v58 = vsel %vm1778_vm3, %v2432_v61, 0.0  ;;  %v2439_v41 = vmul.f32 %v14554_v26, %v1648_v17  ;;  %1758 = vadd.xlane.f32.xlu0 %v11192_v9  ;;  %3265 = vadd.xlane.f32.xlu1 %v11216_v33  ;;  %v8643_v20 = vunpack.i.h.bf16 %v14617_v14 }
 0x3b1   : > { %v2572_v36 = vadd.f32 %v2571_v13, %v2570_v44  ;;  %v2263_v47 = vadd.f32 %v2262_v21, %v2261_v28  ;;  %v2297_v5 = vadd.f32 %v2296_v7, %v2295_v45  ;;  %v2539_v53 = vadd.f32 %v2538_v58, %v2537_v31  ;;  %v1651_v39 = vpop.xlane.xlu0 %1650  ;;  %v1038_v18 = vpop.xlane.xlu1 %1037  ;;  %v14618_v45 = vld [vmem:[#allocation47_spill] sm:$0xff]  ;;  %v14619_v58 = vld [vmem:[#allocation117_spill] sm:$0xff] }
 0x3b2   : > { %v8642_v29 = vunpack.i.l.bf16 %v14617_v14  ;;  %v2440_v43 = vmul.f32 %v14555_v16, %v1651_v39  ;;  %v11435_v61 = vsel %vm945_vm2, %v8647_v37, 0.0  ;;  %v2573_v44 = vsel %vm1778_vm3, %v2439_v41, 0.0  ;;  %v14620_v41 = vld [vmem:[#allocation48_spill] sm:$0xff] }
 0x3b3   : > { %v11438_v17 = vsel %vm5109_vm4, %v2572_v36, %v2563_v15  ;;  %v2264_v9 = vrot.slane %v2263_v47, 1  ;;  %v2298_v33 = vrot.slane %v2297_v5, 2  ;;  %v2540_v52 = vrot.slane %v2539_v53, 4 }
 0x3b4   : > { %v2574_v28 = vsel %vm1778_vm3, %v2440_v43, 0.0  ;;  %v2097_v13 = vmul.f32 %v14618_v45, %v1038_v18  ;;  %3268 = vadd.xlane.f32.xlu0 %v11227_v59  ;;  %1761 = vadd.xlane.f32.xlu1 %v11202_v1  ;;  %v11446_v14 = vsel %vm945_vm2, %v8648_v22, 0.0  ;;  %v8657_v36 = vunpack.i.l.bf16 %v14619_v58 }
 0x3b5   : > { %v2299_v37 = vadd.f32 %v2298_v33, %v2297_v5  ;;  %v2541_v39 = vadd.f32 %v2540_v52, %v2539_v53  ;;  %v2575_v21 = vadd.f32 %v2574_v28, %v2573_v44  ;;  %v1041_v7 = vpop.xlane.xlu0 %1040  ;;  %v1062_v15 = vpop.xlane.xlu1 %1061  ;;  %v2265_v31 = vadd.f32 %v2264_v9, %v2263_v47  ;;  %v14621_v33 = vld [vmem:[#allocation45_spill] sm:$0xff] }
 0x3b6   : > { %v2098_v16 = vmul.f32 %v14620_v41, %v1041_v7  ;;  %v11451_v43 = vsel %vm945_vm2, %v8642_v29, 0.0  ;;  %v11454_v59 = vsel %vm945_vm2, %v8643_v20, 0.0  ;;  %v8658_v5 = vunpack.i.h.bf16 %v14619_v58  ;;  %v14623_v41 = vld [vmem:[#allocation46_spill] sm:$0xff] }
 0x3b7   : > { %v2300_v1 = vrot.slane %v2299_v37, 1  ;;  %v2542_v18 = vrot.slane %v2541_v39, 2  ;;  %v2576_v22 = vrot.slane %v2575_v21, 4  ;;  %v11458_v53 = vsel %vm5119_vm9, %v2265_v31, %v11340_v3  ;;  %v14622_v3 = vld [vmem:[#allocation176_spill] sm:$0xff] }
 0x3b8   : > { %v2266_v47 = vsel %vm1778_vm3, %v2097_v13, 0.0  ;;  %v2267_v9 = vsel %vm1778_vm3, %v2098_v16, 0.0  ;;  %v2105_v52 = vmul.f32 %v14621_v33, %v1062_v15  ;;  %1764 = vadd.xlane.f32.xlu0 %v11231_v38  ;;  %3271 = vadd.xlane.f32.xlu1 %v11234_v0  ;;  %v8653_v31 = vunpack.i.h.bf16 %v14622_v3 }
 0x3b9   : > { %v2301_v20 = vadd.f32 %v2300_v1, %v2299_v37  ;;  %v2543_v29 = vadd.f32 %v2542_v18, %v2541_v39  ;;  %v2577_v44 = vadd.f32 %v2576_v22, %v2575_v21  ;;  %v2268_v28 = vadd.f32 %v2267_v9, %v2266_v47  ;;  %v1065_v7 = vpop.xlane.xlu0 %1064  ;;  %v1630_v26 = vpop.xlane.xlu1 %1629 }
 0x3ba   : > { %v8652_v58 = vunpack.i.l.bf16 %v14622_v3  ;;  %v2106_v13 = vmul.f32 %v14623_v41, %v1065_v7  ;;  %v11470_v16 = vsel %vm945_vm2, %v8657_v36, 0.0  ;;  %v2302_v37 = vsel %vm1778_vm3, %v2105_v52, 0.0 }
 0x3bb   : > { %v2544_v15 = vrot.slane %v2543_v29, 1  ;;  %v2578_v33 = vrot.slane %v2577_v44, 2  ;;  %v2269_v38 = vrot.slane %v2268_v28, 4  ;;  %v11474_v0 = vsel %vm5111_vm5, %v2301_v20, %v11376_v51  ;;  %v14624_v20 = vld [vmem:[#allocation32_spill] sm:$0xff] }
 0x3bc   : > { %v2303_v39 = vsel %vm1778_vm3, %v2106_v13, 0.0  ;;  %v2433_v21 = vmul.f32 %v14559_v6, %v1630_v26  ;;  %3274 = vadd.xlane.f32.xlu0 %v11245_v55  ;;  %3893 = vadd.xlane.f32.xlu1 %v11250_v24  ;;  %v11482_v36 = vsel %vm945_vm2, %v8658_v5, 0.0  ;;  %v11486_v52 = vsel %vm945_vm2, %v8652_v58, 0.0  ;;  %v14625_v55 = vld [vmem:[#allocation120_spill] sm:$0xff] }
 0x3bd   : > { %v2579_v1 = vadd.f32 %v2578_v33, %v2577_v44  ;;  %v2270_v18 = vadd.f32 %v2269_v38, %v2268_v28  ;;  %v2304_v22 = vadd.f32 %v2303_v39, %v2302_v37  ;;  %v1633_v47 = vpop.xlane.xlu0 %1632  ;;  %v1654_v9 = vpop.xlane.xlu1 %1653  ;;  %v2545_v51 = vadd.f32 %v2544_v15, %v2543_v29  ;;  %v14635_v6 = vld [vmem:[#allocation52_spill] sm:$0xff] }
 0x3be   : > { %v2434_v7 = vmul.f32 %v14624_v20, %v1633_v47  ;;  %v11489_v26 = vsel %vm945_vm2, %v8653_v31, 0.0  ;;  %v11493_v24 = vsel %vm945_vm2, %v14625_v55, 0.0  ;;  %v2546_v29 = vsel %vm1778_vm3, %v2433_v21, 0.0  ;;  %v14626_v31 = vld [vmem:[#allocation177_spill] sm:$0xff]  ;;  %v14628_v55 = vld [vmem:[#allocation178_spill] sm:$0xff]  ;;  %v14634_v20 = vld [vmem:[#allocation124_spill] sm:$0xff] }
 0x3bf   : > { %v2580_v5 = vrot.slane %v2579_v1, 1  ;;  %v2271_v3 = vrot.slane %v2270_v18, 2  ;;  %v2305_v33 = vrot.slane %v2304_v22, 4  ;;  %v11497_v44 = vsel %vm5119_vm9, %v2545_v51, %v11404_v63  ;;  %v14627_v51 = vld [vmem:[#allocation179_spill] sm:$0xff] }
 0x3c0   : > { %v2547_v28 = vsel %vm1778_vm3, %v2434_v7, 0.0  ;;  %v2441_v58 = vmul.f32 %v14562_v8, %v1654_v9  ;;  %3896 = vadd.xlane.f32.xlu0 %v11254_v48  ;;  %3899 = vadd.xlane.f32.xlu1 %v11268_v27  ;;  %v11506_v13 = vsel %vm945_vm2, %v14626_v31, 0.0  ;;  %v8662_v21 = vunpack.i.l.bf16 %v14627_v51  ;;  %v14630_v48 = vld [vmem:[#allocation147_spill] sm:$0xff] }
 0x3c1   : > { %v2581_v15 = vadd.f32 %v2580_v5, %v2579_v1  ;;  %v2272_v38 = vadd.f32 %v2271_v3, %v2270_v18  ;;  %v2306_v37 = vadd.f32 %v2305_v33, %v2304_v22  ;;  %v2548_v39 = vadd.f32 %v2547_v28, %v2546_v29  ;;  %v1657_v63 = vpop.xlane.xlu0 %1656  ;;  %v1068_v47 = vpop.xlane.xlu1 %1067  ;;  %v14632_v3 = vld [vmem:[#allocation51_spill] sm:$0xff] }
 0x3c2   : > { %v2442_v7 = vmul.f32 %v14563_v23, %v1657_v63  ;;  %v11512_v9 = vsel %vm945_vm2, %v14628_v55, 0.0  ;;  %v11516_v27 = vsel %vm945_vm2, %v14630_v48, 0.0  ;;  %v2582_v22 = vsel %vm1778_vm3, %v2441_v58, 0.0  ;;  %v14633_v29 = vld [vmem:[#allocation119_spill] sm:$0xff] }
 0x3c3   : > { %14629 = vst [vmem:[#allocation89_spill] sm:$0xff] %v11512_v9  ;;  %14631 = vst [vmem:[#allocation91_spill] sm:$0xff] %v11516_v27  ;;  %v2307_v31 = vrot.slane %v2306_v37, 2  ;;  %v2549_v8 = vrot.slane %v2548_v39, 4  ;;  %v2273_v1 = vrot.slane %v2272_v38, 1  ;;  %v11520_v18 = vsel %vm5111_vm5, %v2581_v15, %v11438_v17 }
 0x3c4   : > { %v2583_v5 = vsel %vm1778_vm3, %v2442_v7, 0.0  ;;  %v2107_v33 = vmul.f32 %v14632_v3, %v1068_v47  ;;  %3902 = vadd.xlane.f32.xlu0 %v11258_v10  ;;  %1767 = vadd.xlane.f32.xlu1 %v11285_v57  ;;  %v11529_v28 = vsel %vm945_vm2, %v14633_v29, 0.0  ;;  %v8663_v58 = vunpack.i.h.bf16 %v14627_v51 }
 0x3c5   : > { %v2308_v63 = vadd.f32 %v2307_v31, %v2306_v37  ;;  %v2550_v55 = vadd.f32 %v2549_v8, %v2548_v39  ;;  %v2584_v48 = vadd.f32 %v2583_v5, %v2582_v22  ;;  %v1071_v23 = vpop.xlane.xlu0 %1070  ;;  %v1660_v17 = vpop.xlane.xlu1 %1659  ;;  %v2274_v15 = vadd.f32 %v2273_v1, %v2272_v38 }
 0x3c6   : > { %v8667_v7 = vunpack.i.l.bf16 %v14634_v20  ;;  %v2108_v47 = vmul.f32 %v14635_v6, %v1071_v23  ;;  %v11535_v10 = vsel %vm945_vm2, %v8662_v21, 0.0  ;;  %v8668_v8 = vunpack.i.h.bf16 %v14634_v20 }
 0x3c7   : > { %v2309_v57 = vrot.slane %v2308_v63, 1  ;;  %v2551_v27 = vrot.slane %v2550_v55, 2  ;;  %v2585_v9 = vrot.slane %v2584_v48, 4  ;;  %v11539_v37 = vsel %vm5121_vm10, %v2274_v15, %v11458_v53 }
 0x3c8   : > { %14636 = vst [vmem:[#allocation79_spill] sm:$0xff] %v11539_v37  ;;  %v2311_v38 = vsel %vm1778_vm3, %v2107_v33, 0.0  ;;  %v2312_v39 = vsel %vm1778_vm3, %v2108_v47, 0.0  ;;  %v2443_v51 = vmul.f32 %v14566_v25, %v1660_v17  ;;  %1770 = vadd.xlane.f32.xlu0 %v11275_v12  ;;  %3277 = vadd.xlane.f32.xlu1 %v11289_v34  ;;  %v11549_v20 = vsel %vm945_vm2, %v8663_v58, 0.0  ;;  %v14637_v33 = vld [vmem:[#allocation180_spill] sm:$0xff] }
 0x3c9   : > { %v2310_v23 = vadd.f32 %v2309_v57, %v2308_v63  ;;  %v2552_v21 = vadd.f32 %v2551_v27, %v2550_v55  ;;  %v2586_v31 = vadd.f32 %v2585_v9, %v2584_v48  ;;  %v2313_v1 = vadd.f32 %v2312_v39, %v2311_v38  ;;  %v1663_v22 = vpop.xlane.xlu0 %1662  ;;  %v1074_v5 = vpop.xlane.xlu1 %1073  ;;  %v14638_v48 = vld [vmem:[#allocation49_spill] sm:$0xff] }
 0x3ca   : > { %v2444_v53 = vmul.f32 %v14567_v4, %v1663_v22  ;;  %v11553_v29 = vsel %vm945_vm2, %v14637_v33, 0.0  ;;  %v11556_v17 = vsel %vm945_vm2, %v8667_v7, 0.0  ;;  %v2591_v27 = vsel %vm1778_vm3, %v2443_v51, 0.0 }
 0x3cb   : > { %v2587_v12 = vrot.slane %v2586_v31, 2  ;;  %v2314_v34 = vrot.slane %v2313_v1, 4  ;;  %v2553_v63 = vrot.slane %v2552_v21, 1  ;;  %v5196_v9 = vsel %vm5113_vm6, %v2310_v23, %v11474_v0  ;;  %v14639_v0 = vld [vmem:[#allocation123_spill] sm:$0xff] }
 0x3cc   : > { %v2592_v55 = vsel %vm1778_vm3, %v2444_v53, 0.0  ;;  %v2109_v15 = vmul.f32 %v14638_v48, %v1074_v5  ;;  %3280 = vadd.xlane.f32.xlu0 %v11292_v46  ;;  %3905 = vadd.xlane.f32.xlu1 %v11296_v60  ;;  %v11566_v58 = vsel %vm945_vm2, %v8668_v8, 0.0  ;;  %v8678_v23 = vunpack.i.h.bf16 %v14639_v0  ;;  %v14640_v53 = vld [vmem:[#allocation181_spill] sm:$0xff]  ;;  %v14641_v5 = vld [vmem:[#allocation50_spill] sm:$0xff] }
 0x3cd   : > { %v2588_v7 = vadd.f32 %v2587_v12, %v2586_v31  ;;  %v2315_v47 = vadd.f32 %v2314_v34, %v2313_v1  ;;  %v2593_v57 = vadd.f32 %v2592_v55, %v2591_v27  ;;  %v1077_v38 = vpop.xlane.xlu0 %1076  ;;  %v1092_v39 = vpop.xlane.xlu1 %1091  ;;  %v2554_v22 = vadd.f32 %v2553_v63, %v2552_v21  ;;  %v14643_v12 = vld [vmem:[#allocation55_spill] sm:$0xff] }
 0x3ce   : > { %v8677_v51 = vunpack.i.l.bf16 %v14639_v0  ;;  %v8672_v33 = vunpack.i.l.bf16 %v14640_v53  ;;  %v2110_v37 = vmul.f32 %v14641_v5, %v1077_v38  ;;  %v8673_v31 = vunpack.i.h.bf16 %v14640_v53 }
 0x3cf   : > { %v2589_v46 = vrot.slane %v2588_v7, 1  ;;  %v2316_v4 = vrot.slane %v2315_v47, 2  ;;  %v2594_v60 = vrot.slane %v2593_v57, 4  ;;  %v11574_v8 = vsel %vm5121_vm10, %v2554_v22, %v11497_v44  ;;  %v14644_v44 = vld [vmem:[#allocation56_spill] sm:$0xff] }
 0x3d0   : > { %14642 = vst [vmem:[#allocation80_spill] sm:$0xff] %v11574_v8  ;;  %v2320_v1 = vsel %vm1778_vm3, %v2109_v15, 0.0  ;;  %v2321_v21 = vsel %vm1778_vm3, %v2110_v37, 0.0  ;;  %v2115_v34 = vmul.f32 %v14643_v12, %v1092_v39  ;;  %3908 = vadd.xlane.f32.xlu0 %v11313_v54  ;;  %1773 = vadd.xlane.f32.xlu1 %v11306_v35  ;;  %v11584_v53 = vsel %vm945_vm2, %v8672_v33, 0.0 }
 0x3d1   : > { %v2590_v63 = vadd.f32 %v2589_v46, %v2588_v7  ;;  %v2317_v27 = vadd.f32 %v2316_v4, %v2315_v47  ;;  %v2595_v55 = vadd.f32 %v2594_v60, %v2593_v57  ;;  %v2322_v38 = vadd.f32 %v2321_v21, %v2320_v1  ;;  %v1095_v0 = vpop.xlane.xlu0 %1094  ;;  %v1098_v25 = vpop.xlane.xlu1 %1097  ;;  %v14647_v57 = vld [vmem:[#allocation53_spill] sm:$0xff] }
 0x3d2   : > { %v2116_v22 = vmul.f32 %v14644_v44, %v1095_v0  ;;  %v11587_v15 = vsel %vm945_vm2, %v8677_v51, 0.0  ;;  %v11590_v37 = vsel %vm945_vm2, %v8678_v23, 0.0  ;;  %v2347_v7 = vsel %vm1778_vm3, %v2115_v34, 0.0  ;;  %v14649_v34 = vld [vmem:[#allocation54_spill] sm:$0xff] }
 0x3d3   : > { %14645 = vst [vmem:[#allocation83_spill] sm:$0xff] %v11587_v15  ;;  %14646 = vst [vmem:[#allocation81_spill] sm:$0xff] %v11590_v37  ;;  %v2318_v54 = vrot.slane %v2317_v27, 1  ;;  %v2596_v39 = vrot.slane %v2595_v55, 2  ;;  %v2323_v35 = vrot.slane %v2322_v38, 4  ;;  %v5297_v4 = vsel %vm5113_vm6, %v2590_v63, %v11520_v18  ;;  %v14648_v18 = vld [vmem:[#allocation185_spill] sm:$0xff] }
 0x3d4   : > { %v2348_v47 = vsel %vm1778_vm3, %v2116_v22, 0.0  ;;  %v2117_v46 = vmul.f32 %v14647_v57, %v1098_v25  ;;  %1776 = vadd.xlane.f32.xlu0 %v11325_v40  ;;  %3283 = vadd.xlane.f32.xlu1 %v11330_v42  ;;  %v11600_v51 = vsel %vm945_vm2, %v8673_v31, 0.0  ;;  %v8687_v63 = vunpack.i.l.bf16 %v14648_v18  ;;  %v14650_v22 = vld [vmem:[#allocation182_spill] sm:$0xff]  ;;  %v14652_v40 = vld [vmem:[#allocation183_spill] sm:$0xff]  ;;  %v14655_v15 = vld [vmem:[#allocation184_spill] sm:$0xff] }
 0x3d5   : > { %v2319_v23 = vadd.f32 %v2318_v54, %v2317_v27  ;;  %v2597_v33 = vadd.f32 %v2596_v39, %v2595_v55  ;;  %v2324_v60 = vadd.f32 %v2323_v35, %v2322_v38  ;;  %v2349_v1 = vadd.f32 %v2348_v47, %v2347_v7  ;;  %v1101_v21 = vpop.xlane.xlu0 %1100  ;;  %v1666_v0 = vpop.xlane.xlu1 %1665  ;;  %v14654_v7 = vld [vmem:[#allocation77_spill] sm:$0xff] }
 0x3d6   : > { %v2118_v8 = vmul.f32 %v14649_v34, %v1101_v21  ;;  %v11606_v25 = vsel %vm945_vm2, %v14650_v22, 0.0  ;;  %v11610_v42 = vsel %vm945_vm2, %v14652_v40, 0.0  ;;  %v8688_v38 = vunpack.i.h.bf16 %v14648_v18  ;;  %v14656_v18 = vld [vmem:[#allocation34_spill] sm:$0xff] }
 0x3d7   : > { %14651 = vst [vmem:[#allocation73_spill] sm:$0xff] %v11606_v25  ;;  %14653 = vst [vmem:[#allocation92_spill] sm:$0xff] %v11610_v42  ;;  %v2598_v31 = vrot.slane %v2597_v33, 1  ;;  %v2325_v37 = vrot.slane %v2324_v60, 2  ;;  %v2350_v27 = vrot.slane %v2349_v1, 4  ;;  %v5197_v55 = vsel %vm5115_vm7, %v2319_v23, %v5196_v9 }
 0x3d8   : > { %v2356_v54 = vsel %vm1778_vm3, %v2117_v46, 0.0  ;;  %v2357_v39 = vsel %vm1778_vm3, %v2118_v8, 0.0  ;;  %v2445_v35 = vmul.f32 %v14570_v11, %v1666_v0  ;;  %3286 = vadd.xlane.f32.xlu0 %v11333_v30  ;;  %3911 = vadd.xlane.f32.xlu1 %v14654_v7  ;;  %v8683_v9 = vunpack.i.h.bf16 %v14655_v15 }
 0x3d9   : > { %v2599_v47 = vadd.f32 %v2598_v31, %v2597_v33  ;;  %v2326_v21 = vadd.f32 %v2325_v37, %v2324_v60  ;;  %v2351_v22 = vadd.f32 %v2350_v27, %v2349_v1  ;;  %v2358_v40 = vadd.f32 %v2357_v39, %v2356_v54  ;;  %v1669_v42 = vpop.xlane.xlu0 %1668  ;;  %v1684_v25 = vpop.xlane.xlu1 %1683  ;;  %v14658_v60 = vld [vmem:[#allocation39_spill] sm:$0xff]  ;;  %v14659_v31 = vld [vmem:[#allocation166_spill] sm:$0xff] }
 0x3da   : > { %v8682_v23 = vunpack.i.l.bf16 %v14655_v15  ;;  %v2446_v46 = vmul.f32 %v14656_v18, %v1669_v42  ;;  %v11623_v8 = vsel %vm945_vm2, %v8687_v63, 0.0  ;;  %v2600_v37 = vsel %vm1778_vm3, %v2445_v35, 0.0  ;;  %v14660_v15 = vld [vmem:[#allocation168_spill] sm:$0xff] }
 0x3db   : > { %14657 = vst [vmem:[#allocation96_spill] sm:$0xff] %v11623_v8  ;;  %v2327_v0 = vrot.slane %v2326_v21, 1  ;;  %v2352_v11 = vrot.slane %v2351_v22, 2  ;;  %v2359_v30 = vrot.slane %v2358_v40, 4  ;;  %v11626_v7 = vsel %vm5115_vm7, %v2599_v47, %v5297_v4  ;;  %v14662_v47 = vld [vmem:[#allocation40_spill] sm:$0xff] }
 0x3dc   : > { %v2601_v33 = vsel %vm1778_vm3, %v2446_v46, 0.0  ;;  %v2451_v1 = vmul.f32 %v14658_v60, %v1684_v25  ;;  %3914 = vadd.xlane.f32.xlu0 %v14659_v31  ;;  %3289 = vadd.xlane.f32.xlu1 %v14660_v15  ;;  %v11634_v42 = vsel %vm945_vm2, %v8688_v38, 0.0  ;;  %v11638_v35 = vsel %vm945_vm2, %v8682_v23, 0.0  ;;  %v14665_v46 = vld [vmem:[#allocation187_spill] sm:$0xff]  ;;  %v14667_v38 = vld [vmem:[#allocation189_spill] sm:$0xff] }
 0x3dd   : > { %14661 = vst [vmem:[#allocation170_spill] sm:$0xff] %v11634_v42  ;;  %v2328_v63 = vadd.f32 %v2327_v0, %v2326_v21  ;;  %v2353_v27 = vadd.f32 %v2352_v11, %v2351_v22  ;;  %v2360_v54 = vadd.f32 %v2359_v30, %v2358_v40  ;;  %v2602_v39 = vadd.f32 %v2601_v33, %v2600_v37  ;;  %v1687_v18 = vpop.xlane.xlu0 %1686  ;;  %v1690_v4 = vpop.xlane.xlu1 %1689  ;;  %v14668_v0 = vld [vmem:[#allocation37_spill] sm:$0xff] }
 0x3de   : > { %v2452_v8 = vmul.f32 %v14662_v47, %v1687_v18  ;;  %14663 = vst [vmem:[#allocation85_spill] sm:$0xff] %v11638_v35  ;;  %v11641_v25 = vsel %vm945_vm2, %v8683_v9, 0.0  ;;  %v11645_v31 = vsel %vm945_vm2, %v14665_v46, 0.0  ;;  %v8697_v15 = vunpack.i.l.bf16 %v14667_v38  ;;  %v14669_v9 = vld [vmem:[#allocation167_spill] sm:$0xff]  ;;  %v14676_v35 = vld [vmem:[#allocation60_spill] sm:$0xff] }
 0x3df   : > { %14664 = vst [vmem:[#allocation86_spill] sm:$0xff] %v11641_v25  ;;  %14666 = vst [vmem:[#allocation88_spill] sm:$0xff] %v11645_v31  ;;  %v2361_v21 = vrot.slane %v2360_v54, 2  ;;  %v2603_v11 = vrot.slane %v2602_v39, 4  ;;  %v11649_v22 = vsel %vm5117_vm8, %v2328_v63, %v5197_v55  ;;  %v2354_v40 = vrot.slane %v2353_v27, 1  ;;  %v14670_v31 = vld [vmem:[#allocation186_spill] sm:$0xff] }
 0x3e0   : > { %v2627_v18 = vsel %vm1778_vm3, %v2451_v1, 0.0  ;;  %v2628_v23 = vsel %vm1778_vm3, %v2452_v8, 0.0  ;;  %v2453_v30 = vmul.f32 %v14668_v0, %v1690_v4  ;;  %3292 = vadd.xlane.f32.xlu0 %v11369_v32  ;;  %3917 = vadd.xlane.f32.xlu1 %v14669_v9  ;;  %v11658_v55 = vsel %vm945_vm2, %v14670_v31, 0.0  ;;  %v14672_v1 = vld [vmem:[#allocation188_spill] sm:$0xff]  ;;  %v14673_v4 = vld [vmem:[#allocation38_spill] sm:$0xff] }
 0x3e1   : > { %v2362_v37 = vadd.f32 %v2361_v21, %v2360_v54  ;;  %v2604_v33 = vadd.f32 %v2603_v11, %v2602_v39  ;;  %v2629_v46 = vadd.f32 %v2628_v23, %v2627_v18  ;;  %v1693_v47 = vpop.xlane.xlu0 %1692  ;;  %v1080_v60 = vpop.xlane.xlu1 %1079  ;;  %14671 = vst [vmem:[#allocation87_spill] sm:$0xff] %v11658_v55  ;;  %v8698_v63 = vunpack.i.h.bf16 %v14667_v38  ;;  %v14675_v11 = vld [vmem:[#allocation59_spill] sm:$0xff] }
 0x3e2   : > { %v8693_v42 = vunpack.i.h.bf16 %v14672_v1  ;;  %v8692_v8 = vunpack.i.l.bf16 %v14672_v1  ;;  %v2454_v0 = vmul.f32 %v14673_v4, %v1693_v47  ;;  %v11665_v54 = vsel %vm945_vm2, %v8697_v15, 0.0 }
 0x3e3   : > { %v2363_v32 = vrot.slane %v2362_v37, 1  ;;  %v2605_v25 = vrot.slane %v2604_v33, 2  ;;  %v2630_v9 = vrot.slane %v2629_v46, 4  ;;  %14674 = vst [vmem:[#allocation95_spill] sm:$0xff] %v11665_v54  ;;  %v2355_v39 = vadd.f32 %v2354_v40, %v2353_v27 }
 0x3e4   : > { %v2636_v21 = vsel %vm1778_vm3, %v2453_v30, 0.0  ;;  %v2637_v31 = vsel %vm1778_vm3, %v2454_v0, 0.0  ;;  %v2111_v18 = vmul.f32 %v14675_v11, %v1080_v60  ;;  %3920 = vadd.xlane.f32.xlu0 %v11373_v56  ;;  %3295 = vadd.xlane.f32.xlu1 %v11384_v62  ;;  %v11674_v27 = vsel %vm945_vm2, %v8692_v8, 0.0 }
 0x3e5   : > { %v2364_v38 = vadd.f32 %v2363_v32, %v2362_v37  ;;  %v2606_v23 = vadd.f32 %v2605_v25, %v2604_v33  ;;  %v2631_v47 = vadd.f32 %v2630_v9, %v2629_v46  ;;  %v2638_v1 = vadd.f32 %v2637_v31, %v2636_v21  ;;  %v1083_v4 = vpop.xlane.xlu0 %1082  ;;  %v1104_v55 = vpop.xlane.xlu1 %1103  ;;  %v14680_v33 = vld [vmem:[#allocation57_spill] sm:$0xff]  ;;  %v14683_v31 = vld [vmem:[#allocation132_spill] sm:$0xff] }
 0x3e6   : > { %v2112_v15 = vmul.f32 %v14676_v35, %v1083_v4  ;;  %v11677_v40 = vsel %vm945_vm2, %v8693_v42, 0.0  ;;  %v11680_v60 = vsel %vm945_vm2, %v8698_v63, 0.0  ;;  %v2329_v30 = vsel %vm1778_vm3, %v2111_v18, 0.0  ;;  %v14681_v42 = vld [vmem:[#allocation126_spill] sm:$0xff] }
 0x3e7   : > { %14677 = vst [vmem:[#allocation93_spill] sm:$0xff] %v11677_v40  ;;  %14678 = vst [vmem:[#allocation94_spill] sm:$0xff] %v11680_v60  ;;  %v11683_v56 = vsel %vm5109_vm4, %v2364_v38, %v2355_v39  ;;  %v2607_v62 = vrot.slane %v2606_v23, 1  ;;  %v2632_v25 = vrot.slane %v2631_v47, 2  ;;  %v2639_v0 = vrot.slane %v2638_v1, 4  ;;  %v14684_v38 = vld [vmem:[#allocation58_spill] sm:$0xff] }
 0x3e8   : > { %14679 = vst [vmem:[#allocation98_spill] sm:$0xff] %v11683_v56  ;;  %v2330_v37 = vsel %vm1778_vm3, %v2112_v15, 0.0  ;;  %v2119_v46 = vmul.f32 %v14680_v33, %v1104_v55  ;;  %3298 = vadd.xlane.f32.xlu0 %v11388_v19  ;;  %3923 = vadd.xlane.f32.xlu1 %v11392_v50  ;;  %v11692_v63 = vsel %vm945_vm2, %v14681_v42, 0.0  ;;  %v8703_v18 = vunpack.i.h.bf16 %v14683_v31  ;;  %v14685_v56 = vld [vmem:[#allocation190_spill] sm:$0xff]  ;;  %v14687_v19 = vld [vmem:[#allocation128_spill] sm:$0xff] }
 0x3e9   : > { %14682 = vst [vmem:[#allocation100_spill] sm:$0xff] %v11692_v63  ;;  %v2608_v8 = vadd.f32 %v2607_v62, %v2606_v23  ;;  %v2633_v4 = vadd.f32 %v2632_v25, %v2631_v47  ;;  %v2640_v32 = vadd.f32 %v2639_v0, %v2638_v1  ;;  %v2331_v9 = vadd.f32 %v2330_v37, %v2329_v30  ;;  %v1107_v39 = vpop.xlane.xlu0 %1106  ;;  %v1672_v21 = vpop.xlane.xlu1 %1671  ;;  %v14690_v30 = vld [vmem:[#allocation125_spill] sm:$0xff]  ;;  %v14713_v40 = vld [vmem:[#allocation192_spill] sm:$0xff] }
 0x3ea   : > { %v2120_v15 = vmul.f32 %v14684_v38, %v1107_v39  ;;  %v11698_v55 = vsel %vm945_vm2, %v14685_v56, 0.0  ;;  %v11702_v50 = vsel %vm945_vm2, %v14687_v19, 0.0  ;;  %v8702_v42 = vunpack.i.l.bf16 %v14683_v31  ;;  %v14689_v56 = vld [vmem:[#allocation169_spill] sm:$0xff] }
 0x3eb   : > { %14686 = vst [vmem:[#allocation102_spill] sm:$0xff] %v11698_v55  ;;  %14688 = vst [vmem:[#allocation97_spill] sm:$0xff] %v11702_v50  ;;  %v2641_v23 = vrot.slane %v2640_v32, 2  ;;  %v2332_v47 = vrot.slane %v2331_v9, 4  ;;  %v11707_v1 = vsel %vm5117_vm8, %v2608_v8, %v11626_v7  ;;  %v2365_v62 = vsel %vm1778_vm3, %v2119_v46, 0.0  ;;  %v14692_v46 = vld [vmem:[#allocation44_spill] sm:$0xff] }
 0x3ec   : > { %v2366_v25 = vsel %vm1778_vm3, %v2120_v15, 0.0  ;;  %v2447_v0 = vmul.f32 %v14599_v2, %v1672_v21  ;;  %3926 = vadd.xlane.f32.xlu0 %v11396_v49  ;;  %3929 = vadd.xlane.f32.xlu1 %v14689_v56  ;;  %v11716_v37 = vsel %vm945_vm2, %v14690_v30, 0.0  ;;  %v2634_v39 = vrot.slane %v2633_v4, 1  ;;  %v14693_v15 = vld [vmem:[#allocation191_spill] sm:$0xff]  ;;  %v14707_v55 = vld [vmem:[#allocation136_spill] sm:$0xff] }
 0x3ed   : > { %14691 = vst [vmem:[#allocation101_spill] sm:$0xff] %v11716_v37  ;;  %v2642_v31 = vadd.f32 %v2641_v23, %v2640_v32  ;;  %v2333_v19 = vadd.f32 %v2332_v47, %v2331_v9  ;;  %v11718_v50 = vadd.f32 %v2366_v25, %v2365_v62  ;;  %v1675_v7 = vpop.xlane.xlu0 %1674  ;;  %v1696_v8 = vpop.xlane.xlu1 %1695  ;;  %v11723_v21 = vsel %vm945_vm2, %v14693_v15, 0.0  ;;  %v14695_v49 = vld [vmem:[#allocation127_spill] sm:$0xff]  ;;  %v14706_v37 = vld [vmem:[#allocation193_spill] sm:$0xff] }
 0x3ee   : > { %v2448_v63 = vmul.f32 %v14692_v46, %v1675_v7  ;;  %14694 = vst [vmem:[#allocation99_spill] sm:$0xff] %v11723_v21  ;;  %v11727_v56 = vsel %vm945_vm2, %v14695_v49, 0.0  ;;  %v14697_v2 = vld [vmem:[#allocation131_spill] sm:$0xff]  ;;  %v11734_v23 = vsel %vm945_vm2, %v8702_v42, 0.0  ;;  %v11737_v47 = vsel %vm945_vm2, %v8703_v18, 0.0  ;;  %v14701_v7 = vld [vmem:[#allocation41_spill] sm:$0xff] }
 0x3ef   : > { %14696 = vst [vmem:[#allocation104_spill] sm:$0xff] %v11727_v56  ;;  %v11731_v30 = vsel %vm945_vm2, %v14697_v2, 0.0  ;;  %v2643_v32 = vrot.slane %v2642_v31, 1  ;;  %v2334_v9 = vrot.slane %v2333_v19, 2  ;;  %14699 = vst [vmem:[#allocation114_spill] sm:$0xff] %v11734_v23  ;;  %v2609_v62 = vsel %vm1778_vm3, %v2447_v0, 0.0 }
 0x3f0   : > { %14698 = vst [vmem:[#allocation108_spill] sm:$0xff] %v11731_v30  ;;  %14700 = vst [vmem:[#allocation103_spill] sm:$0xff] %v11737_v47  ;;  %v2610_v25 = vsel %vm1778_vm3, %v2448_v63, 0.0  ;;  %v2455_v15 = vmul.f32 %v14701_v7, %v1696_v8  ;;  %v14702_v49 = vld [vmem:[#allocation90_spill] sm:$0xff]  ;;  %v2635_v56 = vadd.f32 %v2634_v39, %v2633_v4  ;;  %v8708_v0 = vunpack.i.h.bf16 %v14706_v37 }
 0x3f1   : > { %3932 = vadd.xlane.f32.xlu0 %v14702_v49  ;;  %v14703_v46 = vld [vmem:[#allocation82_spill] sm:$0xff]  ;;  %v2644_v42 = vadd.f32 %v2643_v32, %v2642_v31  ;;  %v2335_v23 = vadd.f32 %v2334_v9, %v2333_v19  ;;  %v2611_v21 = vadd.f32 %v2610_v25, %v2609_v62  ;;  %v1699_v18 = vpop.xlane.xlu0 %1698  ;;  %v1086_v47 = vpop.xlane.xlu1 %1085  ;;  %v8707_v63 = vunpack.i.l.bf16 %v14706_v37  ;;  %v14710_v9 = vld [vmem:[#allocation63_spill] sm:$0xff]  ;;  %v14711_v37 = vld [vmem:[#allocation84_spill] sm:$0xff] }
 0x3f2   : > { %3935 = vadd.xlane.f32.xlu1 %v14703_v46  ;;  %v14704_v2 = vld [vmem:[#allocation134_spill] sm:$0xff]  ;;  %v8718_v8 = vunpack.i.h.bf16 %v14707_v55  ;;  %v8717_v46 = vunpack.i.l.bf16 %v14707_v55  ;;  %v2645_v19 = vsel %vm1778_vm3, %v2455_v15, 0.0  ;;  %v2113_v62 = vmul.f32 %v14710_v9, %v1086_v47 }
 0x3f3   : > { %v11746_v30 = vsel %vm945_vm2, %v14704_v2, 0.0  ;;  %v14708_v7 = vld [vmem:[#allocation42_spill] sm:$0xff]  ;;  %v11754_v60 = vsel %vm5109_vm4, %v2644_v42, %v2635_v56  ;;  %v2336_v2 = vrot.slane %v2335_v23, 1  ;;  %v2612_v4 = vrot.slane %v2611_v21, 4 }
 0x3f4   : > { %14705 = vst [vmem:[#allocation110_spill] sm:$0xff] %v11746_v30  ;;  %v2456_v49 = vmul.f32 %v14708_v7, %v1699_v18  ;;  %v14709_v39 = vld [vmem:[#allocation194_spill] sm:$0xff]  ;;  %v14712_v30 = vld [vmem:[#allocation64_spill] sm:$0xff]  ;;  %v11768_v15 = vsel %vm945_vm2, %v14713_v40, 0.0  ;;  %v2338_v40 = vsel %vm1778_vm3, %v2113_v62, 0.0 }
 0x3f5   : > { %v8713_v31 = vunpack.i.h.bf16 %v14709_v39  ;;  %3938 = vadd.xlane.f32.xlu0 %v14711_v37  ;;  %v8712_v25 = vunpack.i.l.bf16 %v14709_v39  ;;  %v2613_v55 = vadd.f32 %v2612_v4, %v2611_v21  ;;  %v1089_v56 = vpop.xlane.xlu0 %1088  ;;  %v1110_v42 = vpop.xlane.xlu1 %1109  ;;  %v2337_v7 = vadd.f32 %v2336_v2, %v2335_v23 }
 0x3f6   : > { %v2646_v32 = vsel %vm1778_vm3, %v2456_v49, 0.0  ;;  %3301 = vadd.xlane.f32.xlu1 %v11451_v43  ;;  %v2114_v54 = vmul.f32 %v14712_v30, %v1089_v56  ;;  %v14714_v49 = vld [vmem:[#allocation133_spill] sm:$0xff]  ;;  %v11775_v43 = vsel %vm945_vm2, %v8707_v63, 0.0  ;;  %v11778_v21 = vsel %vm945_vm2, %v8708_v0, 0.0 }
 0x3f7   : > { %v11763_v18 = vadd.f32 %v2646_v32, %v2645_v19  ;;  %v11772_v47 = vsel %vm945_vm2, %v14714_v49, 0.0  ;;  %v2614_v39 = vrot.slane %v2613_v55, 2  ;;  %v11781_v4 = vsel %vm945_vm2, %v8717_v46, 0.0  ;;  %v14716_v19 = vld [vmem:[#allocation61_spill] sm:$0xff] }
 0x3f8   : > { %14715 = vst [vmem:[#allocation113_spill] sm:$0xff] %v11781_v4  ;;  %v11785_v23 = vsel %vm5119_vm9, %v2337_v7, %v11649_v22  ;;  %v2339_v2 = vsel %vm1778_vm3, %v2114_v54, 0.0  ;;  %v2121_v32 = vmul.f32 %v14716_v19, %v1110_v42  ;;  %v11793_v0 = vsel %vm945_vm2, %v8718_v8, 0.0  ;;  %v14720_v54 = vld [vmem:[#allocation144_spill] sm:$0xff] }
 0x3f9   : > { %3304 = vadd.xlane.f32.xlu0 %v11454_v59  ;;  %14717 = vst [vmem:[#allocation106_spill] sm:$0xff] %v11793_v0  ;;  %v2615_v63 = vadd.f32 %v2614_v39, %v2613_v55  ;;  %v2340_v46 = vadd.f32 %v2339_v2, %v2338_v40  ;;  %v1113_v37 = vpop.xlane.xlu0 %1112  ;;  %v1678_v56 = vpop.xlane.xlu1 %1677  ;;  %v11796_v22 = vsel %vm945_vm2, %v8712_v25, 0.0  ;;  %v11799_v7 = vsel %vm945_vm2, %v8713_v31, 0.0  ;;  %v14721_v59 = vld [vmem:[#allocation62_spill] sm:$0xff]  ;;  %v14724_v40 = vld [vmem:[#allocation140_spill] sm:$0xff]  ;;  %v14726_v25 = vld [vmem:[#allocation139_spill] sm:$0xff] }
 0x3fa   : > { %3307 = vadd.xlane.f32.xlu1 %v11435_v61  ;;  %14718 = vst [vmem:[#allocation121_spill] sm:$0xff] %v11796_v22  ;;  %14719 = vst [vmem:[#allocation105_spill] sm:$0xff] %v11799_v7  ;;  %v8728_v62 = vunpack.i.h.bf16 %v14720_v54  ;;  %v8727_v42 = vunpack.i.l.bf16 %v14720_v54  ;;  %v2122_v49 = vmul.f32 %v14721_v59, %v1113_v37  ;;  %v14722_v61 = vld [vmem:[#allocation135_spill] sm:$0xff]  ;;  %v11810_v2 = vsel %vm945_vm2, %v14724_v40, 0.0  ;;  %v14730_v40 = vld [vmem:[#allocation137_spill] sm:$0xff] }
 0x3fb   : > { %v11806_v8 = vsel %vm945_vm2, %v14722_v61, 0.0  ;;  %v2616_v55 = vrot.slane %v2615_v63, 1  ;;  %v2341_v39 = vrot.slane %v2340_v46, 4  ;;  %14725 = vst [vmem:[#allocation107_spill] sm:$0xff] %v11810_v2  ;;  %v11814_v31 = vsel %vm945_vm2, %v14726_v25, 0.0  ;;  %v14728_v61 = vld [vmem:[#allocation138_spill] sm:$0xff] }
 0x3fc   : > { %14723 = vst [vmem:[#allocation122_spill] sm:$0xff] %v11806_v8  ;;  %14727 = vst [vmem:[#allocation109_spill] sm:$0xff] %v11814_v31  ;;  %v2374_v0 = vsel %vm1778_vm3, %v2121_v32, 0.0  ;;  %v2375_v54 = vsel %vm1778_vm3, %v2122_v49, 0.0  ;;  %v2449_v37 = vmul.f32 %v14618_v45, %v1678_v56  ;;  %v11823_v8 = vsel %vm945_vm2, %v14728_v61, 0.0  ;;  %v14731_v22 = vld [vmem:[#allocation48_spill] sm:$0xff] }
 0x3fd   : > { %3310 = vadd.xlane.f32.xlu0 %v11446_v14  ;;  %14729 = vst [vmem:[#allocation129_spill] sm:$0xff] %v11823_v8  ;;  %v8722_v2 = vunpack.i.l.bf16 %v14730_v40  ;;  %v2342_v4 = vadd.f32 %v2341_v39, %v2340_v46  ;;  %v11826_v7 = vadd.f32 %v2375_v54, %v2374_v0  ;;  %v1681_v25 = vpop.xlane.xlu0 %1680  ;;  %v1702_v31 = vpop.xlane.xlu1 %1701  ;;  %v2617_v32 = vadd.f32 %v2616_v55, %v2615_v63  ;;  %v14733_v61 = vld [vmem:[#allocation149_spill] sm:$0xff] }
 0x3fe   : > { %3313 = vadd.xlane.f32.xlu1 %v11486_v52  ;;  %v8723_v49 = vunpack.i.h.bf16 %v14730_v40  ;;  %v2450_v56 = vmul.f32 %v14731_v22, %v1681_v25  ;;  %v11831_v14 = vsel %vm945_vm2, %v8727_v42, 0.0  ;;  %v11834_v52 = vsel %vm945_vm2, %v8728_v62, 0.0  ;;  %v14734_v63 = vld [vmem:[#allocation141_spill] sm:$0xff] }
 0x3ff   : > { %14732 = vst [vmem:[#allocation130_spill] sm:$0xff] %v11834_v52  ;;  %v8738_v45 = vunpack.i.h.bf16 %v14733_v61  ;;  %v8737_v8 = vunpack.i.l.bf16 %v14733_v61  ;;  %v2343_v46 = vrot.slane %v2342_v4, 2  ;;  %v11840_v0 = vsel %vm5119_vm9, %v2617_v32, %v11707_v1  ;;  %v14735_v42 = vld [vmem:[#allocation45_spill] sm:$0xff] }
 0x400   : > { %v8732_v55 = vunpack.i.l.bf16 %v14734_v63  ;;  %v2618_v39 = vsel %vm1778_vm3, %v2449_v37, 0.0  ;;  %v2619_v54 = vsel %vm1778_vm3, %v2450_v56, 0.0  ;;  %v2457_v40 = vmul.f32 %v14735_v42, %v1702_v31  ;;  %v14736_v56 = vld [vmem:[#allocation142_spill] sm:$0xff] }
 0x401   : > { %3316 = vadd.xlane.f32.xlu0 %v11489_v26  ;;  %v8733_v62 = vunpack.i.h.bf16 %v14734_v63  ;;  %v2344_v25 = vadd.f32 %v2343_v46, %v2342_v4  ;;  %v2620_v61 = vadd.f32 %v2619_v54, %v2618_v39  ;;  %v1705_v22 = vpop.xlane.xlu0 %1704  ;;  %v1116_v52 = vpop.xlane.xlu1 %1115  ;;  %v11850_v1 = vsel %vm945_vm2, %v8722_v2, 0.0  ;;  %v14737_v26 = vld [vmem:[#allocation143_spill] sm:$0xff] }
 0x402   : > { %3319 = vadd.xlane.f32.xlu1 %v11470_v16  ;;  %v2458_v32 = vmul.f32 %v14623_v41, %v1705_v22  ;;  %v11854_v37 = vsel %vm945_vm2, %v8723_v49, 0.0  ;;  %v11858_v31 = vsel %vm945_vm2, %v14736_v56, 0.0  ;;  %v11862_v16 = vsel %vm945_vm2, %v14737_v26, 0.0  ;;  %v14740_v39 = vld [vmem:[#allocation67_spill] sm:$0xff] }
 0x403   : > { %v2621_v4 = vrot.slane %v2620_v61, 4  ;;  %v11865_v46 = vsel %vm945_vm2, %v8737_v8, 0.0  ;;  %v11868_v2 = vsel %vm945_vm2, %v8738_v45, 0.0  ;;  %v2345_v63 = vrot.slane %v2344_v25, 1 }
 0x404   : > { %14738 = vst [vmem:[#allocation112_spill] sm:$0xff] %v11865_v46  ;;  %14739 = vst [vmem:[#allocation111_spill] sm:$0xff] %v11868_v2  ;;  %v2654_v22 = vsel %vm1778_vm3, %v2457_v40, 0.0  ;;  %v2655_v49 = vsel %vm1778_vm3, %v2458_v32, 0.0  ;;  %v2123_v54 = vmul.f32 %v14740_v39, %v1116_v52  ;;  %v11876_v56 = vsel %vm945_vm2, %v8732_v55, 0.0  ;;  %v14742_v2 = vld [vmem:[#allocation68_spill] sm:$0xff] }
 0x405   : > { %3322 = vadd.xlane.f32.xlu0 %v11482_v36  ;;  %v2622_v26 = vadd.f32 %v2621_v4, %v2620_v61  ;;  %v11878_v8 = vadd.f32 %v2655_v49, %v2654_v22  ;;  %v1119_v41 = vpop.xlane.xlu0 %1118  ;;  %v1708_v45 = vpop.xlane.xlu1 %1707  ;;  %v11881_v42 = vsel %vm945_vm2, %v8733_v62, 0.0  ;;  %v2346_v40 = vadd.f32 %v2345_v63, %v2344_v25  ;;  %v14743_v46 = vld [vmem:[#allocation146_spill] sm:$0xff]  ;;  %v14745_v36 = vld [vmem:[#allocation145_spill] sm:$0xff]  ;;  %v14747_v55 = vld [vmem:[#allocation152_spill] sm:$0xff] }
 0x406   : > { %3941 = vadd.xlane.f32.xlu1 %v11506_v13  ;;  %14741 = vst [vmem:[#allocation171_spill] sm:$0xff] %v11881_v42  ;;  %v2124_v32 = vmul.f32 %v14742_v2, %v1119_v41  ;;  %v11886_v52 = vsel %vm945_vm2, %v14743_v46, 0.0  ;;  %v11890_v13 = vsel %vm945_vm2, %v14745_v36, 0.0  ;;  %v11894_v61 = vsel %vm945_vm2, %v14747_v55, 0.0  ;;  %v14749_v4 = vld [vmem:[#allocation195_spill] sm:$0xff]  ;;  %v14751_v36 = vld [vmem:[#allocation89_spill] sm:$0xff] }
 0x407   : > { %14744 = vst [vmem:[#allocation116_spill] sm:$0xff] %v11886_v52  ;;  %14746 = vst [vmem:[#allocation115_spill] sm:$0xff] %v11890_v13  ;;  %v8743_v22 = vunpack.i.h.bf16 %v14749_v4  ;;  %v8742_v62 = vunpack.i.l.bf16 %v14749_v4  ;;  %v2623_v49 = vrot.slane %v2622_v26, 2  ;;  %v11900_v41 = vsel %vm5121_vm10, %v2346_v40, %v11785_v23  ;;  %v14752_v55 = vld [vmem:[#allocation148_spill] sm:$0xff] }
 0x408   : > { %14748 = vst [vmem:[#allocation172_spill] sm:$0xff] %v11894_v61  ;;  %14750 = vst [vmem:[#allocation118_spill] sm:$0xff] %v11900_v41  ;;  %v2383_v25 = vsel %vm1778_vm3, %v2123_v54, 0.0  ;;  %v2384_v46 = vsel %vm1778_vm3, %v2124_v32, 0.0  ;;  %v2459_v63 = vmul.f32 %v14632_v3, %v1708_v45  ;;  %v11909_v61 = vsel %vm945_vm2, %v14752_v55, 0.0  ;;  %v14754_v54 = vld [vmem:[#allocation151_spill] sm:$0xff] }
 0x409   : > { %3944 = vadd.xlane.f32.xlu0 %v11493_v24  ;;  %14753 = vst [vmem:[#allocation174_spill] sm:$0xff] %v11909_v61  ;;  %v2368_v4 = vrot.slane %v11718_v50, 4  ;;  %v2624_v13 = vadd.f32 %v2623_v49, %v2622_v26  ;;  %v11912_v52 = vadd.f32 %v2384_v46, %v2383_v25  ;;  %v1711_v23 = vpop.xlane.xlu0 %1710  ;;  %v1122_v40 = vpop.xlane.xlu1 %1121  ;;  %v11916_v32 = vsel %vm945_vm2, %v14754_v54, 0.0  ;;  %v14756_v45 = vld [vmem:[#allocation156_spill] sm:$0xff] }
 0x40a   : > { %3947 = vadd.xlane.f32.xlu1 %v14751_v36  ;;  %14755 = vst [vmem:[#allocation173_spill] sm:$0xff] %v11916_v32  ;;  %v8747_v41 = vunpack.i.l.bf16 %v14756_v45  ;;  %v2460_v24 = vmul.f32 %v14635_v6, %v1711_v23  ;;  %v14757_v36 = vld [vmem:[#allocation150_spill] sm:$0xff]  ;;  %v14759_v55 = vld [vmem:[#allocation196_spill] sm:$0xff]  ;;  %v8748_v26 = vunpack.i.h.bf16 %v14756_v45  ;;  %v11930_v49 = vsel %vm945_vm2, %v8742_v62, 0.0  ;;  %v14763_v6 = vld [vmem:[#allocation65_spill] sm:$0xff] }
 0x40b   : > { %v11922_v3 = vsel %vm945_vm2, %v14757_v36, 0.0  ;;  %v11926_v61 = vsel %vm945_vm2, %v14759_v55, 0.0  ;;  %14761 = vst [vmem:[#allocation176_spill] sm:$0xff] %v11930_v49  ;;  %v11933_v25 = vsel %vm945_vm2, %v8743_v22, 0.0  ;;  %v2625_v46 = vrot.slane %v2624_v13, 1  ;;  %v14764_v32 = vld [vmem:[#allocation91_spill] sm:$0xff] }
 0x40c   : > { %14758 = vst [vmem:[#allocation175_spill] sm:$0xff] %v11922_v3  ;;  %14760 = vst [vmem:[#allocation117_spill] sm:$0xff] %v11926_v61  ;;  %v2663_v54 = vsel %vm1778_vm3, %v2459_v63, 0.0  ;;  %v2664_v23 = vsel %vm1778_vm3, %v2460_v24, 0.0  ;;  %v2125_v36 = vmul.f32 %v14763_v6, %v1122_v40  ;;  %v14765_v55 = vld [vmem:[#allocation157_spill] sm:$0xff]  ;;  %v2369_v62 = vadd.f32 %v2368_v4, %v11718_v50  ;;  %v14770_v50 = vld [vmem:[#allocation160_spill] sm:$0xff] }
 0x40d   : > { %14762 = vst [vmem:[#allocation120_spill] sm:$0xff] %v11933_v25  ;;  %3950 = vadd.xlane.f32.xlu0 %v14764_v32  ;;  %v11942_v45 = vsel %vm945_vm2, %v14765_v55, 0.0  ;;  %v11945_v61 = vadd.f32 %v2664_v23, %v2663_v54  ;;  %v1125_v22 = vpop.xlane.xlu0 %1124  ;;  %v1714_v25 = vpop.xlane.xlu1 %1713  ;;  %v14766_v49 = vld [vmem:[#allocation153_spill] sm:$0xff]  ;;  %v2626_v24 = vadd.f32 %v2625_v46, %v2624_v13  ;;  %v2648_v40 = vrot.slane %v11763_v18, 4  ;;  %v14767_v32 = vld [vmem:[#allocation66_spill] sm:$0xff]  ;;  %v14772_v23 = vld [vmem:[#allocation155_spill] sm:$0xff] }
 0x40e   : > { %3325 = vadd.xlane.f32.xlu1 %v11535_v10  ;;  %v11949_v63 = vsel %vm945_vm2, %v14766_v49, 0.0  ;;  %v2126_v3 = vmul.f32 %v14767_v32, %v1125_v22  ;;  %v14768_v10 = vld [vmem:[#allocation154_spill] sm:$0xff]  ;;  %v11958_v55 = vsel %vm945_vm2, %v8747_v41, 0.0  ;;  %v8752_v4 = vunpack.i.l.bf16 %v14770_v50 }
 0x40f   : > { %v11955_v42 = vsel %vm945_vm2, %v14768_v10, 0.0  ;;  %14769 = vst [vmem:[#allocation177_spill] sm:$0xff] %v11958_v55  ;;  %v11962_v54 = vsel %vm945_vm2, %v8748_v26, 0.0  ;;  %v11966_v49 = vsel %vm945_vm2, %v14772_v23, 0.0  ;;  %v11970_v13 = vsel %vm5121_vm10, %v2626_v24, %v11840_v0  ;;  %v14775_v24 = vld [vmem:[#allocation74_spill] sm:$0xff] }
 0x410   : > { %14771 = vst [vmem:[#allocation179_spill] sm:$0xff] %v11962_v54  ;;  %14773 = vst [vmem:[#allocation178_spill] sm:$0xff] %v11966_v49  ;;  %v8753_v46 = vunpack.i.h.bf16 %v14770_v50  ;;  %v2392_v22 = vsel %vm1778_vm3, %v2125_v36, 0.0  ;;  %v2393_v41 = vsel %vm1778_vm3, %v2126_v3, 0.0  ;;  %v2461_v10 = vmul.f32 %v14638_v48, %v1714_v25  ;;  %v14777_v36 = vld [vmem:[#allocation198_spill] sm:$0xff] }
 0x411   : > { %14774 = vst [vmem:[#allocation147_spill] sm:$0xff] %v11970_v13  ;;  %3328 = vadd.xlane.f32.xlu0 %v11549_v20  ;;  %v2370_v26 = vrot.slane %v2369_v62, 2  ;;  %v2377_v23 = vrot.slane %v11826_v7, 4  ;;  %v11979_v49 = vadd.f32 %v2393_v41, %v2392_v22  ;;  %v1717_v54 = vpop.xlane.xlu0 %1716  ;;  %v1732_v0 = vpop.xlane.xlu1 %1731  ;;  %v11983_v50 = vsel %vm945_vm2, %v14775_v24, 0.0  ;;  %v14779_v22 = vld [vmem:[#allocation158_spill] sm:$0xff]  ;;  %v14782_v24 = vld [vmem:[#allocation76_spill] sm:$0xff] }
 0x412   : > { %3953 = vadd.xlane.f32.xlu1 %v11529_v28  ;;  %14776 = vst [vmem:[#allocation119_spill] sm:$0xff] %v11983_v50  ;;  %v8758_v13 = vunpack.i.h.bf16 %v14777_v36  ;;  %v8757_v3 = vunpack.i.l.bf16 %v14777_v36  ;;  %v2649_v25 = vadd.f32 %v2648_v40, %v11763_v18  ;;  %v2462_v20 = vmul.f32 %v14641_v5, %v1717_v54  ;;  %v14778_v28 = vld [vmem:[#allocation159_spill] sm:$0xff] }
 0x413   : > { %v11991_v48 = vsel %vm945_vm2, %v14778_v28, 0.0  ;;  %v11995_v41 = vsel %vm945_vm2, %v14779_v22, 0.0  ;;  %v11998_v55 = vsel %vm945_vm2, %v8752_v4, 0.0  ;;  %v12002_v50 = vsel %vm945_vm2, %v14782_v24, 0.0 }
 0x414   : > { %14780 = vst [vmem:[#allocation124_spill] sm:$0xff] %v11995_v41  ;;  %14781 = vst [vmem:[#allocation180_spill] sm:$0xff] %v11998_v55  ;;  %v2672_v36 = vsel %vm1778_vm3, %v2461_v10, 0.0  ;;  %v2673_v18 = vsel %vm1778_vm3, %v2462_v20, 0.0  ;;  %v2467_v40 = vmul.f32 %v14643_v12, %v1732_v0  ;;  %v12010_v54 = vsel %vm945_vm2, %v8753_v46, 0.0  ;;  %v14789_v46 = vld [vmem:[#allocation161_spill] sm:$0xff] }
 0x415   : > { %14783 = vst [vmem:[#allocation123_spill] sm:$0xff] %v12002_v50  ;;  %3956 = vadd.xlane.f32.xlu0 %v11553_v29  ;;  %14784 = vst [vmem:[#allocation181_spill] sm:$0xff] %v12010_v54  ;;  %v2371_v28 = vadd.f32 %v2370_v26, %v2369_v62  ;;  %v2378_v4 = vadd.f32 %v2377_v23, %v11826_v7  ;;  %v2674_v22 = vadd.f32 %v2673_v18, %v2672_v36  ;;  %v1735_v5 = vpop.xlane.xlu0 %1734  ;;  %v1738_v24 = vpop.xlane.xlu1 %1737  ;;  %v14785_v50 = vld [vmem:[#allocation197_spill] sm:$0xff]  ;;  %v14791_v26 = vld [vmem:[#allocation75_spill] sm:$0xff] }
 0x416   : > { %3331 = vadd.xlane.f32.xlu1 %v11556_v17  ;;  %v12015_v10 = vsel %vm945_vm2, %v14785_v50, 0.0  ;;  %v2650_v20 = vrot.slane %v2649_v25, 2  ;;  %v2468_v0 = vmul.f32 %v14644_v44, %v1735_v5  ;;  %v12019_v29 = vsel %vm945_vm2, %v8757_v3, 0.0  ;;  %v14793_v50 = vld [vmem:[#allocation162_spill] sm:$0xff] }
 0x417   : > { %14786 = vst [vmem:[#allocation185_spill] sm:$0xff] %v12015_v10  ;;  %14787 = vst [vmem:[#allocation182_spill] sm:$0xff] %v12019_v29  ;;  %v12022_v17 = vsel %vm945_vm2, %v8758_v13, 0.0  ;;  %v2657_v62 = vrot.slane %v11878_v8, 4  ;;  %v12027_v7 = vsel %vm945_vm2, %v14789_v46, 0.0  ;;  %v12031_v23 = vsel %vm945_vm2, %v14791_v26, 0.0 }
 0x418   : > { %14788 = vst [vmem:[#allocation183_spill] sm:$0xff] %v12022_v17  ;;  %14790 = vst [vmem:[#allocation77_spill] sm:$0xff] %v12027_v7  ;;  %v12035_v36 = vsel %vm945_vm2, %v14793_v50, 0.0  ;;  %v2699_v5 = vsel %vm1778_vm3, %v2467_v40, 0.0  ;;  %v2700_v3 = vsel %vm1778_vm3, %v2468_v0, 0.0  ;;  %v2469_v13 = vmul.f32 %v14647_v57, %v1738_v24  ;;  %v14795_v18 = vld [vmem:[#allocation78_spill] sm:$0xff] }
 0x419   : > { %14792 = vst [vmem:[#allocation184_spill] sm:$0xff] %v12031_v23  ;;  %14794 = vst [vmem:[#allocation166_spill] sm:$0xff] %v12035_v36  ;;  %3334 = vadd.xlane.f32.xlu0 %v11566_v58  ;;  %v12044_v46 = vsel %vm945_vm2, %v14795_v18, 0.0  ;;  %v2372_v26 = vrot.slane %v2371_v28, 1  ;;  %v2379_v44 = vrot.slane %v2378_v4, 2  ;;  %v2701_v12 = vadd.f32 %v2700_v3, %v2699_v5  ;;  %v1741_v23 = vpop.xlane.xlu0 %1740  ;;  %v1128_v50 = vpop.xlane.xlu1 %1127  ;;  %v14797_v36 = vld [vmem:[#allocation163_spill] sm:$0xff] }
 0x41a   : > { %3349 = vadd.xlane.f32.xlu1 %v11584_v53  ;;  %14796 = vst [vmem:[#allocation168_spill] sm:$0xff] %v12044_v46  ;;  %v12048_v40 = vsel %vm945_vm2, %v14797_v36, 0.0  ;;  %v2651_v0 = vadd.f32 %v2650_v20, %v2649_v25  ;;  %v2386_v24 = vrot.slane %v11912_v52, 4  ;;  %v2666_v58 = vrot.slane %v11945_v61, 4  ;;  %v14799_v7 = vld [vmem:[#allocation165_spill] sm:$0xff]  ;;  %v14802_v17 = vld [vmem:[#allocation83_spill] sm:$0xff] }
 0x41b   : > { %14798 = vst [vmem:[#allocation187_spill] sm:$0xff] %v12048_v40  ;;  %v2470_v53 = vmul.f32 %v14649_v34, %v1741_v23  ;;  %v2658_v57 = vadd.f32 %v2657_v62, %v11878_v8  ;;  %v2395_v18 = vrot.slane %v11979_v49, 4  ;;  %v2702_v46 = vrot.slane %v2701_v12, 4  ;;  %v14801_v20 = vld [vmem:[#allocation69_spill] sm:$0xff]  ;;  %v14804_v54 = vld [vmem:[#allocation70_spill] sm:$0xff] }
 0x41c   : > { %v12057_v5 = vsel %vm945_vm2, %v14799_v7, 0.0  ;;  %v2675_v3 = vrot.slane %v2674_v22, 4  ;;  %v2708_v36 = vsel %vm1778_vm3, %v2469_v13, 0.0  ;;  %v2127_v40 = vmul.f32 %v14801_v20, %v1128_v50 }
 0x41d   : > { %14800 = vst [vmem:[#allocation189_spill] sm:$0xff] %v12057_v5  ;;  %v2709_v25 = vsel %vm1778_vm3, %v2470_v53, 0.0  ;;  %3352 = vadd.xlane.f32.xlu0 %v11600_v51  ;;  %v12064_v23 = vadd.f32 %v2372_v26, %v2371_v28  ;;  %v2380_v8 = vadd.f32 %v2379_v44, %v2378_v4  ;;  %v2703_v62 = vadd.f32 %v2702_v46, %v2701_v12  ;;  %v1131_v29 = vpop.xlane.xlu0 %1130  ;;  %v1720_v10 = vpop.xlane.xlu1 %1719  ;;  %v14805_v4 = vld [vmem:[#allocation81_spill] sm:$0xff] }
 0x41e   : > { %3355 = vadd.xlane.f32.xlu1 %v14802_v17  ;;  %v2710_v34 = vadd.f32 %v2709_v25, %v2708_v36  ;;  %v2652_v7 = vrot.slane %v2651_v0, 1  ;;  %v2387_v5 = vadd.f32 %v2386_v24, %v11912_v52  ;;  %v2667_v13 = vadd.f32 %v2666_v58, %v11945_v61  ;;  %v14806_v46 = vld [vmem:[#allocation73_spill] sm:$0xff] }
 0x41f   : > { %14803 = vst [vmem:[#allocation167_spill] sm:$0xff] %v12064_v23  ;;  %v2128_v53 = vmul.f32 %v14804_v54, %v1131_v29  ;;  %v2659_v55 = vrot.slane %v2658_v57, 2  ;;  %v2396_v50 = vadd.f32 %v2395_v18, %v11979_v49  ;;  %v2704_v51 = vrot.slane %v2703_v62, 2 }
 0x420   : > { %v2711_v41 = vrot.slane %v2710_v34, 4  ;;  %v2676_v17 = vadd.f32 %v2675_v3, %v2674_v22  ;;  %v2401_v28 = vsel %vm1778_vm3, %v2127_v40, 0.0  ;;  %v2463_v44 = vmul.f32 %v14675_v11, %v1720_v10 }
 0x421   : > { %v2402_v12 = vsel %vm1778_vm3, %v2128_v53, 0.0  ;;  %3358 = vadd.xlane.f32.xlu0 %v14805_v4  ;;  %v2381_v52 = vrot.slane %v2380_v8, 1  ;;  %v2705_v61 = vadd.f32 %v2704_v51, %v2703_v62  ;;  %v1723_v24 = vpop.xlane.xlu0 %1722  ;;  %v1744_v58 = vpop.xlane.xlu1 %1743  ;;  %v2653_v49 = vadd.f32 %v2652_v7, %v2651_v0 }
 0x422   : > { %3959 = vadd.xlane.f32.xlu1 %v14806_v46  ;;  %v2712_v26 = vadd.f32 %v2711_v41, %v2710_v34  ;;  %v2403_v29 = vadd.f32 %v2402_v12, %v2401_v28  ;;  %v2388_v18 = vrot.slane %v2387_v5, 2  ;;  %v2668_v36 = vrot.slane %v2667_v13, 2  ;;  %v14807_v34 = vld [vmem:[#allocation92_spill] sm:$0xff]  ;;  %v14808_v41 = vld [vmem:[#allocation85_spill] sm:$0xff] }
 0x423   : > { %v2464_v22 = vmul.f32 %v14676_v35, %v1723_v24  ;;  %v2660_v40 = vadd.f32 %v2659_v55, %v2658_v57  ;;  %v2397_v3 = vrot.slane %v2396_v50, 2  ;;  %v2677_v10 = vrot.slane %v2676_v17, 2 }
 0x424   : > { %v2713_v25 = vrot.slane %v2712_v26, 2  ;;  %v2404_v53 = vrot.slane %v2403_v29, 4  ;;  %v2681_v4 = vsel %vm1778_vm3, %v2463_v44, 0.0  ;;  %v2471_v62 = vmul.f32 %v14680_v33, %v1744_v58 }
 0x425   : > { %v2682_v46 = vsel %vm1778_vm3, %v2464_v22, 0.0  ;;  %3962 = vadd.xlane.f32.xlu0 %v14807_v34  ;;  %v12081_v0 = vadd.f32 %v2381_v52, %v2380_v8  ;;  %v2706_v7 = vrot.slane %v2705_v61, 1  ;;  %v1747_v57 = vpop.xlane.xlu0 %1746  ;;  %v1134_v55 = vpop.xlane.xlu1 %1133  ;;  %v2389_v12 = vadd.f32 %v2388_v18, %v2387_v5  ;;  %v14810_v52 = vld [vmem:[#allocation71_spill] sm:$0xff] }
 0x426   : > { %3337 = vadd.xlane.f32.xlu1 %v14808_v41  ;;  %v2714_v51 = vadd.f32 %v2713_v25, %v2712_v26  ;;  %v2683_v28 = vadd.f32 %v2682_v46, %v2681_v4  ;;  %v2669_v24 = vadd.f32 %v2668_v36, %v2667_v13  ;;  %v2405_v23 = vadd.f32 %v2404_v53, %v2403_v29  ;;  %v14811_v26 = vld [vmem:[#allocation86_spill] sm:$0xff]  ;;  %v14812_v25 = vld [vmem:[#allocation96_spill] sm:$0xff] }
 0x427   : > { %14809 = vst [vmem:[#allocation186_spill] sm:$0xff] %v12081_v0  ;;  %v2472_v44 = vmul.f32 %v14684_v38, %v1747_v57  ;;  %v2661_v35 = vrot.slane %v2660_v40, 1  ;;  %v2398_v22 = vadd.f32 %v2397_v3, %v2396_v50  ;;  %v2678_v33 = vadd.f32 %v2677_v10, %v2676_v17  ;;  %v14813_v10 = vld [vmem:[#allocation72_spill] sm:$0xff]  ;;  %v14835_v0 = vld [vmem:[#allocation13_spill] sm:$0xff] }
 0x428   : > { %v2715_v11 = vrot.slane %v2714_v51, 1  ;;  %v2684_v58 = vrot.slane %v2683_v28, 4  ;;  %v2717_v34 = vsel %vm1778_vm3, %v2471_v62, 0.0  ;;  %v2129_v41 = vmul.f32 %v14810_v52, %v1134_v55 }
 0x429   : > { %v2718_v8 = vsel %vm1778_vm3, %v2472_v44, 0.0  ;;  %3340 = vadd.xlane.f32.xlu0 %v14811_v26  ;;  %v2707_v5 = vadd.f32 %v2706_v7, %v2705_v61  ;;  %v1137_v36 = vpop.xlane.xlu0 %1136  ;;  %v1726_v53 = vpop.xlane.xlu1 %1725  ;;  %v2390_v50 = vrot.slane %v2389_v12, 1  ;;  %v2670_v3 = vrot.slane %v2669_v24, 1 }
 0x42a   : > { %3361 = vadd.xlane.f32.xlu1 %v14812_v25  ;;  %v2716_v13 = vadd.f32 %v2715_v11, %v2714_v51  ;;  %v2685_v29 = vadd.f32 %v2684_v58, %v2683_v28  ;;  %v2719_v18 = vadd.f32 %v2718_v8, %v2717_v34  ;;  %v2406_v17 = vrot.slane %v2405_v23, 2  ;;  %v14815_v51 = vld [vmem:[#allocation170_spill] sm:$0xff]  ;;  %v14816_v28 = vld [vmem:[#allocation87_spill] sm:$0xff] }
 0x42b   : > { %v2130_v4 = vmul.f32 %v14813_v10, %v1137_v36  ;;  %v2399_v46 = vrot.slane %v2398_v22, 1  ;;  %v2679_v44 = vrot.slane %v2678_v33, 1  ;;  %v2410_v61 = vsel %vm1778_vm3, %v2129_v41, 0.0 }
 0x42c   : > { %v12091_v62 = vsel %vm5109_vm4, %v2716_v13, %v2707_v5  ;;  %v2686_v57 = vrot.slane %v2685_v29, 2  ;;  %v2720_v55 = vrot.slane %v2719_v18, 4  ;;  %v2465_v7 = vmul.f32 %v14710_v9, %v1726_v53 }
 0x42d   : > { %14814 = vst [vmem:[#allocation188_spill] sm:$0xff] %v12091_v62  ;;  %v2411_v11 = vsel %vm1778_vm3, %v2130_v4, 0.0  ;;  %3364 = vadd.xlane.f32.xlu0 %v14815_v51  ;;  %v1729_v26 = vpop.xlane.xlu0 %1728  ;;  %v1750_v25 = vpop.xlane.xlu1 %1749  ;;  %v12100_v5 = vsel %vm5111_vm5, %v2653_v49, %v11754_v60  ;;  %v12102_v13 = vadd.f32 %v2661_v35, %v2660_v40  ;;  %v12104_v41 = vadd.f32 %v2406_v17, %v2405_v23  ;;  %v14820_v49 = vld [vmem:[#allocation88_spill] sm:$0xff] }
 0x42e   : > { %3965 = vadd.xlane.f32.xlu1 %v14816_v28  ;;  %v2687_v58 = vadd.f32 %v2686_v57, %v2685_v29  ;;  %v2721_v34 = vadd.f32 %v2720_v55, %v2719_v18  ;;  %v2412_v8 = vadd.f32 %v2411_v11, %v2410_v61  ;;  %v2466_v36 = vmul.f32 %v14712_v30, %v1729_v26 }
 0x42f   : > { %14817 = vst [vmem:[#allocation126_spill] sm:$0xff] %v12104_v41  ;;  %v2473_v53 = vmul.f32 %v14716_v19, %v1750_v25  ;;  %v12108_v4 = vadd.f32 %v2390_v50, %v2389_v12  ;;  %v12110_v57 = vadd.f32 %v2670_v3, %v2669_v24  ;;  %v12112_v55 = vadd.f32 %v2399_v46, %v2398_v22  ;;  %v14822_v46 = vld [vmem:[#allocation11_spill] sm:$0xff]  ;;  %v14830_v24 = vld [vmem:[#allocation16_spill] sm:$0xff] }
 0x430   : > { %v2688_v51 = vrot.slane %v2687_v58, 1  ;;  %v2722_v29 = vrot.slane %v2721_v34, 2  ;;  %v2413_v18 = vrot.slane %v2412_v8, 4  ;;  %v2690_v60 = vsel %vm1778_vm3, %v2465_v7, 0.0 }
 0x431   : > { %14818 = vst [vmem:[#allocation132_spill] sm:$0xff] %v12108_v4  ;;  %14819 = vst [vmem:[#allocation190_spill] sm:$0xff] %v12112_v55  ;;  %v2691_v35 = vsel %vm1778_vm3, %v2466_v36, 0.0  ;;  %3968 = vadd.xlane.f32.xlu0 %v14820_v49  ;;  %v12118_v23 = vadd.f32 %v2679_v44, %v2678_v33  ;;  %v1753_v17 = vpop.xlane.xlu0 %1752  ;;  %v3254_v61 = vpop.xlane.xlu1 %3253  ;;  %v2726_v22 = vsel %vm1778_vm3, %v2473_v53, 0.0  ;;  %v14824_v44 = vld [vmem:[#allocation93_spill] sm:$0xff]  ;;  %v14826_v36 = vld [vmem:[#allocation12_spill] sm:$0xff] }
 0x432   : > { %3343 = vadd.xlane.f32.xlu1 %v11674_v27  ;;  %v2723_v40 = vadd.f32 %v2722_v29, %v2721_v34  ;;  %v2414_v12 = vadd.f32 %v2413_v18, %v2412_v8  ;;  %v2692_v50 = vadd.f32 %v2691_v35, %v2690_v60  ;;  %v2474_v3 = vmul.f32 %v14721_v59, %v1753_v17  ;;  %v14825_v34 = vld [vmem:[#allocation95_spill] sm:$0xff]  ;;  %v14834_v59 = vld [vmem:[#allocation10_spill] sm:$0xff] }
 0x433   : > { %14821 = vst [vmem:[#allocation128_spill] sm:$0xff] %v12118_v23  ;;  %v4373_v11 = vmul.f32 %v14822_v46, %v3254_v61  ;;  %v12124_v25 = vadd.f32 %v2688_v51, %v2687_v58  ;;  %v1779_v8 = vsel %vm1778_vm3, %v14822_v46, 0.0  ;;  %v1780_v53 = vsel %vm1778_vm3, %v14826_v36, 0.0  ;;  %v14829_v17 = vld [vmem:[#allocation15_spill] sm:$0xff] }
 0x434   : > { %v2724_v7 = vrot.slane %v2723_v40, 1  ;;  %v2415_v28 = vrot.slane %v2414_v12, 2  ;;  %v2693_v26 = vrot.slane %v2692_v50, 4  ;;  %v2727_v27 = vsel %vm1778_vm3, %v2474_v3, 0.0 }
 0x435   : > { %14823 = vst [vmem:[#allocation169_spill] sm:$0xff] %v12124_v25  ;;  %v4437_v33 = vsel %vm4084_vm11, %v4373_v11, 0.0  ;;  %3346 = vadd.xlane.f32.xlu0 %v14824_v44  ;;  %v2728_v51 = vadd.f32 %v2727_v27, %v2726_v22  ;;  %v3257_v60 = vpop.xlane.xlu0 %3256  ;;  %v3260_v35 = vpop.xlane.xlu1 %3259  ;;  %v1781_v3 = vadd.f32 %v1780_v53, %v1779_v8  ;;  %v1788_v11 = vsel %vm1778_vm3, %v14829_v17, 0.0 }
 0x436   : > { %3367 = vadd.xlane.f32.xlu1 %v14825_v34  ;;  %v12134_v29 = vadd.f32 %v2724_v7, %v2723_v40  ;;  %v12136_v18 = vadd.f32 %v2415_v28, %v2414_v12  ;;  %v2694_v58 = vadd.f32 %v2693_v26, %v2692_v50  ;;  %v4374_v49 = vmul.f32 %v14826_v36, %v3257_v60  ;;  %v14831_v7 = vld [vmem:[#allocation9_spill] sm:$0xff]  ;;  %v14832_v28 = vld [vmem:[#allocation94_spill] sm:$0xff] }
 0x437   : > { %v4375_v61 = vmul.f32 %v14829_v17, %v3260_v35  ;;  %v2729_v34 = vrot.slane %v2728_v51, 4  ;;  %v1789_v40 = vsel %vm1778_vm3, %v14830_v24, 0.0  ;;  %v1797_v12 = vsel %vm1778_vm3, %v14831_v7, 0.0  ;;  %v14833_v26 = vld [vmem:[#allocation102_spill] sm:$0xff] }
 0x438   : > { %14827 = vst [vmem:[#allocation125_spill] sm:$0xff] %v12134_v29  ;;  %14828 = vst [vmem:[#allocation191_spill] sm:$0xff] %v12136_v18  ;;  %v2695_v44 = vrot.slane %v2694_v58, 2  ;;  %v4438_v50 = vsel %vm4084_vm11, %v4374_v49, 0.0  ;;  %v1782_v27 = vrot.slane %v1781_v3, 4  ;;  %v1790_v8 = vadd.f32 %v1789_v40, %v1788_v11  ;;  %v14836_v11 = vld [vmem:[#allocation100_spill] sm:$0xff] }
 0x439   : > { %v4446_v22 = vsel %vm4084_vm11, %v4375_v61, 0.0  ;;  %3370 = vadd.xlane.f32.xlu0 %v14832_v28  ;;  %v2730_v60 = vadd.f32 %v2729_v34, %v2728_v51  ;;  %v4439_v35 = vadd.f32 %v4438_v50, %v4437_v33  ;;  %v3263_v29 = vpop.xlane.xlu0 %3262  ;;  %v1756_v62 = vpop.xlane.xlu1 %1755  ;;  %v1798_v19 = vsel %vm1778_vm3, %v14834_v59, 0.0 }
 0x43a   : > { %3971 = vadd.xlane.f32.xlu1 %v14833_v26  ;;  %v12150_v53 = vadd.f32 %v2695_v44, %v2694_v58  ;;  %v4376_v38 = vmul.f32 %v14830_v24, %v3263_v29  ;;  %v2475_v49 = vmul.f32 %v14740_v39, %v1756_v62  ;;  %v1783_v61 = vadd.f32 %v1782_v27, %v1781_v3  ;;  %v14837_v44 = vld [vmem:[#allocation101_spill] sm:$0xff] }
 0x43b   : > { %v1791_v55 = vrot.slane %v1790_v8, 4  ;;  %v2731_v28 = vrot.slane %v2730_v60, 2  ;;  %v4440_v4 = vrot.slane %v4439_v35, 4  ;;  %v1799_v26 = vadd.f32 %v1798_v19, %v1797_v12 }
 0x43c   : > { %v1806_v58 = vsel %vm1778_vm3, %v14835_v0, 0.0  ;;  %v4447_v51 = vsel %vm4084_vm11, %v4376_v38, 0.0  ;;  %v2735_v33 = vsel %vm1778_vm3, %v2475_v49, 0.0  ;;  %v1784_v34 = vrot.slane %v1783_v61, 2 }
 0x43d   : > { %3974 = vadd.xlane.f32.xlu0 %v14836_v11  ;;  %v1792_v29 = vadd.f32 %v1791_v55, %v1790_v8  ;;  %v2732_v40 = vadd.f32 %v2731_v28, %v2730_v60  ;;  %v4441_v62 = vadd.f32 %v4440_v4, %v4439_v35  ;;  %v4448_v3 = vadd.f32 %v4447_v51, %v4446_v22  ;;  %v1759_v50 = vpop.xlane.xlu0 %1758  ;;  %v3266_v27 = vpop.xlane.xlu1 %3265  ;;  %v14838_v8 = vld [vmem:[#allocation97_spill] sm:$0xff]  ;;  %v14839_v4 = vld [vmem:[#allocation99_spill] sm:$0xff] }
 0x43e   : > { %3989 = vadd.xlane.f32.xlu1 %v14837_v44  ;;  %v1800_v39 = vrot.slane %v1799_v26, 4  ;;  %v2476_v19 = vmul.f32 %v14742_v2, %v1759_v50  ;;  %v4377_v12 = vmul.f32 %v14831_v7, %v3266_v27  ;;  %v1785_v18 = vadd.f32 %v1784_v34, %v1783_v61 }
 0x43f   : > { %v1793_v38 = vrot.slane %v1792_v29, 2  ;;  %v2733_v25 = vrot.slane %v2732_v40, 1  ;;  %v4442_v49 = vrot.slane %v4441_v62, 2  ;;  %v4449_v41 = vrot.slane %v4448_v3, 4 }
 0x440   : > { %v1801_v11 = vadd.f32 %v1800_v39, %v1799_v26  ;;  %v2736_v44 = vsel %vm1778_vm3, %v2476_v19, 0.0  ;;  %v4455_v55 = vsel %vm4084_vm11, %v4377_v12, 0.0  ;;  %v1786_v22 = vrot.slane %v1785_v18, 1 }
 0x441   : > { %3992 = vadd.xlane.f32.xlu0 %v14838_v8  ;;  %v1794_v60 = vadd.f32 %v1793_v38, %v1792_v29  ;;  %v12168_v35 = vadd.f32 %v2733_v25, %v2732_v40  ;;  %v4443_v28 = vadd.f32 %v4442_v49, %v4441_v62  ;;  %v4450_v51 = vadd.f32 %v4449_v41, %v4448_v3  ;;  %v3269_v34 = vpop.xlane.xlu0 %3268  ;;  %v1762_v50 = vpop.xlane.xlu1 %1761  ;;  %v14841_v40 = vld [vmem:[#allocation104_spill] sm:$0xff]  ;;  %v14842_v41 = vld [vmem:[#allocation114_spill] sm:$0xff] }
 0x442   : > { %3995 = vadd.xlane.f32.xlu1 %v14839_v4  ;;  %v2737_v61 = vadd.f32 %v2736_v44, %v2735_v33  ;;  %v4378_v27 = vmul.f32 %v14834_v59, %v3269_v34  ;;  %v2477_v39 = vmul.f32 %v14763_v6, %v1762_v50  ;;  %v12172_v26 = vadd.f32 %v1786_v22, %v1785_v18  ;;  %v14843_v62 = vld [vmem:[#allocation14_spill] sm:$0xff] }
 0x443   : > { %14840 = vst [vmem:[#allocation127_spill] sm:$0xff] %v12168_v35  ;;  %v1795_v19 = vrot.slane %v1794_v60, 1  ;;  %v4444_v12 = vrot.slane %v4443_v28, 1  ;;  %v4451_v8 = vrot.slane %v4450_v51, 2  ;;  %v1802_v4 = vrot.slane %v1801_v11, 2 }
 0x444   : > { %v2738_v2 = vrot.slane %v2737_v61, 4  ;;  %v4456_v29 = vsel %vm4084_vm11, %v4378_v27, 0.0  ;;  %v2744_v25 = vsel %vm1778_vm3, %v2477_v39, 0.0  ;;  %v1807_v3 = vsel %vm1778_vm3, %v14843_v62, 0.0 }
 0x445   : > { %3998 = vadd.xlane.f32.xlu0 %v14841_v40  ;;  %v12178_v33 = vadd.f32 %v1795_v19, %v1794_v60  ;;  %v4445_v18 = vadd.f32 %v4444_v12, %v4443_v28  ;;  %v4452_v38 = vadd.f32 %v4451_v8, %v4450_v51  ;;  %v4457_v44 = vadd.f32 %v4456_v29, %v4455_v55  ;;  %v1765_v22 = vpop.xlane.xlu0 %1764  ;;  %v3272_v34 = vpop.xlane.xlu1 %3271  ;;  %v14844_v60 = vld [vmem:[#allocation19_spill] sm:$0xff]  ;;  %v14846_v55 = vld [vmem:[#allocation108_spill] sm:$0xff] }
 0x446   : > { %3373 = vadd.xlane.f32.xlu1 %v14842_v41  ;;  %v2739_v49 = vadd.f32 %v2738_v2, %v2737_v61  ;;  %v2478_v50 = vmul.f32 %v14767_v32, %v1765_v22  ;;  %v4379_v27 = vmul.f32 %v14835_v0, %v3272_v34  ;;  %v1803_v39 = vadd.f32 %v1802_v4, %v1801_v11  ;;  %v14845_v2 = vld [vmem:[#allocation103_spill] sm:$0xff] }
 0x447   : > { %v1808_v35 = vadd.f32 %v1807_v3, %v1806_v58  ;;  %v4453_v40 = vrot.slane %v4452_v38, 1  ;;  %v4458_v41 = vrot.slane %v4457_v44, 4  ;;  %v1815_v19 = vsel %vm1778_vm3, %v14844_v60, 0.0 }
 0x448   : > { %v2740_v6 = vrot.slane %v2739_v49, 2  ;;  %v2745_v23 = vsel %vm1778_vm3, %v2478_v50, 0.0  ;;  %v4464_v28 = vsel %vm4084_vm11, %v4379_v27, 0.0  ;;  %v1804_v51 = vrot.slane %v1803_v39, 1 }
 0x449   : > { %3376 = vadd.xlane.f32.xlu0 %v14845_v2  ;;  %v1809_v61 = vrot.slane %v1808_v35, 4  ;;  %v4454_v12 = vadd.f32 %v4453_v40, %v4452_v38  ;;  %v4459_v11 = vadd.f32 %v4458_v41, %v4457_v44  ;;  %v2746_v58 = vadd.f32 %v2745_v23, %v2744_v25  ;;  %v3275_v4 = vpop.xlane.xlu0 %3274  ;;  %v3894_v29 = vpop.xlane.xlu1 %3893  ;;  %v14848_v23 = vld [vmem:[#allocation110_spill] sm:$0xff] }
 0x44a   : > { %3977 = vadd.xlane.f32.xlu1 %v14846_v55  ;;  %v2741_v8 = vadd.f32 %v2740_v6, %v2739_v49  ;;  %v4380_v3 = vmul.f32 %v14843_v62, %v3275_v4  ;;  %v4725_v22 = vmul.f32 %v14822_v46, %v3894_v29  ;;  %v12192_v34 = vadd.f32 %v1804_v51, %v1803_v39  ;;  %v14849_v49 = vld [vmem:[#allocation20_spill] sm:$0xff] }
 0x44b   : > { %v1810_v50 = vadd.f32 %v1809_v61, %v1808_v35  ;;  %v12195_v27 = vsel %vm5109_vm4, %v4454_v12, %v4445_v18  ;;  %v4460_v55 = vrot.slane %v4459_v11, 2  ;;  %v2747_v32 = vrot.slane %v2746_v58, 4 }
 0x44c   : > { %14847 = vst [vmem:[#allocation131_spill] sm:$0xff] %v12195_v27  ;;  %v2742_v2 = vrot.slane %v2741_v8, 1  ;;  %v4465_v38 = vsel %vm4084_vm11, %v4380_v3, 0.0  ;;  %v4789_v6 = vsel %vm4084_vm11, %v4725_v22, 0.0  ;;  %v1816_v44 = vsel %vm1778_vm3, %v14849_v49, 0.0 }
 0x44d   : > { %3980 = vadd.xlane.f32.xlu0 %v11768_v15  ;;  %v1811_v25 = vrot.slane %v1810_v50, 2  ;;  %v4461_v35 = vadd.f32 %v4460_v55, %v4459_v11  ;;  %v2748_v18 = vadd.f32 %v2747_v32, %v2746_v58  ;;  %v4466_v40 = vadd.f32 %v4465_v38, %v4464_v28  ;;  %v3897_v41 = vpop.xlane.xlu0 %3896  ;;  %v3900_v51 = vpop.xlane.xlu1 %3899 }
 0x44e   : > { %4001 = vadd.xlane.f32.xlu1 %v14848_v23  ;;  %v12203_v39 = vadd.f32 %v2742_v2, %v2741_v8  ;;  %v4726_v61 = vmul.f32 %v14826_v36, %v3897_v41  ;;  %v4727_v12 = vmul.f32 %v14829_v17, %v3900_v51  ;;  %v1817_v29 = vadd.f32 %v1816_v44, %v1815_v19  ;;  %v14851_v23 = vld [vmem:[#allocation17_spill] sm:$0xff] }
 0x44f   : > { %v1812_v4 = vadd.f32 %v1811_v25, %v1810_v50  ;;  %v4462_v15 = vrot.slane %v4461_v35, 1  ;;  %v2749_v3 = vrot.slane %v2748_v18, 2  ;;  %v4467_v22 = vrot.slane %v4466_v40, 4 }
 0x450   : > { %14850 = vst [vmem:[#allocation90_spill] sm:$0xff] %v12203_v39  ;;  %v1824_v27 = vsel %vm1778_vm3, %v14851_v23, 0.0  ;;  %v4790_v8 = vsel %vm4084_vm11, %v4726_v61, 0.0  ;;  %v4798_v11 = vsel %vm4084_vm11, %v4727_v12, 0.0  ;;  %v1818_v28 = vrot.slane %v1817_v29, 4 }
 0x451   : > { %4004 = vadd.xlane.f32.xlu0 %v11772_v47  ;;  %v1813_v32 = vrot.slane %v1812_v4, 1  ;;  %v12213_v58 = vadd.f32 %v4462_v15, %v4461_v35  ;;  %v2750_v50 = vadd.f32 %v2749_v3, %v2748_v18  ;;  %v4468_v19 = vadd.f32 %v4467_v22, %v4466_v40  ;;  %v3903_v55 = vpop.xlane.xlu0 %3902  ;;  %v1768_v38 = vpop.xlane.xlu1 %1767 }
 0x452   : > { %3379 = vadd.xlane.f32.xlu1 %v11775_v43  ;;  %v4791_v2 = vadd.f32 %v4790_v8, %v4789_v6  ;;  %v4728_v25 = vmul.f32 %v14830_v24, %v3903_v55  ;;  %v2479_v44 = vmul.f32 %v14801_v20, %v1768_v38  ;;  %v1819_v51 = vadd.f32 %v1818_v28, %v1817_v29  ;;  %v14853_v43 = vld [vmem:[#allocation18_spill] sm:$0xff]  ;;  %v14854_v6 = vld [vmem:[#allocation121_spill] sm:$0xff]  ;;  %v14856_v24 = vld [vmem:[#allocation27_spill] sm:$0xff] }
 0x453   : > { %14852 = vst [vmem:[#allocation82_spill] sm:$0xff] %v12213_v58  ;;  %v12217_v41 = vadd.f32 %v1813_v32, %v1812_v4  ;;  %v2751_v61 = vrot.slane %v2750_v50, 1  ;;  %v4469_v47 = vrot.slane %v4468_v19, 2  ;;  %v1825_v17 = vsel %vm1778_vm3, %v14853_v43, 0.0 }
 0x454   : > { %v4792_v12 = vrot.slane %v4791_v2, 4  ;;  %v4799_v35 = vsel %vm4084_vm11, %v4728_v25, 0.0  ;;  %v2753_v18 = vsel %vm1778_vm3, %v2479_v44, 0.0  ;;  %v1820_v40 = vrot.slane %v1819_v51, 2 }
 0x455   : > { %3382 = vadd.xlane.f32.xlu0 %v11778_v21  ;;  %v1826_v15 = vadd.f32 %v1825_v17, %v1824_v27  ;;  %v12225_v3 = vadd.f32 %v2751_v61, %v2750_v50  ;;  %v4470_v4 = vadd.f32 %v4469_v47, %v4468_v19  ;;  %v4800_v22 = vadd.f32 %v4799_v35, %v4798_v11  ;;  %v1771_v8 = vpop.xlane.xlu0 %1770  ;;  %v3278_v32 = vpop.xlane.xlu1 %3277  ;;  %v14857_v50 = vld [vmem:[#allocation105_spill] sm:$0xff] }
 0x456   : > { %3397 = vadd.xlane.f32.xlu1 %v14854_v6  ;;  %v4793_v29 = vadd.f32 %v4792_v12, %v4791_v2  ;;  %v2480_v28 = vmul.f32 %v14804_v54, %v1771_v8  ;;  %v4381_v55 = vmul.f32 %v14844_v60, %v3278_v32  ;;  %v1821_v38 = vadd.f32 %v1820_v40, %v1819_v51  ;;  %v14858_v11 = vld [vmem:[#allocation113_spill] sm:$0xff] }
 0x457   : > { %14855 = vst [vmem:[#allocation134_spill] sm:$0xff] %v12225_v3  ;;  %v1827_v25 = vrot.slane %v1826_v15, 4  ;;  %v4471_v44 = vrot.slane %v4470_v4, 1  ;;  %v4801_v21 = vrot.slane %v4800_v22, 4  ;;  %v1833_v6 = vsel %vm1778_vm3, %v14856_v24, 0.0 }
 0x458   : > { %v4794_v58 = vrot.slane %v4793_v29, 2  ;;  %v2754_v17 = vsel %vm1778_vm3, %v2480_v28, 0.0  ;;  %v4473_v27 = vsel %vm4084_vm11, %v4381_v55, 0.0  ;;  %v1822_v19 = vrot.slane %v1821_v38, 1 }
 0x459   : > { %3400 = vadd.xlane.f32.xlu0 %v14857_v50  ;;  %v1828_v2 = vadd.f32 %v1827_v25, %v1826_v15  ;;  %v12235_v61 = vadd.f32 %v4471_v44, %v4470_v4  ;;  %v4802_v47 = vadd.f32 %v4801_v21, %v4800_v22  ;;  %v2755_v12 = vadd.f32 %v2754_v17, %v2753_v18  ;;  %v3281_v35 = vpop.xlane.xlu0 %3280  ;;  %v3906_v40 = vpop.xlane.xlu1 %3905  ;;  %v14861_v18 = vld [vmem:[#allocation106_spill] sm:$0xff] }
 0x45a   : > { %3403 = vadd.xlane.f32.xlu1 %v14858_v11  ;;  %v4795_v51 = vadd.f32 %v4794_v58, %v4793_v29  ;;  %v4382_v8 = vmul.f32 %v14849_v49, %v3281_v35  ;;  %v4729_v32 = vmul.f32 %v14831_v7, %v3906_v40  ;;  %v12239_v28 = vadd.f32 %v1822_v19, %v1821_v38  ;;  %v14860_v11 = vld [vmem:[#allocation28_spill] sm:$0xff]  ;;  %v14862_v29 = vld [vmem:[#allocation107_spill] sm:$0xff] }
 0x45b   : > { %14859 = vst [vmem:[#allocation193_spill] sm:$0xff] %v12235_v61  ;;  %v1829_v55 = vrot.slane %v1828_v2, 2  ;;  %v4803_v50 = vrot.slane %v4802_v47, 2  ;;  %v2756_v3 = vrot.slane %v2755_v12, 4  ;;  %v1834_v15 = vsel %vm1778_vm3, %v14860_v11, 0.0 }
 0x45c   : > { %v4796_v36 = vrot.slane %v4795_v51, 1  ;;  %v4474_v4 = vsel %vm4084_vm11, %v4382_v8, 0.0  ;;  %v4807_v58 = vsel %vm4084_vm11, %v4729_v32, 0.0  ;;  %v1835_v25 = vadd.f32 %v1834_v15, %v1833_v6 }
 0x45d   : > { %3406 = vadd.xlane.f32.xlu0 %v14861_v18  ;;  %v1830_v22 = vadd.f32 %v1829_v55, %v1828_v2  ;;  %v4804_v38 = vadd.f32 %v4803_v50, %v4802_v47  ;;  %v2757_v21 = vadd.f32 %v2756_v3, %v2755_v12  ;;  %v4475_v17 = vadd.f32 %v4474_v4, %v4473_v27  ;;  %v3909_v19 = vpop.xlane.xlu0 %3908  ;;  %v1774_v35 = vpop.xlane.xlu1 %1773  ;;  %v14863_v18 = vld [vmem:[#allocation31_spill] sm:$0xff]  ;;  %v14864_v3 = vld [vmem:[#allocation122_spill] sm:$0xff]  ;;  %v14865_v27 = vld [vmem:[#allocation129_spill] sm:$0xff] }
 0x45e   : > { %3983 = vadd.xlane.f32.xlu1 %v14862_v29  ;;  %v4797_v44 = vadd.f32 %v4796_v36, %v4795_v51  ;;  %v4730_v40 = vmul.f32 %v14834_v59, %v3909_v19  ;;  %v2481_v61 = vmul.f32 %v14810_v52, %v1774_v35  ;;  %v1836_v8 = vrot.slane %v1835_v25, 4  ;;  %v14866_v59 = vld [vmem:[#allocation32_spill] sm:$0xff] }
 0x45f   : > { %v1831_v7 = vrot.slane %v1830_v22, 1  ;;  %v4805_v46 = vrot.slane %v4804_v38, 1  ;;  %v2758_v32 = vrot.slane %v2757_v21, 2  ;;  %v4476_v39 = vrot.slane %v4475_v17, 4 }
 0x460   : > { %v1842_v29 = vsel %vm1778_vm3, %v14863_v18, 0.0  ;;  %v4808_v6 = vsel %vm4084_vm11, %v4730_v40, 0.0  ;;  %v2762_v36 = vsel %vm1778_vm3, %v2481_v61, 0.0  ;;  %v1837_v51 = vadd.f32 %v1836_v8, %v1835_v25  ;;  %v14868_v25 = vld [vmem:[#allocation109_spill] sm:$0xff] }
 0x461   : > { %3986 = vadd.xlane.f32.xlu0 %v14864_v3  ;;  %v1832_v2 = vadd.f32 %v1831_v7, %v1830_v22  ;;  %v4806_v47 = vadd.f32 %v4805_v46, %v4804_v38  ;;  %v12255_v12 = vadd.f32 %v2758_v32, %v2757_v21  ;;  %v4477_v55 = vadd.f32 %v4476_v39, %v4475_v17  ;;  %v1777_v15 = vpop.xlane.xlu0 %1776  ;;  %v3284_v4 = vpop.xlane.xlu1 %3283  ;;  %v14880_v7 = vld [vmem:[#allocation25_spill] sm:$0xff] }
 0x462   : > { %4007 = vadd.xlane.f32.xlu1 %v14865_v27  ;;  %v4809_v50 = vadd.f32 %v4808_v6, %v4807_v58  ;;  %v2482_v19 = vmul.f32 %v14813_v10, %v1777_v15  ;;  %v4383_v35 = vmul.f32 %v14851_v23, %v3284_v4  ;;  %v1838_v40 = vrot.slane %v1837_v51, 2 }
 0x463   : > { %v1843_v61 = vsel %vm1778_vm3, %v14866_v59, 0.0  ;;  %v12262_v3 = vsel %vm5109_vm4, %v4806_v47, %v4797_v44  ;;  %v4478_v46 = vrot.slane %v4477_v55, 2  ;;  %v5110_v27 = vsel %vm5109_vm4, %v12178_v33, %v12172_v26 }
 0x464   : > { %14867 = vst [vmem:[#allocation136_spill] sm:$0xff] %v12262_v3  ;;  %v4810_v22 = vrot.slane %v4809_v50, 4  ;;  %v2763_v39 = vsel %vm1778_vm3, %v2482_v19, 0.0  ;;  %v4482_v58 = vsel %vm4084_vm11, %v4383_v35, 0.0  ;;  %v1839_v38 = vadd.f32 %v1838_v40, %v1837_v51  ;;  %v14888_v3 = vld [vmem:[#allocation29_spill] sm:$0xff] }
 0x465   : > { %4010 = vadd.xlane.f32.xlu0 %v14868_v25  ;;  %v1844_v21 = vadd.f32 %v1843_v61, %v1842_v29  ;;  %v4479_v17 = vadd.f32 %v4478_v46, %v4477_v55  ;;  %v2764_v32 = vadd.f32 %v2763_v39, %v2762_v36  ;;  %v3287_v6 = vpop.xlane.xlu0 %3286  ;;  %v3912_v44 = vpop.xlane.xlu1 %3911  ;;  %v5112_v29 = vsel %vm5111_vm5, %v12192_v34, %v5110_v27 }
 0x466   : > { %3385 = vadd.xlane.f32.xlu1 %v11850_v1  ;;  %v4811_v8 = vadd.f32 %v4810_v22, %v4809_v50  ;;  %v4384_v47 = vmul.f32 %v14853_v43, %v3287_v6  ;;  %v4731_v15 = vmul.f32 %v14835_v0, %v3912_v44  ;;  %v1840_v4 = vrot.slane %v1839_v38, 1 }
 0x467   : > { %v1845_v19 = vrot.slane %v1844_v21, 4  ;;  %v4480_v35 = vrot.slane %v4479_v17, 1  ;;  %v2765_v1 = vrot.slane %v2764_v32, 4  ;;  %v5114_v44 = vsel %vm5113_vm6, %v12217_v41, %v5112_v29 }
 0x468   : > { %v4812_v25 = vrot.slane %v4811_v8, 2  ;;  %v4483_v36 = vsel %vm4084_vm11, %v4384_v47, 0.0  ;;  %v4816_v51 = vsel %vm4084_vm11, %v4731_v15, 0.0  ;;  %v1841_v26 = vadd.f32 %v1840_v4, %v1839_v38 }
 0x469   : > { %3388 = vadd.xlane.f32.xlu0 %v11854_v37  ;;  %v1846_v33 = vadd.f32 %v1845_v19, %v1844_v21  ;;  %v12280_v55 = vadd.f32 %v4480_v35, %v4479_v17  ;;  %v2766_v40 = vadd.f32 %v2765_v1, %v2764_v32  ;;  %v4484_v61 = vadd.f32 %v4483_v36, %v4482_v58  ;;  %v3915_v46 = vpop.xlane.xlu0 %3914  ;;  %v3290_v22 = vpop.xlane.xlu1 %3289  ;;  %v14870_v17 = vld [vmem:[#allocation130_spill] sm:$0xff] }
 0x46a   : > { %3409 = vadd.xlane.f32.xlu1 %v11831_v14  ;;  %v4813_v50 = vadd.f32 %v4812_v25, %v4811_v8  ;;  %v4732_v39 = vmul.f32 %v14843_v62, %v3915_v46  ;;  %v4385_v34 = vmul.f32 %v14856_v24, %v3290_v22  ;;  %v5116_v38 = vsel %vm5115_vm7, %v12239_v28, %v5114_v44 }
 0x46b   : > { %14869 = vst [vmem:[#allocation194_spill] sm:$0xff] %v12280_v55  ;;  %v1847_v6 = vrot.slane %v1846_v33, 2  ;;  %v2767_v27 = vrot.slane %v2766_v40, 2  ;;  %v4485_v14 = vrot.slane %v4484_v61, 4  ;;  %v5118_v32 = vsel %vm5117_vm8, %v1832_v2, %v5116_v38 }
 0x46c   : > { %v4814_v37 = vrot.slane %v4813_v50, 1  ;;  %v4817_v21 = vsel %vm4084_vm11, %v4732_v39, 0.0  ;;  %v4491_v58 = vsel %vm4084_vm11, %v4385_v34, 0.0  ;;  %v5120_v29 = vsel %vm5119_vm9, %v1841_v26, %v5118_v32  ;;  %v14876_v32 = vld [vmem:[#allocation22_spill] sm:$0xff] }
 0x46d   : > { %3412 = vadd.xlane.f32.xlu0 %v14870_v17  ;;  %v1848_v8 = vadd.f32 %v1847_v6, %v1846_v33  ;;  %v12295_v41 = vadd.f32 %v2767_v27, %v2766_v40  ;;  %v4486_v15 = vadd.f32 %v4485_v14, %v4484_v61  ;;  %v4818_v4 = vadd.f32 %v4817_v21, %v4816_v51  ;;  %v3293_v19 = vpop.xlane.xlu0 %3292  ;;  %v3918_v35 = vpop.xlane.xlu1 %3917  ;;  %v14872_v33 = vld [vmem:[#allocation23_spill] sm:$0xff] }
 0x46e   : > { %4013 = vadd.xlane.f32.xlu1 %v11858_v31  ;;  %v12293_v47 = vadd.f32 %v4814_v37, %v4813_v50  ;;  %v4386_v28 = vmul.f32 %v14860_v11, %v3293_v19  ;;  %v4733_v25 = vmul.f32 %v14844_v60, %v3918_v35  ;;  %v1851_v2 = vsel %vm1778_vm3, %v14872_v33, 0.0  ;;  %v14873_v50 = vld [vmem:[#allocation24_spill] sm:$0xff]  ;;  %v14874_v37 = vld [vmem:[#allocation21_spill] sm:$0xff]  ;;  %v14877_v19 = vld [vmem:[#allocation171_spill] sm:$0xff] }
 0x46f   : > { %v1849_v1 = vrot.slane %v1848_v8, 1  ;;  %v4487_v36 = vrot.slane %v4486_v15, 2  ;;  %v4819_v31 = vrot.slane %v4818_v4, 4  ;;  %v1852_v40 = vsel %vm1778_vm3, %v14873_v50, 0.0  ;;  %v14878_v35 = vld [vmem:[#allocation112_spill] sm:$0xff] }
 0x470   : > { %14871 = vst [vmem:[#allocation84_spill] sm:$0xff] %v12293_v47  ;;  %v4492_v61 = vsel %vm4084_vm11, %v4386_v28, 0.0  ;;  %v4825_v51 = vsel %vm4084_vm11, %v4733_v25, 0.0  ;;  %v1853_v22 = vadd.f32 %v1852_v40, %v1851_v2  ;;  %v1860_v27 = vsel %vm1778_vm3, %v14874_v37, 0.0 }
 0x471   : > { %4016 = vadd.xlane.f32.xlu0 %v11862_v16  ;;  %v1850_v46 = vadd.f32 %v1849_v1, %v1848_v8  ;;  %v4488_v39 = vadd.f32 %v4487_v36, %v4486_v15  ;;  %v4820_v26 = vadd.f32 %v4819_v31, %v4818_v4  ;;  %v4493_v34 = vadd.f32 %v4492_v61, %v4491_v58  ;;  %v3921_v6 = vpop.xlane.xlu0 %3920  ;;  %v3296_v44 = vpop.xlane.xlu1 %3295 }
 0x472   : > { %3391 = vadd.xlane.f32.xlu1 %v11876_v56  ;;  %v4734_v14 = vmul.f32 %v14849_v49, %v3921_v6  ;;  %v4387_v38 = vmul.f32 %v14863_v18, %v3296_v44  ;;  %v1854_v16 = vrot.slane %v1853_v22, 4  ;;  %v1861_v15 = vsel %vm1778_vm3, %v14876_v32, 0.0 }
 0x473   : > { %v12313_v21 = vsel %vm5121_vm10, %v1850_v46, %v5120_v29  ;;  %v4489_v17 = vrot.slane %v4488_v39, 1  ;;  %v4821_v56 = vrot.slane %v4820_v26, 2  ;;  %v4494_v8 = vrot.slane %v4493_v34, 4 }
 0x474   : > { %14875 = vst [vmem:[#allocation192_spill] sm:$0xff] %v12313_v21  ;;  %v4826_v58 = vsel %vm4084_vm11, %v4734_v14, 0.0  ;;  %v4500_v4 = vsel %vm4084_vm11, %v4387_v38, 0.0  ;;  %v1855_v28 = vadd.f32 %v1854_v16, %v1853_v22  ;;  %v1862_v25 = vadd.f32 %v1861_v15, %v1860_v27 }
 0x475   : > { %3394 = vadd.xlane.f32.xlu0 %v14877_v19  ;;  %v12321_v1 = vadd.f32 %v4489_v17, %v4488_v39  ;;  %v4822_v29 = vadd.f32 %v4821_v56, %v4820_v26  ;;  %v4495_v36 = vadd.f32 %v4494_v8, %v4493_v34  ;;  %v4827_v31 = vadd.f32 %v4826_v58, %v4825_v51  ;;  %v3299_v2 = vpop.xlane.xlu0 %3298  ;;  %v3924_v40 = vpop.xlane.xlu1 %3923  ;;  %v14881_v34 = vld [vmem:[#allocation111_spill] sm:$0xff]  ;;  %v14882_v51 = vld [vmem:[#allocation116_spill] sm:$0xff] }
 0x476   : > { %3415 = vadd.xlane.f32.xlu1 %v14878_v35  ;;  %v4388_v61 = vmul.f32 %v14866_v59, %v3299_v2  ;;  %v4735_v46 = vmul.f32 %v14851_v23, %v3924_v40  ;;  %v1856_v6 = vrot.slane %v1855_v28, 2  ;;  %v1863_v44 = vrot.slane %v1862_v25, 4 }
 0x477   : > { %14879 = vst [vmem:[#allocation133_spill] sm:$0xff] %v12321_v1  ;;  %v4823_v14 = vrot.slane %v4822_v29, 1  ;;  %v4496_v38 = vrot.slane %v4495_v36, 2  ;;  %v4828_v19 = vrot.slane %v4827_v31, 4  ;;  %v1869_v22 = vsel %vm1778_vm3, %v14880_v7, 0.0 }
 0x478   : > { %v4501_v39 = vsel %vm4084_vm11, %v4388_v61, 0.0  ;;  %v4834_v26 = vsel %vm4084_vm11, %v4735_v46, 0.0  ;;  %v1857_v27 = vadd.f32 %v1856_v6, %v1855_v28  ;;  %v1864_v16 = vadd.f32 %v1863_v44, %v1862_v25  ;;  %v14885_v28 = vld [vmem:[#allocation26_spill] sm:$0xff] }
 0x479   : > { %3418 = vadd.xlane.f32.xlu0 %v14881_v34  ;;  %v12331_v17 = vadd.f32 %v4823_v14, %v4822_v29  ;;  %v12333_v56 = vadd.f32 %v4496_v38, %v4495_v36  ;;  %v4829_v8 = vadd.f32 %v4828_v19, %v4827_v31  ;;  %v4502_v15 = vadd.f32 %v4501_v39, %v4500_v4  ;;  %v3927_v58 = vpop.xlane.xlu0 %3926  ;;  %v3930_v35 = vpop.xlane.xlu1 %3929  ;;  %v14886_v4 = vld [vmem:[#allocation115_spill] sm:$0xff]  ;;  %v14887_v31 = vld [vmem:[#allocation174_spill] sm:$0xff] }
 0x47a   : > { %4019 = vadd.xlane.f32.xlu1 %v14882_v51  ;;  %v4736_v2 = vmul.f32 %v14853_v43, %v3927_v58  ;;  %v4737_v40 = vmul.f32 %v14856_v24, %v3930_v35  ;;  %v1858_v61 = vrot.slane %v1857_v27, 1  ;;  %v1865_v46 = vrot.slane %v1864_v16, 2 }
 0x47b   : > { %14883 = vst [vmem:[#allocation144_spill] sm:$0xff] %v12331_v17  ;;  %14884 = vst [vmem:[#allocation135_spill] sm:$0xff] %v12333_v56  ;;  %v4830_v47 = vrot.slane %v4829_v8, 2  ;;  %v4503_v51 = vrot.slane %v4502_v15, 4  ;;  %v1870_v25 = vsel %vm1778_vm3, %v14885_v28, 0.0 }
 0x47c   : > { %v4835_v29 = vsel %vm4084_vm11, %v4736_v2, 0.0  ;;  %v4843_v36 = vsel %vm4084_vm11, %v4737_v40, 0.0  ;;  %v12344_v6 = vadd.f32 %v1858_v61, %v1857_v27  ;;  %v1866_v44 = vadd.f32 %v1865_v46, %v1864_v16 }
 0x47d   : > { %4022 = vadd.xlane.f32.xlu0 %v14886_v4  ;;  %v4831_v14 = vadd.f32 %v4830_v47, %v4829_v8  ;;  %v4504_v38 = vadd.f32 %v4503_v51, %v4502_v15  ;;  %v4836_v19 = vadd.f32 %v4835_v29, %v4834_v26  ;;  %v1871_v35 = vadd.f32 %v1870_v25, %v1869_v22  ;;  %v14889_v26 = vld [vmem:[#allocation172_spill] sm:$0xff]  ;;  %v14890_v8 = vld [vmem:[#allocation175_spill] sm:$0xff]  ;;  %v14891_v15 = vld [vmem:[#allocation30_spill] sm:$0xff] }
 0x47e   : > { %4037 = vadd.xlane.f32.xlu1 %v14887_v31  ;;  %v3933_v39 = vpop.xlane.xlu0 %3932  ;;  %v1867_v2 = vrot.slane %v1866_v44, 1  ;;  %v1878_v40 = vsel %vm1778_vm3, %v14888_v3, 0.0  ;;  %v1879_v61 = vsel %vm1778_vm3, %v14891_v15, 0.0 }
 0x47f   : > { %v3936_v58 = vpop.xlane.xlu1 %3935  ;;  %v4738_v34 = vmul.f32 %v14860_v11, %v3933_v39  ;;  %v4832_v4 = vrot.slane %v4831_v14, 1  ;;  %v4505_v1 = vrot.slane %v4504_v38, 2  ;;  %v4837_v31 = vrot.slane %v4836_v19, 4 }
 0x480   : > { %v4739_v17 = vmul.f32 %v14863_v18, %v3936_v58  ;;  %v1872_v27 = vrot.slane %v1871_v35, 4  ;;  %v12354_v22 = vadd.f32 %v1867_v2, %v1866_v44  ;;  %v1880_v55 = vadd.f32 %v1879_v61, %v1878_v40  ;;  %v14894_v2 = vld [vmem:[#allocation35_spill] sm:$0xff]  ;;  %v14895_v18 = vld [vmem:[#allocation36_spill] sm:$0xff] }
 0x481   : > { %v4844_v16 = vsel %vm4084_vm11, %v4738_v34, 0.0  ;;  %4040 = vadd.xlane.f32.xlu0 %v14889_v26  ;;  %v12358_v46 = vadd.f32 %v4832_v4, %v4831_v14  ;;  %v12360_v51 = vadd.f32 %v4505_v1, %v4504_v38  ;;  %v4838_v25 = vadd.f32 %v4837_v31, %v4836_v19  ;;  %v14896_v38 = vld [vmem:[#allocation173_spill] sm:$0xff]  ;;  %v14897_v19 = vld [vmem:[#allocation176_spill] sm:$0xff] }
 0x482   : > { %v4852_v47 = vsel %vm4084_vm11, %v4739_v17, 0.0  ;;  %4043 = vadd.xlane.f32.xlu1 %v14890_v8  ;;  %v4845_v29 = vadd.f32 %v4844_v16, %v4843_v36  ;;  %v3939_v39 = vpop.xlane.xlu0 %3938  ;;  %v1873_v26 = vadd.f32 %v1872_v27, %v1871_v35  ;;  %v1887_v56 = vsel %vm1778_vm3, %v14894_v2, 0.0 }
 0x483   : > { %14892 = vst [vmem:[#allocation140_spill] sm:$0xff] %v12358_v46  ;;  %14893 = vst [vmem:[#allocation139_spill] sm:$0xff] %v12360_v51  ;;  %v3302_v58 = vpop.xlane.xlu1 %3301  ;;  %v4740_v34 = vmul.f32 %v14866_v59, %v3939_v39  ;;  %v4839_v8 = vrot.slane %v4838_v25, 2  ;;  %v1888_v14 = vsel %vm1778_vm3, %v14895_v18, 0.0  ;;  %v1881_v31 = vrot.slane %v1880_v55, 4 }
 0x484   : > { %v4389_v17 = vmul.f32 %v14872_v33, %v3302_v58  ;;  %v4846_v44 = vrot.slane %v4845_v29, 4  ;;  %v1874_v4 = vrot.slane %v1873_v26, 2  ;;  %v1889_v39 = vadd.f32 %v1888_v14, %v1887_v56 }
 0x485   : > { %v4853_v1 = vsel %vm4084_vm11, %v4740_v34, 0.0  ;;  %4046 = vadd.xlane.f32.xlu0 %v14896_v38  ;;  %v4840_v35 = vadd.f32 %v4839_v8, %v4838_v25  ;;  %v1882_v34 = vadd.f32 %v1881_v31, %v1880_v55  ;;  %v14898_v25 = vld [vmem:[#allocation120_spill] sm:$0xff] }
 0x486   : > { %v4509_v36 = vsel %vm4084_vm11, %v4389_v17, 0.0  ;;  %3421 = vadd.xlane.f32.xlu1 %v14897_v19  ;;  %v4847_v40 = vadd.f32 %v4846_v44, %v4845_v29  ;;  %v4854_v27 = vadd.f32 %v4853_v1, %v4852_v47  ;;  %v3305_v16 = vpop.xlane.xlu0 %3304  ;;  %v1875_v51 = vadd.f32 %v1874_v4, %v1873_v26  ;;  %v14899_v47 = vld [vmem:[#allocation117_spill] sm:$0xff] }
 0x487   : > { %v3308_v61 = vpop.xlane.xlu1 %3307  ;;  %v4390_v58 = vmul.f32 %v14873_v50, %v3305_v16  ;;  %v4841_v59 = vrot.slane %v4840_v35, 1  ;;  %v1890_v38 = vrot.slane %v1889_v39, 4  ;;  %v1883_v56 = vrot.slane %v1882_v34, 2 }
 0x488   : > { %v4391_v46 = vmul.f32 %v14874_v37, %v3308_v61  ;;  %v4848_v17 = vrot.slane %v4847_v40, 2  ;;  %v4855_v11 = vrot.slane %v4854_v27, 4  ;;  %v1876_v29 = vrot.slane %v1875_v51, 1 }
 0x489   : > { %v4510_v19 = vsel %vm4084_vm11, %v4390_v58, 0.0  ;;  %3424 = vadd.xlane.f32.xlu0 %v14898_v25  ;;  %v12378_v8 = vadd.f32 %v4841_v59, %v4840_v35 }
 0x48a   : > { %v4518_v24 = vsel %vm4084_vm11, %v4391_v46, 0.0  ;;  %4025 = vadd.xlane.f32.xlu1 %v14899_v47  ;;  %v12380_v44 = vadd.f32 %v4848_v17, %v4847_v40  ;;  %v4856_v26 = vadd.f32 %v4855_v11, %v4854_v27  ;;  %v4511_v55 = vadd.f32 %v4510_v19, %v4509_v36  ;;  %v3311_v14 = vpop.xlane.xlu0 %3310  ;;  %v14902_v36 = vld [vmem:[#allocation33_spill] sm:$0xff] }
 0x48b   : > { %14900 = vst [vmem:[#allocation138_spill] sm:$0xff] %v12378_v8  ;;  %v3314_v1 = vpop.xlane.xlu1 %3313  ;;  %v4392_v4 = vmul.f32 %v14876_v32, %v3311_v14  ;;  %v12384_v16 = vadd.f32 %v1876_v29, %v1875_v51  ;;  %v1884_v46 = vadd.f32 %v1883_v56, %v1882_v34  ;;  %v1891_v47 = vadd.f32 %v1890_v38, %v1889_v39 }
 0x48c   : > { %14901 = vst [vmem:[#allocation137_spill] sm:$0xff] %v12380_v44  ;;  %v4393_v31 = vmul.f32 %v14880_v7, %v3314_v1  ;;  %v4857_v58 = vrot.slane %v4856_v26, 2  ;;  %v4512_v25 = vrot.slane %v4511_v55, 4  ;;  %v1896_v40 = vsel %vm1778_vm3, %v14902_v36, 0.0 }
 0x48d   : > { %v4519_v59 = vsel %vm4084_vm11, %v4392_v4, 0.0  ;;  %4028 = vadd.xlane.f32.xlu0 %v11949_v63  ;;  %v1885_v11 = vrot.slane %v1884_v46, 1  ;;  %v1892_v29 = vrot.slane %v1891_v47, 2  ;;  %v14904_v63 = vld [vmem:[#allocation34_spill] sm:$0xff] }
 0x48e   : > { %v4527_v35 = vsel %vm4084_vm11, %v4393_v31, 0.0  ;;  %4049 = vadd.xlane.f32.xlu1 %v11942_v45  ;;  %v12393_v51 = vadd.f32 %v4857_v58, %v4856_v26  ;;  %v4513_v27 = vadd.f32 %v4512_v25, %v4511_v55  ;;  %v4520_v34 = vadd.f32 %v4519_v59, %v4518_v24  ;;  %v3317_v17 = vpop.xlane.xlu0 %3316  ;;  %v14905_v55 = vld [vmem:[#allocation177_spill] sm:$0xff]  ;;  %v14906_v58 = vld [vmem:[#allocation43_spill] sm:$0xff] }
 0x48f   : > { %v3320_v19 = vpop.xlane.xlu1 %3319  ;;  %v4394_v39 = vmul.f32 %v14885_v28, %v3317_v17  ;;  %v12397_v56 = vadd.f32 %v1885_v11, %v1884_v46  ;;  %v1897_v45 = vsel %vm1778_vm3, %v14904_v63, 0.0  ;;  %v1893_v4 = vadd.f32 %v1892_v29, %v1891_v47  ;;  %v14907_v46 = vld [vmem:[#allocation44_spill] sm:$0xff] }
 0x490   : > { %14903 = vst [vmem:[#allocation149_spill] sm:$0xff] %v12393_v51  ;;  %v4395_v38 = vmul.f32 %v14888_v3, %v3320_v19  ;;  %v4514_v14 = vrot.slane %v4513_v27, 2  ;;  %v4521_v1 = vrot.slane %v4520_v34, 4  ;;  %v1898_v31 = vadd.f32 %v1897_v45, %v1896_v40 }
 0x491   : > { %v4528_v26 = vsel %vm4084_vm11, %v4394_v39, 0.0  ;;  %4052 = vadd.xlane.f32.xlu0 %v11955_v42  ;;  %v1905_v25 = vsel %vm1778_vm3, %v14906_v58, 0.0  ;;  %v1906_v59 = vsel %vm1778_vm3, %v14907_v46, 0.0  ;;  %v1894_v40 = vrot.slane %v1893_v4, 1 }
 0x492   : > { %v4536_v24 = vsel %vm4084_vm11, %v4395_v38, 0.0  ;;  %3427 = vadd.xlane.f32.xlu1 %v14905_v55  ;;  %v4515_v11 = vadd.f32 %v4514_v14, %v4513_v27  ;;  %v4522_v17 = vadd.f32 %v4521_v1, %v4520_v34  ;;  %v4529_v19 = vadd.f32 %v4528_v26, %v4527_v35  ;;  %v3323_v61 = vpop.xlane.xlu0 %3322  ;;  %v14908_v34 = vld [vmem:[#allocation179_spill] sm:$0xff] }
 0x493   : > { %v3942_v47 = vpop.xlane.xlu1 %3941  ;;  %v4396_v29 = vmul.f32 %v14891_v15, %v3323_v61  ;;  %v1899_v38 = vrot.slane %v1898_v31, 4  ;;  %v1907_v42 = vadd.f32 %v1906_v59, %v1905_v25  ;;  %v12411_v51 = vadd.f32 %v1894_v40, %v1893_v4  ;;  %v14909_v35 = vld [vmem:[#allocation119_spill] sm:$0xff] }
 0x494   : > { %v4741_v39 = vmul.f32 %v14872_v33, %v3942_v47  ;;  %v4516_v45 = vrot.slane %v4515_v11, 1  ;;  %v4523_v55 = vrot.slane %v4522_v17, 2  ;;  %v4530_v8 = vrot.slane %v4529_v19, 4 }
 0x495   : > { %v4537_v44 = vsel %vm4084_vm11, %v4396_v29, 0.0  ;;  %3430 = vadd.xlane.f32.xlu0 %v14908_v34  ;;  %v1900_v14 = vadd.f32 %v1899_v38, %v1898_v31  ;;  %v1908_v1 = vrot.slane %v1907_v42, 4  ;;  %v14910_v34 = vld [vmem:[#allocation47_spill] sm:$0xff] }
 0x496   : > { %v4861_v27 = vsel %vm4084_vm11, %v4741_v39, 0.0  ;;  %4031 = vadd.xlane.f32.xlu1 %v14909_v35  ;;  %v4517_v61 = vadd.f32 %v4516_v45, %v4515_v11  ;;  %v4524_v26 = vadd.f32 %v4523_v55, %v4522_v17  ;;  %v4531_v47 = vadd.f32 %v4530_v8, %v4529_v19  ;;  %v3945_v25 = vpop.xlane.xlu0 %3944  ;;  %v14911_v8 = vld [vmem:[#allocation178_spill] sm:$0xff] }
 0x497   : > { %v4538_v33 = vadd.f32 %v4537_v44, %v4536_v24  ;;  %v3948_v59 = vpop.xlane.xlu1 %3947  ;;  %v4742_v43 = vmul.f32 %v14873_v50, %v3945_v25  ;;  %v1901_v40 = vrot.slane %v1900_v14, 2  ;;  %v1909_v29 = vadd.f32 %v1908_v1, %v1907_v42 }
 0x498   : > { %v4743_v4 = vmul.f32 %v14874_v37, %v3948_v59  ;;  %v4525_v23 = vrot.slane %v4524_v26, 1  ;;  %v4532_v39 = vrot.slane %v4531_v47, 2  ;;  %v1914_v35 = vsel %vm1778_vm3, %v14910_v34, 0.0 }
 0x499   : > { %v4539_v49 = vrot.slane %v4538_v33, 4  ;;  %v4862_v31 = vsel %vm4084_vm11, %v4742_v43, 0.0  ;;  %4034 = vadd.xlane.f32.xlu0 %v14911_v8  ;;  %v1902_v44 = vadd.f32 %v1901_v40, %v1900_v14  ;;  %v1910_v24 = vrot.slane %v1909_v29, 2 }
 0x49a   : > { %v4870_v11 = vsel %vm4084_vm11, %v4743_v4, 0.0  ;;  %4055 = vadd.xlane.f32.xlu1 %v11991_v48  ;;  %v4526_v17 = vadd.f32 %v4525_v23, %v4524_v26  ;;  %v4533_v19 = vadd.f32 %v4532_v39, %v4531_v47  ;;  %v4863_v42 = vadd.f32 %v4862_v31, %v4861_v27  ;;  %v3951_v45 = vpop.xlane.xlu0 %3950 }
 0x49b   : > { %v4540_v38 = vadd.f32 %v4539_v49, %v4538_v33  ;;  %v3326_v55 = vpop.xlane.xlu1 %3325  ;;  %v4744_v1 = vmul.f32 %v14876_v32, %v3951_v45  ;;  %v1903_v59 = vrot.slane %v1902_v44, 1  ;;  %v1911_v43 = vadd.f32 %v1910_v24, %v1909_v29  ;;  %v14913_v49 = vld [vmem:[#allocation124_spill] sm:$0xff] }
 0x49c   : > { %v4397_v25 = vmul.f32 %v14894_v2, %v3326_v55  ;;  %v12428_v4 = vsel %vm5109_vm4, %v4526_v17, %v4517_v61  ;;  %v4534_v8 = vrot.slane %v4533_v19, 1  ;;  %v4864_v48 = vrot.slane %v4863_v42, 4  ;;  %v14914_v33 = vld [vmem:[#allocation180_spill] sm:$0xff] }
 0x49d   : > { %14912 = vst [vmem:[#allocation141_spill] sm:$0xff] %v12428_v4  ;;  %v4541_v37 = vrot.slane %v4540_v38, 2  ;;  %v4871_v14 = vsel %vm4084_vm11, %v4744_v1, 0.0  ;;  %4058 = vadd.xlane.f32.xlu0 %v14913_v49  ;;  %v1904_v27 = vadd.f32 %v1903_v59, %v1902_v44  ;;  %v1912_v26 = vrot.slane %v1911_v43, 1  ;;  %v14916_v55 = vld [vmem:[#allocation48_spill] sm:$0xff]  ;;  %v14919_v59 = vld [vmem:[#allocation39_spill] sm:$0xff] }
 0x49e   : > { %v4545_v23 = vsel %vm4084_vm11, %v4397_v25, 0.0  ;;  %3433 = vadd.xlane.f32.xlu1 %v14914_v33  ;;  %v12434_v47 = vadd.f32 %v4534_v8, %v4533_v19  ;;  %v4865_v29 = vadd.f32 %v4864_v48, %v4863_v42  ;;  %v4872_v39 = vadd.f32 %v4871_v14, %v4870_v11  ;;  %v3329_v61 = vpop.xlane.xlu0 %3328  ;;  %v14918_v11 = vld [vmem:[#allocation123_spill] sm:$0xff] }
 0x49f   : > { %v4542_v40 = vadd.f32 %v4541_v37, %v4540_v38  ;;  %v3954_v31 = vpop.xlane.xlu1 %3953  ;;  %v4398_v24 = vmul.f32 %v14895_v18, %v3329_v61  ;;  %v1913_v45 = vadd.f32 %v1912_v26, %v1911_v43  ;;  %v1915_v1 = vsel %vm1778_vm3, %v14916_v55, 0.0  ;;  %v14917_v38 = vld [vmem:[#allocation181_spill] sm:$0xff] }
 0x4a0   : > { %14915 = vst [vmem:[#allocation142_spill] sm:$0xff] %v12434_v47  ;;  %v4745_v17 = vmul.f32 %v14880_v7, %v3954_v31  ;;  %v4866_v49 = vrot.slane %v4865_v29, 2  ;;  %v4873_v33 = vrot.slane %v4872_v39, 4  ;;  %v1916_v44 = vadd.f32 %v1915_v1, %v1914_v35 }
 0x4a1   : > { %v4543_v25 = vrot.slane %v4542_v40, 1  ;;  %v4546_v19 = vsel %vm4084_vm11, %v4398_v24, 0.0  ;;  %3436 = vadd.xlane.f32.xlu0 %v14917_v38  ;;  %v5123_v42 = vsel %vm5109_vm4, %v12354_v22, %v12344_v6  ;;  %v1923_v43 = vsel %vm1778_vm3, %v14919_v59, 0.0 }
 0x4a2   : > { %v4879_v37 = vsel %vm4084_vm11, %v4745_v17, 0.0  ;;  %4061 = vadd.xlane.f32.xlu1 %v14918_v11  ;;  %v4867_v48 = vadd.f32 %v4866_v49, %v4865_v29  ;;  %v4874_v14 = vadd.f32 %v4873_v33, %v4872_v39  ;;  %v4547_v35 = vadd.f32 %v4546_v19, %v4545_v23  ;;  %v3957_v26 = vpop.xlane.xlu0 %3956  ;;  %v14921_v39 = vld [vmem:[#allocation185_spill] sm:$0xff] }
 0x4a3   : > { %v12449_v8 = vadd.f32 %v4543_v25, %v4542_v40  ;;  %v3332_v61 = vpop.xlane.xlu1 %3331  ;;  %v4746_v31 = vmul.f32 %v14885_v28, %v3957_v26  ;;  %v1917_v17 = vrot.slane %v1916_v44, 4  ;;  %v5124_v1 = vsel %vm5111_vm5, %v12384_v16, %v5123_v42  ;;  %v14922_v25 = vld [vmem:[#allocation182_spill] sm:$0xff] }
 0x4a4   : > { %v4399_v24 = vmul.f32 %v14902_v36, %v3332_v61  ;;  %v4868_v38 = vrot.slane %v4867_v48, 1  ;;  %v4875_v6 = vrot.slane %v4874_v14, 2  ;;  %v4548_v22 = vrot.slane %v4547_v35, 4 }
 0x4a5   : > { %14920 = vst [vmem:[#allocation143_spill] sm:$0xff] %v12449_v8  ;;  %v5125_v40 = vsel %vm5113_vm6, %v12397_v56, %v5124_v1  ;;  %v4880_v29 = vsel %vm4084_vm11, %v4746_v31, 0.0  ;;  %4064 = vadd.xlane.f32.xlu0 %v14921_v39  ;;  %v1918_v49 = vadd.f32 %v1917_v17, %v1916_v44  ;;  %v14925_v17 = vld [vmem:[#allocation40_spill] sm:$0xff] }
 0x4a6   : > { %v4554_v23 = vsel %vm4084_vm11, %v4399_v24, 0.0  ;;  %3439 = vadd.xlane.f32.xlu1 %v14922_v25  ;;  %v5126_v33 = vsel %vm5115_vm7, %v12411_v51, %v5125_v40  ;;  %v4869_v19 = vadd.f32 %v4868_v38, %v4867_v48  ;;  %v4876_v16 = vadd.f32 %v4875_v6, %v4874_v14  ;;  %v3335_v26 = vpop.xlane.xlu0 %3334  ;;  %v14923_v14 = vld [vmem:[#allocation183_spill] sm:$0xff] }
 0x4a7   : > { %v4549_v11 = vadd.f32 %v4548_v22, %v4547_v35  ;;  %v4881_v42 = vadd.f32 %v4880_v29, %v4879_v37  ;;  %v3350_v61 = vpop.xlane.xlu1 %3349  ;;  %v4400_v56 = vmul.f32 %v14904_v63, %v3335_v26  ;;  %v1919_v1 = vrot.slane %v1918_v49, 2  ;;  %v14924_v37 = vld [vmem:[#allocation77_spill] sm:$0xff] }
 0x4a8   : > { %v4405_v31 = vmul.f32 %v14919_v59, %v3350_v61  ;;  %v5127_v24 = vsel %vm5117_vm8, %v1904_v27, %v5126_v33  ;;  %v4877_v39 = vrot.slane %v4876_v16, 1  ;;  %v1924_v38 = vsel %vm1778_vm3, %v14925_v17, 0.0  ;;  %v14926_v26 = vld [vmem:[#allocation37_spill] sm:$0xff] }
 0x4a9   : > { %v4550_v8 = vrot.slane %v4549_v11, 2  ;;  %v4882_v25 = vrot.slane %v4881_v42, 4  ;;  %v5128_v44 = vsel %vm5119_vm9, %v1913_v45, %v5127_v24  ;;  %v4555_v51 = vsel %vm4084_vm11, %v4400_v56, 0.0  ;;  %3442 = vadd.xlane.f32.xlu0 %v14923_v14 }
 0x4aa   : > { %v4581_v48 = vsel %vm4084_vm11, %v4405_v31, 0.0  ;;  %4067 = vadd.xlane.f32.xlu1 %v14924_v37  ;;  %v1920_v35 = vadd.f32 %v1919_v1, %v1918_v49  ;;  %v4878_v6 = vadd.f32 %v4877_v39, %v4876_v16  ;;  %v4556_v40 = vadd.f32 %v4555_v51, %v4554_v23  ;;  %v3353_v29 = vpop.xlane.xlu0 %3352  ;;  %v14928_v16 = vld [vmem:[#allocation184_spill] sm:$0xff] }
 0x4ab   : > { %v4551_v22 = vadd.f32 %v4550_v8, %v4549_v11  ;;  %v4883_v27 = vadd.f32 %v4882_v25, %v4881_v42  ;;  %v3356_v33 = vpop.xlane.xlu1 %3355  ;;  %v4406_v45 = vmul.f32 %v14925_v17, %v3353_v29  ;;  %v1925_v31 = vadd.f32 %v1924_v38, %v1923_v43  ;;  %v14929_v23 = vld [vmem:[#allocation168_spill] sm:$0xff] }
 0x4ac   : > { %v4407_v61 = vmul.f32 %v14926_v26, %v3356_v33  ;;  %v1921_v56 = vrot.slane %v1920_v35, 1  ;;  %v12476_v24 = vsel %vm5109_vm4, %v4878_v6, %v4869_v19  ;;  %v4557_v1 = vrot.slane %v4556_v40, 4  ;;  %v14931_v6 = vld [vmem:[#allocation38_spill] sm:$0xff] }
 0x4ad   : > { %14927 = vst [vmem:[#allocation146_spill] sm:$0xff] %v12476_v24  ;;  %v4552_v14 = vrot.slane %v4551_v22, 1  ;;  %v4884_v49 = vrot.slane %v4883_v27, 2  ;;  %v4582_v37 = vsel %vm4084_vm11, %v4406_v45, 0.0  ;;  %4070 = vadd.xlane.f32.xlu0 %v14928_v16  ;;  %v1926_v42 = vrot.slane %v1925_v31, 4 }
 0x4ae   : > { %v4590_v8 = vsel %vm4084_vm11, %v4407_v61, 0.0  ;;  %4073 = vadd.xlane.f32.xlu1 %v14929_v23  ;;  %v1922_v11 = vadd.f32 %v1921_v56, %v1920_v35  ;;  %v4558_v43 = vadd.f32 %v4557_v1, %v4556_v40  ;;  %v4583_v51 = vadd.f32 %v4582_v37, %v4581_v48  ;;  %v3359_v19 = vpop.xlane.xlu0 %3358  ;;  %v14934_v40 = vld [vmem:[#allocation189_spill] sm:$0xff] }
 0x4af   : > { %v12482_v39 = vadd.f32 %v4552_v14, %v4551_v22  ;;  %v4885_v25 = vadd.f32 %v4884_v49, %v4883_v27  ;;  %v3960_v38 = vpop.xlane.xlu1 %3959  ;;  %v4408_v29 = vmul.f32 %v14931_v6, %v3359_v19  ;;  %v1927_v61 = vadd.f32 %v1926_v42, %v1925_v31  ;;  %v14933_v27 = vld [vmem:[#allocation166_spill] sm:$0xff] }
 0x4b0   : > { %v4747_v33 = vmul.f32 %v14888_v3, %v3960_v38  ;;  %v12487_v45 = vsel %vm5121_vm10, %v1922_v11, %v5128_v44  ;;  %v4559_v24 = vrot.slane %v4558_v43, 2  ;;  %v4584_v23 = vrot.slane %v4583_v51, 4 }
 0x4b1   : > { %14930 = vst [vmem:[#allocation145_spill] sm:$0xff] %v12482_v39  ;;  %14932 = vst [vmem:[#allocation152_spill] sm:$0xff] %v12487_v45  ;;  %v4886_v16 = vrot.slane %v4885_v25, 1  ;;  %v1932_v35 = vsel %vm1778_vm3, %v14926_v26, 0.0  ;;  %v4591_v22 = vsel %vm4084_vm11, %v4408_v29, 0.0  ;;  %4076 = vadd.xlane.f32.xlu0 %v14933_v27  ;;  %v1928_v56 = vrot.slane %v1927_v61, 2 }
 0x4b2   : > { %v4888_v48 = vsel %vm4084_vm11, %v4747_v33, 0.0  ;;  %4079 = vadd.xlane.f32.xlu1 %v14934_v40  ;;  %v1933_v44 = vsel %vm1778_vm3, %v14931_v6, 0.0  ;;  %v4560_v31 = vadd.f32 %v4559_v24, %v4558_v43  ;;  %v4585_v49 = vadd.f32 %v4584_v23, %v4583_v51  ;;  %v3963_v37 = vpop.xlane.xlu0 %3962  ;;  %v14936_v39 = vld [vmem:[#allocation41_spill] sm:$0xff]  ;;  %v14937_v43 = vld [vmem:[#allocation187_spill] sm:$0xff] }
 0x4b3   : > { %v12497_v14 = vadd.f32 %v4886_v16, %v4885_v25  ;;  %v4592_v1 = vadd.f32 %v4591_v22, %v4590_v8  ;;  %v3338_v11 = vpop.xlane.xlu1 %3337  ;;  %v4748_v42 = vmul.f32 %v14891_v15, %v3963_v37  ;;  %v1929_v38 = vadd.f32 %v1928_v56, %v1927_v61 }
 0x4b4   : > { %v4401_v19 = vmul.f32 %v14906_v58, %v3338_v11  ;;  %v1934_v29 = vadd.f32 %v1933_v44, %v1932_v35  ;;  %v4561_v33 = vrot.slane %v4560_v31, 1  ;;  %v4586_v27 = vrot.slane %v4585_v49, 2 }
 0x4b5   : > { %14935 = vst [vmem:[#allocation195_spill] sm:$0xff] %v12497_v14  ;;  %v4593_v40 = vrot.slane %v4592_v1, 4  ;;  %v1941_v47 = vsel %vm1778_vm3, %v14936_v39, 0.0  ;;  %v4889_v25 = vsel %vm4084_vm11, %v4748_v42, 0.0  ;;  %4082 = vadd.xlane.f32.xlu0 %v14937_v43  ;;  %v1930_v8 = vrot.slane %v1929_v38, 1  ;;  %v14939_v43 = vld [vmem:[#allocation42_spill] sm:$0xff] }
 0x4b6   : > { %v4563_v24 = vsel %vm4084_vm11, %v4401_v19, 0.0  ;;  %v1935_v51 = vrot.slane %v1934_v29, 4  ;;  %v12506_v16 = vadd.f32 %v4561_v33, %v4560_v31  ;;  %v4587_v23 = vadd.f32 %v4586_v27, %v4585_v49  ;;  %v3341_v35 = vpop.xlane.xlu0 %3340 }
 0x4b7   : > { %v4594_v22 = vadd.f32 %v4593_v40, %v4592_v1  ;;  %v4890_v61 = vadd.f32 %v4889_v25, %v4888_v48  ;;  %v3362_v56 = vpop.xlane.xlu1 %3361  ;;  %v4402_v44 = vmul.f32 %v14907_v46, %v3341_v35  ;;  %v12510_v11 = vadd.f32 %v1930_v8, %v1929_v38 }
 0x4b8   : > { %14938 = vst [vmem:[#allocation89_spill] sm:$0xff] %v12506_v16  ;;  %v4409_v37 = vmul.f32 %v14936_v39, %v3362_v56  ;;  %v1936_v42 = vadd.f32 %v1935_v51, %v1934_v29  ;;  %v4588_v14 = vrot.slane %v4587_v23, 1  ;;  %v1942_v15 = vsel %vm1778_vm3, %v14939_v43, 0.0 }
 0x4b9   : > { %v4595_v19 = vrot.slane %v4594_v22, 2  ;;  %v4891_v4 = vrot.slane %v4890_v61, 4  ;;  %v4564_v31 = vsel %vm4084_vm11, %v4402_v44, 0.0  ;;  %v1943_v1 = vadd.f32 %v1942_v15, %v1941_v47  ;;  %v14940_v44 = vld [vmem:[#allocation45_spill] sm:$0xff] }
 0x4ba   : > { %v4599_v49 = vsel %vm4084_vm11, %v4409_v37, 0.0  ;;  %v1937_v48 = vrot.slane %v1936_v42, 2  ;;  %v4589_v33 = vadd.f32 %v4588_v14, %v4587_v23  ;;  %v4565_v25 = vadd.f32 %v4564_v31, %v4563_v24  ;;  %v3365_v35 = vpop.xlane.xlu0 %3364 }
 0x4bb   : > { %v4596_v27 = vadd.f32 %v4595_v19, %v4594_v22  ;;  %v4892_v40 = vadd.f32 %v4891_v4, %v4890_v61  ;;  %v3966_v38 = vpop.xlane.xlu1 %3965  ;;  %v4410_v29 = vmul.f32 %v14939_v43, %v3365_v35  ;;  %v1944_v56 = vrot.slane %v1943_v1, 4 }
 0x4bc   : > { %v4749_v8 = vmul.f32 %v14894_v2, %v3966_v38  ;;  %v1938_v51 = vadd.f32 %v1937_v48, %v1936_v42  ;;  %v4566_v28 = vrot.slane %v4565_v25, 4  ;;  %v1950_v37 = vsel %vm1778_vm3, %v14940_v44, 0.0 }
 0x4bd   : > { %v4597_v16 = vrot.slane %v4596_v27, 1  ;;  %v4893_v3 = vrot.slane %v4892_v40, 2  ;;  %v4600_v15 = vsel %vm4084_vm11, %v4410_v29, 0.0  ;;  %v1945_v14 = vadd.f32 %v1944_v56, %v1943_v1 }
 0x4be   : > { %v4897_v47 = vsel %vm4084_vm11, %v4749_v8, 0.0  ;;  %v1939_v4 = vrot.slane %v1938_v51, 1  ;;  %v4567_v22 = vadd.f32 %v4566_v28, %v4565_v25  ;;  %v4601_v61 = vadd.f32 %v4600_v15, %v4599_v49  ;;  %v3969_v19 = vpop.xlane.xlu0 %3968  ;;  %v14942_v49 = vld [vmem:[#allocation46_spill] sm:$0xff]  ;;  %v14945_v15 = vld [vmem:[#allocation164_spill] sm:$0xff] }
 0x4bf   : > { %v4598_v24 = vadd.f32 %v4597_v16, %v4596_v27  ;;  %v4894_v23 = vadd.f32 %v4893_v3, %v4892_v40  ;;  %v3344_v31 = vpop.xlane.xlu1 %3343  ;;  %v4750_v42 = vmul.f32 %v14895_v18, %v3969_v19  ;;  %v1946_v38 = vrot.slane %v1945_v14, 2 }
 0x4c0   : > { %v4403_v48 = vmul.f32 %v14910_v34, %v3344_v31  ;;  %v12524_v35 = vadd.f32 %v1939_v4, %v1938_v51  ;;  %v4568_v8 = vrot.slane %v4567_v22, 2  ;;  %v4602_v7 = vrot.slane %v4601_v61, 4 }
 0x4c1   : > { %v12527_v2 = vsel %vm5109_vm4, %v4598_v24, %v4589_v33  ;;  %v4895_v29 = vrot.slane %v4894_v23, 1  ;;  %v4898_v16 = vsel %vm4084_vm11, %v4750_v42, 0.0  ;;  %v1947_v28 = vadd.f32 %v1946_v38, %v1945_v14 }
 0x4c2   : > { %14941 = vst [vmem:[#allocation148_spill] sm:$0xff] %v12527_v2  ;;  %v4572_v3 = vsel %vm4084_vm11, %v4403_v48, 0.0  ;;  %v1951_v1 = vsel %vm1778_vm3, %v14942_v49, 0.0  ;;  %v12535_v40 = vadd.f32 %v4568_v8, %v4567_v22  ;;  %v4603_v25 = vadd.f32 %v4602_v7, %v4601_v61  ;;  %v3347_v56 = vpop.xlane.xlu0 %3346  ;;  %v14946_v22 = vld [vmem:[#allocation51_spill] sm:$0xff] }
 0x4c3   : > { %v12533_v27 = vadd.f32 %v4895_v29, %v4894_v23  ;;  %v4899_v51 = vadd.f32 %v4898_v16, %v4897_v47  ;;  %v3368_v33 = vpop.xlane.xlu1 %3367  ;;  %5208 = vrot.lane.b32.xlu1 %v14945_v15, %s8931_s26  ;;  %v4404_v4 = vmul.f32 %v14916_v55, %v3347_v56  ;;  %v1948_v14 = vrot.slane %v1947_v28, 1 }
 0x4c4   : > { %14944 = vst [vmem:[#allocation156_spill] sm:$0xff] %v12535_v40  ;;  %v4411_v24 = vmul.f32 %v14940_v44, %v3368_v33  ;;  %v1952_v19 = vadd.f32 %v1951_v1, %v1950_v37  ;;  %v4604_v23 = vrot.slane %v4603_v25, 2  ;;  %v1959_v7 = vsel %vm1778_vm3, %v14946_v22, 0.0  ;;  %v14947_v37 = vld [vmem:[#allocation52_spill] sm:$0xff] }
 0x4c5   : > { %14943 = vst [vmem:[#allocation151_spill] sm:$0xff] %v12533_v27  ;;  %v4900_v42 = vrot.slane %v4899_v51, 4  ;;  %v4573_v47 = vsel %vm4084_vm11, %v4404_v4, 0.0  ;;  %v12546_v48 = vadd.f32 %v1948_v14, %v1947_v28  ;;  %v1960_v1 = vsel %vm1778_vm3, %v14947_v37, 0.0 }
 0x4c6   : > { %v4608_v61 = vsel %vm4084_vm11, %v4411_v24, 0.0  ;;  %v1953_v38 = vrot.slane %v1952_v19, 4  ;;  %v4605_v29 = vadd.f32 %v4604_v23, %v4603_v25  ;;  %v4574_v16 = vadd.f32 %v4573_v47, %v4572_v3  ;;  %v3371_v56 = vpop.xlane.xlu0 %3370 }
 0x4c7   : > { %v4901_v8 = vadd.f32 %v4900_v42, %v4899_v51  ;;  %v3972_v33 = vpop.xlane.xlu1 %3971  ;;  %5232 = vrot.lane.b32.xlu1 %v14945_v15, %s8932_s28  ;;  %v4412_v31 = vmul.f32 %v14942_v49, %v3371_v56  ;;  %v1961_v28 = vadd.f32 %v1960_v1, %v1959_v7  ;;  %v14948_v51 = vld [vmem:[#allocation49_spill] sm:$0xff] }
 0x4c8   : > { %v4751_v4 = vmul.f32 %v14902_v36, %v3972_v33  ;;  %v1954_v24 = vadd.f32 %v1953_v38, %v1952_v19  ;;  %v4606_v14 = vrot.slane %v4605_v29, 1  ;;  %v4575_v25 = vrot.slane %v4574_v16, 4 }
 0x4c9   : > { %v4902_v2 = vrot.slane %v4901_v8, 2  ;;  %v1968_v3 = vsel %vm1778_vm3, %v14948_v51, 0.0  ;;  %v4609_v23 = vsel %vm4084_vm11, %v4412_v31, 0.0  ;;  %v1962_v27 = vrot.slane %v1961_v28, 4 }
 0x4ca   : > { %v4906_v42 = vsel %vm4084_vm11, %v4751_v4, 0.0  ;;  %v1955_v47 = vrot.slane %v1954_v24, 2  ;;  %v12558_v40 = vadd.f32 %v4606_v14, %v4605_v29  ;;  %v4576_v56 = vadd.f32 %v4575_v25, %v4574_v16  ;;  %v3975_v33 = vpop.xlane.xlu0 %3974 }
 0x4cb   : > { %v4903_v18 = vadd.f32 %v4902_v2, %v4901_v8  ;;  %v4610_v32 = vadd.f32 %v4609_v23, %v4608_v61  ;;  %v3990_v19 = vpop.xlane.xlu1 %3989  ;;  %5244 = vrot.lane.b32.xlu1 %v14945_v15, %s8933_s29  ;;  %v4752_v7 = vmul.f32 %v14904_v63, %v3975_v33  ;;  %5220 = vrot.lane.b32.xlu0 %v12313_v21, %s8928_s20  ;;  %v14950_v8 = vld [vmem:[#allocation50_spill] sm:$0xff] }
 0x4cc   : > { %14949 = vst [vmem:[#allocation150_spill] sm:$0xff] %v12558_v40  ;;  %v4757_v38 = vmul.f32 %v14919_v59, %v3990_v19  ;;  %v1956_v31 = vadd.f32 %v1955_v47, %v1954_v24  ;;  %v1963_v1 = vadd.f32 %v1962_v27, %v1961_v28  ;;  %v4577_v4 = vrot.slane %v4576_v56, 2  ;;  %v14953_v28 = vld [vmem:[#allocation80_spill] sm:$0xff] }
 0x4cd   : > { %v4904_v29 = vrot.slane %v4903_v18, 1  ;;  %v4611_v2 = vrot.slane %v4610_v32, 4  ;;  %v1969_v61 = vsel %vm1778_vm3, %v14950_v8, 0.0  ;;  %v4907_v16 = vsel %vm4084_vm11, %v4752_v7, 0.0 }
 0x4ce   : > { %v4933_v14 = vsel %vm4084_vm11, %v4757_v38, 0.0  ;;  %v1957_v15 = vrot.slane %v1956_v31, 1  ;;  %v1964_v25 = vrot.slane %v1963_v1, 2  ;;  %v12572_v33 = vadd.f32 %v4577_v4, %v4576_v56  ;;  %v3993_v24 = vpop.xlane.xlu0 %3992  ;;  %v14954_v38 = vld [vmem:[#allocation79_spill] sm:$0xff] }
 0x4cf   : > { %v12570_v23 = vadd.f32 %v4904_v29, %v4903_v18  ;;  %v4612_v19 = vadd.f32 %v4611_v2, %v4610_v32  ;;  %v4908_v21 = vadd.f32 %v4907_v16, %v4906_v42  ;;  %v3996_v27 = vpop.xlane.xlu1 %3995  ;;  %5316 = vrot.lane.b32.xlu1 %v14953_v28, %s8934_s30  ;;  %v4758_v47 = vmul.f32 %v14925_v17, %v3993_v24  ;;  %v14955_v42 = vld [vmem:[#allocation59_spill] sm:$0xff]  ;;  %v14956_v24 = vld [vmem:[#allocation60_spill] sm:$0xff] }
 0x4d0   : > { %14952 = vst [vmem:[#allocation91_spill] sm:$0xff] %v12572_v33  ;;  %v4759_v7 = vmul.f32 %v14926_v26, %v3996_v27  ;;  %5210 = vrot.lane.b32.xlu0 %v14954_v38, %s8931_s26  ;;  %v12580_v40 = vadd.f32 %v1957_v15, %v1956_v31  ;;  %v1965_v18 = vadd.f32 %v1964_v25, %v1963_v1  ;;  %v1977_v4 = vsel %vm1778_vm3, %v14955_v42, 0.0 }
 0x4d1   : > { %14951 = vst [vmem:[#allocation196_spill] sm:$0xff] %v12570_v23  ;;  %v4613_v56 = vrot.slane %v4612_v19, 2  ;;  %v4909_v29 = vrot.slane %v4908_v21, 4  ;;  %v1970_v32 = vadd.f32 %v1969_v61, %v1968_v3  ;;  %v4934_v2 = vsel %vm4084_vm11, %v4758_v47, 0.0 }
 0x4d2   : > { %v4942_v16 = vsel %vm4084_vm11, %v4759_v7, 0.0  ;;  %v1966_v28 = vrot.slane %v1965_v18, 1  ;;  %v1978_v27 = vsel %vm1778_vm3, %v14956_v24, 0.0  ;;  %v4935_v59 = vadd.f32 %v4934_v2, %v4933_v14  ;;  %v3999_v31 = vpop.xlane.xlu0 %3998 }
 0x4d3   : > { %v4614_v26 = vadd.f32 %v4613_v56, %v4612_v19  ;;  %v4910_v17 = vadd.f32 %v4909_v29, %v4908_v21  ;;  %v3374_v15 = vpop.xlane.xlu1 %3373  ;;  %5234 = vrot.lane.b32.xlu1 %v14954_v38, %s8932_s28  ;;  %v1971_v3 = vrot.slane %v1970_v32, 4  ;;  %v4760_v1 = vmul.f32 %v14931_v6, %v3999_v31 }
 0x4d4   : > { %v4413_v61 = vmul.f32 %v14946_v22, %v3374_v15  ;;  %5222 = vrot.lane.b32.xlu0 %v12487_v45, %s8928_s20  ;;  %v12594_v25 = vadd.f32 %v1966_v28, %v1965_v18  ;;  %v1979_v47 = vadd.f32 %v1978_v27, %v1977_v4  ;;  %v4936_v21 = vrot.slane %v4935_v59, 4  ;;  %v14958_v4 = vld [vmem:[#allocation118_spill] sm:$0xff] }
 0x4d5   : > { %v4615_v7 = vrot.slane %v4614_v26, 1  ;;  %v4911_v19 = vrot.slane %v4910_v17, 2  ;;  %v1972_v14 = vadd.f32 %v1971_v3, %v1970_v32  ;;  %v4943_v56 = vsel %vm4084_vm11, %v4760_v1, 0.0 }
 0x4d6   : > { %v4617_v29 = vsel %vm4084_vm11, %v4413_v61, 0.0  ;;  %v1980_v2 = vrot.slane %v1979_v47, 4  ;;  %v1986_v31 = vsel %vm1778_vm3, %v14710_v9, 0.0  ;;  %v4937_v23 = vadd.f32 %v4936_v21, %v4935_v59  ;;  %v3377_v18 = vpop.xlane.xlu0 %3376 }
 0x4d7   : > { %v12600_v6 = vadd.f32 %v4615_v7, %v4614_v26  ;;  %v4912_v15 = vadd.f32 %v4911_v19, %v4910_v17  ;;  %v4944_v45 = vadd.f32 %v4943_v56, %v4942_v16  ;;  %v3978_v28 = vpop.xlane.xlu1 %3977  ;;  %5212 = vrot.lane.b32.xlu1 %v14958_v4, %s8931_s26  ;;  %v4414_v32 = vmul.f32 %v14947_v37, %v3377_v18 }
 0x4d8   : > { %v4753_v27 = vmul.f32 %v14906_v58, %v3978_v28  ;;  %5246 = vrot.lane.b32.xlu0 %v14954_v38, %s8933_s29  ;;  %v1973_v3 = vrot.slane %v1972_v14, 2  ;;  %v1981_v1 = vadd.f32 %v1980_v2, %v1979_v47  ;;  %v4938_v26 = vrot.slane %v4937_v23, 2 }
 0x4d9   : > { %14957 = vst [vmem:[#allocation157_spill] sm:$0xff] %v12600_v6  ;;  %v4913_v61 = vrot.slane %v4912_v15, 1  ;;  %v4945_v7 = vrot.slane %v4944_v45, 4  ;;  %v1987_v59 = vsel %vm1778_vm3, %v14712_v30, 0.0  ;;  %v4618_v17 = vsel %vm4084_vm11, %v4414_v32, 0.0  ;;  %v14960_v30 = vld [vmem:[#allocation147_spill] sm:$0xff] }
 0x4da   : > { %v4915_v16 = vsel %vm4084_vm11, %v4753_v27, 0.0  ;;  %v1974_v19 = vadd.f32 %v1973_v3, %v1972_v14  ;;  %v1982_v21 = vrot.slane %v1981_v1, 2  ;;  %v4939_v18 = vadd.f32 %v4938_v26, %v4937_v23  ;;  %v3981_v38 = vpop.xlane.xlu0 %3980 }
 0x4db   : > { %v12612_v56 = vadd.f32 %v4913_v61, %v4912_v15  ;;  %v4946_v28 = vadd.f32 %v4945_v7, %v4944_v45  ;;  %v4619_v6 = vadd.f32 %v4618_v17, %v4617_v29  ;;  %v4002_v9 = vpop.xlane.xlu1 %4001  ;;  %v4754_v47 = vmul.f32 %v14907_v46, %v3981_v38 }
 0x4dc   : > { %v4761_v2 = vmul.f32 %v14936_v39, %v4002_v9  ;;  %v1975_v37 = vrot.slane %v1974_v19, 1  ;;  %v1983_v33 = vadd.f32 %v1982_v21, %v1981_v1  ;;  %5318 = vrot.lane.b32.xlu0 %v14960_v30, %s8934_s30  ;;  %v4940_v32 = vrot.slane %v4939_v18, 1 }
 0x4dd   : > { %14959 = vst [vmem:[#allocation153_spill] sm:$0xff] %v12612_v56  ;;  %v4947_v27 = vrot.slane %v4946_v28, 2  ;;  %v4620_v14 = vrot.slane %v4619_v6, 4  ;;  %v1988_v3 = vadd.f32 %v1987_v59, %v1986_v31  ;;  %v4916_v15 = vsel %vm4084_vm11, %v4754_v47, 0.0 }
 0x4de   : > { %v4951_v45 = vsel %vm4084_vm11, %v4761_v2, 0.0  ;;  %v1976_v23 = vadd.f32 %v1975_v37, %v1974_v19  ;;  %v1984_v29 = vrot.slane %v1983_v33, 1  ;;  %v4941_v61 = vadd.f32 %v4940_v32, %v4939_v18  ;;  %v4005_v9 = vpop.xlane.xlu0 %4004 }
 0x4df   : > { %v4948_v26 = vadd.f32 %v4947_v27, %v4946_v28  ;;  %v4621_v7 = vadd.f32 %v4620_v14, %v4619_v6  ;;  %v4917_v17 = vadd.f32 %v4916_v15, %v4915_v16  ;;  %v3380_v38 = vpop.xlane.xlu1 %3379  ;;  %v1989_v21 = vrot.slane %v1988_v3, 4 }
 0x4e0   : > { %v1985_v1 = vadd.f32 %v1984_v29, %v1983_v33  ;;  %v5130_v30 = vsel %vm5109_vm4, %v12524_v35, %v12510_v11  ;;  %v4762_v31 = vmul.f32 %v14939_v43, %v4005_v9  ;;  %5236 = vrot.lane.b32.xlu0 %v14958_v4, %s8932_s28  ;;  %v4415_v28 = vmul.f32 %v14948_v51, %v3380_v38 }
 0x4e1   : > { %v4949_v59 = vrot.slane %v4948_v26, 1  ;;  %v4622_v37 = vrot.slane %v4621_v7, 2  ;;  %v4918_v19 = vrot.slane %v4917_v17, 4  ;;  %v5131_v6 = vsel %vm5111_vm5, %v12546_v48, %v5130_v30 }
 0x4e2   : > { %v1990_v16 = vadd.f32 %v1989_v21, %v1988_v3  ;;  %v5132_v33 = vsel %vm5113_vm6, %v12580_v40, %v5131_v6  ;;  %v4952_v18 = vsel %vm4084_vm11, %v4762_v31, 0.0  ;;  %v3383_v32 = vpop.xlane.xlu0 %3382  ;;  %v4626_v3 = vsel %vm4084_vm11, %v4415_v28, 0.0 }
 0x4e3   : > { %v4950_v11 = vadd.f32 %v4949_v59, %v4948_v26  ;;  %v4623_v35 = vadd.f32 %v4622_v37, %v4621_v7  ;;  %v4919_v47 = vadd.f32 %v4918_v19, %v4917_v17  ;;  %v5133_v2 = vsel %vm5115_vm7, %v12594_v25, %v5132_v33  ;;  %v3398_v27 = vpop.xlane.xlu1 %3397  ;;  %v14962_v25 = vld [vmem:[#allocation55_spill] sm:$0xff] }
 0x4e4   : > { %v1991_v14 = vrot.slane %v1990_v16, 2  ;;  %v5134_v15 = vsel %vm5117_vm8, %v1976_v23, %v5133_v2  ;;  %v4953_v48 = vadd.f32 %v4952_v18, %v4951_v45  ;;  %v4416_v38 = vmul.f32 %v14950_v8, %v3383_v32 }
 0x4e5   : > { %v12637_v40 = vsel %vm5109_vm4, %v4950_v11, %v4941_v61  ;;  %v4624_v29 = vrot.slane %v4623_v35, 1  ;;  %v4920_v9 = vrot.slane %v4919_v47, 2  ;;  %v5135_v26 = vsel %vm5119_vm9, %v1985_v1, %v5134_v15 }
 0x4e6   : > { %14961 = vst [vmem:[#allocation154_spill] sm:$0xff] %v12637_v40  ;;  %v1992_v7 = vadd.f32 %v1991_v14, %v1990_v16  ;;  %v4954_v17 = vrot.slane %v4953_v48, 4  ;;  %v4421_v21 = vmul.f32 %v14962_v25, %v3398_v27  ;;  %v2697_v45 = vrot.slane %v12150_v53, 1  ;;  %v3401_v61 = vpop.xlane.xlu0 %3400  ;;  %v14968_v14 = vld [vmem:[#allocation169_spill] sm:$0xff] }
 0x4e7   : > { %v12642_v30 = vadd.f32 %v4624_v29, %v4623_v35  ;;  %v12644_v31 = vadd.f32 %v4920_v9, %v4919_v47  ;;  %v5304_v23 = vsel %vm5113_vm6, %v12102_v13, %v12100_v5  ;;  %v3404_v59 = vpop.xlane.xlu1 %3403  ;;  %v4627_v19 = vsel %vm4084_vm11, %v4416_v38, 0.0  ;;  %v14965_v47 = vld [vmem:[#allocation128_spill] sm:$0xff]  ;;  %v14966_v13 = vld [vmem:[#allocation126_spill] sm:$0xff] }
 0x4e8   : > { %v1993_v37 = vrot.slane %v1992_v7, 1  ;;  %v4955_v1 = vadd.f32 %v4954_v17, %v4953_v48  ;;  %v4653_v6 = vsel %vm4084_vm11, %v4421_v21, 0.0  ;;  %v4628_v33 = vadd.f32 %v4627_v19, %v4626_v3  ;;  %v14969_v48 = vld [vmem:[#allocation191_spill] sm:$0xff]  ;;  %v14970_v29 = vld [vmem:[#allocation98_spill] sm:$0xff] }
 0x4e9   : > { %14963 = vst [vmem:[#allocation160_spill] sm:$0xff] %v12642_v30  ;;  %14964 = vst [vmem:[#allocation155_spill] sm:$0xff] %v12644_v31  ;;  %v2698_v18 = vadd.f32 %v2697_v45, %v12150_v53  ;;  %v5305_v28 = vsel %vm5115_vm7, %v12110_v57, %v5304_v23  ;;  %v14967_v2 = vrot.slane %v14966_v13, 1  ;;  %v2417_v3 = vrot.slane %v14969_v48, 1  ;;  %v14971_v53 = vld [vmem:[#allocation167_spill] sm:$0xff]  ;;  %v14973_v45 = vld [vmem:[#allocation186_spill] sm:$0xff] }
 0x4ea   : > { %v1994_v11 = vadd.f32 %v1993_v37, %v1992_v7  ;;  %v4956_v35 = vrot.slane %v4955_v1, 2  ;;  %v5306_v5 = vsel %vm5117_vm8, %v14965_v47, %v5305_v28  ;;  %v4629_v27 = vrot.slane %v4628_v33, 4  ;;  %v12667_v57 = vpop.xlane.xlu0 %3406  ;;  %v14974_v28 = vld [vmem:[#allocation132_spill] sm:$0xff] }
 0x4eb   : > { %v2409_v32 = vadd.f32 %v14967_v2, %v14966_v13  ;;  %v5307_v15 = vsel %vm5119_vm9, %v14968_v14, %v5306_v5  ;;  %v5202_v9 = vsel %vm5111_vm5, %v14971_v53, %v14970_v29  ;;  %v12669_v7 = vpop.xlane.xlu1 %3983  ;;  %v2418_v19 = vadd.f32 %v2417_v3, %v14969_v48  ;;  %v14975_v5 = vld [vmem:[#allocation56_spill] sm:$0xff] }
 0x4ec   : > { %v12672_v17 = vsel %vm5121_vm10, %v1994_v11, %v5135_v26  ;;  %v4957_v38 = vadd.f32 %v4956_v35, %v4955_v1  ;;  %v5308_v21 = vsel %vm5121_vm10, %v2698_v18, %v5307_v15  ;;  %v5203_v23 = vsel %vm5113_vm6, %v14973_v45, %v5202_v9  ;;  %v14976_v26 = vld [vmem:[#allocation190_spill] sm:$0xff]  ;;  %v14977_v11 = vld [vmem:[#allocation53_spill] sm:$0xff] }
 0x4ed   : > { %14972 = vst [vmem:[#allocation74_spill] sm:$0xff] %v12672_v17  ;;  %5224 = vrot.lane.b32.xlu1 %v12672_v17, %s8928_s20  ;;  %v4630_v37 = vadd.f32 %v4629_v27, %v4628_v33  ;;  %v5204_v47 = vsel %vm5115_vm7, %v14974_v28, %v5203_v23  ;;  %v4422_v13 = vmul.f32 %v14975_v5, %v3401_v61  ;;  %v1995_v35 = vsel %vm1778_vm3, %v14962_v25, 0.0 }
 0x4ee   : > { %v4958_v2 = vrot.slane %v4957_v38, 1  ;;  %v5205_v1 = vsel %vm5117_vm8, %v14976_v26, %v5204_v47  ;;  %v4423_v18 = vmul.f32 %v14977_v11, %v3404_v59  ;;  %v1996_v27 = vsel %vm1778_vm3, %v14975_v5, 0.0  ;;  %v12692_v48 = vpop.xlane.xlu0 %3986 }
 0x4ef   : > { %v4631_v14 = vrot.slane %v4630_v37, 2  ;;  %v5206_v15 = vsel %vm5119_vm9, %v2409_v32, %v5205_v1  ;;  %v4654_v33 = vsel %vm4084_vm11, %v4422_v13, 0.0  ;;  %v12694_v61 = vpop.xlane.xlu1 %4007  ;;  %v1997_v9 = vadd.f32 %v1996_v27, %v1995_v35  ;;  %v14981_v13 = vld [vmem:[#allocation58_spill] sm:$0xff]  ;;  %v14982_v1 = vld [vmem:[#allocation61_spill] sm:$0xff] }
 0x4f0   : > { %v12696_v3 = vadd.f32 %v4958_v2, %v4957_v38  ;;  %v12699_v29 = vsel %vm5121_vm10, %v2418_v19, %v5206_v15  ;;  %v4655_v59 = vadd.f32 %v4654_v33, %v4653_v6  ;;  %v12702_v53 = vsel %vm4084_vm11, %v4423_v18, 0.0  ;;  %v14979_v38 = vld [vmem:[#allocation54_spill] sm:$0xff]  ;;  %v14980_v6 = vld [vmem:[#allocation57_spill] sm:$0xff] }
 0x4f1   : > { %5248 = vrot.lane.b32.xlu1 %v14958_v4, %s8933_s29  ;;  %v4632_v32 = vadd.f32 %v4631_v14, %v4630_v37  ;;  %5214 = vrot.lane.b32.xlu0 %v12699_v29, %s8931_s26  ;;  %v2004_v45 = vsel %vm1778_vm3, %v14977_v11, 0.0  ;;  %v2005_v23 = vsel %vm1778_vm3, %v14979_v38, 0.0  ;;  %v2013_v47 = vsel %vm1778_vm3, %v14980_v6, 0.0  ;;  %v14983_v27 = vld [vmem:[#allocation62_spill] sm:$0xff]  ;;  %v14986_v11 = vld [vmem:[#allocation68_spill] sm:$0xff] }
 0x4f2   : > { %14978 = vst [vmem:[#allocation198_spill] sm:$0xff] %v12696_v3  ;;  %v4656_v19 = vrot.slane %v4655_v59, 4  ;;  %v2006_v28 = vadd.f32 %v2005_v23, %v2004_v45  ;;  %v2014_v2 = vsel %vm1778_vm3, %v14981_v13, 0.0  ;;  %v1998_v37 = vrot.slane %v1997_v9, 4  ;;  %v12718_v35 = vpop.xlane.xlu0 %4010  ;;  %v14984_v23 = vld [vmem:[#allocation67_spill] sm:$0xff] }
 0x4f3   : > { %v4633_v4 = vrot.slane %v4632_v32, 1  ;;  %v2015_v26 = vadd.f32 %v2014_v2, %v2013_v47  ;;  %v2022_v18 = vsel %vm1778_vm3, %v14982_v1, 0.0  ;;  %v12720_v14 = vpop.xlane.xlu1 %3385  ;;  %v2023_v45 = vsel %vm1778_vm3, %v14983_v27, 0.0 }
 0x4f4   : > { %v4657_v15 = vadd.f32 %v4656_v19, %v4655_v59  ;;  %v2007_v33 = vrot.slane %v2006_v28, 4  ;;  %v2031_v16 = vsel %vm1778_vm3, %v14984_v23, 0.0  ;;  %v1999_v47 = vadd.f32 %v1998_v37, %v1997_v9  ;;  %v14987_v59 = vld [vmem:[#allocation65_spill] sm:$0xff] }
 0x4f5   : > { %v12726_v17 = vadd.f32 %v4633_v4, %v4632_v32  ;;  %5320 = vrot.lane.b32.xlu1 %v5308_v21, %s8934_s30  ;;  %v2016_v2 = vrot.slane %v2015_v26, 4  ;;  %v2024_v3 = vadd.f32 %v2023_v45, %v2022_v18  ;;  %v2032_v5 = vsel %vm1778_vm3, %v14986_v11, 0.0  ;;  %v14988_v4 = vld [vmem:[#allocation66_spill] sm:$0xff] }
 0x4f6   : > { %v4658_v40 = vrot.slane %v4657_v15, 2  ;;  %v2008_v30 = vadd.f32 %v2007_v33, %v2006_v28  ;;  %v2040_v19 = vsel %vm1778_vm3, %v14987_v59, 0.0  ;;  %v2000_v43 = vrot.slane %v1999_v47, 2  ;;  %v12737_v37 = vpop.xlane.xlu0 %3388 }
 0x4f7   : > { %14985 = vst [vmem:[#allocation159_spill] sm:$0xff] %v12726_v17  ;;  %v2017_v39 = vadd.f32 %v2016_v2, %v2015_v26  ;;  %v2025_v25 = vrot.slane %v2024_v3, 4  ;;  %v2033_v56 = vadd.f32 %v2032_v5, %v2031_v16  ;;  %v2041_v21 = vsel %vm1778_vm3, %v14988_v4, 0.0  ;;  %v12739_v28 = vpop.xlane.xlu1 %3409 }
 0x4f8   : > { %v4659_v23 = vadd.f32 %v4658_v40, %v4657_v15  ;;  %v2009_v32 = vrot.slane %v2008_v30, 2  ;;  %v2049_v9 = vsel %vm1778_vm3, %v14801_v20, 0.0  ;;  %v2001_v18 = vadd.f32 %v2000_v43, %v1999_v47 }
 0x4f9   : > { %5238 = vrot.lane.b32.xlu1 %v12699_v29, %s8932_s28  ;;  %v2018_v33 = vrot.slane %v2017_v39, 2  ;;  %v2026_v26 = vadd.f32 %v2025_v25, %v2024_v3  ;;  %v2034_v45 = vrot.slane %v2033_v56, 4  ;;  %v2042_v5 = vadd.f32 %v2041_v21, %v2040_v19 }
 0x4fa   : > { %v4660_v16 = vrot.slane %v4659_v23, 1  ;;  %v2010_v40 = vadd.f32 %v2009_v32, %v2008_v30  ;;  %v2050_v15 = vsel %vm1778_vm3, %v14804_v54, 0.0  ;;  %v2002_v2 = vrot.slane %v2001_v18, 1  ;;  %v12749_v32 = vpop.xlane.xlu0 %3412 }
 0x4fb   : > { %v2019_v4 = vadd.f32 %v2018_v33, %v2017_v39  ;;  %v2027_v20 = vrot.slane %v2026_v26, 2  ;;  %v2035_v59 = vadd.f32 %v2034_v45, %v2033_v56  ;;  %v2043_v8 = vrot.slane %v2042_v5, 4  ;;  %v12751_v39 = vpop.xlane.xlu1 %4013 }
 0x4fc   : > { %v12745_v17 = vadd.f32 %v4660_v16, %v4659_v23  ;;  %v2011_v11 = vrot.slane %v2010_v40, 1  ;;  %v2051_v51 = vadd.f32 %v2050_v15, %v2049_v9  ;;  %v2003_v27 = vadd.f32 %v2002_v2, %v2001_v18 }
 0x4fd   : > { %v2020_v43 = vrot.slane %v2019_v4, 1  ;;  %v2028_v47 = vadd.f32 %v2027_v20, %v2026_v26  ;;  %v2036_v25 = vrot.slane %v2035_v59, 2  ;;  %v2044_v31 = vadd.f32 %v2043_v8, %v2042_v5 }
 0x4fe   : > { %v2012_v3 = vadd.f32 %v2011_v11, %v2010_v40  ;;  %v2052_v30 = vrot.slane %v2051_v51, 4  ;;  %v2058_v19 = vsel %vm1778_vm3, %v14810_v52, 0.0  ;;  %v2059_v9 = vsel %vm1778_vm3, %v14813_v10, 0.0  ;;  %v15008_v10 = vld [vmem:[#allocation32_spill] sm:$0xff] }
 0x4ff   : > { %v2021_v56 = vadd.f32 %v2020_v43, %v2019_v4  ;;  %v2029_v23 = vrot.slane %v2028_v47, 1  ;;  %v2037_v21 = vadd.f32 %v2036_v25, %v2035_v59  ;;  %v2045_v18 = vrot.slane %v2044_v31, 2 }
 0x500   : > { %v2053_v33 = vadd.f32 %v2052_v30, %v2051_v51  ;;  %v2060_v20 = vadd.f32 %v2059_v9, %v2058_v19  ;;  %v5137_v11 = vsel %vm5109_vm4, %v2012_v3, %v2003_v27  ;;  %v4424_v16 = vmul.f32 %v14979_v38, %v12667_v57  ;;  %v12769_v30 = vpop.xlane.xlu1 %3391 }
 0x501   : > { %v2030_v8 = vadd.f32 %v2029_v23, %v2028_v47  ;;  %v2038_v26 = vrot.slane %v2037_v21, 1  ;;  %v5138_v45 = vsel %vm5111_vm5, %v2021_v56, %v5137_v11  ;;  %v2046_v40 = vadd.f32 %v2045_v18, %v2044_v31  ;;  %v12767_v31 = vpop.xlane.xlu0 %4016  ;;  %v14990_v23 = vld [vmem:[#allocation188_spill] sm:$0xff]  ;;  %v14992_v11 = vld [vmem:[#allocation127_spill] sm:$0xff] }
 0x502   : > { %v2054_v5 = vrot.slane %v2053_v33, 2  ;;  %v2061_v4 = vrot.slane %v2060_v20, 4  ;;  %v4755_v59 = vmul.f32 %v14910_v34, %v12669_v7  ;;  %v4663_v51 = vsel %vm4084_vm11, %v4424_v16, 0.0 }
 0x503   : > { %v2039_v15 = vadd.f32 %v2038_v26, %v2037_v21  ;;  %v5139_v2 = vsel %vm5113_vm6, %v2030_v8, %v5138_v45  ;;  %v14989_v27 = vrot.slane %v12255_v12, 1  ;;  %v2047_v47 = vrot.slane %v2046_v40, 1  ;;  %v14991_v21 = vld [vmem:[#allocation125_spill] sm:$0xff] }
 0x504   : > { %v2055_v25 = vadd.f32 %v2054_v5, %v2053_v33  ;;  %v2062_v3 = vadd.f32 %v2061_v4, %v2060_v20  ;;  %v4664_v57 = vadd.f32 %v4663_v51, %v12702_v53  ;;  %v4924_v19 = vsel %vm4084_vm11, %v4755_v59, 0.0  ;;  %v14994_v51 = vld [vmem:[#allocation11_spill] sm:$0xff] }
 0x505   : > { %v2761_v43 = vadd.f32 %v14989_v27, %v12255_v12  ;;  %v5140_v7 = vsel %vm5115_vm7, %v2039_v15, %v5139_v2  ;;  %v2769_v56 = vrot.slane %v12295_v41, 1  ;;  %v5310_v9 = vsel %vm5111_vm5, %v14991_v21, %v14990_v23  ;;  %v14996_v21 = vld [vmem:[#allocation12_spill] sm:$0xff] }
 0x506   : > { %v2048_v12 = vadd.f32 %v2047_v47, %v2046_v40  ;;  %v2056_v18 = vrot.slane %v2055_v25, 1  ;;  %v2063_v33 = vrot.slane %v2062_v3, 2  ;;  %v4665_v20 = vrot.slane %v4664_v57, 4  ;;  %v14993_v40 = vld [vmem:[#allocation90_spill] sm:$0xff] }
 0x507   : > { %v2770_v53 = vadd.f32 %v2769_v56, %v12295_v41  ;;  %v5311_v8 = vsel %vm5113_vm6, %v14992_v11, %v5310_v9  ;;  %v4756_v26 = vmul.f32 %v14916_v55, %v12692_v48  ;;  %v4763_v45 = vmul.f32 %v14940_v44, %v12694_v61 }
 0x508   : > { %v2057_v16 = vadd.f32 %v2056_v18, %v2055_v25  ;;  %v2064_v5 = vadd.f32 %v2063_v33, %v2062_v3  ;;  %v5141_v4 = vsel %vm5117_vm8, %v2048_v12, %v5140_v7  ;;  %v4666_v59 = vadd.f32 %v4665_v20, %v4664_v57  ;;  %v14995_v25 = vld [vmem:[#allocation134_spill] sm:$0xff]  ;;  %v12796_v7 = vpop.xlane.xlu0 %3394  ;;  %v12798_v57 = vpop.xlane.xlu1 %3415  ;;  %v14997_v12 = vld [vmem:[#allocation15_spill] sm:$0xff] }
 0x509   : > { %v5312_v15 = vsel %vm5115_vm7, %v14993_v40, %v5311_v8  ;;  %v4925_v2 = vsel %vm4084_vm11, %v4756_v26, 0.0  ;;  %v12789_v41 = vsel %vm4084_vm11, %v4763_v45, 0.0  ;;  %v4085_v27 = vsel %vm4084_vm11, %v14994_v51, 0.0  ;;  %v14998_v45 = vld [vmem:[#allocation16_spill] sm:$0xff] }
 0x50a   : > { %v2065_v48 = vrot.slane %v2064_v5, 1  ;;  %v5142_v47 = vsel %vm5119_vm9, %v2057_v16, %v5141_v4  ;;  %v4667_v61 = vrot.slane %v4666_v59, 2  ;;  %v5313_v3 = vsel %vm5117_vm8, %v14995_v25, %v5312_v15  ;;  %v14999_v4 = vld [vmem:[#allocation9_spill] sm:$0xff] }
 0x50b   : > { %v5314_v56 = vsel %vm5119_vm9, %v2761_v43, %v5313_v3  ;;  %v4926_v23 = vadd.f32 %v4925_v2, %v4924_v19  ;;  %v4086_v9 = vsel %vm4084_vm11, %v14996_v21, 0.0  ;;  %v4094_v18 = vsel %vm4084_vm11, %v14997_v12, 0.0  ;;  %v15000_v19 = vld [vmem:[#allocation10_spill] sm:$0xff] }
 0x50c   : > { %v2066_v33 = vadd.f32 %v2065_v48, %v2064_v5  ;;  %v4668_v20 = vadd.f32 %v4667_v61, %v4666_v59  ;;  %v5315_v11 = vsel %vm5121_vm10, %v2770_v53, %v5314_v56  ;;  %v4087_v8 = vadd.f32 %v4086_v9, %v4085_v27  ;;  %v12824_v21 = vpop.xlane.xlu1 %4019 }
 0x50d   : > { %5322 = vrot.lane.b32.xlu1 %v5315_v11, %s8934_s30  ;;  %v4927_v26 = vrot.slane %v4926_v23, 4  ;;  %v4095_v16 = vsel %vm4084_vm11, %v14998_v45, 0.0  ;;  %v4103_v43 = vsel %vm4084_vm11, %v14999_v4, 0.0  ;;  %v4104_v40 = vsel %vm4084_vm11, %v15000_v19, 0.0 }
 0x50e   : > { %v12814_v15 = vsel %vm5121_vm10, %v2066_v33, %v5142_v47  ;;  %v4669_v5 = vrot.slane %v4668_v20, 1  ;;  %v4088_v59 = vrot.slane %v4087_v8, 4  ;;  %v4096_v2 = vadd.f32 %v4095_v16, %v4094_v18  ;;  %v12822_v47 = vpop.xlane.xlu0 %3418  ;;  %v15002_v18 = vld [vmem:[#allocation20_spill] sm:$0xff]  ;;  %v15003_v16 = vld [vmem:[#allocation17_spill] sm:$0xff] }
 0x50f   : > { %15001 = vst [vmem:[#allocation158_spill] sm:$0xff] %v12814_v15  ;;  %5226 = vrot.lane.b32.xlu0 %v12814_v15, %s8928_s20  ;;  %v4928_v53 = vadd.f32 %v4927_v26, %v4926_v23  ;;  %v4105_v51 = vadd.f32 %v4104_v40, %v4103_v43  ;;  %v4112_v27 = vsel %vm4084_vm11, %v14835_v0, 0.0  ;;  %v4113_v48 = vsel %vm4084_vm11, %v14843_v62, 0.0  ;;  %v15004_v40 = vld [vmem:[#allocation18_spill] sm:$0xff] }
 0x510   : > { %v4670_v61 = vadd.f32 %v4669_v5, %v4668_v20  ;;  %v4089_v25 = vadd.f32 %v4088_v59, %v4087_v8  ;;  %v4097_v3 = vrot.slane %v4096_v2, 4  ;;  %v4114_v56 = vadd.f32 %v4113_v48, %v4112_v27 }
 0x511   : > { %v4929_v9 = vrot.slane %v4928_v53, 2  ;;  %v4106_v12 = vrot.slane %v4105_v51, 4  ;;  %v4121_v23 = vsel %vm4084_vm11, %v14844_v60, 0.0  ;;  %v4122_v33 = vsel %vm4084_vm11, %v15002_v18, 0.0 }
 0x512   : > { %v12832_v0 = vsel %vm5109_vm4, %v4670_v61, %v12745_v17  ;;  %v4090_v62 = vrot.slane %v4089_v25, 2  ;;  %v4098_v20 = vadd.f32 %v4097_v3, %v4096_v2  ;;  %v4115_v11 = vrot.slane %v4114_v56, 4  ;;  %v15005_v61 = vld [vmem:[#allocation27_spill] sm:$0xff]  ;;  %v12845_v3 = vpop.xlane.xlu0 %4022 }
 0x513   : > { %5250 = vrot.lane.b32.xlu0 %v12699_v29, %s8933_s29  ;;  %v12836_v8 = vadd.f32 %v4929_v9, %v4928_v53  ;;  %v4107_v26 = vadd.f32 %v4106_v12, %v4105_v51  ;;  %v4123_v45 = vadd.f32 %v4122_v33, %v4121_v23  ;;  %v4130_v60 = vsel %vm4084_vm11, %v15003_v16, 0.0  ;;  %v12847_v9 = vpop.xlane.xlu1 %4037  ;;  %v15006_v23 = vld [vmem:[#allocation28_spill] sm:$0xff] }
 0x514   : > { %v4091_v4 = vadd.f32 %v4090_v62, %v4089_v25  ;;  %v4099_v43 = vrot.slane %v4098_v20, 2  ;;  %v4116_v19 = vadd.f32 %v4115_v11, %v4114_v56  ;;  %v4131_v17 = vsel %vm4084_vm11, %v15004_v40, 0.0  ;;  %v15007_v40 = vld [vmem:[#allocation31_spill] sm:$0xff] }
 0x515   : > { %v4108_v59 = vrot.slane %v4107_v26, 2  ;;  %v4124_v2 = vrot.slane %v4123_v45, 4  ;;  %v4132_v27 = vadd.f32 %v4131_v17, %v4130_v60  ;;  %v4139_v51 = vsel %vm4084_vm11, %v15005_v61, 0.0 }
 0x516   : > { %v4092_v48 = vrot.slane %v4091_v4, 1  ;;  %v4100_v29 = vadd.f32 %v4099_v43, %v4098_v20  ;;  %v4117_v53 = vrot.slane %v4116_v19, 2  ;;  %v4140_v18 = vsel %vm4084_vm11, %v15006_v23, 0.0 }
 0x517   : > { %v4109_v25 = vadd.f32 %v4108_v59, %v4107_v26  ;;  %v4125_v56 = vadd.f32 %v4124_v2, %v4123_v45  ;;  %v4133_v12 = vrot.slane %v4132_v27, 4  ;;  %v4141_v16 = vadd.f32 %v4140_v18, %v4139_v51  ;;  %v12860_v51 = vpop.xlane.xlu1 %4043 }
 0x518   : > { %v4093_v33 = vadd.f32 %v4092_v48, %v4091_v4  ;;  %v4101_v62 = vrot.slane %v4100_v29, 1  ;;  %v4118_v11 = vadd.f32 %v4117_v53, %v4116_v19  ;;  %v4148_v17 = vsel %vm4084_vm11, %v15007_v40, 0.0  ;;  %v12858_v53 = vpop.xlane.xlu0 %4040 }
 0x519   : > { %v4110_v60 = vrot.slane %v4109_v25, 1  ;;  %v4126_v20 = vrot.slane %v4125_v56, 2  ;;  %v4134_v43 = vadd.f32 %v4133_v12, %v4132_v27  ;;  %v4142_v15 = vrot.slane %v4141_v16, 4 }
 0x51a   : > { %v4102_v61 = vadd.f32 %v4101_v62, %v4100_v29  ;;  %v4119_v5 = vrot.slane %v4118_v11, 1  ;;  %v4149_v26 = vsel %vm4084_vm11, %v15008_v10, 0.0  ;;  %v4764_v27 = vmul.f32 %v14942_v49, %v12718_v35 }
 0x51b   : > { %v4111_v45 = vadd.f32 %v4110_v60, %v4109_v25  ;;  %v4127_v59 = vadd.f32 %v4126_v20, %v4125_v56  ;;  %v4135_v2 = vrot.slane %v4134_v43, 2  ;;  %v4150_v23 = vadd.f32 %v4149_v26, %v4148_v17  ;;  %v15009_v20 = vld [vmem:[#allocation135_spill] sm:$0xff] }
 0x51c   : > { %v4120_v4 = vadd.f32 %v4119_v5, %v4118_v11  ;;  %v4143_v48 = vadd.f32 %v4142_v15, %v4141_v16  ;;  %v5383_v19 = vsel %vm5109_vm4, %v4102_v61, %v4093_v33  ;;  %v4961_v5 = vsel %vm4084_vm11, %v4764_v27, 0.0  ;;  %v15011_v17 = vld [vmem:[#allocation139_spill] sm:$0xff]  ;;  %v12880_v27 = vpop.xlane.xlu0 %4046 }
 0x51d   : > { %v4128_v29 = vrot.slane %v4127_v59, 1  ;;  %v4136_v12 = vadd.f32 %v4135_v2, %v4134_v43  ;;  %v4151_v18 = vrot.slane %v4150_v23, 4  ;;  %v5384_v10 = vsel %vm5111_vm5, %v4111_v45, %v5383_v19  ;;  %v15013_v19 = vld [vmem:[#allocation82_spill] sm:$0xff] }
 0x51e   : > { %v4144_v25 = vrot.slane %v4143_v48, 2  ;;  %v5385_v56 = vsel %vm5113_vm6, %v4120_v4, %v5384_v10  ;;  %v4417_v15 = vmul.f32 %v14955_v42, %v12720_v14  ;;  %v4962_v11 = vadd.f32 %v4961_v5, %v12789_v41 }
 0x51f   : > { %v4129_v33 = vadd.f32 %v4128_v29, %v4127_v59  ;;  %v4137_v62 = vrot.slane %v4136_v12, 1  ;;  %v4152_v35 = vadd.f32 %v4151_v18, %v4150_v23  ;;  %v15010_v43 = vrot.slane %v15009_v20, 1  ;;  %v15012_v23 = vld [vmem:[#allocation131_spill] sm:$0xff]  ;;  %v12882_v29 = vpop.xlane.xlu1 %3421 }
 0x520   : > { %v4145_v16 = vadd.f32 %v4144_v25, %v4143_v48  ;;  %v4635_v60 = vsel %vm4084_vm11, %v4417_v15, 0.0  ;;  %v4507_v61 = vrot.slane %v15011_v17, 1  ;;  %v4963_v4 = vrot.slane %v4962_v11, 4  ;;  %v15014_v25 = vld [vmem:[#allocation193_spill] sm:$0xff]  ;;  %v15015_v15 = vld [vmem:[#allocation194_spill] sm:$0xff] }
 0x521   : > { %v4499_v40 = vadd.f32 %v15010_v43, %v15009_v20  ;;  %v4138_v26 = vadd.f32 %v4137_v62, %v4136_v12  ;;  %v4153_v45 = vrot.slane %v4152_v35, 2  ;;  %v5386_v2 = vsel %vm5115_vm7, %v4129_v33, %v5385_v56 }
 0x522   : > { %v4146_v14 = vrot.slane %v4145_v16, 1  ;;  %v4508_v59 = vadd.f32 %v4507_v61, %v15011_v17  ;;  %v5456_v41 = vsel %vm5111_vm5, %v15013_v19, %v15012_v23  ;;  %v4418_v48 = vmul.f32 %v14956_v24, %v12737_v37  ;;  %v15016_v17 = vld [vmem:[#allocation133_spill] sm:$0xff] }
 0x523   : > { %v4154_v18 = vadd.f32 %v4153_v45, %v4152_v35  ;;  %v5387_v12 = vsel %vm5117_vm8, %v4138_v26, %v5386_v2  ;;  %v4964_v10 = vadd.f32 %v4963_v4, %v4962_v11  ;;  %v5457_v56 = vsel %vm5113_vm6, %v15014_v25, %v5456_v41  ;;  %v15017_v45 = vld [vmem:[#allocation23_spill] sm:$0xff] }
 0x524   : > { %v4147_v5 = vadd.f32 %v4146_v14, %v4145_v16  ;;  %v5458_v33 = vsel %vm5115_vm7, %v15015_v15, %v5457_v56  ;;  %v4636_v62 = vsel %vm4084_vm11, %v4418_v48, 0.0  ;;  %v4425_v37 = vmul.f32 %v14980_v6, %v12739_v28  ;;  %v15020_v48 = vld [vmem:[#allocation22_spill] sm:$0xff]  ;;  %v12912_v56 = vpop.xlane.xlu0 %3424 }
 0x525   : > { %v4155_v20 = vrot.slane %v4154_v18, 1  ;;  %v4965_v43 = vrot.slane %v4964_v10, 2  ;;  %v5459_v35 = vsel %vm5117_vm8, %v15016_v17, %v5458_v33  ;;  %v4637_v61 = vadd.f32 %v4636_v62, %v4635_v60  ;;  %v15019_v60 = vld [vmem:[#allocation21_spill] sm:$0xff]  ;;  %v15022_v33 = vld [vmem:[#allocation26_spill] sm:$0xff] }
 0x526   : > { %v5388_v11 = vsel %vm5119_vm9, %v4147_v5, %v5387_v12  ;;  %v5460_v26 = vsel %vm5119_vm9, %v4499_v40, %v5459_v35  ;;  %v12897_v16 = vsel %vm4084_vm11, %v4425_v37, 0.0  ;;  %v4157_v2 = vsel %vm4084_vm11, %v15017_v45, 0.0  ;;  %v15021_v12 = vld [vmem:[#allocation25_spill] sm:$0xff] }
 0x527   : > { %v4156_v4 = vadd.f32 %v4155_v20, %v4154_v18  ;;  %v4966_v14 = vadd.f32 %v4965_v43, %v4964_v10  ;;  %v12902_v28 = vsel %vm5121_vm10, %v4508_v59, %v5460_v26  ;;  %v4638_v23 = vrot.slane %v4637_v61, 4  ;;  %v12914_v18 = vpop.xlane.xlu1 %4025  ;;  %v15023_v37 = vld [vmem:[#allocation29_spill] sm:$0xff]  ;;  %v15024_v43 = vld [vmem:[#allocation30_spill] sm:$0xff] }
 0x528   : > { %15018 = vst [vmem:[#allocation76_spill] sm:$0xff] %v12902_v28  ;;  %v4158_v19 = vsel %vm4084_vm11, %v14873_v50, 0.0  ;;  %v4166_v41 = vsel %vm4084_vm11, %v15019_v60, 0.0  ;;  %v4167_v40 = vsel %vm4084_vm11, %v15020_v48, 0.0  ;;  %v4175_v25 = vsel %vm4084_vm11, %v15021_v12, 0.0 }
 0x529   : > { %v5389_v59 = vsel %vm5121_vm10, %v4156_v4, %v5388_v11  ;;  %v4967_v10 = vrot.slane %v4966_v14, 1  ;;  %v4639_v5 = vadd.f32 %v4638_v23, %v4637_v61  ;;  %v4159_v15 = vadd.f32 %v4158_v19, %v4157_v2  ;;  %v15026_v4 = vld [vmem:[#allocation35_spill] sm:$0xff]  ;;  %v15027_v19 = vld [vmem:[#allocation36_spill] sm:$0xff] }
 0x52a   : > { %5487 = vrot.lane.b32.xlu1 %v5389_v59, %s8931_s26  ;;  %5411 = vrot.lane.b32.xlu0 %v5389_v59, %s8935_s7  ;;  %v4168_v50 = vadd.f32 %v4167_v40, %v4166_v41  ;;  %v4176_v62 = vsel %vm4084_vm11, %v15022_v33, 0.0  ;;  %v4184_v20 = vsel %vm4084_vm11, %v15023_v37, 0.0  ;;  %v4185_v17 = vsel %vm4084_vm11, %v15024_v43, 0.0  ;;  %v12939_v33 = vpop.xlane.xlu0 %4028 }
 0x52b   : > { %v12925_v35 = vadd.f32 %v4967_v10, %v4966_v14  ;;  %v4640_v11 = vrot.slane %v4639_v5, 2  ;;  %v4160_v61 = vrot.slane %v4159_v15, 4  ;;  %v4177_v26 = vadd.f32 %v4176_v62, %v4175_v25 }
 0x52c   : > { %v4169_v45 = vrot.slane %v4168_v50, 4  ;;  %v4186_v2 = vadd.f32 %v4185_v17, %v4184_v20  ;;  %v4193_v23 = vsel %vm4084_vm11, %v15026_v4, 0.0  ;;  %v4194_v60 = vsel %vm4084_vm11, %v15027_v19, 0.0 }
 0x52d   : > { %15025 = vst [vmem:[#allocation197_spill] sm:$0xff] %v12925_v35  ;;  %v4641_v41 = vadd.f32 %v4640_v11, %v4639_v5  ;;  %v4161_v48 = vadd.f32 %v4160_v61, %v4159_v15  ;;  %v4178_v40 = vrot.slane %v4177_v26, 4  ;;  %v4195_v12 = vadd.f32 %v4194_v60, %v4193_v23  ;;  %v12941_v5 = vpop.xlane.xlu1 %4049 }
 0x52e   : > { %5511 = vrot.lane.b32.xlu1 %v12902_v28, %s8932_s28  ;;  %5499 = vrot.lane.b32.xlu0 %v12902_v28, %s8928_s20  ;;  %v4170_v14 = vadd.f32 %v4169_v45, %v4168_v50  ;;  %v4187_v25 = vrot.slane %v4186_v2, 4  ;;  %v4202_v59 = vsel %vm4084_vm11, %v14902_v36, 0.0  ;;  %v4203_v10 = vsel %vm4084_vm11, %v14904_v63, 0.0 }
 0x52f   : > { %v4642_v15 = vrot.slane %v4641_v41, 1  ;;  %v4162_v62 = vrot.slane %v4161_v48, 2  ;;  %v4179_v37 = vadd.f32 %v4178_v40, %v4177_v26  ;;  %v4196_v20 = vrot.slane %v4195_v12, 4 }
 0x530   : > { %v4171_v43 = vrot.slane %v4170_v14, 2  ;;  %v4188_v17 = vadd.f32 %v4187_v25, %v4186_v2  ;;  %v4204_v11 = vadd.f32 %v4203_v10, %v4202_v59  ;;  %v4211_v50 = vsel %vm4084_vm11, %v14906_v58, 0.0 }
 0x531   : > { %v12945_v61 = vadd.f32 %v4642_v15, %v4641_v41  ;;  %v4163_v36 = vadd.f32 %v4162_v62, %v4161_v48  ;;  %v4180_v45 = vrot.slane %v4179_v37, 2  ;;  %v4197_v4 = vadd.f32 %v4196_v20, %v4195_v12  ;;  %v12951_v41 = vpop.xlane.xlu0 %4052  ;;  %v12953_v48 = vpop.xlane.xlu1 %3427 }
 0x532   : > { %v4172_v63 = vadd.f32 %v4171_v43, %v4170_v14  ;;  %v4189_v23 = vrot.slane %v4188_v17, 2  ;;  %v4205_v19 = vrot.slane %v4204_v11, 4  ;;  %v4212_v60 = vsel %vm4084_vm11, %v14907_v46, 0.0 }
 0x533   : > { %v4164_v28 = vrot.slane %v4163_v36, 1  ;;  %v4181_v26 = vadd.f32 %v4180_v45, %v4179_v37  ;;  %v4198_v40 = vrot.slane %v4197_v4, 2  ;;  %v4213_v35 = vadd.f32 %v4212_v60, %v4211_v50 }
 0x534   : > { %v4173_v2 = vrot.slane %v4172_v63, 1  ;;  %v4190_v25 = vadd.f32 %v4189_v23, %v4188_v17  ;;  %v4206_v59 = vadd.f32 %v4205_v19, %v4204_v11  ;;  %v4220_v58 = vsel %vm4084_vm11, %v14910_v34, 0.0  ;;  %v15028_v19 = vld [vmem:[#allocation137_spill] sm:$0xff] }
 0x535   : > { %v4165_v12 = vadd.f32 %v4164_v28, %v4163_v36  ;;  %v4182_v14 = vrot.slane %v4181_v26, 1  ;;  %v4199_v10 = vadd.f32 %v4198_v40, %v4197_v4  ;;  %v4214_v15 = vrot.slane %v4213_v35, 4 }
 0x536   : > { %v4174_v62 = vadd.f32 %v4173_v2, %v4172_v63  ;;  %v4191_v46 = vrot.slane %v4190_v25, 1  ;;  %v4207_v20 = vrot.slane %v4206_v59, 2  ;;  %v4221_v37 = vsel %vm4084_vm11, %v14916_v55, 0.0 }
 0x537   : > { %v4183_v43 = vadd.f32 %v4182_v14, %v4181_v26  ;;  %v4200_v17 = vrot.slane %v4199_v10, 1  ;;  %v4215_v11 = vadd.f32 %v4214_v15, %v4213_v35  ;;  %v4222_v50 = vadd.f32 %v4221_v37, %v4220_v58  ;;  %v15030_v26 = vld [vmem:[#allocation149_spill] sm:$0xff]  ;;  %v15031_v35 = vld [vmem:[#allocation136_spill] sm:$0xff] }
 0x538   : > { %v4192_v45 = vadd.f32 %v4191_v46, %v4190_v25  ;;  %v4208_v34 = vadd.f32 %v4207_v20, %v4206_v59  ;;  %v5390_v23 = vsel %vm5109_vm4, %v4174_v62, %v4165_v12  ;;  %v15029_v28 = vrot.slane %v15028_v19, 1  ;;  %v15032_v58 = vld [vmem:[#allocation84_spill] sm:$0xff]  ;;  %v12967_v59 = vpop.xlane.xlu0 %3430  ;;  %v12969_v12 = vpop.xlane.xlu1 %4031 }
 0x539   : > { %v4201_v4 = vadd.f32 %v4200_v17, %v4199_v10  ;;  %v4216_v60 = vrot.slane %v4215_v11, 2  ;;  %v4223_v63 = vrot.slane %v4222_v50, 4  ;;  %v5391_v40 = vsel %vm5111_vm5, %v4183_v43, %v5390_v23  ;;  %v15033_v46 = vld [vmem:[#allocation144_spill] sm:$0xff] }
 0x53a   : > { %v4851_v36 = vadd.f32 %v15029_v28, %v15028_v19  ;;  %v4209_v2 = vrot.slane %v4208_v34, 1  ;;  %v5392_v55 = vsel %vm5113_vm6, %v4192_v45, %v5391_v40  ;;  %v4859_v14 = vrot.slane %v15030_v26, 1  ;;  %v15034_v17 = vld [vmem:[#allocation140_spill] sm:$0xff]  ;;  %v15035_v40 = vld [vmem:[#allocation138_spill] sm:$0xff] }
 0x53b   : > { %v5556_v25 = vsel %vm5111_vm5, %v15032_v58, %v15031_v35  ;;  %v4217_v15 = vadd.f32 %v4216_v60, %v4215_v11  ;;  %v4224_v62 = vadd.f32 %v4223_v63, %v4222_v50  ;;  %v5393_v10 = vsel %vm5115_vm7, %v4201_v4, %v5392_v55  ;;  %v15036_v63 = vld [vmem:[#allocation156_spill] sm:$0xff]  ;;  %v15038_v58 = vld [vmem:[#allocation91_spill] sm:$0xff] }
 0x53c   : > { %v5557_v20 = vsel %vm5113_vm6, %v15033_v46, %v5556_v25  ;;  %v4210_v37 = vadd.f32 %v4209_v2, %v4208_v34  ;;  %v4860_v43 = vadd.f32 %v4859_v14, %v15030_v26  ;;  %v4426_v23 = vmul.f32 %v14981_v13, %v12749_v32 }
 0x53d   : > { %v5558_v45 = vsel %vm5115_vm7, %v15034_v17, %v5557_v20  ;;  %v4218_v19 = vrot.slane %v4217_v15, 1  ;;  %v4225_v28 = vrot.slane %v4224_v62, 2  ;;  %v4765_v50 = vmul.f32 %v14946_v22, %v12751_v39  ;;  %v15041_v20 = vld [vmem:[#allocation52_spill] sm:$0xff]  ;;  %v12999_v17 = vpop.xlane.xlu0 %4034 }
 0x53e   : > { %v5559_v11 = vsel %vm5117_vm8, %v15035_v40, %v5558_v45  ;;  %v5394_v4 = vsel %vm5117_vm8, %v4210_v37, %v5393_v10  ;;  %v4672_v60 = vsel %vm4084_vm11, %v4426_v23, 0.0  ;;  %v15037_v2 = vrot.slane %v15036_v63, 1  ;;  %v15039_v10 = vld [vmem:[#allocation141_spill] sm:$0xff]  ;;  %v15042_v45 = vld [vmem:[#allocation143_spill] sm:$0xff] }
 0x53f   : > { %v5560_v34 = vsel %vm5119_vm9, %v4851_v36, %v5559_v11  ;;  %v4219_v26 = vadd.f32 %v4218_v19, %v4217_v15  ;;  %v4226_v32 = vadd.f32 %v4225_v28, %v4224_v62  ;;  %v4673_v35 = vadd.f32 %v4672_v60, %v12897_v16  ;;  %v15040_v36 = vld [vmem:[#allocation142_spill] sm:$0xff]  ;;  %v13001_v15 = vpop.xlane.xlu1 %4055  ;;  %v15043_v28 = vld [vmem:[#allocation145_spill] sm:$0xff] }
 0x540   : > { %v4571_v55 = vadd.f32 %v15037_v2, %v15036_v63  ;;  %v5561_v14 = vsel %vm5121_vm10, %v4860_v43, %v5560_v34  ;;  %v4969_v39 = vsel %vm4084_vm11, %v4765_v50, 0.0  ;;  %v4579_v25 = vrot.slane %v15038_v58, 1  ;;  %v15045_v63 = vld [vmem:[#allocation89_spill] sm:$0xff] }
 0x541   : > { %5583 = vrot.lane.b32.xlu0 %v5561_v14, %s8933_s29  ;;  %v5463_v46 = vsel %vm5111_vm5, %v15040_v36, %v15039_v10  ;;  %v4766_v37 = vmul.f32 %v15041_v20, %v12767_v31  ;;  %v4227_v62 = vrot.slane %v4226_v32, 1  ;;  %v5395_v16 = vsel %vm5119_vm9, %v4219_v26, %v5394_v4  ;;  %v15044_v31 = vld [vmem:[#allocation63_spill] sm:$0xff] }
 0x542   : > { %v4674_v43 = vrot.slane %v4673_v35, 4  ;;  %v5464_v23 = vsel %vm5113_vm6, %v15042_v45, %v5463_v46  ;;  %v4580_v19 = vadd.f32 %v4579_v25, %v15038_v58  ;;  %v4419_v50 = vmul.f32 %v15044_v31, %v12769_v30  ;;  %v15046_v58 = vld [vmem:[#allocation64_spill] sm:$0xff] }
 0x543   : > { %v5465_v40 = vsel %vm5115_vm7, %v15043_v28, %v5464_v23  ;;  %v4970_v11 = vsel %vm4084_vm11, %v4766_v37, 0.0  ;;  %v4228_v34 = vadd.f32 %v4227_v62, %v4226_v32  ;;  %v4420_v25 = vmul.f32 %v15046_v58, %v12796_v7  ;;  %v15051_v28 = vld [vmem:[#allocation146_spill] sm:$0xff] }
 0x544   : > { %v4675_v60 = vadd.f32 %v4674_v43, %v4673_v35  ;;  %v5466_v2 = vsel %vm5117_vm8, %v15045_v63, %v5465_v40  ;;  %v4971_v4 = vadd.f32 %v4970_v11, %v4969_v39  ;;  %v4644_v14 = vsel %vm4084_vm11, %v4419_v50, 0.0  ;;  %v15048_v39 = vld [vmem:[#allocation155_spill] sm:$0xff]  ;;  %v13036_v43 = vpop.xlane.xlu1 %3433  ;;  %v15054_v63 = vld [vmem:[#allocation62_spill] sm:$0xff] }
 0x545   : > { %v5467_v26 = vsel %vm5119_vm9, %v4571_v55, %v5466_v2  ;;  %v4427_v10 = vmul.f32 %v14982_v1, %v12798_v57  ;;  %v5396_v36 = vsel %vm5121_vm10, %v4228_v34, %v5395_v16  ;;  %v4645_v55 = vsel %vm4084_vm11, %v4420_v25, 0.0  ;;  %v13034_v16 = vpop.xlane.xlu0 %4058  ;;  %v15052_v40 = vld [vmem:[#allocation195_spill] sm:$0xff]  ;;  %v15056_v25 = vld [vmem:[#allocation50_spill] sm:$0xff] }
 0x546   : > { %v4676_v46 = vrot.slane %v4675_v60, 2  ;;  %v13022_v30 = vsel %vm5121_vm10, %v4580_v19, %v5467_v26  ;;  %v4972_v32 = vrot.slane %v4971_v4, 4  ;;  %5413 = vrot.lane.b32.xlu1 %v5396_v36, %s8935_s7  ;;  %5489 = vrot.lane.b32.xlu0 %v5396_v36, %s8931_s26  ;;  %v15049_v7 = vrot.slane %v15048_v39, 1  ;;  %v15053_v50 = vld [vmem:[#allocation151_spill] sm:$0xff]  ;;  %v15055_v26 = vld [vmem:[#allocation49_spill] sm:$0xff] }
 0x547   : > { %15047 = vst [vmem:[#allocation161_spill] sm:$0xff] %v13022_v30  ;;  %v4680_v35 = vsel %vm4084_vm11, %v4427_v10, 0.0  ;;  %v15050_v57 = vrot.slane %v12836_v8, 1  ;;  %v4646_v19 = vadd.f32 %v4645_v55, %v4644_v14  ;;  %v5563_v11 = vsel %vm5111_vm5, %v15052_v40, %v15051_v28  ;;  %v15057_v14 = vld [vmem:[#allocation196_spill] sm:$0xff] }
 0x548   : > { %v4923_v37 = vadd.f32 %v15049_v7, %v15048_v39  ;;  %v4677_v45 = vadd.f32 %v4676_v46, %v4675_v60  ;;  %v4973_v23 = vadd.f32 %v4972_v32, %v4971_v4  ;;  %v5564_v34 = vsel %vm5113_vm6, %v15053_v50, %v5563_v11  ;;  %v15058_v32 = vld [vmem:[#allocation153_spill] sm:$0xff] }
 0x549   : > { %v4932_v62 = vadd.f32 %v15050_v57, %v12836_v8  ;;  %v4428_v2 = vmul.f32 %v15054_v63, %v12822_v47  ;;  %v4767_v8 = vmul.f32 %v15055_v26, %v12824_v21  ;;  %v4768_v10 = vmul.f32 %v15056_v25, %v12845_v3 }
 0x54a   : > { %v4678_v36 = vrot.slane %v4677_v45, 1  ;;  %v4974_v60 = vrot.slane %v4973_v23, 2  ;;  %v4647_v4 = vrot.slane %v4646_v19, 4  ;;  %v5565_v46 = vsel %vm5115_vm7, %v15057_v14, %v5564_v34  ;;  %5501 = vrot.lane.b32.xlu1 %v13022_v30, %s8928_s20  ;;  %5513 = vrot.lane.b32.xlu0 %v13022_v30, %s8932_s28  ;;  %v15059_v34 = vld [vmem:[#allocation55_spill] sm:$0xff]  ;;  %v13064_v30 = vpop.xlane.xlu0 %3436 }
 0x54b   : > { %v5566_v47 = vsel %vm5117_vm8, %v15058_v32, %v5565_v46  ;;  %v4681_v21 = vsel %vm4084_vm11, %v4428_v2, 0.0  ;;  %v4978_v55 = vsel %vm4084_vm11, %v4767_v8, 0.0  ;;  %v4979_v3 = vsel %vm4084_vm11, %v4768_v10, 0.0  ;;  %v13066_v46 = vpop.xlane.xlu1 %4061 }
 0x54c   : > { %v4679_v39 = vadd.f32 %v4678_v36, %v4677_v45  ;;  %v4975_v7 = vadd.f32 %v4974_v60, %v4973_v23  ;;  %v4648_v57 = vadd.f32 %v4647_v4, %v4646_v19  ;;  %v5567_v28 = vsel %vm5119_vm9, %v4923_v37, %v5566_v47  ;;  %v15061_v19 = vld [vmem:[#allocation39_spill] sm:$0xff]  ;;  %v15064_v4 = vld [vmem:[#allocation37_spill] sm:$0xff] }
 0x54d   : > { %v5568_v40 = vsel %vm5121_vm10, %v4932_v62, %v5567_v28  ;;  %v4682_v11 = vadd.f32 %v4681_v21, %v4680_v35  ;;  %v4980_v50 = vadd.f32 %v4979_v3, %v4978_v55  ;;  %v4773_v14 = vmul.f32 %v15059_v34, %v12847_v9  ;;  %v15062_v9 = vld [vmem:[#allocation40_spill] sm:$0xff]  ;;  %v15065_v55 = vld [vmem:[#allocation38_spill] sm:$0xff] }
 0x54e   : > { %v13070_v2 = vsel %vm5111_vm5, %v4679_v39, %v12832_v0  ;;  %v4976_v45 = vrot.slane %v4975_v7, 1  ;;  %v4649_v23 = vrot.slane %v4648_v57, 2  ;;  %v4229_v37 = vsel %vm4084_vm11, %v15061_v19, 0.0  ;;  %5585 = vrot.lane.b32.xlu0 %v5568_v40, %s8933_s29  ;;  %v15066_v39 = vld [vmem:[#allocation41_spill] sm:$0xff] }
 0x54f   : > { %15060 = vst [vmem:[#allocation75_spill] sm:$0xff] %v13070_v2  ;;  %v4683_v35 = vrot.slane %v4682_v11, 4  ;;  %v4981_v62 = vrot.slane %v4980_v50, 4  ;;  %v13076_v8 = vsel %vm4084_vm11, %v4773_v14, 0.0  ;;  %v4230_v10 = vsel %vm4084_vm11, %v15062_v9, 0.0 }
 0x550   : > { %v13080_v36 = vadd.f32 %v4976_v45, %v4975_v7  ;;  %v13082_v60 = vadd.f32 %v4649_v23, %v4648_v57  ;;  %v4231_v0 = vadd.f32 %v4230_v10, %v4229_v37  ;;  %v4238_v32 = vsel %vm4084_vm11, %v15064_v4, 0.0  ;;  %v15067_v7 = vld [vmem:[#allocation42_spill] sm:$0xff] }
 0x551   : > { %v4684_v47 = vadd.f32 %v4683_v35, %v4682_v11  ;;  %v4982_v21 = vadd.f32 %v4981_v62, %v4980_v50  ;;  %v4239_v3 = vsel %vm4084_vm11, %v15065_v55, 0.0  ;;  %v4247_v28 = vsel %vm4084_vm11, %v15066_v39, 0.0  ;;  %v13095_v50 = vpop.xlane.xlu0 %4064  ;;  %v13097_v35 = vpop.xlane.xlu1 %3439 }
 0x552   : > { %15063 = vst [vmem:[#allocation162_spill] sm:$0xff] %v13080_v36  ;;  %v4232_v14 = vrot.slane %v4231_v0, 4  ;;  %v4240_v19 = vadd.f32 %v4239_v3, %v4238_v32  ;;  %v4248_v57 = vsel %vm4084_vm11, %v15067_v7, 0.0  ;;  %v4256_v11 = vsel %vm4084_vm11, %v14940_v44, 0.0  ;;  %15068 = vst [vmem:[#allocation78_spill] sm:$0xff] %v13097_v35 }
 0x553   : > { %v4685_v45 = vrot.slane %v4684_v47, 2  ;;  %v4983_v23 = vrot.slane %v4982_v21, 2  ;;  %v4249_v37 = vadd.f32 %v4248_v57, %v4247_v28  ;;  %v4257_v10 = vsel %vm4084_vm11, %v14942_v49, 0.0 }
 0x554   : > { %v4233_v62 = vadd.f32 %v4232_v14, %v4231_v0  ;;  %v4241_v9 = vrot.slane %v4240_v19, 4  ;;  %v4265_v4 = vsel %vm4084_vm11, %v14946_v22, 0.0  ;;  %v4258_v39 = vadd.f32 %v4257_v10, %v4256_v11 }
 0x555   : > { %v4686_v32 = vadd.f32 %v4685_v45, %v4684_v47  ;;  %v4984_v55 = vadd.f32 %v4983_v23, %v4982_v21  ;;  %v4250_v3 = vrot.slane %v4249_v37, 4  ;;  %v4266_v44 = vsel %vm4084_vm11, %v15041_v20, 0.0  ;;  %v13113_v20 = vpop.xlane.xlu0 %3442  ;;  %v13115_v23 = vpop.xlane.xlu1 %4067 }
 0x556   : > { %v4234_v28 = vrot.slane %v4233_v62, 2  ;;  %v4242_v7 = vadd.f32 %v4241_v9, %v4240_v19  ;;  %v4274_v57 = vsel %vm4084_vm11, %v15055_v26, 0.0  ;;  %v4259_v2 = vrot.slane %v4258_v39, 4 }
 0x557   : > { %v4687_v0 = vrot.slane %v4686_v32, 1  ;;  %v4985_v14 = vrot.slane %v4984_v55, 1  ;;  %v4251_v40 = vadd.f32 %v4250_v3, %v4249_v37  ;;  %v4267_v35 = vadd.f32 %v4266_v44, %v4265_v4 }
 0x558   : > { %v4235_v49 = vadd.f32 %v4234_v28, %v4233_v62  ;;  %v4243_v36 = vrot.slane %v4242_v7, 2  ;;  %v4275_v22 = vsel %vm4084_vm11, %v15056_v25, 0.0  ;;  %v4260_v45 = vadd.f32 %v4259_v2, %v4258_v39 }
 0x559   : > { %v13109_v47 = vadd.f32 %v4687_v0, %v4686_v32  ;;  %v13111_v21 = vadd.f32 %v4985_v14, %v4984_v55  ;;  %v4252_v19 = vrot.slane %v4251_v40, 2  ;;  %v4268_v37 = vrot.slane %v4267_v35, 4 }
 0x55a   : > { %v4236_v26 = vrot.slane %v4235_v49, 1  ;;  %v4244_v11 = vadd.f32 %v4243_v36, %v4242_v7  ;;  %v4276_v9 = vadd.f32 %v4275_v22, %v4274_v57  ;;  %v4261_v10 = vrot.slane %v4260_v45, 2 }
 0x55b   : > { %15069 = vst [vmem:[#allocation163_spill] sm:$0xff] %v13109_v47  ;;  %v4253_v62 = vadd.f32 %v4252_v19, %v4251_v40  ;;  %v4283_v4 = vsel %vm4084_vm11, %v14955_v42, 0.0  ;;  %v4284_v25 = vsel %vm4084_vm11, %v14956_v24, 0.0  ;;  %v4269_v3 = vadd.f32 %v4268_v37, %v4267_v35  ;;  %v13127_v35 = vpop.xlane.xlu1 %4073 }
 0x55c   : > { %v4237_v32 = vadd.f32 %v4236_v26, %v4235_v49  ;;  %v4245_v55 = vrot.slane %v4244_v11, 1  ;;  %v4277_v2 = vrot.slane %v4276_v9, 4  ;;  %v4262_v28 = vadd.f32 %v4261_v10, %v4260_v45  ;;  %v13125_v49 = vpop.xlane.xlu0 %4070  ;;  %15070 = vst [vmem:[#allocation165_spill] sm:$0xff] %v13127_v35  ;;  %v15071_v10 = vld [vmem:[#allocation56_spill] sm:$0xff] }
 0x55d   : > { %v4254_v39 = vrot.slane %v4253_v62, 1  ;;  %v4285_v44 = vadd.f32 %v4284_v25, %v4283_v4  ;;  %v4292_v36 = vsel %vm4084_vm11, %v15044_v31, 0.0  ;;  %v4270_v57 = vrot.slane %v4269_v3, 2 }
 0x55e   : > { %v4246_v7 = vadd.f32 %v4245_v55, %v4244_v11  ;;  %v4278_v40 = vadd.f32 %v4277_v2, %v4276_v9  ;;  %v4293_v0 = vsel %vm4084_vm11, %v15046_v58, 0.0  ;;  %v4263_v22 = vrot.slane %v4262_v28, 1 }
 0x55f   : > { %v4255_v14 = vadd.f32 %v4254_v39, %v4253_v62  ;;  %v4286_v19 = vrot.slane %v4285_v44, 4  ;;  %v4294_v47 = vadd.f32 %v4293_v0, %v4292_v36  ;;  %v4271_v26 = vadd.f32 %v4270_v57, %v4269_v3  ;;  %v15072_v36 = vld [vmem:[#allocation53_spill] sm:$0xff] }
 0x560   : > { %v4279_v45 = vrot.slane %v4278_v40, 2  ;;  %v5397_v37 = vsel %vm5109_vm4, %v4246_v7, %v4237_v32  ;;  %v4774_v11 = vmul.f32 %v15071_v10, %v12858_v53  ;;  %v4264_v4 = vadd.f32 %v4263_v22, %v4262_v28 }
 0x561   : > { %v4287_v9 = vadd.f32 %v4286_v19, %v4285_v44  ;;  %v4295_v25 = vrot.slane %v4294_v47, 4  ;;  %v5398_v55 = vsel %vm5111_vm5, %v4255_v14, %v5397_v37  ;;  %v4272_v62 = vrot.slane %v4271_v26, 1  ;;  %v15073_v19 = vld [vmem:[#allocation67_spill] sm:$0xff] }
 0x562   : > { %v4280_v2 = vadd.f32 %v4279_v45, %v4278_v40  ;;  %v5006_v39 = vsel %vm4084_vm11, %v4774_v11, 0.0  ;;  %v4775_v0 = vmul.f32 %v15072_v36, %v12860_v51  ;;  %v5399_v57 = vsel %vm5113_vm6, %v4264_v4, %v5398_v55  ;;  %v13143_v51 = vpop.xlane.xlu0 %4076 }
 0x563   : > { %v4288_v35 = vrot.slane %v4287_v9, 2  ;;  %v4296_v3 = vadd.f32 %v4295_v25, %v4294_v47  ;;  %v5007_v32 = vadd.f32 %v5006_v39, %v13076_v8  ;;  %v4273_v7 = vadd.f32 %v4272_v62, %v4271_v26  ;;  %v13145_v47 = vpop.xlane.xlu1 %4079  ;;  %v15076_v62 = vld [vmem:[#allocation148_spill] sm:$0xff]  ;;  %v15077_v39 = vld [vmem:[#allocation150_spill] sm:$0xff] }
 0x564   : > { %v4281_v53 = vrot.slane %v4280_v2, 1  ;;  %v5014_v28 = vsel %vm4084_vm11, %v4775_v0, 0.0  ;;  %v4776_v44 = vmul.f32 %v14979_v38, %v12880_v27  ;;  %v4429_v45 = vmul.f32 %v15073_v19, %v12882_v29  ;;  %15074 = vst [vmem:[#allocation83_spill] sm:$0xff] %v13145_v47  ;;  %v15078_v0 = vld [vmem:[#allocation68_spill] sm:$0xff] }
 0x565   : > { %v4289_v14 = vadd.f32 %v4288_v35, %v4287_v9  ;;  %v4297_v40 = vrot.slane %v4296_v3, 2  ;;  %v5008_v22 = vrot.slane %v5007_v32, 4  ;;  %v5400_v8 = vsel %vm5115_vm7, %v4273_v7, %v5399_v57 }
 0x566   : > { %v4282_v37 = vadd.f32 %v4281_v53, %v4280_v2  ;;  %v5015_v26 = vsel %vm4084_vm11, %v4776_v44, 0.0  ;;  %v15075_v11 = vrot.slane %v13082_v60, 1  ;;  %v4689_v29 = vsel %vm4084_vm11, %v4429_v45, 0.0 }
 0x567   : > { %v4290_v27 = vrot.slane %v4289_v14, 1  ;;  %v4298_v35 = vadd.f32 %v4297_v40, %v4296_v3  ;;  %v5009_v9 = vadd.f32 %v5008_v22, %v5007_v32  ;;  %v5016_v25 = vadd.f32 %v5015_v26, %v5014_v28  ;;  %v15081_v26 = vld [vmem:[#allocation160_spill] sm:$0xff] }
 0x568   : > { %v4652_v4 = vadd.f32 %v15075_v11, %v13082_v60  ;;  %v5401_v55 = vsel %vm5117_vm8, %v4282_v37, %v5400_v8  ;;  %v5470_v2 = vsel %vm5111_vm5, %v15077_v39, %v15076_v62  ;;  %v4430_v57 = vmul.f32 %v15078_v0, %v12912_v56  ;;  %v15079_v60 = vld [vmem:[#allocation157_spill] sm:$0xff]  ;;  %v13169_v8 = vpop.permute.xlu1 %5208 }
 0x569   : > { %v4291_v7 = vadd.f32 %v4290_v27, %v4289_v14  ;;  %v4299_v53 = vrot.slane %v4298_v35, 1  ;;  %v5010_v44 = vrot.slane %v5009_v9, 2  ;;  %v5017_v47 = vrot.slane %v5016_v25, 4  ;;  %v13167_v14 = vpop.xlane.xlu0 %4082  ;;  %15080 = vst [vmem:[#allocation70_spill] sm:$0xff] %v13169_v8 }
 0x56a   : > { %v5471_v3 = vsel %vm5113_vm6, %v15079_v60, %v5470_v2  ;;  %v4690_v32 = vsel %vm4084_vm11, %v4430_v57, 0.0  ;;  %v4769_v28 = vmul.f32 %v14955_v42, %v12914_v18  ;;  %v4301_v40 = vsel %vm4084_vm11, %v15059_v34, 0.0 }
 0x56b   : > { %v4300_v22 = vadd.f32 %v4299_v53, %v4298_v35  ;;  %v5402_v45 = vsel %vm5119_vm9, %v4291_v7, %v5401_v55  ;;  %v5011_v37 = vadd.f32 %v5010_v44, %v5009_v9  ;;  %v5018_v56 = vadd.f32 %v5017_v47, %v5016_v25  ;;  %v15082_v9 = vld [vmem:[#allocation159_spill] sm:$0xff] }
 0x56c   : > { %v5472_v11 = vsel %vm5115_vm7, %v15081_v26, %v5471_v3  ;;  %v4691_v27 = vadd.f32 %v4690_v32, %v4689_v29  ;;  %v13174_v62 = vsel %vm4084_vm11, %v4769_v28, 0.0  ;;  %v4302_v42 = vsel %vm4084_vm11, %v15071_v10, 0.0  ;;  %v13203_v28 = vpop.permute.xlu1 %5232 }
 0x56d   : > { %v5403_v18 = vsel %vm5121_vm10, %v4300_v22, %v5402_v45  ;;  %v5012_v34 = vrot.slane %v5011_v37, 1  ;;  %v5019_v35 = vrot.slane %v5018_v56, 2  ;;  %v5473_v47 = vsel %vm5117_vm8, %v15082_v9, %v5472_v11  ;;  %15085 = vst [vmem:[#allocation92_spill] sm:$0xff] %v13203_v28 }
 0x56e   : > { %5415 = vrot.lane.b32.xlu1 %v5403_v18, %s8935_s7  ;;  %v5474_v25 = vsel %vm5119_vm9, %v12945_v61, %v5473_v47  ;;  %v4692_v55 = vrot.slane %v4691_v27, 4  ;;  %v4303_v29 = vadd.f32 %v4302_v42, %v4301_v40  ;;  %v4310_v39 = vsel %vm4084_vm11, %v15072_v36, 0.0 }
 0x56f   : > { %v5013_v2 = vadd.f32 %v5012_v34, %v5011_v37  ;;  %v5020_v57 = vadd.f32 %v5019_v35, %v5018_v56  ;;  %v13187_v10 = vsel %vm5121_vm10, %v4652_v4, %v5474_v25  ;;  %v4311_v7 = vsel %vm4084_vm11, %v14979_v38, 0.0  ;;  %v13201_v38 = vpop.permute.xlu0 %5220 }
 0x570   : > { %15083 = vst [vmem:[#allocation81_spill] sm:$0xff] %v13187_v10  ;;  %5503 = vrot.lane.b32.xlu0 %v13187_v10, %s8928_s20  ;;  %v4693_v53 = vadd.f32 %v4692_v55, %v4691_v27  ;;  %v4304_v44 = vrot.slane %v4303_v29, 4  ;;  %v4312_v60 = vadd.f32 %v4311_v7, %v4310_v39  ;;  %v4319_v61 = vsel %vm4084_vm11, %v14980_v6, 0.0  ;;  %15084 = vst [vmem:[#allocation73_spill] sm:$0xff] %v13201_v38  ;;  %v15086_v55 = vld [vmem:[#allocation65_spill] sm:$0xff] }
 0x571   : > { %v5021_v3 = vrot.slane %v5020_v57, 1  ;;  %v4320_v36 = vsel %vm4084_vm11, %v14981_v13, 0.0  ;;  %v4328_v4 = vsel %vm4084_vm11, %v14982_v1, 0.0  ;;  %v4329_v32 = vsel %vm4084_vm11, %v15054_v63, 0.0 }
 0x572   : > { %5491 = vrot.lane.b32.xlu1 %v5403_v18, %s8931_s26  ;;  %v4694_v40 = vrot.slane %v4693_v53, 2  ;;  %v4305_v22 = vadd.f32 %v4304_v44, %v4303_v29  ;;  %v4313_v45 = vrot.slane %v4312_v60, 4  ;;  %v4321_v37 = vadd.f32 %v4320_v36, %v4319_v61  ;;  %v15088_v36 = vld [vmem:[#allocation69_spill] sm:$0xff] }
 0x573   : > { %v5022_v56 = vadd.f32 %v5021_v3, %v5020_v57  ;;  %v4330_v26 = vadd.f32 %v4329_v32, %v4328_v4  ;;  %v4337_v11 = vsel %vm4084_vm11, %v15073_v19, 0.0  ;;  %v4338_v27 = vsel %vm4084_vm11, %v15078_v0, 0.0  ;;  %v15087_v3 = vld [vmem:[#allocation66_spill] sm:$0xff]  ;;  %v13221_v4 = vpop.permute.xlu0 %5210  ;;  %v13223_v32 = vpop.permute.xlu1 %5244 }
 0x574   : > { %v4695_v42 = vadd.f32 %v4694_v40, %v4693_v53  ;;  %v4306_v34 = vrot.slane %v4305_v22, 2  ;;  %v4314_v35 = vadd.f32 %v4313_v45, %v4312_v60  ;;  %v4322_v9 = vrot.slane %v4321_v37, 4  ;;  %15089 = vst [vmem:[#allocation85_spill] sm:$0xff] %v13221_v4  ;;  %15090 = vst [vmem:[#allocation71_spill] sm:$0xff] %v13223_v32 }
 0x575   : > { %v13211_v47 = vsel %vm5109_vm4, %v5022_v56, %v5013_v2  ;;  %v4331_v18 = vrot.slane %v4330_v26, 4  ;;  %v4339_v25 = vadd.f32 %v4338_v27, %v4337_v11  ;;  %v4346_v29 = vsel %vm4084_vm11, %v15086_v55, 0.0 }
 0x576   : > { %5515 = vrot.lane.b32.xlu1 %v13187_v10, %s8932_s28  ;;  %v4696_v39 = vrot.slane %v4695_v42, 1  ;;  %v4307_v57 = vadd.f32 %v4306_v34, %v4305_v22  ;;  %v4315_v7 = vrot.slane %v4314_v35, 2  ;;  %v4323_v44 = vadd.f32 %v4322_v9, %v4321_v37 }
 0x577   : > { %v4332_v61 = vadd.f32 %v4331_v18, %v4330_v26  ;;  %v4340_v53 = vrot.slane %v4339_v25, 4  ;;  %v4347_v60 = vsel %vm4084_vm11, %v15087_v3, 0.0  ;;  %v4355_v2 = vsel %vm4084_vm11, %v15088_v36, 0.0 }
 0x578   : > { %v13225_v40 = vadd.f32 %v4696_v39, %v4695_v42  ;;  %v4308_v45 = vrot.slane %v4307_v57, 1  ;;  %v4316_v56 = vadd.f32 %v4315_v7, %v4314_v35  ;;  %v4324_v11 = vrot.slane %v4323_v44, 2  ;;  %v15092_v7 = vld [vmem:[#allocation72_spill] sm:$0xff] }
 0x579   : > { %v4333_v22 = vrot.slane %v4332_v61, 2  ;;  %v4341_v27 = vadd.f32 %v4340_v53, %v4339_v25  ;;  %v4348_v37 = vadd.f32 %v4347_v60, %v4346_v29  ;;  %v4356_v26 = vsel %vm4084_vm11, %v14804_v54, 0.0 }
 0x57a   : > { %15091 = vst [vmem:[#allocation86_spill] sm:$0xff] %v13225_v40  ;;  %v4309_v34 = vadd.f32 %v4308_v45, %v4307_v57  ;;  %v4317_v9 = vrot.slane %v4316_v56, 1  ;;  %v4325_v18 = vadd.f32 %v4324_v11, %v4323_v44  ;;  %v4357_v10 = vadd.f32 %v4356_v26, %v4355_v2  ;;  %v13233_v57 = vpop.permute.xlu0 %5222  ;;  %v13235_v44 = vpop.permute.xlu1 %5316 }
 0x57b   : > { %v4334_v28 = vadd.f32 %v4333_v22, %v4332_v61  ;;  %v4342_v38 = vrot.slane %v4341_v27, 2  ;;  %v4349_v4 = vrot.slane %v4348_v37, 4  ;;  %v4364_v42 = vsel %vm4084_vm11, %v14810_v52, 0.0 }
 0x57c   : > { %v4318_v39 = vadd.f32 %v4317_v9, %v4316_v56  ;;  %v4326_v32 = vrot.slane %v4325_v18, 1  ;;  %v4358_v35 = vrot.slane %v4357_v10, 4  ;;  %v4365_v25 = vsel %vm4084_vm11, %v15092_v7, 0.0 }
 0x57d   : > { %v4335_v29 = vrot.slane %v4334_v28, 1  ;;  %v4343_v53 = vadd.f32 %v4342_v38, %v4341_v27  ;;  %v4350_v60 = vadd.f32 %v4349_v4, %v4348_v37  ;;  %v4366_v40 = vadd.f32 %v4365_v25, %v4364_v42 }
 0x57e   : > { %v4327_v61 = vadd.f32 %v4326_v32, %v4325_v18  ;;  %v4359_v2 = vadd.f32 %v4358_v35, %v4357_v10  ;;  %v5404_v45 = vsel %vm5109_vm4, %v4318_v39, %v4309_v34  ;;  %v4770_v56 = vmul.f32 %v14956_v24, %v12939_v33 }
 0x57f   : > { %v4336_v11 = vadd.f32 %v4335_v29, %v4334_v28  ;;  %v4344_v22 = vrot.slane %v4343_v53, 1  ;;  %v4351_v26 = vrot.slane %v4350_v60, 2  ;;  %v4367_v9 = vrot.slane %v4366_v40, 4 }
 0x580   : > { %v4360_v8 = vrot.slane %v4359_v2, 2  ;;  %v5405_v38 = vsel %vm5111_vm5, %v4327_v61, %v5404_v45  ;;  %v4988_v4 = vsel %vm4084_vm11, %v4770_v56, 0.0  ;;  %v4777_v27 = vmul.f32 %v14980_v6, %v12941_v5  ;;  %v13252_v5 = vpop.permute.xlu0 %5246 }
 0x581   : > { %v4345_v37 = vadd.f32 %v4344_v22, %v4343_v53  ;;  %v4352_v32 = vadd.f32 %v4351_v26, %v4350_v60  ;;  %v4368_v10 = vadd.f32 %v4367_v9, %v4366_v40  ;;  %v5406_v34 = vsel %vm5113_vm6, %v4336_v11, %v5405_v38  ;;  %v13254_v40 = vpop.permute.xlu1 %5234 }
 0x582   : > { %v4361_v18 = vadd.f32 %v4360_v8, %v4359_v2  ;;  %v4989_v24 = vadd.f32 %v4988_v4, %v13174_v62  ;;  %v5023_v33 = vsel %vm4084_vm11, %v4777_v27, 0.0  ;;  %v4778_v28 = vmul.f32 %v14981_v13, %v12951_v41 }
 0x583   : > { %v4353_v42 = vrot.slane %v4352_v32, 1  ;;  %v4369_v39 = vrot.slane %v4368_v10, 2  ;;  %v5407_v35 = vsel %vm5115_vm7, %v4345_v37, %v5406_v34  ;;  %v4431_v6 = vmul.f32 %v15086_v55, %v12953_v48 }
 0x584   : > { %v4362_v25 = vrot.slane %v4361_v18, 1  ;;  %v4990_v8 = vrot.slane %v4989_v24, 4  ;;  %v5024_v62 = vsel %vm4084_vm11, %v4778_v28, 0.0  ;;  %v4432_v29 = vmul.f32 %v15087_v3, %v12967_v59 }
 0x585   : > { %v4354_v53 = vadd.f32 %v4353_v42, %v4352_v32  ;;  %v4370_v13 = vadd.f32 %v4369_v39, %v4368_v10  ;;  %v5025_v41 = vadd.f32 %v5024_v62, %v5023_v33  ;;  %v4698_v60 = vsel %vm4084_vm11, %v4431_v6, 0.0 }
 0x586   : > { %v4363_v61 = vadd.f32 %v4362_v25, %v4361_v18  ;;  %v4991_v2 = vadd.f32 %v4990_v8, %v4989_v24  ;;  %v4699_v48 = vsel %vm4084_vm11, %v4432_v29, 0.0  ;;  %v4771_v45 = vmul.f32 %v15044_v31, %v12969_v12  ;;  %v13270_v12 = vpop.permute.xlu0 %5318  ;;  %v13272_v31 = vpop.permute.xlu1 %5212 }
 0x587   : > { %v4371_v56 = vrot.slane %v4370_v13, 1  ;;  %v5408_v11 = vsel %vm5117_vm8, %v4354_v53, %v5407_v35  ;;  %v5026_v22 = vrot.slane %v5025_v41, 4  ;;  %v4700_v26 = vadd.f32 %v4699_v48, %v4698_v60 }
 0x588   : > { %v5409_v9 = vsel %vm5119_vm9, %v4363_v61, %v5408_v11  ;;  %v4992_v59 = vrot.slane %v4991_v2, 2  ;;  %v4996_v38 = vsel %vm4084_vm11, %v4771_v45, 0.0  ;;  %v4772_v4 = vmul.f32 %v15046_v58, %v12999_v17 }
 0x589   : > { %v4372_v27 = vadd.f32 %v4371_v56, %v4370_v13  ;;  %v5027_v37 = vadd.f32 %v5026_v22, %v5025_v41  ;;  %v4701_v32 = vrot.slane %v4700_v26, 4  ;;  %v4779_v10 = vmul.f32 %v14982_v1, %v13001_v15 }
 0x58a   : > { %v4993_v34 = vadd.f32 %v4992_v59, %v4991_v2  ;;  %v4997_v18 = vsel %vm4084_vm11, %v4772_v4, 0.0  ;;  %v4780_v24 = vmul.f32 %v15054_v63, %v13034_v16  ;;  %v4433_v33 = vmul.f32 %v15088_v36, %v13036_v43  ;;  %v13290_v61 = vpop.permute.xlu0 %5236  ;;  %v13292_v2 = vpop.permute.xlu1 %5224 }
 0x58b   : > { %v5410_v17 = vsel %vm5121_vm10, %v4372_v27, %v5409_v9  ;;  %v5028_v58 = vrot.slane %v5027_v37, 2  ;;  %v4702_v28 = vadd.f32 %v4701_v32, %v4700_v26  ;;  %v4998_v42 = vadd.f32 %v4997_v18, %v4996_v38 }
 0x58c   : > { %5417 = vrot.lane.b32.xlu0 %v5410_v17, %s8935_s7  ;;  %v4994_v1 = vrot.slane %v4993_v34, 1  ;;  %v5032_v15 = vsel %vm4084_vm11, %v4779_v10, 0.0  ;;  %v5033_v39 = vsel %vm4084_vm11, %v4780_v24, 0.0  ;;  %v4707_v35 = vsel %vm4084_vm11, %v4433_v33, 0.0 }
 0x58d   : > { %v5029_v6 = vadd.f32 %v5028_v58, %v5027_v37  ;;  %v4703_v25 = vrot.slane %v4702_v28, 2  ;;  %v4999_v16 = vrot.slane %v4998_v42, 4  ;;  %v5034_v63 = vadd.f32 %v5033_v39, %v5032_v15  ;;  %v15094_v58 = vld [vmem:[#allocation154_spill] sm:$0xff] }
 0x58e   : > { %v4995_v8 = vadd.f32 %v4994_v1, %v4993_v34  ;;  %v4434_v43 = vmul.f32 %v14804_v54, %v13064_v30  ;;  %v4781_v62 = vmul.f32 %v15073_v19, %v13066_v46  ;;  %v4782_v29 = vmul.f32 %v15078_v0, %v13095_v50  ;;  %v15093_v46 = vld [vmem:[#allocation78_spill] sm:$0xff] }
 0x58f   : > { %v5030_v53 = vrot.slane %v5029_v6, 1  ;;  %v4704_v13 = vadd.f32 %v4703_v25, %v4702_v28  ;;  %v5000_v41 = vadd.f32 %v4999_v16, %v4998_v42  ;;  %v5035_v60 = vrot.slane %v5034_v63, 4  ;;  %v13317_v42 = vpop.permute.xlu1 %5248  ;;  %v15097_v16 = vld [vmem:[#allocation162_spill] sm:$0xff] }
 0x590   : > { %5493 = vrot.lane.b32.xlu0 %v5410_v17, %s8931_s26  ;;  %v4708_v48 = vsel %vm4084_vm11, %v4434_v43, 0.0  ;;  %v5041_v30 = vsel %vm4084_vm11, %v4781_v62, 0.0  ;;  %v5042_v45 = vsel %vm4084_vm11, %v4782_v29, 0.0  ;;  %v4435_v19 = vmul.f32 %v14810_v52, %v15093_v46 }
 0x591   : > { %v5031_v50 = vadd.f32 %v5030_v53, %v5029_v6  ;;  %v4705_v0 = vrot.slane %v4704_v13, 1  ;;  %v5001_v56 = vrot.slane %v5000_v41, 2  ;;  %v5036_v11 = vadd.f32 %v5035_v60, %v5034_v63 }
 0x592   : > { %v4709_v22 = vadd.f32 %v4708_v48, %v4707_v35  ;;  %v5043_v26 = vadd.f32 %v5042_v45, %v5041_v30  ;;  %v4716_v9 = vsel %vm4084_vm11, %v4435_v19, 0.0  ;;  %v4436_v59 = vmul.f32 %v15092_v7, %v13113_v20  ;;  %v15095_v20 = vld [vmem:[#allocation198_spill] sm:$0xff]  ;;  %v15096_v35 = vld [vmem:[#allocation197_spill] sm:$0xff] }
 0x593   : > { %v13305_v38 = vsel %vm5111_vm5, %v5031_v50, %v13211_v47  ;;  %v13307_v4 = vadd.f32 %v4705_v0, %v4704_v13  ;;  %v5002_v27 = vadd.f32 %v5001_v56, %v5000_v41  ;;  %v5037_v37 = vrot.slane %v5036_v11, 2  ;;  %v13315_v47 = vpop.permute.xlu0 %5214  ;;  %v15098_v48 = vld [vmem:[#allocation165_spill] sm:$0xff] }
 0x594   : > { %v4710_v32 = vrot.slane %v4709_v22, 4  ;;  %v5044_v10 = vrot.slane %v5043_v26, 4  ;;  %v4717_v34 = vsel %vm4084_vm11, %v4436_v59, 0.0  ;;  %v4783_v18 = vmul.f32 %v15086_v55, %v13115_v23  ;;  %v5616_v59 = vld [vmem:[#allocation4 + $0x8] sm:$0xff] }
 0x595   : > { %v5003_v24 = vrot.slane %v5002_v27, 1  ;;  %v5038_v33 = vadd.f32 %v5037_v37, %v5036_v11  ;;  %v4718_v17 = vadd.f32 %v4717_v34, %v4716_v9  ;;  %v5570_v28 = vsel %vm5111_vm5, %v15095_v20, %v15094_v58  ;;  %v5618_v37 = vld [vmem:[#allocation4 + $0x18] sm:$0xff] }
 0x596   : > { %v4711_v1 = vadd.f32 %v4710_v32, %v4709_v22  ;;  %v5045_v15 = vadd.f32 %v5044_v10, %v5043_v26  ;;  %v5050_v39 = vsel %vm4084_vm11, %v4783_v18, 0.0  ;;  %v5571_v6 = vsel %vm5113_vm6, %v15096_v35, %v5570_v28  ;;  %v15099_v22 = vld [vmem:[#allocation83_spill] sm:$0xff]  ;;  %v5623_v28 = vld [vmem:[#allocation4 + $0x40] sm:$0xff] }
 0x597   : > { %v5039_v25 = vrot.slane %v5038_v33, 1  ;;  %v4719_v23 = vrot.slane %v4718_v17, 4  ;;  %v5004_v55 = vadd.f32 %v5003_v24, %v5002_v27  ;;  %v5572_v63 = vsel %vm5115_vm7, %v15097_v16, %v5571_v6  ;;  %v13339_v56 = vpop.permute.xlu0 %5226  ;;  %v5622_v27 = vld [vmem:[#allocation4 + $0x38] sm:$0xff]  ;;  %v5624_v24 = vld [vmem:[#allocation4 + $0x48] sm:$0xff] }
 0x598   : > { %v4712_v43 = vrot.slane %v4711_v1, 2  ;;  %v5046_v62 = vrot.slane %v5045_v15, 2  ;;  %v5573_v29 = vsel %vm5117_vm8, %v13111_v21, %v5572_v63  ;;  %v4784_v53 = vmul.f32 %v15087_v3, %v13125_v49  ;;  %v5628_v6 = vld [vmem:[#allocation4 + $0x68] sm:$0xff] }
 0x599   : > { %v13328_v13 = vadd.f32 %v5039_v25, %v5038_v33  ;;  %v4720_v41 = vadd.f32 %v4719_v23, %v4718_v17  ;;  %v5574_v60 = vsel %vm5119_vm9, %v4995_v8, %v5573_v29  ;;  %v4785_v30 = vmul.f32 %v15088_v36, %v15098_v48  ;;  %v13341_v8 = vpop.permute.xlu1 %5320  ;;  %v5615_v33 = vld [vmem:[#allocation4] sm:$0xff]  ;;  %v5621_v17 = vld [vmem:[#allocation4 + $0x30] sm:$0xff]  ;;  %v5634_v25 = vld [vmem:[#allocation4 + $0x98] sm:$0xff] }
 0x59a   : > { %v4713_v45 = vadd.f32 %v4712_v43, %v4711_v1  ;;  %v5047_v46 = vadd.f32 %v5046_v62, %v5045_v15  ;;  %v5575_v19 = vsel %vm5121_vm10, %v5004_v55, %v5574_v60  ;;  %v5051_v50 = vsel %vm4084_vm11, %v4784_v53, 0.0  ;;  %v5630_v43 = vld [vmem:[#allocation4 + $0x78] sm:$0xff]  ;;  %v5636_v62 = vld [vmem:[#allocation4 + $0xa8] sm:$0xff]  ;;  %v5627_v48 = vld [vmem:[#allocation4 + $0x60] sm:$0xff] }
 0x59b   : > { %v4721_v0 = vrot.slane %v4720_v41, 2  ;;  %5587 = vrot.lane.b32.xlu1 %v5575_v19, %s8933_s29  ;;  %v5052_v21 = vadd.f32 %v5051_v50, %v5050_v39  ;;  %v5059_v49 = vsel %vm4084_vm11, %v4785_v30, 0.0  ;;  %v4786_v3 = vmul.f32 %v14804_v54, %v13143_v51  ;;  %v15100_v54 = vld [vmem:[#allocation70_spill] sm:$0xff]  ;;  %v15101_v51 = vld [vmem:[#allocation192_spill] sm:$0xff] }
 0x59c   : > { %v4714_v36 = vrot.slane %v4713_v45, 1  ;;  %v5048_v11 = vrot.slane %v5047_v46, 1  ;;  %v4787_v26 = vmul.f32 %v14810_v52, %v15099_v22  ;;  %v4788_v9 = vmul.f32 %v15092_v7, %v13167_v14  ;;  %v5617_v7 = vld [vmem:[#allocation4 + $0x10] sm:$0xff] }
 0x59d   : > { %v4722_v32 = vadd.f32 %v4721_v0, %v4720_v41  ;;  %v5053_v10 = vrot.slane %v5052_v21, 4  ;;  %v5060_v34 = vsel %vm4084_vm11, %v4786_v3, 0.0  ;;  %v5328_v18 = vsel %vm1778_vm3, %v15101_v51, %v15100_v54  ;;  %v15102_v41 = vld [vmem:[#allocation73_spill] sm:$0xff]  ;;  %v5633_v30 = vld [vmem:[#allocation4 + $0x90] sm:$0xff]  ;;  %v15103_v0 = vld [vmem:[#allocation92_spill] sm:$0xff] }
 0x59e   : > { %v4715_v58 = vadd.f32 %v4714_v36, %v4713_v45  ;;  %v13351_v20 = vadd.f32 %v5048_v11, %v5047_v46  ;;  %v5061_v52 = vadd.f32 %v5060_v34, %v5059_v49  ;;  %v5068_v14 = vsel %vm4084_vm11, %v4787_v26, 0.0  ;;  %v13357_v45 = vpop.permute.xlu0 %5250  ;;  %v13359_v46 = vpop.permute.xlu1 %5238  ;;  %v5629_v3 = vld [vmem:[#allocation4 + $0x70] sm:$0xff]  ;;  %v5635_v36 = vld [vmem:[#allocation4 + $0xa0] sm:$0xff] }
 0x59f   : > { %v4723_v1 = vrot.slane %v4722_v32, 1  ;;  %v5054_v15 = vadd.f32 %v5053_v10, %v5052_v21  ;;  %v5069_v39 = vsel %vm4084_vm11, %v4788_v9, 0.0  ;;  %v8042_v35 = vpack.c.bf16 %v5622_v27, %v5616_v59  ;;  %v15104_v9 = vld [vmem:[#allocation75_spill] sm:$0xff]  ;;  %v15106_v34 = vld [vmem:[#allocation86_spill] sm:$0xff] }
 0x5a0   : > { %v5062_v23 = vrot.slane %v5061_v52, 4  ;;  %v5070_v55 = vadd.f32 %v5069_v39, %v5068_v14  ;;  %v8054_v16 = vpack.c.bf16 %v5624_v24, %v5618_v37  ;;  %v8044_v63 = vpack.c.bf16 %v5621_v17, %v5615_v33  ;;  %v15105_v59 = vld [vmem:[#allocation163_spill] sm:$0xff]  ;;  %v15107_v14 = vld [vmem:[#allocation85_spill] sm:$0xff]  ;;  %v5645_v39 = vld [vmem:[#allocation4 + $0xf0] sm:$0xff] }
 0x5a1   : > { %v5055_v29 = vrot.slane %v5054_v15, 2  ;;  %8043 = vmatprep.subr.bf16.mxu0 %v8042_v35  ;;  %v8056_v53 = vpack.c.bf16 %v5623_v28, %v5617_v7  ;;  %v5332_v60 = vsel %vm945_vm2, %v5328_v18, %v15102_v41  ;;  %v8046_v49 = vpack.c.bf16 %v5634_v25, %v5628_v6  ;;  %v5640_v18 = vld [vmem:[#allocation4 + $0xc8] sm:$0xff]  ;;  %v5646_v24 = vld [vmem:[#allocation4 + $0xf8] sm:$0xff]  ;;  %v15108_v7 = vld [vmem:[#allocation152_spill] sm:$0xff] }
 0x5a2   : > { %v5063_v19 = vadd.f32 %v5062_v23, %v5061_v52  ;;  %v5071_v50 = vrot.slane %v5070_v55, 4  ;;  %8055 = vmatprep.subr.bf16.mxu1 %v8054_v16  ;;  %8045 = vmatpush1.bf16.msra.mxu0 %v8044_v63  ;;  %v5337_v21 = vsel %vm5336_vm12, %v5332_v60, %v15103_v0  ;;  %v8058_v22 = vpack.c.bf16 %v5636_v62, %v5630_v43  ;;  %v5642_v33 = vld [vmem:[#allocation4 + $0xd8] sm:$0xff]  ;;  %v5641_v23 = vld [vmem:[#allocation4 + $0xd0] sm:$0xff] }
 0x5a3   : > { %v5056_v11 = vadd.f32 %v5055_v29, %v5054_v15  ;;  %8057 = vmatpush1.bf16.msra.mxu1 %v8056_v53  ;;  %v4724_v26 = vadd.f32 %v4723_v1, %v4722_v32  ;;  %v5478_v27 = vsel %vm5113_vm6, %v15105_v59, %v15104_v9  ;;  %8047 = vmatprep.subr.bf16.mxu0 %v8046_v49  ;;  %v5648_v1 = vld [vmem:[#allocation4 + $0x108] sm:$0xff]  ;;  %v5639_v15 = vld [vmem:[#allocation4 + $0xc0] sm:$0xff]  ;;  %v13379_v29 = vpop.permute.xlu0 %5411  ;;  %v13381_v53 = vpop.permute.xlu1 %5322  ;;  %v8936_v49 = vmov 0.0   ;;  %v15110_v9 = vld [vmem:[#allocation74_spill] sm:$0xff] }
 0x5a4   : > { %v5064_v37 = vrot.slane %v5063_v19, 2  ;;  %v5072_v10 = vadd.f32 %v5071_v50, %v5070_v55  ;;  %v5479_v54 = vsel %vm5115_vm7, %v15106_v34, %v5478_v27  ;;  %v8048_v51 = vpack.c.bf16 %v5633_v30, %v5627_v48  ;;  %8059 = vmatprep.subr.bf16.mxu1 %v8058_v22  ;;  %v5647_v55 = vld [vmem:[#allocation4 + $0x100] sm:$0xff]  ;;  %5764 = vmatprep.mubr.f32.mxu0 %v8936_v49  ;;  %v5625_v27 = vld [vmem:[#allocation4 + $0x50] sm:$0xff]  ;;  %v5658_v34 = vld [vmem:[#allocation4 + $0x158] sm:$0xff] }
 0x5a5   : > { %v5057_v17 = vrot.slane %v5056_v11, 1  ;;  %v5480_v52 = vsel %vm5117_vm8, %v13307_v4, %v5479_v54  ;;  %v8060_v32 = vpack.c.bf16 %v5635_v36, %v5629_v3  ;;  %v5329_v28 = vsel %vm1778_vm3, %v15108_v7, %v15107_v14  ;;  %v15109_v4 = vld [vmem:[#allocation71_spill] sm:$0xff]  ;;  %v5620_v36 = vld [vmem:[#allocation4 + $0x28] sm:$0xff]  ;;  %5853 = vmatprep.mubr.f32.mxu1 %v8936_v49  ;;  %v5631_v7 = vld [vmem:[#allocation4 + $0x80] sm:$0xff] }
 0x5a6   : > { %v5065_v35 = vadd.f32 %v5064_v37, %v5063_v19  ;;  %v5073_v6 = vrot.slane %v5072_v10, 2  ;;  %v5481_v25 = vsel %vm5119_vm9, %v4715_v58, %v5480_v52  ;;  %8049 = vmatpush1.bf16.msra.mxu0 %v8048_v51  ;;  %v5342_v43 = vsel %vm5341_vm13, %v5337_v21, %v15109_v4  ;;  %v5632_v37 = vld [vmem:[#allocation4 + $0x88] sm:$0xff]  ;;  %v15111_v52 = vld [vmem:[#allocation158_spill] sm:$0xff] }
 0x5a7   : > { %v5058_v16 = vadd.f32 %v5057_v17, %v5056_v11  ;;  %v13375_v63 = vsel %vm5121_vm10, %v4724_v26, %v5481_v25  ;;  %8061 = vmatpush1.bf16.msra.mxu1 %v8060_v32  ;;  %v8050_v62 = vpack.c.bf16 %v5646_v24, %v5640_v18  ;;  %v8062_v58 = vpack.c.bf16 %v5648_v1, %v5642_v33  ;;  %v5626_v11 = vld [vmem:[#allocation4 + $0x58] sm:$0xff]  ;;  %v5500_v54 = vpop.permute.xlu0 %5499  ;;  %v5651_v18 = vld [vmem:[#allocation4 + $0x120] sm:$0xff]  ;;  %v5657_v24 = vld [vmem:[#allocation4 + $0x150] sm:$0xff] }
 0x5a8   : > { %v5066_v41 = vrot.slane %v5065_v35, 1  ;;  %v5074_v60 = vadd.f32 %v5073_v6, %v5072_v10  ;;  %5517 = vrot.lane.b32.xlu0 %v13375_v63, %s8932_s28  ;;  %5505 = vrot.lane.b32.xlu1 %v13375_v63, %s8928_s20  ;;  %v8052_v48 = vpack.c.bf16 %v5645_v39, %v5639_v15  ;;  %v8064_v30 = vpack.c.bf16 %v5647_v55, %v5641_v23  ;;  %v5638_v10 = vld [vmem:[#allocation4 + $0xb8] sm:$0xff]  ;;  %v5644_v15 = vld [vmem:[#allocation4 + $0xe8] sm:$0xff]  ;;  %v15112_v55 = vld [vmem:[#allocation76_spill] sm:$0xff] }
 0x5a9   : > { %8051 = vmatprep.subr.bf16.mxu0 %v8050_v62  ;;  %v5333_v19 = vsel %vm945_vm2, %v5329_v28, %v13233_v57  ;;  %8063 = vmatprep.subr.bf16.mxu1 %v8062_v58  ;;  %v13391_v21 = vsel %vm5346_vm14, %v5342_v43, %v13235_v44  ;;  %v5578_v57 = vsel %vm5113_vm6, %v13328_v13, %v13305_v38  ;;  %v5637_v28 = vld [vmem:[#allocation4 + $0xb0] sm:$0xff]  ;;  %v5664_v25 = vld [vmem:[#allocation4 + $0x188] sm:$0xff]  ;;  %v5670_v23 = vld [vmem:[#allocation4 + $0x1b8] sm:$0xff] }
 0x5aa   : > { %v5067_v50 = vadd.f32 %v5066_v41, %v5065_v35  ;;  %v5075_v0 = vrot.slane %v5074_v60, 1  ;;  %8053 = vmatpush1.bf16.msra.mxu0 %v8052_v48  ;;  %v5338_v3 = vsel %vm5336_vm12, %v5333_v19, %v13254_v40  ;;  %v5579_v44 = vsel %vm5115_vm7, %v13351_v20, %v5578_v57  ;;  %v5619_v40 = vld [vmem:[#allocation4 + $0x20] sm:$0xff]  ;;  %v5652_v20 = vld [vmem:[#allocation4 + $0x128] sm:$0xff]  ;;  %v5669_v4 = vld [vmem:[#allocation4 + $0x1b0] sm:$0xff] }
 0x5ab   : > { %8065 = vmatpush1.bf16.msra.mxu1 %v8064_v30  ;;  %v5343_v26 = vsel %vm5341_vm13, %v5338_v3, %v13252_v5  ;;  %v5330_v59 = vsel %vm1778_vm3, %v15110_v9, %v13272_v31  ;;  %v5580_v38 = vsel %vm5117_vm8, %v5058_v16, %v5579_v44  ;;  %v5488_v5 = vpop.permute.xlu1 %5487  ;;  %v8066_v33 = vpack.c.bf16 %v5626_v11, %v5620_v36  ;;  %v5663_v16 = vld [vmem:[#allocation4 + $0x180] sm:$0xff]  ;;  %v5649_v48 = vld [vmem:[#allocation4 + $0x110] sm:$0xff]  ;;  %v5676_v30 = vld [vmem:[#allocation4 + $0x1e8] sm:$0xff] }
 0x5ac   : > { %v5076_v22 = vadd.f32 %v5075_v0, %v5074_v60  ;;  %v5334_v13 = vsel %vm945_vm2, %v5330_v59, %v13292_v2  ;;  %v5581_v31 = vsel %vm5119_vm9, %v5067_v50, %v5580_v38  ;;  %v13417_v51 = vsel %vm5346_vm14, %v5343_v26, %v13270_v12  ;;  %v5643_v62 = vld [vmem:[#allocation4 + $0xe0] sm:$0xff]  ;;  %v5682_v19 = vld [vmem:[#allocation4 + $0x218] sm:$0xff]  ;;  %v5660_v3 = vld [vmem:[#allocation4 + $0x168] sm:$0xff] }
 0x5ad   : > { %7432 = vmatmul.mubr.msk.f32.vlgmr.msra.gmra.mrb[0].mxu0 %vm5687_vm15, %v13391_v21  ;;  %v8068_v17 = vpack.c.bf16 %v5625_v27, %v5619_v40  ;;  %v5331_v32 = vsel %vm1778_vm3, %v15111_v52, %v13315_v47  ;;  %v5339_v12 = vsel %vm5336_vm12, %v5334_v13, %v13290_v61  ;;  %v8070_v14 = vpack.c.bf16 %v5638_v10, %v5632_v37  ;;  %v5650_v47 = vld [vmem:[#allocation4 + $0x118] sm:$0xff]  ;;  %v5675_v11 = vld [vmem:[#allocation4 + $0x1e0] sm:$0xff]  ;;  %v5656_v9 = vld [vmem:[#allocation4 + $0x148] sm:$0xff] }
 0x5ae   : > { %7436 = vmatmul.mubr.msk.f32.vlgmr.msra.gmra.mrb[0].mxu1 %vm5687_vm15, %v13391_v21  ;;  %5770 = vmatprep.mubr.f32.mxu0 %v8936_v49  ;;  %v5582_v2 = vsel %vm5121_vm10, %v5076_v22, %v5581_v31  ;;  %v8078_v1 = vpack.c.bf16 %v5658_v34, %v5652_v20  ;;  %v5344_v39 = vsel %vm5341_vm13, %v5339_v12, %v13317_v42  ;;  %v5654_v0 = vld [vmem:[#allocation4 + $0x138] sm:$0xff]  ;;  %v5681_v22 = vld [vmem:[#allocation4 + $0x210] sm:$0xff]  ;;  %v5659_v27 = vld [vmem:[#allocation4 + $0x160] sm:$0xff] }
 0x5af   : > { %5859 = vmatprep.mubr.f32.mxu1 %v8936_v49  ;;  %5589 = vrot.lane.b32.xlu1 %v5582_v2, %s8933_s29  ;;  %v5335_v35 = vsel %vm945_vm2, %v5331_v32, %v13339_v56  ;;  %v8080_v6 = vpack.c.bf16 %v5657_v24, %v5651_v18  ;;  %v13438_v61 = vsel %vm5346_vm14, %v5344_v39, %v13341_v8  ;;  %v5512_v60 = vpop.permute.xlu1 %5511  ;;  %v5662_v59 = vld [vmem:[#allocation4 + $0x178] sm:$0xff]  ;;  %v5672_v20 = vld [vmem:[#allocation4 + $0x1c8] sm:$0xff]  ;;  %v5655_v18 = vld [vmem:[#allocation4 + $0x140] sm:$0xff] }
 0x5b0   : > { %8067 = vmatprep.subr.bf16.mxu0 %v8066_v33  ;;  %v5340_v42 = vsel %vm5336_vm12, %v5335_v35, %v13359_v46  ;;  %v5595_v56 = vsel %vm1778_vm3, %v13379_v29, %v15112_v55  ;;  %v8072_v43 = vpack.c.bf16 %v5637_v28, %v5631_v7  ;;  %8079 = vmatprep.subr.bf16.mxu1 %v8078_v1  ;;  %v5666_v10 = vld [vmem:[#allocation4 + $0x198] sm:$0xff]  ;;  %v5661_v24 = vld [vmem:[#allocation4 + $0x170] sm:$0xff]  ;;  %v5668_v33 = vld [vmem:[#allocation4 + $0x1a8] sm:$0xff] }
 0x5b1   : > { %7433 = vmatmul.mubr.msk.f32.gmra.mrb[2].mxu0 %vm5687_vm15, %v13417_v51  ;;  %v5599_v41 = vsel %vm945_vm2, %v5595_v56, %v5488_v5  ;;  %v8074_v58 = vpack.c.bf16 %v5650_v47, %v5644_v15  ;;  %v8082_v46 = vpack.c.bf16 %v5670_v23, %v5664_v25  ;;  %v5345_v29 = vsel %vm5341_vm13, %v5340_v42, %v13357_v45  ;;  %v5665_v32 = vld [vmem:[#allocation4 + $0x190] sm:$0xff]  ;;  %v5671_v12 = vld [vmem:[#allocation4 + $0x1c0] sm:$0xff]  ;;  %v5678_v1 = vld [vmem:[#allocation4 + $0x1f8] sm:$0xff] }
 0x5b2   : > { %7437 = vmatmul.mubr.msk.f32.gmra.mrb[2].mxu1 %vm5687_vm15, %v13417_v51  ;;  %5776 = vmatprep.mubr.f32.mxu0 %v8936_v49  ;;  %v8084_v50 = vpack.c.bf16 %v5669_v4, %v5663_v16  ;;  %v13456_v57 = vsel %vm5346_vm14, %v5345_v29, %v13381_v53  ;;  %v5603_v36 = vsel %vm5336_vm12, %v5599_v41, %v5500_v54  ;;  %v5653_v53 = vld [vmem:[#allocation4 + $0x130] sm:$0xff]  ;;  %v15113_v54 = vld [vmem:[#allocation161_spill] sm:$0xff]  ;;  %v5683_v55 = vld [vmem:[#allocation4 + $0x220] sm:$0xff] }
 0x5b3   : > { %5865 = vmatprep.mubr.f32.mxu1 %v8936_v49  ;;  %8069 = vmatpush1.bf16.msra.mxu0 %v8068_v17  ;;  %v5584_v8 = vpop.permute.xlu0 %5583  ;;  %v8076_v45 = vpack.c.bf16 %v5649_v48, %v5643_v62  ;;  %v8086_v44 = vpack.c.bf16 %v5682_v19, %v5676_v30  ;;  %v5607_v26 = vsel %vm5341_vm13, %v5603_v36, %v5512_v60  ;;  %v5674_v17 = vld [vmem:[#allocation4 + $0x1d8] sm:$0xff]  ;;  %v5684_v15 = vld [vmem:[#allocation4 + $0x228] sm:$0xff]  ;;  %v5677_v42 = vld [vmem:[#allocation4 + $0x1f0] sm:$0xff] }
 0x5b4   : > { %8071 = vmatprep.subr.bf16.mxu0 %v8070_v14  ;;  %8081 = vmatpush1.bf16.msra.mxu1 %v8080_v6  ;;  %v8090_v40 = vpack.c.bf16 %v5660_v3, %v5654_v0  ;;  %v8088_v37 = vpack.c.bf16 %v5681_v22, %v5675_v11  ;;  %v13468_v34 = vsel %vm5346_vm14, %v5607_v26, %v5584_v8  ;;  %v5667_v56 = vld [vmem:[#allocation4 + $0x1a0] sm:$0xff]  ;;  %v5673_v4 = vld [vmem:[#allocation4 + $0x1d0] sm:$0xff]  ;;  %v6383_v62 = vld [vmem:[#allocation6 + $0x308] sm:$0xff] }
 0x5b5   : > { %7434 = vmatmul.mubr.msk.f32.gmra.mrb[4].mxu0 %vm5687_vm15, %v13438_v61  ;;  %8083 = vmatprep.subr.bf16.mxu1 %v8082_v46  ;;  %v8102_v31 = vpack.c.bf16 %v5662_v59, %v5656_v9  ;;  %v8092_v2 = vpack.c.bf16 %v5659_v27, %v5653_v53  ;;  %v8094_v52 = vpack.c.bf16 %v5672_v20, %v5666_v10  ;;  %v5680_v8 = vld [vmem:[#allocation4 + $0x208] sm:$0xff]  ;;  %v5686_v60 = vld [vmem:[#allocation4 + $0x238] sm:$0xff]  ;;  %v5679_v19 = vld [vmem:[#allocation4 + $0x200] sm:$0xff] }
 0x5b6   : > { %7438 = vmatmul.mubr.msk.f32.gmra.mrb[4].mxu1 %vm5687_vm15, %v13438_v61  ;;  %5782 = vmatprep.mubr.f32.mxu0 %v8936_v49  ;;  %v8104_v39 = vpack.c.bf16 %v5661_v24, %v5655_v18  ;;  %v8106_v6 = vpack.c.bf16 %v5674_v17, %v5668_v33  ;;  %v8096_v47 = vpack.c.bf16 %v5671_v12, %v5665_v32  ;;  %v5685_v29 = vld [vmem:[#allocation4 + $0x230] sm:$0xff]  ;;  %v6385_v3 = vld [vmem:[#allocation6 + $0x318] sm:$0xff]  ;;  %v6386_v11 = vld [vmem:[#allocation6 + $0x320] sm:$0xff] }
 0x5b7   : > { %8073 = vmatpush1.bf16.msra.mxu0 %v8072_v43  ;;  %5871 = vmatprep.mubr.f32.mxu1 %v8936_v49  ;;  %v8098_v23 = vpack.c.bf16 %v5684_v15, %v5678_v1  ;;  %v6382_v43 = vld [vmem:[#allocation6 + $0x300] sm:$0xff]  ;;  %v8108_v48 = vpack.c.bf16 %v5673_v4, %v5667_v56  ;;  %v8110_v30 = vpack.c.bf16 %v5686_v60, %v5680_v8  ;;  %v6384_v0 = vld [vmem:[#allocation6 + $0x310] sm:$0xff]  ;;  %v6387_v22 = vld [vmem:[#allocation6 + $0x328] sm:$0xff] }
 0x5b8   : > { %8075 = vmatprep.subr.bf16.mxu0 %v8074_v58  ;;  %8085 = vmatpush1.bf16.msra.mxu1 %v8084_v50  ;;  %v5490_v38 = vpop.permute.xlu0 %5489  ;;  %v5414_v13 = vpop.permute.xlu1 %5413  ;;  %v8100_v58 = vpack.c.bf16 %v5683_v55, %v5677_v42  ;;  %v8114_v46 = vpack.c.bf16 %v6383_v62, %v6382_v43  ;;  %v8112_v50 = vpack.c.bf16 %v5685_v29, %v5679_v19  ;;  %v6389_v26 = vld [vmem:[#allocation6 + $0x338] sm:$0xff]  ;;  %v6390_v59 = vld [vmem:[#allocation6 + $0x340] sm:$0xff]  ;;  %v6392_v27 = vld [vmem:[#allocation6 + $0x350] sm:$0xff] }
 0x5b9   : > { %7435 = vmatmul.mubr.msk.f32.gmra.mrb[6].mxu0 %vm5687_vm15, %v13456_v57  ;;  %v5596_v5 = vsel %vm1778_vm3, %v5414_v13, %v15113_v54  ;;  %8087 = vmatprep.subr.bf16.mxu1 %v8086_v44  ;;  %v8118_v36 = vpack.c.bf16 %v6385_v3, %v6384_v0  ;;  %v6388_v44 = vld [vmem:[#allocation6 + $0x330] sm:$0xff]  ;;  %v6286_v20 = vld [vmem:[#allocation6 + $0x80] sm:$0xff]  ;;  %v6287_v54 = vld [vmem:[#allocation6 + $0x88] sm:$0xff] }
 0x5ba   : > { %7439 = vmatmul.mubr.msk.f32.gmra.mrb[6].mxu1 %vm5687_vm15, %v13456_v57  ;;  %5942 = vmatprep.mubr.f32.mxu0 %v8936_v49  ;;  %v5600_v28 = vsel %vm945_vm2, %v5596_v5, %v5490_v38  ;;  %v8126_v9 = vpack.c.bf16 %v6389_v26, %v6388_v44  ;;  %v15114_v18 = vld [vmem:[#allocation81_spill] sm:$0xff]  ;;  %v6270_v55 = vld [vmem:[#allocation6] sm:$0xff]  ;;  %v6288_v4 = vld [vmem:[#allocation6 + $0x90] sm:$0xff] }
 0x5bb   : > { %8077 = vmatpush1.bf16.msra.mxu0 %v8076_v45  ;;  %6043 = vmatprep.mubr.f32.mxu1 %v8936_v49  ;;  %v8122_v45 = vpack.c.bf16 %v6387_v22, %v6386_v11  ;;  %v6319_v32 = vld [vmem:[#allocation6 + $0x188] sm:$0xff]  ;;  %v6289_v43 = vld [vmem:[#allocation6 + $0x98] sm:$0xff]  ;;  %v6272_v8 = vld [vmem:[#allocation6 + $0x10] sm:$0xff] }
 0x5bc   : > { %8091 = vmatprep.subr.bf16.mxu0 %v8090_v40  ;;  %8089 = vmatpush1.bf16.msra.mxu1 %v8088_v37  ;;  %v5514_v14 = vpop.permute.xlu0 %5513  ;;  %v5502_v7 = vpop.permute.xlu1 %5501  ;;  %v6391_v40 = vld [vmem:[#allocation6 + $0x348] sm:$0xff]  ;;  %v6393_v37 = vld [vmem:[#allocation6 + $0x358] sm:$0xff]  ;;  %v8142_v62 = vpack.c.bf16 %v6289_v43, %v6288_v4  ;;  %v6274_v19 = vld [vmem:[#allocation6 + $0x20] sm:$0xff] }
 0x5bd   : > { %6366 = vrot.lane.b32.xlu0 %v13468_v34, %s8937_s8  ;;  %v5604_v35 = vsel %vm5336_vm12, %v5600_v28, %v5502_v7  ;;  %8103 = vmatprep.subr.bf16.mxu1 %v8102_v31  ;;  %v8130_v53 = vpack.c.bf16 %v6391_v40, %v6390_v59  ;;  %v8134_v38 = vpack.c.bf16 %v6393_v37, %v6392_v27  ;;  %v6271_v56 = vld [vmem:[#allocation6 + $0x8] sm:$0xff]  ;;  %v6273_v60 = vld [vmem:[#allocation6 + $0x18] sm:$0xff]  ;;  %v6276_v11 = vld [vmem:[#allocation6 + $0x30] sm:$0xff] }
 0x5be   : > { %7440 = vmatmul.mubr.msk.f32.vlgmr.msra.gmra.mrb[8].mxu0 %vm5687_vm15, %v13391_v21  ;;  %v5608_v25 = vsel %vm5341_vm13, %v5604_v35, %v5514_v14  ;;  %v8138_v31 = vpack.c.bf16 %v6287_v54, %v6286_v20  ;;  %v6275_v29 = vld [vmem:[#allocation6 + $0x28] sm:$0xff]  ;;  %v6293_v0 = vld [vmem:[#allocation6 + $0xb8] sm:$0xff]  ;;  %v6294_v44 = vld [vmem:[#allocation6 + $0xc0] sm:$0xff] }
 0x5bf   : > { %5948 = vmatprep.mubr.f32.mxu0 %v8936_v49  ;;  %8093 = vmatpush1.bf16.msra.mxu0 %v8092_v2  ;;  %v8148_v3 = vpack.c.bf16 %v6275_v29, %v6274_v19  ;;  %v6277_v22 = vld [vmem:[#allocation6 + $0x38] sm:$0xff]  ;;  %v6295_v26 = vld [vmem:[#allocation6 + $0xc8] sm:$0xff]  ;;  %v6320_v40 = vld [vmem:[#allocation6 + $0x190] sm:$0xff] }
 0x5c0   : > { %7444 = vmatmul.mubr.msk.f32.vlgmr.msra.gmra.mrb[8].mxu1 %vm5687_vm15, %v13468_v34  ;;  %8095 = vmatprep.subr.bf16.mxu0 %v8094_v52  ;;  %v5586_v16 = vpop.permute.xlu0 %5585  ;;  %v6318_v52 = vld [vmem:[#allocation6 + $0x180] sm:$0xff]  ;;  %v8152_v59 = vpack.c.bf16 %v6277_v22, %v6276_v11  ;;  %v8154_v27 = vpack.c.bf16 %v6295_v26, %v6294_v44  ;;  %v6304_v54 = vld [vmem:[#allocation6 + $0x110] sm:$0xff]  ;;  %v6331_v22 = vld [vmem:[#allocation6 + $0x1e8] sm:$0xff] }
 0x5c1   : > { %6049 = vmatprep.mubr.f32.mxu1 %v8936_v49  ;;  %8105 = vmatpush1.bf16.msra.mxu1 %v8104_v39  ;;  %v13487_v41 = vsel %vm5346_vm14, %v5608_v25, %v5586_v16  ;;  %v8170_v12 = vpack.c.bf16 %v6319_v32, %v6318_v52  ;;  %v6278_v37 = vld [vmem:[#allocation6 + $0x40] sm:$0xff]  ;;  %v6281_v52 = vld [vmem:[#allocation6 + $0x58] sm:$0xff]  ;;  %v6328_v29 = vld [vmem:[#allocation6 + $0x1d0] sm:$0xff] }
 0x5c2   : > { %7441 = vmatmul.mubr.msk.f32.gmra.mrb[10].mxu0 %vm5687_vm15, %v13417_v51  ;;  %8107 = vmatprep.subr.bf16.mxu1 %v8106_v6  ;;  %v6298_v32 = vld [vmem:[#allocation6 + $0xe0] sm:$0xff] }
 0x5c3   : > { %5954 = vmatprep.mubr.f32.mxu0 %v8936_v49  ;;  %8097 = vmatpush1.bf16.msra.mxu0 %v8096_v47  ;;  %v6326_v43 = vld [vmem:[#allocation6 + $0x1c0] sm:$0xff] }
 0x5c4   : > { %8099 = vmatprep.subr.bf16.mxu0 %v8098_v23  ;;  %6368 = vrot.lane.b32.xlu1 %v13487_v41, %s8937_s8  ;;  %v6330_v11 = vld [vmem:[#allocation6 + $0x1e0] sm:$0xff] }
 0x5c5   : > { %7445 = vmatmul.mubr.msk.f32.gmra.mrb[10].mxu1 %vm5687_vm15, %v13487_v41  ;;  %v8194_v44 = vpack.c.bf16 %v6331_v22, %v6330_v11  ;;  %v6314_v26 = vld [vmem:[#allocation6 + $0x160] sm:$0xff]  ;;  %v6356_v11 = vld [vmem:[#allocation6 + $0x2b0] sm:$0xff]  ;;  %v6357_v22 = vld [vmem:[#allocation6 + $0x2b8] sm:$0xff] }
 0x5c6   : > { %7442 = vmatmul.mubr.msk.f32.gmra.mrb[12].mxu0 %vm5687_vm15, %v13438_v61  ;;  %6055 = vmatprep.mubr.f32.mxu1 %v8936_v49 }
 0x5c7   : > { %5960 = vmatprep.mubr.f32.mxu0 %v8936_v49  ;;  %8101 = vmatpush1.bf16.msra.mxu0 %v8100_v58  ;;  %v6290_v58 = vld [vmem:[#allocation6 + $0xa0] sm:$0xff] }
 0x5c8   : > { %8109 = vmatpush1.bf16.msra.mxu1 %v8108_v48  ;;  %8115 = vmatprep.subr.bf16.mxu0 %v8114_v46  ;;  %v6291_v48 = vld [vmem:[#allocation6 + $0xa8] sm:$0xff] }
 0x5c9   : > { %8111 = vmatprep.subr.bf16.mxu1 %v8110_v30  ;;  %v8146_v30 = vpack.c.bf16 %v6291_v48, %v6290_v58 }
 0x5ca   : > { %7443 = vmatmul.mubr.msk.f32.gmra.mrb[14].mxu0 %vm5687_vm15, %v13456_v57 }
 0x5cb   : > { %6132 = vmatprep.mubr.f32.mxu0 %v8936_v49 }
 0x5cc   : > { %8113 = vmatpush1.bf16.msra.mxu1 %v8112_v50  ;;  %v6292_v50 = vld [vmem:[#allocation6 + $0xb0] sm:$0xff] }
 0x5cd   : > { %8139 = vmatprep.subr.bf16.mxu1 %v8138_v31 }
 0x5ce   : > { %7448 = vmatmul.mubr.msk.f32.vlgmr.msra.gmra.mrb[16].mxu0 %vm5687_vm15, %v13468_v34 }
 0x5cf   : > { %6138 = vmatprep.mubr.f32.mxu0 %v8936_v49  ;;  %8117 = vmatpush3.bf16.msra.mxu0 %v8114_v46  ;;  %v8144_v46 = vpack.c.bf16 %v6273_v60, %v6272_v8  ;;  %v6284_v8 = vld [vmem:[#allocation6 + $0x70] sm:$0xff]  ;;  %v6285_v60 = vld [vmem:[#allocation6 + $0x78] sm:$0xff] }
 0x5d0   : > { %8119 = vmatprep.subr.bf16.mxu0 %v8118_v36  ;;  %v8168_v19 = vpack.c.bf16 %v6285_v60, %v6284_v8  ;;  %v6336_v8 = vld [vmem:[#allocation6 + $0x210] sm:$0xff]  ;;  %v6337_v60 = vld [vmem:[#allocation6 + $0x218] sm:$0xff] }
 0x5d2   : > { %7449 = vmatmul.mubr.msk.f32.gmra.mrb[18].mxu0 %vm5687_vm15, %v13487_v41 }
 0x5d3   : > { %6144 = vmatprep.mubr.f32.mxu0 %v8936_v49  ;;  %8121 = vmatpush3.bf16.msra.mxu0 %v8118_v36  ;;  %v8150_v36 = vpack.c.bf16 %v6293_v0, %v6292_v50  ;;  %v6329_v50 = vld [vmem:[#allocation6 + $0x1d8] sm:$0xff] }
 0x5d4   : > { %8123 = vmatprep.subr.bf16.mxu0 %v8122_v45 }
 0x5d7   : > { %8125 = vmatpush3.bf16.msra.mxu0 %v8122_v45 }
 0x5d8   : > { %8127 = vmatprep.subr.bf16.mxu0 %v8126_v9 }
 0x5db   : > { %8129 = vmatpush3.bf16.msra.mxu0 %v8126_v9  ;;  %v6303_v9 = vld [vmem:[#allocation6 + $0x108] sm:$0xff] }
 0x5dc   : > { %8131 = vmatprep.subr.bf16.mxu0 %v8130_v53 }
 0x5df   : > { %8133 = vmatpush3.bf16.msra.mxu0 %v8130_v53  ;;  %v6321_v53 = vld [vmem:[#allocation6 + $0x198] sm:$0xff] }
 0x5e0   : > { %8135 = vmatprep.subr.bf16.mxu0 %v8134_v38  ;;  %v5416_v13 = vpop.permute.xlu1 %5415 }
 0x5e1   : > { %v5597_v24 = vsel %vm1778_vm3, %v5416_v13, %v15114_v18  ;;  %v6296_v13 = vld [vmem:[#allocation6 + $0xd0] sm:$0xff]  ;;  %v6322_v18 = vld [vmem:[#allocation6 + $0x1a0] sm:$0xff] }
 0x5e2   : > { %v5504_v5 = vpop.permute.xlu0 %5503 }
 0x5e3   : > { %8137 = vmatpush3.bf16.msra.mxu0 %v8134_v38  ;;  %v6279_v38 = vld [vmem:[#allocation6 + $0x48] sm:$0xff] }
 0x5e4   : > { %v5492_v10 = vpop.permute.xlu1 %5491  ;;  %8171 = vmatprep.subr.bf16.mxu0 %v8170_v12  ;;  %v8156_v31 = vpack.c.bf16 %v6279_v38, %v6278_v37  ;;  %v6299_v12 = vld [vmem:[#allocation6 + $0xe8] sm:$0xff]  ;;  %v6317_v37 = vld [vmem:[#allocation6 + $0x178] sm:$0xff] }
 0x5e5   : > { %v5601_v2 = vsel %vm945_vm2, %v5597_v24, %v5492_v10 }
 0x5e6   : > { %v5605_v17 = vsel %vm5336_vm12, %v5601_v2, %v5504_v5  ;;  %v6305_v5 = vld [vmem:[#allocation6 + $0x118] sm:$0xff]  ;;  %v6323_v2 = vld [vmem:[#allocation6 + $0x1a8] sm:$0xff] }
 0x5e8   : > { %v5516_v33 = vpop.permute.xlu1 %5515 }
 0x5e9   : > { %v5609_v7 = vsel %vm5341_vm13, %v5605_v17, %v5516_v33  ;;  %v6280_v17 = vld [vmem:[#allocation6 + $0x50] sm:$0xff] }
 0x5fe   : > { %v5418_v1 = vpop.permute.xlu0 %5417 }
 0x5ff   : > { %v5598_v35 = vsel %vm1778_vm3, %v5418_v1, %v13375_v63  ;;  %v8140_v63 = vpack.c.bf16 %v6271_v56, %v6270_v55  ;;  %v6307_v1 = vld [vmem:[#allocation6 + $0x128] sm:$0xff]  ;;  %v6308_v56 = vld [vmem:[#allocation6 + $0x130] sm:$0xff] }
 0x602   : > { %v5494_v15 = vpop.permute.xlu0 %5493 }
 0x603   : > { %v5602_v6 = vsel %vm945_vm2, %v5598_v35, %v5494_v15  ;;  %v8160_v15 = vpack.c.bf16 %v6281_v52, %v6280_v17  ;;  %v8162_v35 = vpack.c.bf16 %v6299_v12, %v6298_v32 }
 0x60d   : > { %v5588_v14 = vpop.permute.xlu1 %5587 }
 0x60e   : > { %v5613_v28 = vsel %vm5346_vm14, %v5609_v7, %v5588_v14  ;;  %v8176_v14 = vpack.c.bf16 %v6305_v5, %v6304_v54  ;;  %v8178_v7 = vpack.c.bf16 %v6323_v2, %v6322_v18 }
 0x60f   : > { %6370 = vrot.lane.b32.xlu0 %v5613_v28, %s8937_s8  ;;  %7446 = vmatmul.mubr.msk.f32.gmra.mrb[12].mxu1 %vm5687_vm15, %v5613_v28 }
 0x610   : > { %7450 = vmatmul.mubr.msk.f32.gmra.mrb[20].mxu0 %vm5687_vm15, %v5613_v28  ;;  %6061 = vmatprep.mubr.f32.mxu1 %v8936_v49 }
 0x611   : > { %6150 = vmatprep.mubr.f32.mxu0 %v8936_v49 }
 0x61a   : > { %v5506_v39 = vpop.permute.xlu1 %5505  ;;  %v5518_v25 = vpop.permute.xlu0 %5517 }
 0x61b   : > { %v5606_v47 = vsel %vm5336_vm12, %v5602_v6, %v5506_v39  ;;  %v6324_v39 = vld [vmem:[#allocation6 + $0x1b0] sm:$0xff]  ;;  %v6282_v6 = vld [vmem:[#allocation6 + $0x60] sm:$0xff] }
 0x61c   : > { %v5610_v23 = vsel %vm5341_vm13, %v5606_v47, %v5518_v25  ;;  %v6283_v47 = vld [vmem:[#allocation6 + $0x68] sm:$0xff]  ;;  %v6300_v25 = vld [vmem:[#allocation6 + $0xf0] sm:$0xff] }
 0x61d   : > { %v8164_v4 = vpack.c.bf16 %v6283_v47, %v6282_v6  ;;  %v6352_v47 = vld [vmem:[#allocation6 + $0x290] sm:$0xff] }
 0x621   : > { %v5590_v42 = vpop.permute.xlu1 %5589 }
 0x622   : > { %v5614_v16 = vsel %vm5346_vm14, %v5610_v23, %v5590_v42  ;;  %v6301_v23 = vld [vmem:[#allocation6 + $0xf8] sm:$0xff] }
 0x623   : > { %6372 = vrot.lane.b32.xlu1 %v5614_v16, %s8937_s8  ;;  %7447 = vmatmul.mubr.msk.f32.gmra.mrb[14].mxu1 %vm5687_vm15, %v5614_v16 }
 0x624   : > { %7451 = vmatmul.mubr.msk.f32.gmra.mrb[22].mxu0 %vm5687_vm15, %v5614_v16  ;;  %6221 = vmatprep.mubr.f32.mxu1 %v8936_v49 }
 0x627   : > { %7452 = vmatmul.mubr.msk.f32.vlgmr.msra.gmra.mrb[16].mxu1 %vm5687_vm15, %v13468_v34 }
 0x628   : > { %6227 = vmatprep.mubr.f32.mxu1 %v8936_v49  ;;  %8141 = vmatpush3.bf16.msra.mxu1 %v8140_v63  ;;  %v6327_v63 = vld [vmem:[#allocation6 + $0x1c8] sm:$0xff] }
 0x629   : > { %8143 = vmatprep.subr.bf16.mxu1 %v8142_v62  ;;  %v8166_v62 = vpack.c.bf16 %v6301_v23, %v6300_v25  ;;  %v8186_v48 = vpack.c.bf16 %v6327_v63, %v6326_v43  ;;  %v6353_v25 = vld [vmem:[#allocation6 + $0x298] sm:$0xff] }
 0x62a   : > { %v8206_v63 = vpack.c.bf16 %v6353_v25, %v6352_v47  ;;  %v6344_v47 = vld [vmem:[#allocation6 + $0x250] sm:$0xff]  ;;  %v6362_v25 = vld [vmem:[#allocation6 + $0x2e0] sm:$0xff] }
 0x62b   : > { %7453 = vmatmul.mubr.msk.f32.gmra.mrb[18].mxu1 %vm5687_vm15, %v13487_v41  ;;  %v6302_v41 = vld [vmem:[#allocation6 + $0x100] sm:$0xff] }
 0x62c   : > { %6233 = vmatprep.mubr.f32.mxu1 %v8936_v49  ;;  %8145 = vmatpush3.bf16.msra.mxu1 %v8144_v46  ;;  %v8172_v10 = vpack.c.bf16 %v6303_v9, %v6302_v41  ;;  %v6310_v46 = vld [vmem:[#allocation6 + $0x140] sm:$0xff]  ;;  %v6315_v41 = vld [vmem:[#allocation6 + $0x168] sm:$0xff]  ;;  %v6332_v9 = vld [vmem:[#allocation6 + $0x1f0] sm:$0xff] }
 0x62d   : > { %8147 = vmatprep.subr.bf16.mxu1 %v8146_v30  ;;  %v6311_v30 = vld [vmem:[#allocation6 + $0x148] sm:$0xff] }
 0x62e   : > { %v8188_v0 = vpack.c.bf16 %v6311_v30, %v6310_v46  ;;  %v6355_v46 = vld [vmem:[#allocation6 + $0x2a8] sm:$0xff] }
 0x62f   : > { %v6367_v34 = vpop.permute.xlu0 %6366  ;;  %7454 = vmatmul.mubr.msk.f32.gmra.mrb[20].mxu1 %vm5687_vm15, %v5613_v28  ;;  %v6306_v28 = vld [vmem:[#allocation6 + $0x120] sm:$0xff] }
 0x630   : > { %v6378_v45 = vsel %vm5687_vm15, %v13391_v21, %v6367_v34  ;;  %6239 = vmatprep.mubr.f32.mxu1 %v8936_v49  ;;  %8149 = vmatpush3.bf16.msra.mxu1 %v8148_v3  ;;  %v6297_v21 = vld [vmem:[#allocation6 + $0xd8] sm:$0xff]  ;;  %v8174_v49 = vpack.c.bf16 %v6321_v53, %v6320_v40  ;;  %v8180_v42 = vpack.c.bf16 %v6307_v1, %v6306_v28  ;;  %v6312_v34 = vld [vmem:[#allocation6 + $0x150] sm:$0xff] }
 0x631   : > { %7884 = vmatprep.mubr.msk.f32.mxu0 %vm6394_vm0, %v6378_v45  ;;  %8151 = vmatprep.subr.bf16.mxu1 %v8150_v36  ;;  %v8158_v33 = vpack.c.bf16 %v6297_v21, %v6296_v13  ;;  %v8190_v3 = vpack.c.bf16 %v6329_v50, %v6328_v29  ;;  %v6313_v36 = vld [vmem:[#allocation6 + $0x158] sm:$0xff]  ;;  %v8196_v40 = vpack.c.bf16 %v6315_v41, %v6314_v26  ;;  %v6350_v13 = vld [vmem:[#allocation6 + $0x280] sm:$0xff]  ;;  %v6351_v21 = vld [vmem:[#allocation6 + $0x288] sm:$0xff] }
 0x632   : > { %v8192_v45 = vpack.c.bf16 %v6313_v36, %v6312_v34  ;;  %v6338_v34 = vld [vmem:[#allocation6 + $0x220] sm:$0xff]  ;;  %v6339_v36 = vld [vmem:[#allocation6 + $0x228] sm:$0xff]  ;;  %v8214_v41 = vpack.c.bf16 %v6357_v22, %v6356_v11 }
 0x633   : > { %7455 = vmatmul.mubr.msk.f32.gmra.mrb[22].mxu1 %vm5687_vm15, %v5614_v16  ;;  %v6309_v16 = vld [vmem:[#allocation6 + $0x138] sm:$0xff]  ;;  %v8212_v26 = vpack.c.bf16 %v6339_v36, %v6338_v34 }
 0x634   : > { %8153 = vmatpush3.bf16.msra.mxu1 %v8152_v59  ;;  %v8184_v58 = vpack.c.bf16 %v6309_v16, %v6308_v56  ;;  %v6333_v59 = vld [vmem:[#allocation6 + $0x1f8] sm:$0xff] }
 0x635   : > { %8155 = vmatprep.subr.bf16.mxu1 %v8154_v27  ;;  %v8198_v53 = vpack.c.bf16 %v6333_v59, %v6332_v9  ;;  %v6316_v27 = vld [vmem:[#allocation6 + $0x170] sm:$0xff]  ;;  %v6341_v59 = vld [vmem:[#allocation6 + $0x238] sm:$0xff] }
 0x636   : > { %v6369_v20 = vpop.permute.xlu1 %6368  ;;  %v8200_v38 = vpack.c.bf16 %v6317_v37, %v6316_v27  ;;  %v6340_v9 = vld [vmem:[#allocation6 + $0x230] sm:$0xff] }
 0x637   : > { %v6379_v24 = vsel %vm5687_vm15, %v13417_v51, %v6369_v20  ;;  %v6325_v51 = vld [vmem:[#allocation6 + $0x1b8] sm:$0xff] }
 0x638   : > { %7885 = vmatmul.mubr.msk.f32.vlgmr.msra.gmra.mrb[24].mxu0 %vm6394_vm0, %v6379_v24  ;;  %8157 = vmatpush3.bf16.msra.mxu1 %v8156_v31  ;;  %v8182_v55 = vpack.c.bf16 %v6325_v51, %v6324_v39  ;;  %v6334_v51 = vld [vmem:[#allocation6 + $0x200] sm:$0xff] }
 0x639   : > { %8173 = vmatpush3.bf16.msra.mxu0 %v8172_v10  ;;  %8159 = vmatprep.subr.bf16.mxu1 %v8158_v33  ;;  %v8202_v10 = vpack.c.bf16 %v6351_v21, %v6350_v13  ;;  %v8216_v13 = vpack.c.bf16 %v6341_v59, %v6340_v9 }
 0x63a   : > { %8175 = vmatprep.subr.bf16.mxu0 %v8174_v49 }
 0x63c   : > { %8161 = vmatpush3.bf16.msra.mxu1 %v8160_v15 }
 0x63d   : > { %8177 = vmatpush3.bf16.msra.mxu0 %v8176_v14  ;;  %8163 = vmatprep.subr.bf16.mxu1 %v8162_v35  ;;  %v6335_v35 = vld [vmem:[#allocation6 + $0x208] sm:$0xff] }
 0x63e   : > { %8179 = vmatprep.subr.bf16.mxu0 %v8178_v7  ;;  %v8204_v16 = vpack.c.bf16 %v6335_v35, %v6334_v51 }
 0x640   : > { %8165 = vmatpush3.bf16.msra.mxu1 %v8164_v4 }
 0x641   : > { %8181 = vmatpush3.bf16.msra.mxu0 %v8180_v42  ;;  %8167 = vmatprep.subr.bf16.mxu1 %v8166_v62 }
 0x642   : > { %8183 = vmatprep.subr.bf16.mxu0 %v8182_v55 }
 0x644   : > { %8169 = vmatpush3.bf16.msra.mxu1 %v8168_v19 }
 0x645   : > { %8185 = vmatpush3.bf16.msra.mxu0 %v8184_v58  ;;  %8203 = vmatprep.subr.bf16.mxu1 %v8202_v10 }
 0x646   : > { %8187 = vmatprep.subr.bf16.mxu0 %v8186_v48  ;;  %v6354_v48 = vld [vmem:[#allocation6 + $0x2a0] sm:$0xff] }
 0x649   : > { %8189 = vmatpush3.bf16.msra.mxu0 %v8188_v0 }
 0x64a   : > { %8191 = vmatprep.subr.bf16.mxu0 %v8190_v3  ;;  %v8208_v3 = vpack.c.bf16 %v6337_v60, %v6336_v8  ;;  %v6348_v8 = vld [vmem:[#allocation6 + $0x270] sm:$0xff]  ;;  %v6349_v60 = vld [vmem:[#allocation6 + $0x278] sm:$0xff] }
 0x64d   : > { %8193 = vmatpush3.bf16.msra.mxu0 %v8192_v45 }
 0x64e   : > { %8195 = vmatprep.subr.bf16.mxu0 %v8194_v44 }
 0x651   : > { %8197 = vmatpush3.bf16.msra.mxu0 %v8196_v40  ;;  %v6358_v40 = vld [vmem:[#allocation6 + $0x2c0] sm:$0xff] }
 0x652   : > { %8199 = vmatprep.subr.bf16.mxu0 %v8198_v53  ;;  %v6359_v53 = vld [vmem:[#allocation6 + $0x2c8] sm:$0xff] }
 0x653   : > { %v8218_v10 = vpack.c.bf16 %v6359_v53, %v6358_v40 }
 0x655   : > { %8201 = vmatpush3.bf16.msra.mxu0 %v8200_v38 }
 0x680   : > { %v5766_v20 = vpop.f32.mrb[0].mxu0 }
 0x681   : > { %v6371_v49 = vpop.permute.xlu0 %6370  ;;  %v13543_v54 = vpop.f32.mrb[0].mxu1 }
 0x682   : > { %v6380_v5 = vsel %vm5687_vm15, %v13438_v61, %v6371_v49  ;;  %v5768_v31 = vpop.f32.mrb[1].mxu0  ;;  %v13547_v18 = vpop.f32.mrb[1].mxu1  ;;  %v6343_v49 = vld [vmem:[#allocation6 + $0x248] sm:$0xff] }
 0x683   : > { %7887 = vmatprep.mubr.msk.f32.mxu0 %vm6394_vm0, %v6380_v5  ;;  %v6360_v5 = vld [vmem:[#allocation6 + $0x2d0] sm:$0xff] }
 0x684   : > { %v5772_v24 = vpop.f32.mrb[2].mxu0 }
 0x685   : > { %v13550_v2 = vpop.f32.mrb[2].mxu1  ;;  %v5774_v33 = vpop.f32.mrb[3].mxu0 }
 0x686   : > { %v13552_v17 = vpop.f32.mrb[3].mxu1 }
 0x688   : > { %v13554_v52 = vpop.f32.mrb[4].mxu0 }
 0x689   : > { %v13556_v32 = vpop.f32.mrb[4].mxu1  ;;  %v13558_v12 = vpop.f32.mrb[5].mxu0 }
 0x68a   : > { %v13560_v14 = vpop.f32.mrb[5].mxu1 }
 0x68c   : > { %v13562_v61 = vpop.f32.mrb[6].mxu0 }
 0x68d   : > { %v13564_v7 = vpop.f32.mrb[6].mxu1  ;;  %v13566_v28 = vpop.f32.mrb[7].mxu0 }
 0x68e   : > { %v13568_v1 = vpop.f32.mrb[7].mxu1 }
 0x691   : > { %v13570_v15 = vpop.f32.mrb[8].mxu0 }
 0x692   : > { %v13572_v39 = vpop.f32.mrb[9].mxu0 }
 0x693   : > { %v6045_v6 = vpop.f32.mrb[8].mxu1 }
 0x694   : > { %v6246_v23 = vmul.f32 %v6045_v6, %v5766_v20  ;;  %v6047_v42 = vpop.f32.mrb[9].mxu1  ;;  %v6342_v20 = vld [vmem:[#allocation6 + $0x240] sm:$0xff] }
 0x695   : > { %v13574_v55 = vpop.f32.mrb[10].mxu0  ;;  %v6247_v56 = vmul.f32 %v6047_v42, %v5768_v31  ;;  %v6373_v4 = vpop.permute.xlu1 %6372  ;;  %v6361_v31 = vld [vmem:[#allocation6 + $0x2d8] sm:$0xff]  ;;  %v8220_v35 = vpack.c.bf16 %v6343_v49, %v6342_v20  ;;  %v6761_v20 = vld [vmem:[#allocation6 + $0x368] sm:$0xff] }
 0x696   : > { %v13576_v43 = vpop.f32.mrb[11].mxu0  ;;  %v6381_v62 = vsel %vm5687_vm15, %v13456_v57, %v6373_v4  ;;  %v8210_v57 = vpack.c.bf16 %v6355_v46, %v6354_v48  ;;  %v8222_v6 = vpack.c.bf16 %v6361_v31, %v6360_v5  ;;  %v6364_v4 = vld [vmem:[#allocation6 + $0x2f0] sm:$0xff]  ;;  %v6763_v5 = vld [vmem:[#allocation6 + $0x378] sm:$0xff] }
 0x697   : > { %6557 = vmatprep.mubr.f32.mxu1 %v6247_v56  ;;  %7888 = vmatmul.mubr.msk.f32.gmra.mrb[26].mxu0 %vm6394_vm0, %v6381_v62 }
 0x698   : > { %6558 = vmatmul.mubr.f32.vlgmr.msra.gmra.mrb[24].mxu1 %v6246_v23  ;;  %v6051_v58 = vpop.f32.mrb[10].mxu1  ;;  %v6363_v23 = vld [vmem:[#allocation6 + $0x2e8] sm:$0xff] }
 0x699   : > { %v13581_v30 = vpop.f32.mrb[12].mxu0  ;;  %v6252_v19 = vmul.f32 %v6051_v58, %v5772_v24  ;;  %v6053_v29 = vpop.f32.mrb[11].mxu1  ;;  %8205 = vmatpush3.bf16.msra.mxu1 %v8204_v16  ;;  %v8226_v56 = vpack.c.bf16 %v6363_v23, %v6362_v25  ;;  %v6346_v16 = vld [vmem:[#allocation6 + $0x260] sm:$0xff]  ;;  %v8232_v58 = vpack.c.bf16 %v6349_v60, %v6348_v8  ;;  %v6873_v60 = vld [vmem:[#allocation6 + $0x3f8] sm:$0xff] }
 0x69a   : > { %v13583_v50 = vpop.f32.mrb[13].mxu0  ;;  %v6253_v0 = vmul.f32 %v6053_v29, %v5774_v33  ;;  %8207 = vmatprep.subr.bf16.mxu1 %v8206_v63  ;;  %v6365_v63 = vld [vmem:[#allocation6 + $0x2f8] sm:$0xff]  ;;  %v6772_v23 = vld [vmem:[#allocation6 + $0x3c0] sm:$0xff] }
 0x69c   : > { %6562 = vmatprep.mubr.f32.mxu1 %v6253_v0 }
 0x69d   : > { %v13585_v45 = vpop.f32.mrb[14].mxu0  ;;  %6563 = vmatmul.mubr.f32.gmra.mrb[26].mxu1 %v6252_v19 }
 0x69e   : > { %v13587_v44 = vpop.f32.mrb[15].mxu0  ;;  %8209 = vmatpush3.bf16.msra.mxu1 %v8208_v3 }
 0x69f   : > { %8211 = vmatprep.subr.bf16.mxu1 %v8210_v57 }
 0x6a1   : > { %v6134_v27 = vpop.f32.mrb[16].mxu0 }
 0x6a2   : > { %v6248_v37 = vmul.f32 %v6134_v27, %v13543_v54  ;;  %v6136_v38 = vpop.f32.mrb[17].mxu0  ;;  %8213 = vmatpush3.bf16.msra.mxu1 %v8212_v26 }
 0x6a3   : > { %v6249_v21 = vmul.f32 %v6136_v38, %v13547_v18  ;;  %8215 = vmatprep.subr.bf16.mxu1 %v8214_v41  ;;  %v6345_v18 = vld [vmem:[#allocation6 + $0x258] sm:$0xff] }
 0x6a4   : > { %v8224_v42 = vpack.c.bf16 %v6345_v18, %v6344_v47  ;;  %v6770_v47 = vld [vmem:[#allocation6 + $0x3b0] sm:$0xff]  ;;  %v6771_v18 = vld [vmem:[#allocation6 + $0x3b8] sm:$0xff] }
 0x6a5   : > { %v6140_v24 = vpop.f32.mrb[18].mxu0  ;;  %6642 = vmatprep.mubr.f32.mxu0 %v6249_v21  ;;  %v8254_v25 = vpack.c.bf16 %v6771_v18, %v6770_v47 }
 0x6a6   : > { %v6254_v33 = vmul.f32 %v6140_v24, %v13550_v2  ;;  %v6142_v51 = vpop.f32.mrb[19].mxu0  ;;  %6643 = vmatmul.mubr.f32.vlgmr.msra.gmra.mrb[28].mxu0 %v6248_v37  ;;  %8217 = vmatpush3.bf16.msra.mxu1 %v8216_v13  ;;  %v6347_v2 = vld [vmem:[#allocation6 + $0x268] sm:$0xff] }
 0x6a7   : > { %v6255_v54 = vmul.f32 %v6142_v51, %v13552_v17  ;;  %8219 = vmatprep.subr.bf16.mxu1 %v8218_v10  ;;  %v8228_v62 = vpack.c.bf16 %v6347_v2, %v6346_v16  ;;  %v8230_v17 = vpack.c.bf16 %v6365_v63, %v6364_v4  ;;  %v6760_v10 = vld [vmem:[#allocation6 + $0x360] sm:$0xff]  ;;  %v6765_v24 = vld [vmem:[#allocation6 + $0x388] sm:$0xff]  ;;  %v6767_v51 = vld [vmem:[#allocation6 + $0x398] sm:$0xff] }
 0x6a8   : > { %v8234_v49 = vpack.c.bf16 %v6761_v20, %v6760_v10  ;;  %v6775_v2 = vld [vmem:[#allocation6 + $0x3d8] sm:$0xff]  ;;  %v6870_v63 = vld [vmem:[#allocation6 + $0x3e0] sm:$0xff] }
 0x6a9   : > { %6647 = vmatprep.mubr.f32.mxu0 %v6255_v54  ;;  %v6769_v54 = vld [vmem:[#allocation6 + $0x3a8] sm:$0xff] }
 0x6aa   : > { %6648 = vmatmul.mubr.f32.gmra.mrb[30].mxu0 %v6254_v33  ;;  %8221 = vmatpush3.bf16.msra.mxu1 %v8220_v35  ;;  %v6766_v33 = vld [vmem:[#allocation6 + $0x390] sm:$0xff]  ;;  %v6768_v35 = vld [vmem:[#allocation6 + $0x3a0] sm:$0xff] }
 0x6ab   : > { %8223 = vmatprep.subr.bf16.mxu1 %v8222_v6  ;;  %8235 = vmatprep.subr.bf16.mxu0 %v8234_v49  ;;  %v8250_v6 = vpack.c.bf16 %v6769_v54, %v6768_v35 }
 0x6ac   : > { %8237 = vmatpush3.bf16.msra.mxu0 %v8234_v49 }
 0x6ae   : > { %8225 = vmatpush3.bf16.msra.mxu1 %v8224_v42  ;;  %v6773_v42 = vld [vmem:[#allocation6 + $0x3c8] sm:$0xff] }
 0x6af   : > { %8227 = vmatprep.subr.bf16.mxu1 %v8226_v56  ;;  %v6774_v56 = vld [vmem:[#allocation6 + $0x3d0] sm:$0xff]  ;;  %v8258_v16 = vpack.c.bf16 %v6773_v42, %v6772_v23  ;;  %v7460_v23 = vld [vmem:[#allocation6 + $0x560] ss:$0 sm:$0xff] }
 0x6b0   : > { %v8262_v4 = vpack.c.bf16 %v6775_v2, %v6774_v56 }
 0x6b2   : > { %8229 = vmatpush3.bf16.msra.mxu1 %v8228_v62  ;;  %v6871_v62 = vld [vmem:[#allocation6 + $0x3e8] sm:$0xff] }
 0x6b3   : > { %8231 = vmatprep.subr.bf16.mxu1 %v8230_v17  ;;  %v6872_v17 = vld [vmem:[#allocation6 + $0x3f0] sm:$0xff]  ;;  %v8266_v8 = vpack.c.bf16 %v6871_v62, %v6870_v63 }
 0x6b6   : > { %8233 = vmatpush3.bf16.msra.mxu1 %v8232_v58 }
 0x6b7   : > { %8267 = vmatprep.subr.bf16.mxu1 %v8266_v8 }
 0x6e2   : > { %v6057_v48 = vpop.f32.mrb[12].mxu1 }
 0x6e3   : > { %v6258_v46 = vmul.f32 %v6057_v48, %v13554_v52  ;;  %v6146_v19 = vpop.f32.mrb[20].mxu0  ;;  %v6059_v29 = vpop.f32.mrb[13].mxu1 }
 0x6e4   : > { %v6260_v0 = vmul.f32 %v6146_v19, %v13556_v32  ;;  %v6259_v3 = vmul.f32 %v6059_v29, %v13558_v12  ;;  %v6148_v57 = vpop.f32.mrb[21].mxu0  ;;  %v6874_v19 = vld [vmem:[#allocation6 + $0x400] sm:$0xff]  ;;  %v6875_v29 = vld [vmem:[#allocation6 + $0x408] sm:$0xff] }
 0x6e5   : > { %v6261_v34 = vmul.f32 %v6148_v57, %v13560_v14 }
 0x6e6   : > { %6567 = vmatprep.mubr.f32.mxu1 %v6259_v3 }
 0x6e7   : > { %6652 = vmatprep.mubr.f32.mxu0 %v6261_v34  ;;  %6568 = vmatmul.mubr.f32.gmra.mrb[28].mxu1 %v6258_v46  ;;  %v8270_v46 = vpack.c.bf16 %v6873_v60, %v6872_v17  ;;  %v8274_v34 = vpack.c.bf16 %v6875_v29, %v6874_v19 }
 0x6e8   : > { %6653 = vmatmul.mubr.f32.gmra.mrb[32].mxu0 %v6260_v0 }
 0x6f6   : > { %v6063_v36 = vpop.f32.mrb[14].mxu1 }
 0x6f7   : > { %v6264_v11 = vmul.f32 %v6063_v36, %v13562_v61  ;;  %v6152_v22 = vpop.f32.mrb[22].mxu0  ;;  %v6065_v26 = vpop.f32.mrb[15].mxu1 }
 0x6f8   : > { %v6266_v52 = vmul.f32 %v6152_v22, %v13564_v7  ;;  %v6265_v41 = vmul.f32 %v6065_v26, %v13566_v28  ;;  %v6154_v9 = vpop.f32.mrb[23].mxu0  ;;  %v6877_v22 = vld [vmem:[#allocation6 + $0x418] sm:$0xff] }
 0x6f9   : > { %v6267_v32 = vmul.f32 %v6154_v9, %v13568_v1 }
 0x6fa   : > { %v6223_v12 = vpop.f32.mrb[16].mxu1  ;;  %6572 = vmatprep.mubr.f32.mxu1 %v6265_v41 }
 0x6fb   : > { %v6250_v14 = vmul.f32 %v6223_v12, %v13570_v15  ;;  %6657 = vmatprep.mubr.f32.mxu0 %v6267_v32  ;;  %v6225_v59 = vpop.f32.mrb[17].mxu1  ;;  %6573 = vmatmul.mubr.f32.gmra.mrb[30].mxu1 %v6264_v11  ;;  %v6876_v11 = vld [vmem:[#allocation6 + $0x410] sm:$0xff]  ;;  %v6878_v32 = vld [vmem:[#allocation6 + $0x420] sm:$0xff]  ;;  %v6879_v12 = vld [vmem:[#allocation6 + $0x428] sm:$0xff] }
 0x6fc   : > { %v6251_v40 = vmul.f32 %v6225_v59, %v13572_v39  ;;  %6658 = vmatmul.mubr.f32.gmra.mrb[34].mxu0 %v6266_v52  ;;  %v8278_v9 = vpack.c.bf16 %v6877_v22, %v6876_v11  ;;  %v8282_v59 = vpack.c.bf16 %v6879_v12, %v6878_v32  ;;  %v6884_v22 = vld [vmem:[#allocation6 + $0x450] sm:$0xff] }
 0x6fd   : > { %v6982_v32 = vld [vmem:[#allocation6 + $0x470] sm:$0xff] }
 0x6fe   : > { %v6229_v61 = vpop.f32.mrb[18].mxu1  ;;  %6727 = vmatprep.mubr.f32.mxu1 %v6251_v40  ;;  %v6880_v40 = vld [vmem:[#allocation6 + $0x430] sm:$0xff] }
 0x6ff   : > { %v6256_v53 = vmul.f32 %v6229_v61, %v13574_v55  ;;  %v6231_v7 = vpop.f32.mrb[19].mxu1  ;;  %6728 = vmatmul.mubr.f32.vlgmr.msra.gmra.mrb[32].mxu1 %v6250_v14  ;;  %v6881_v61 = vld [vmem:[#allocation6 + $0x438] sm:$0xff] }
 0x700   : > { %v6257_v28 = vmul.f32 %v6231_v7, %v13576_v43  ;;  %8269 = vmatpush3.bf16.msra.mxu1 %v8266_v8 }
 0x701   : > { %8271 = vmatprep.subr.bf16.mxu1 %v8270_v46 }
 0x702   : > { %v6235_v27 = vpop.f32.mrb[20].mxu1  ;;  %6732 = vmatprep.mubr.f32.mxu1 %v6257_v28  ;;  %v8286_v28 = vpack.c.bf16 %v6881_v61, %v6880_v40  ;;  %v6984_v40 = vld [vmem:[#allocation6 + $0x480] sm:$0xff]  ;;  %v6985_v61 = vld [vmem:[#allocation6 + $0x488] sm:$0xff] }
 0x703   : > { %v6262_v1 = vmul.f32 %v6235_v27, %v13581_v30  ;;  %v6237_v37 = vpop.f32.mrb[21].mxu1  ;;  %6733 = vmatmul.mubr.f32.gmra.mrb[34].mxu1 %v6256_v53  ;;  %v6762_v30 = vld [vmem:[#allocation6 + $0x370] sm:$0xff] }
 0x704   : > { %v6263_v15 = vmul.f32 %v6237_v37, %v13583_v50  ;;  %v8238_v31 = vpack.c.bf16 %v6763_v5, %v6762_v30  ;;  %v6764_v50 = vld [vmem:[#allocation6 + $0x380] sm:$0xff]  ;;  %8273 = vmatpush3.bf16.msra.mxu1 %v8270_v46  ;;  %v6883_v37 = vld [vmem:[#allocation6 + $0x448] sm:$0xff] }
 0x705   : > { %8275 = vmatprep.subr.bf16.mxu1 %v8274_v34 }
 0x706   : > { %v6241_v38 = vpop.f32.mrb[22].mxu1  ;;  %6737 = vmatprep.mubr.f32.mxu1 %v6263_v15  ;;  %8239 = vmatprep.subr.bf16.mxu0 %v8238_v31 }
 0x707   : > { %v6268_v39 = vmul.f32 %v6241_v38, %v13585_v45  ;;  %v6243_v13 = vpop.f32.mrb[23].mxu1  ;;  %6738 = vmatmul.mubr.f32.gmra.mrb[36].mxu1 %v6262_v1  ;;  %v8242_v45 = vpack.c.bf16 %v6765_v24, %v6764_v50  ;;  %8241 = vmatpush3.bf16.msra.mxu0 %v8238_v31  ;;  %v6882_v1 = vld [vmem:[#allocation6 + $0x440] sm:$0xff] }
 0x708   : > { %v6269_v55 = vmul.f32 %v6243_v13, %v13587_v44  ;;  %v8246_v44 = vpack.c.bf16 %v6767_v51, %v6766_v33  ;;  %8277 = vmatpush3.bf16.msra.mxu1 %v8274_v34  ;;  %v8290_v13 = vpack.c.bf16 %v6883_v37, %v6882_v1  ;;  %v6988_v1 = vld [vmem:[#allocation6 + $0x4a0] sm:$0xff]  ;;  %v6989_v37 = vld [vmem:[#allocation6 + $0x4a8] sm:$0xff] }
 0x709   : > { %8243 = vmatprep.subr.bf16.mxu0 %v8242_v45  ;;  %8279 = vmatprep.subr.bf16.mxu1 %v8278_v9 }
 0x70a   : > { %6742 = vmatprep.mubr.f32.mxu1 %v6269_v55 }
 0x70b   : > { %v13609_v21 = vpop.f32.mrb[24].mxu0  ;;  %6743 = vmatmul.mubr.f32.gmra.mrb[38].mxu1 %v6268_v39  ;;  %8245 = vmatpush3.bf16.msra.mxu0 %v8242_v45 }
 0x70c   : > { %v6473_v43 = vpop.f32.mrb[25].mxu0  ;;  %8247 = vmatprep.subr.bf16.mxu0 %v8246_v44  ;;  %8281 = vmatpush3.bf16.msra.mxu1 %v8278_v9  ;;  %v6981_v9 = vld [vmem:[#allocation6 + $0x468] sm:$0xff] }
 0x70d   : > { %8283 = vmatprep.subr.bf16.mxu1 %v8282_v59 }
 0x70f   : > { %8249 = vmatpush3.bf16.msra.mxu0 %v8246_v44 }
 0x710   : > { %8251 = vmatprep.subr.bf16.mxu0 %v8250_v6  ;;  %8285 = vmatpush3.bf16.msra.mxu1 %v8282_v59 }
 0x711   : > { %8287 = vmatprep.subr.bf16.mxu1 %v8286_v28 }
 0x713   : > { %8253 = vmatpush3.bf16.msra.mxu0 %v8250_v6 }
 0x714   : > { %8255 = vmatprep.subr.bf16.mxu0 %v8254_v25  ;;  %8289 = vmatpush3.bf16.msra.mxu1 %v8286_v28  ;;  %v6987_v28 = vld [vmem:[#allocation6 + $0x498] sm:$0xff] }
 0x715   : > { %8291 = vmatprep.subr.bf16.mxu1 %v8290_v13 }
 0x717   : > { %8257 = vmatpush3.bf16.msra.mxu0 %v8254_v25 }
 0x718   : > { %8259 = vmatprep.subr.bf16.mxu0 %v8258_v16  ;;  %8293 = vmatpush3.bf16.msra.mxu1 %v8290_v13 }
 0x71b   : > { %8261 = vmatpush3.bf16.msra.mxu0 %v8258_v16 }
 0x71c   : > { %8263 = vmatprep.subr.bf16.mxu0 %v8262_v4 }
 0x71f   : > { %8265 = vmatpush3.bf16.msra.mxu0 %v8262_v4 }
 0x76a   : > { %v7889_v58 = vpop.f32.mrb[26].mxu0 }
 0x76b   : > { %v7680_v48 = vpop.f32.mrb[24].mxu1  ;;  %v6483_v0 = vpop.f32.mrb[27].mxu0 }
 0x76c   : > { %v7681_v3 = vpop.f32.mrb[25].mxu1 }
 0x76d   : > { %v7682_v57 = vadd.f32 %v7681_v3, %v7680_v48 }
 0x76f   : > { %v6560_v36 = vadd.f32 %v7682_v57, %v6473_v43 }
 0x770   : > { %v7683_v26 = vpop.f32.mrb[26].mxu1 }
 0x771   : > { %v7684_v52 = vpop.f32.mrb[27].mxu1 }
 0x772   : > { %v7685_v41 = vadd.f32 %v7684_v52, %v7683_v26  ;;  %v6885_v26 = vld [vmem:[#allocation6 + $0x458] sm:$0xff] }
 0x773   : > { %v8294_v52 = vpack.c.bf16 %v6885_v26, %v6884_v22 }
 0x774   : > { %v6565_v14 = vadd.f32 %v13609_v21, %v7685_v41  ;;  %v6980_v41 = vld [vmem:[#allocation6 + $0x460] sm:$0xff] }
 0x775   : > { %8295 = vmatprep.subr.bf16.mxu1 %v8294_v52  ;;  %v8298_v12 = vpack.c.bf16 %v6981_v9, %v6980_v41 }
 0x776   : > { %8297 = vmatpush3.bf16.msra.mxu1 %v8294_v52 }
 0x777   : > { %8299 = vmatprep.subr.bf16.mxu0 %v8298_v12 }
 0x779   : > { %v7724_v53 = vpop.f32.mrb[28].mxu0 }
 0x77a   : > { %v7725_v7 = vpop.f32.mrb[29].mxu0 }
 0x77b   : > { %v7726_v27 = vadd.f32 %v7725_v7, %v7724_v53  ;;  %v8306_v53 = vpack.c.bf16 %v6985_v61, %v6984_v40  ;;  %v6986_v7 = vld [vmem:[#allocation6 + $0x490] sm:$0xff] }
 0x77c   : > { %v7104_v61 = vld [vmem:[#allocation6 + $0x550] sm:$0xff] }
 0x77d   : > { %v6645_v15 = vadd.f32 %v7726_v27, %v6560_v36  ;;  %v7727_v38 = vpop.f32.mrb[30].mxu0  ;;  %v8310_v27 = vpack.c.bf16 %v6987_v28, %v6986_v7  ;;  %v7463_v28 = vld [vmem:[#allocation6 + $0x578] ss:$0 sm:$0xff] }
 0x77e   : > { %v7728_v39 = vpop.f32.mrb[31].mxu0 }
 0x77f   : > { %v7729_v55 = vadd.f32 %v7728_v39, %v7727_v38  ;;  %v6990_v38 = vld [vmem:[#allocation6 + $0x4b0] sm:$0xff]  ;;  %v6991_v39 = vld [vmem:[#allocation6 + $0x4b8] sm:$0xff] }
 0x780   : > { %v8318_v13 = vpack.c.bf16 %v6991_v39, %v6990_v38 }
 0x781   : > { %v6650_v21 = vadd.f32 %v7729_v55, %v6565_v14  ;;  %v6983_v14 = vld [vmem:[#allocation6 + $0x478] sm:$0xff]  ;;  %v6992_v55 = vld [vmem:[#allocation6 + $0x4c0] sm:$0xff] }
 0x782   : > { %v8302_v59 = vpack.c.bf16 %v6983_v14, %v6982_v32 }
 0x7ba   : > { %v7686_v43 = vpop.f32.mrb[28].mxu1 }
 0x7bb   : > { %v7730_v10 = vpop.f32.mrb[32].mxu0  ;;  %v7687_v20 = vpop.f32.mrb[29].mxu1 }
 0x7bc   : > { %v7688_v30 = vadd.f32 %v7687_v20, %v7686_v43  ;;  %v7731_v49 = vpop.f32.mrb[33].mxu0 }
 0x7bd   : > { %v7732_v5 = vadd.f32 %v7731_v49, %v7730_v10  ;;  %v7461_v10 = vld [vmem:[#allocation6 + $0x568] ss:$0 sm:$0xff] }
 0x7be   : > { %v6570_v31 = vadd.f32 %v7688_v30, %v6483_v0 }
 0x7c0   : > { %v6655_v50 = vadd.f32 %v7732_v5, %v6570_v31 }
 0x7ce   : > { %v7689_v24 = vpop.f32.mrb[30].mxu1 }
 0x7cf   : > { %v7733_v45 = vpop.f32.mrb[34].mxu0  ;;  %v7690_v33 = vpop.f32.mrb[31].mxu1 }
 0x7d0   : > { %v7691_v51 = vadd.f32 %v7690_v33, %v7689_v24  ;;  %v7734_v44 = vpop.f32.mrb[35].mxu0 }
 0x7d1   : > { %v7735_v35 = vadd.f32 %v7734_v44, %v7733_v45 }
 0x7d2   : > { %v6575_v54 = vadd.f32 %v7889_v58, %v7691_v51  ;;  %v7768_v6 = vpop.f32.mrb[32].mxu1 }
 0x7d3   : > { %v7769_v47 = vpop.f32.mrb[33].mxu1 }
 0x7d4   : > { %v6660_v18 = vadd.f32 %v7735_v35, %v6575_v54  ;;  %v7770_v25 = vadd.f32 %v7769_v47, %v7768_v6  ;;  %v6994_v54 = vld [vmem:[#allocation6 + $0x4d0] sm:$0xff]  ;;  %v6995_v6 = vld [vmem:[#allocation6 + $0x4d8] sm:$0xff] }
 0x7d5   : > { %v8326_v47 = vpack.c.bf16 %v6995_v6, %v6994_v54 }
 0x7d6   : > { %v6730_v42 = vadd.f32 %v7770_v25, %v6645_v15  ;;  %v7771_v56 = vpop.f32.mrb[34].mxu1  ;;  %v8314_v15 = vpack.c.bf16 %v6989_v37, %v6988_v1  ;;  %v7091_v25 = vld [vmem:[#allocation6 + $0x4e8] sm:$0xff] }
 0x7d7   : > { %v7772_v16 = vpop.f32.mrb[35].mxu1 }
 0x7d8   : > { %v7773_v2 = vadd.f32 %v7772_v16, %v7771_v56  ;;  %v6752_v4 = vadd.f32 %v7460_v23, %v6730_v42  ;;  %v7093_v56 = vld [vmem:[#allocation6 + $0x4f8] sm:$0xff] }
 0x7da   : > { %v6735_v63 = vadd.f32 %v7773_v2, %v6650_v21  ;;  %v7774_v62 = vpop.f32.mrb[36].mxu1  ;;  %v6756_v17 = vmax.f32 %v6752_v4, 0.0  ;;  %v6993_v21 = vld [vmem:[#allocation6 + $0x4c8] sm:$0xff]  ;;  %v7094_v2 = vld [vmem:[#allocation6 + $0x500] sm:$0xff] }
 0x7db   : > { %v7775_v8 = vpop.f32.mrb[37].mxu1  ;;  %v8322_v43 = vpack.c.bf16 %v6993_v21, %v6992_v55  ;;  %v7095_v4 = vld [vmem:[#allocation6 + $0x508] sm:$0xff] }
 0x7dc   : > { %v6753_v60 = vadd.f32 %v7460_v23, %v6735_v63  ;;  %v7776_v48 = vadd.f32 %v7775_v8, %v7774_v62  ;;  %7922 = vmatprep.mubr.f32.mxu0 %v6756_v17  ;;  %v8338_v63 = vpack.c.bf16 %v7095_v4, %v7094_v2  ;;  %v7096_v62 = vld [vmem:[#allocation6 + $0x510] sm:$0xff]  ;;  %v7097_v17 = vld [vmem:[#allocation6 + $0x518] sm:$0xff] }
 0x7dd   : > { %v8342_v8 = vpack.c.bf16 %v7097_v17, %v7096_v62 }
 0x7de   : > { %v6757_v46 = vmax.f32 %v6753_v60, 0.0  ;;  %v6740_v19 = vadd.f32 %v7776_v48, %v6655_v50  ;;  %v7777_v58 = vpop.f32.mrb[38].mxu1  ;;  %v7098_v60 = vld [vmem:[#allocation6 + $0x520] sm:$0xff]  ;;  %v7099_v48 = vld [vmem:[#allocation6 + $0x528] sm:$0xff] }
 0x7df   : > { %v7778_v29 = vpop.f32.mrb[39].mxu1 }
 0x7e0   : > { %v7779_v0 = vadd.f32 %v7778_v29, %v7777_v58  ;;  %7923 = vmatmul.mubr.f32.vlgmr.msra.gmra.mrb[36].mxu0 %v6757_v46  ;;  %v6754_v3 = vadd.f32 %v7460_v23, %v6740_v19  ;;  %v8346_v46 = vpack.c.bf16 %v7099_v48, %v7098_v60  ;;  %v7100_v19 = vld [vmem:[#allocation6 + $0x530] sm:$0xff]  ;;  %v7101_v58 = vld [vmem:[#allocation6 + $0x538] sm:$0xff] }
 0x7e1   : > { %8301 = vmatpush3.bf16.msra.mxu0 %v8298_v12  ;;  %v8350_v29 = vpack.c.bf16 %v7101_v58, %v7100_v19  ;;  %v7196_v58 = vlaneseq }
 0x7e2   : > { %v6745_v57 = vadd.f32 %v7779_v0, %v6660_v18  ;;  %v6758_v34 = vmax.f32 %v6754_v3, 0.0  ;;  %8303 = vmatprep.subr.bf16.mxu0 %v8302_v59  ;;  %v7090_v18 = vld [vmem:[#allocation6 + $0x4e0] sm:$0xff]  ;;  %v7103_v3 = vld [vmem:[#allocation6 + $0x548] sm:$0xff] }
 0x7e3   : > { %v8330_v42 = vpack.c.bf16 %v7091_v25, %v7090_v18  ;;  %v7102_v0 = vld [vmem:[#allocation6 + $0x540] sm:$0xff] }
 0x7e4   : > { %7925 = vmatprep.mubr.f32.mxu0 %v6758_v34  ;;  %v6755_v36 = vadd.f32 %v7460_v23, %v6745_v57  ;;  %v7092_v23 = vld [vmem:[#allocation6 + $0x4f0] sm:$0xff]  ;;  %v8354_v57 = vpack.c.bf16 %v7103_v3, %v7102_v0 }
 0x7e5   : > { %8305 = vmatpush3.bf16.msra.mxu0 %v8302_v59  ;;  %v8334_v16 = vpack.c.bf16 %v7093_v56, %v7092_v23  ;;  %8331 = vmatprep.subr.bf16.mxu1 %v8330_v42  ;;  %v7462_v34 = vld [vmem:[#allocation6 + $0x570] ss:$0 sm:$0xff] }
 0x7e6   : > { %v6759_v11 = vmax.f32 %v6755_v36, 0.0  ;;  %8307 = vmatprep.subr.bf16.mxu0 %v8306_v53 }
 0x7e8   : > { %7926 = vmatmul.mubr.f32.gmra.mrb[38].mxu0 %v6759_v11 }
 0x7e9   : > { %8309 = vmatpush3.bf16.msra.mxu0 %v8306_v53  ;;  %v7105_v53 = vld [vmem:[#allocation6 + $0x558] sm:$0xff] }
 0x7ea   : > { %8311 = vmatprep.subr.bf16.mxu0 %v8310_v27  ;;  %v8358_v7 = vpack.c.bf16 %v7105_v53, %v7104_v61 }
 0x7ed   : > { %8313 = vmatpush3.bf16.msra.mxu0 %v8310_v27 }
 0x7ee   : > { %8315 = vmatprep.subr.bf16.mxu0 %v8314_v15 }
 0x7f1   : > { %8317 = vmatpush3.bf16.msra.mxu0 %v8314_v15 }
 0x7f2   : > { %8319 = vmatprep.subr.bf16.mxu0 %v8318_v13 }
 0x7f5   : > { %8321 = vmatpush3.bf16.msra.mxu0 %v8318_v13 }
 0x7f6   : > { %8323 = vmatprep.subr.bf16.mxu0 %v8322_v43 }
 0x7f9   : > { %8325 = vmatpush3.bf16.msra.mxu0 %v8322_v43 }
 0x7fa   : > { %8327 = vmatprep.subr.bf16.mxu0 %v8326_v47 }
 0x7fd   : > { %8329 = vmatpush3.bf16.msra.mxu0 %v8326_v47 }
 0x8b3   : > { %v7924_v20 = vpop.f32.mrb[36].mxu0 }
 0x8b4   : > { %v6853_v30 = vadd.f32 %v7924_v20, %v7461_v10  ;;  %v6847_v49 = vpop.f32.mrb[37].mxu0 }
 0x8b5   : > { %v6848_v5 = vadd.f32 %v7461_v10, %v6847_v49 }
 0x8b6   : > { %v6867_v50 = vmax.f32 %v6853_v30, 0.0  ;;  %v7464_v30 = vld [vmem:[#allocation6 + $0x580] ss:$0 sm:$0xff] }
 0x8b7   : > { %v6866_v31 = vmax.f32 %v6848_v5, 0.0 }
 0x8b9   : > { %7960 = vmatprep.mubr.f32.mxu1 %v6866_v31 }
 0x8ba   : > { %7961 = vmatmul.mubr.f32.vlgmr.msra.gmra.mrb[40].mxu1 %v6867_v50 }
 0x8bb   : > { %v7927_v24 = vpop.f32.mrb[38].mxu0  ;;  %8333 = vmatpush3.bf16.msra.mxu1 %v8330_v42 }
 0x8bc   : > { %v6863_v45 = vadd.f32 %v7927_v24, %v7461_v10  ;;  %v6857_v33 = vpop.f32.mrb[39].mxu0  ;;  %8335 = vmatprep.subr.bf16.mxu1 %v8334_v16 }
 0x8bd   : > { %v6858_v51 = vadd.f32 %v7461_v10, %v6857_v33 }
 0x8be   : > { %v6869_v35 = vmax.f32 %v6863_v45, 0.0 }
 0x8bf   : > { %v6868_v44 = vmax.f32 %v6858_v51, 0.0  ;;  %8337 = vmatpush3.bf16.msra.mxu1 %v8334_v16 }
 0x8c0   : > { %8339 = vmatprep.subr.bf16.mxu1 %v8338_v63 }
 0x8c1   : > { %7963 = vmatprep.mubr.f32.mxu1 %v6868_v44 }
 0x8c2   : > { %7964 = vmatmul.mubr.f32.gmra.mrb[42].mxu1 %v6869_v35 }
 0x8c3   : > { %8341 = vmatpush3.bf16.msra.mxu1 %v8338_v63 }
 0x8c4   : > { %8343 = vmatprep.subr.bf16.mxu1 %v8342_v8 }
 0x8c7   : > { %8345 = vmatpush3.bf16.msra.mxu1 %v8342_v8 }
 0x8c8   : > { %8347 = vmatprep.subr.bf16.mxu1 %v8346_v46 }
 0x8cb   : > { %8349 = vmatpush3.bf16.msra.mxu1 %v8346_v46 }
 0x8cc   : > { %8351 = vmatprep.subr.bf16.mxu1 %v8350_v29 }
 0x8cf   : > { %8353 = vmatpush3.bf16.msra.mxu1 %v8350_v29 }
 0x8d0   : > { %8355 = vmatprep.subr.bf16.mxu1 %v8354_v57 }
 0x8d3   : > { %8357 = vmatpush3.bf16.msra.mxu1 %v8354_v57 }
 0x8d4   : > { %8359 = vmatprep.subr.bf16.mxu1 %v8358_v7 }
 0x8d7   : > { %8361 = vmatpush3.bf16.msra.mxu1 %v8358_v7 }
 0x98d   : > { %v7962_v36 = vpop.f32.mrb[40].mxu1 }
 0x98e   : > { %v6963_v11 = vadd.f32 %v7962_v36, %v7462_v34  ;;  %v6957_v22 = vpop.f32.mrb[41].mxu1 }
 0x98f   : > { %v6958_v26 = vadd.f32 %v7462_v34, %v6957_v22 }
 0x990   : > { %v6977_v41 = vmax.f32 %v6963_v11, 0.0 }
 0x991   : > { %v6976_v52 = vmax.f32 %v6958_v26, 0.0  ;;  %v13616_v26 = vand.u32 127, %v7196_v58 }
 0x993   : > { %7998 = vmatprep.mubr.f32.mxu0 %v6976_v52  ;;  %vm7198_vm1 = vcmp.lt.s32.totalorder %v13616_v26, 3  ;;  %vm7287_vm2 = vcmp.eq.s32.totalorder %v13616_v26, 3 }
 0x994   : > { %7999 = vmatmul.mubr.f32.vlgmr.msra.gmra.mrb[40].mxu0 %v6977_v41 }
 0x995   : > { %v7965_v9 = vpop.f32.mrb[42].mxu1 }
 0x996   : > { %v6973_v32 = vadd.f32 %v7965_v9, %v7462_v34  ;;  %v6967_v12 = vpop.f32.mrb[43].mxu1 }
 0x997   : > { %v6968_v14 = vadd.f32 %v7462_v34, %v6967_v12 }
 0x998   : > { %v6979_v40 = vmax.f32 %v6973_v32, 0.0 }
 0x999   : > { %v6978_v59 = vmax.f32 %v6968_v14, 0.0 }
 0x99b   : > { %8001 = vmatprep.mubr.f32.mxu0 %v6978_v59 }
 0x99c   : > { %8002 = vmatmul.mubr.f32.gmra.mrb[42].mxu0 %v6979_v40 }
 0xa67   : > { %v8000_v27 = vpop.f32.mrb[40].mxu0 }
 0xa68   : > { %v7073_v1 = vadd.f32 %v8000_v27, %v7463_v28  ;;  %v7067_v37 = vpop.f32.mrb[41].mxu0 }
 0xa69   : > { %v7068_v15 = vadd.f32 %v7463_v28, %v7067_v37 }
 0xa6a   : > { %v7087_v39 = vmax.f32 %v7073_v1, 0.0 }
 0xa6b   : > { %v7086_v38 = vmax.f32 %v7068_v15, 0.0 }
 0xa6d   : > { %8036 = vmatprep.mubr.f32.mxu1 %v7086_v38 }
 0xa6e   : > { %8037 = vmatmul.mubr.f32.vlgmr.msra.gmra.mrb[44].mxu1 %v7087_v39 }
 0xa6f   : > { %v8003_v13 = vpop.f32.mrb[42].mxu0 }
 0xa70   : > { %v7083_v55 = vadd.f32 %v8003_v13, %v7463_v28  ;;  %v7077_v21 = vpop.f32.mrb[43].mxu0 }
 0xa71   : > { %v7078_v43 = vadd.f32 %v7463_v28, %v7077_v21 }
 0xa72   : > { %v7089_v20 = vmax.f32 %v7083_v55, 0.0 }
 0xa73   : > { %v7088_v10 = vmax.f32 %v7078_v43, 0.0 }
 0xa75   : > { %8039 = vmatprep.mubr.f32.mxu1 %v7088_v10 }
 0xa76   : > { %8040 = vmatmul.mubr.f32.gmra.mrb[46].mxu1 %v7089_v20 }
 0xb41   : > { %v8038_v49 = vpop.f32.mrb[44].mxu1 }
 0xb42   : > { %v7183_v5 = vadd.f32 %v8038_v49, %v7464_v30  ;;  %v7177_v31 = vpop.f32.mrb[45].mxu1 }
 0xb43   : > { %v7178_v50 = vadd.f32 %v7464_v30, %v7177_v31 }
 0xb44   : > { %v7232_v24 = vand.u32 2147483647, %v7183_v5  ;;  %v7466_v16 = vmul.f32 -1.442695, %v7183_v5  ;;  %v7224_v3 = vsub.f32 0.0, %v7183_v5 }
 0xb45   : > { %v7231_v45 = vand.u32 2147483647, %v7178_v50  ;;  %v7465_v63 = vmul.f32 -1.442695, %v7178_v50  ;;  %v7223_v34 = vsub.f32 0.0, %v7178_v50 }
 0xb46   : > { %v7236_v33 = vsub.f32 0.0, %v7232_v24  ;;  %v7228_v9 = vmax.f32 %v7224_v3, 0.0 }
 0xb47   : > { %v7235_v51 = vsub.f32 0.0, %v7231_v45  ;;  %v7227_v14 = vmax.f32 %v7223_v34, 0.0 }
 0xb48   : > { %v7241_v44 = vmul.f32 1.442695, %v7236_v33  ;;  %v8938_v33 = vmov 0  }
 0xb49   : > { %v7239_v35 = vmul.f32 1.442695, %v7235_v51  ;;  %v8041_v54 = vpop.f32.mrb[46].mxu1  ;;  %8760 = vset.pattern.permute.xlu0 %v8938_v33  ;;  %8759 = vset.pattern.permute.xlu1 %v8938_v33 }
 0xb4a   : > { %8761 = vpow2.f32 %v7241_v44  ;;  %v13612_v6 = vadd.f32 %v8041_v54, %v7464_v30  ;;  %v7187_v47 = vpop.f32.mrb[47].mxu1 }
 0xb4b   : > { %8763 = vpow2.f32 %v7239_v35  ;;  %v7188_v18 = vadd.f32 %v7464_v30, %v7187_v47  ;;  %v7263_v47 = vld [vmem:[%s264_s15] sm:$0xff] }
 0xb4c   : > { %v7234_v25 = vand.u32 2147483647, %v13612_v6  ;;  %v7468_v48 = vmul.f32 -1.442695, %v13612_v6  ;;  %v7226_v38 = vsub.f32 0.0, %v13612_v6  ;;  %v7264_v6 = vld [vmem:[%s264_s15 + $0x8] sm:$0xff] }
 0xb4d   : > { %v7233_v23 = vand.u32 2147483647, %v7188_v18  ;;  %v7467_v46 = vmul.f32 -1.442695, %v7188_v18  ;;  %v7225_v1 = vsub.f32 0.0, %v7188_v18 }
 0xb4e   : > { %v7238_v42 = vsub.f32 0.0, %v7234_v25  ;;  %v7230_v10 = vmax.f32 %v7226_v38, 0.0 }
 0xb4f   : > { %v7237_v56 = vsub.f32 0.0, %v7233_v23  ;;  %v7229_v55 = vmax.f32 %v7225_v1, 0.0 }
 0xb50   : > { %v7245_v2 = vmul.f32 1.442695, %v7238_v42 }
 0xb51   : > { %v7243_v4 = vmul.f32 1.442695, %v7237_v56  ;;  %v7265_v56 = vld [vmem:[%s264_s15 + $0x10] sm:$0xff] }
 0xb52   : > { %8765 = vpow2.f32 %v7245_v2 }
 0xb53   : > { %8767 = vpow2.f32 %v7466_v16 }
 0xb54   : > { %v8762_v62 = vpop.eup %8761  ;;  %8769 = vpow2.f32 %v7243_v4  ;;  %v7266_v4 = vld [vmem:[%s264_s15 + $0x18] sm:$0xff] }
 0xb55   : > { %v8764_v17 = vpop.eup %8763  ;;  %v7248_v8 = vadd.f32 1.0, %v8762_v62  ;;  %8771 = vpow2.f32 %v7465_v63 }
 0xb56   : > { %v7247_v60 = vadd.f32 1.0, %v8764_v17 }
 0xb57   : > { %8773 = vlog2.f32 %v7248_v8 }
 0xb58   : > { %8775 = vlog2.f32 %v7247_v60 }
 0xb59   : > { %8777 = vpow2.f32 %v7468_v48 }
 0xb5a   : > { %8779 = vpow2.f32 %v7467_v46 }
 0xb5c   : > { %v8766_v19 = vpop.eup %8765 }
 0xb5d   : > { %v7250_v29 = vadd.f32 1.0, %v8766_v19  ;;  %v8768_v0 = vpop.eup %8767 }
 0xb5e   : > { %v8770_v57 = vpop.eup %8769  ;;  %v7212_v41 = vadd.f32 1.0, %v8768_v0 }
 0xb5f   : > { %v8772_v36 = vpop.eup %8771  ;;  %v7249_v11 = vadd.f32 1.0, %v8770_v57  ;;  %8781 = vlog2.f32 %v7250_v29 }
 0xb60   : > { %v7211_v12 = vadd.f32 1.0, %v8772_v36 }
 0xb61   : > { %v8774_v22 = vpop.eup %8773  ;;  %8783 = vlog2.f32 %v7249_v11 }
 0xb62   : > { %v8776_v52 = vpop.eup %8775  ;;  %v7254_v32 = vmul.f32 0.6931472, %v8774_v22  ;;  %8785 = vrcp.f32 %v7212_v41 }
 0xb63   : > { %v7252_v59 = vmul.f32 0.6931472, %v8776_v52  ;;  %v8778_v7 = vpop.eup %8777  ;;  %8787 = vrcp.f32 %v7211_v12 }
 0xb64   : > { %v7260_v40 = vadd.f32 %v7254_v32, %v7228_v9  ;;  %v8780_v27 = vpop.eup %8779  ;;  %v7214_v15 = vadd.f32 1.0, %v8778_v7 }
 0xb65   : > { %v7259_v61 = vadd.f32 %v7252_v59, %v7227_v14  ;;  %v7213_v39 = vadd.f32 1.0, %v8780_v27 }
 0xb66   : > { %v7268_v53 = vsel %vm7198_vm1, %v7260_v40, 0.0  ;;  %8789 = vrcp.f32 %v7214_v15 }
 0xb67   : > { %7273 = vadd.xlane.f32.xlu1 %v7268_v53  ;;  %v7267_v28 = vsel %vm7198_vm1, %v7259_v61, 0.0  ;;  %8791 = vrcp.f32 %v7213_v39 }
 0xb68   : > { %7271 = vadd.xlane.f32.xlu0 %v7267_v28 }
 0xb69   : > { %v8782_v37 = vpop.eup %8781 }
 0xb6a   : > { %v7258_v43 = vmul.f32 0.6931472, %v8782_v37 }
 0xb6b   : > { %v8784_v13 = vpop.eup %8783 }
 0xb6c   : > { %v7256_v21 = vmul.f32 0.6931472, %v8784_v13  ;;  %v8786_v30 = vpop.eup %8785  ;;  %v7262_v31 = vadd.f32 %v7258_v43, %v7230_v10 }
 0xb6d   : > { %v8788_v49 = vpop.eup %8787  ;;  %v7284_v50 = vsel %vm7198_vm1, %v8786_v30, 0.0 }
 0xb6e   : > { %v7261_v20 = vadd.f32 %v7256_v21, %v7229_v55  ;;  %v7283_v24 = vsel %vm7198_vm1, %v8788_v49, 0.0  ;;  %v7270_v45 = vsel %vm7198_vm1, %v7262_v31, 0.0 }
 0xb70   : > { %v7269_v5 = vsel %vm7198_vm1, %v7261_v20, 0.0  ;;  %v8790_v51 = vpop.eup %8789 }
 0xb71   : > { %7275 = vadd.xlane.f32.xlu0 %v7269_v5  ;;  %v8792_v44 = vpop.eup %8791  ;;  %v7286_v35 = vsel %vm7198_vm1, %v8790_v51, 0.0 }
 0xb72   : > { %v7285_v54 = vsel %vm7198_vm1, %v8792_v44, 0.0 }
 0xb75   : > { %7277 = vadd.xlane.f32.xlu0 %v7270_v45 }
 0xbf4   : > { %v7274_v18 = vpop.xlane.xlu1 %7273 }
 0xbf5   : > { %v7280_v25 = vmul.f32 %v7274_v18, %v7264_v6  ;;  %v7272_v23 = vpop.xlane.xlu0 %7271 }
 0xbf6   : > { %v7279_v42 = vmul.f32 %v7272_v23, %v7263_v47 }
 0xbf7   : > { %7295 = vperm.xlu0 %8760, %v7280_v25  }
 0xbf8   : > { %7290 = vperm.xlu1 %8759, %v7279_v42  }
 0xbfe   : > { %v7276_v16 = vpop.xlane.xlu0 %7275 }
 0xbff   : > { %v7281_v2 = vmul.f32 %v7276_v16, %v7265_v56 }
 0xc01   : > { %7300 = vperm.xlu1 %8759, %v7281_v2  }
 0xc02   : > { %v7278_v63 = vpop.xlane.xlu0 %7277 }
 0xc03   : > { %v7282_v62 = vmul.f32 %v7278_v63, %v7266_v4 }
 0xc05   : > { %7305 = vperm.xlu1 %8759, %v7282_v62  }
 0xc76   : > { %v7296_v17 = vpop.permute.xlu0 %7295 }
 0xc77   : > { %v7291_v8 = vpop.permute.xlu1 %7290  ;;  %v7309_v48 = vsel %vm7287_vm2, %v7296_v17, %v7284_v50 }
 0xc78   : > { %v7308_v60 = vsel %vm7287_vm2, %v7291_v8, %v7283_v24  ;;  %7313 = vst [vmem:[%s270_s25 + $0x8] sm:$0xff] %v7309_v48 }
 0xc79   : > { %7312 = vst [vmem:[%s270_s25] sm:$0xff] %v7308_v60 }
 0xc80   : > { %v7301_v46 = vpop.permute.xlu1 %7300 }
 0xc81   : > { %v7310_v19 = vsel %vm7287_vm2, %v7301_v46, %v7285_v54 }
 0xc82   : > { %7314 = vst [vmem:[%s270_s25 + $0x10] sm:$0xff] %v7310_v19 }
 0xc84   : > { %v7306_v58 = vpop.permute.xlu1 %7305 }
 0xc85   : > { %v7311_v29 = vsel %vm7287_vm2, %v7306_v58, %v7286_v35 }
 0xc86   : > { %7315 = vst [vmem:[%s270_s25 + $0x18] sm:$0xff] %v7311_v29 }
 0xc87 PF: > { %p15_p6 = scmp.ge.s32.totalorder %s9060_s9, 4   ;;  %s15115_s15 = smov %s8909_s16 }
 0xc88   : > { %s15116_s16 = smov %s8913_s17  ;;  %s15117_s17 = smov %s9069_s12 }
 0xc89   : > { %s15118_s18 = smov %s9060_s9  ;;  %17 = sbr.rel (!%p15_p6) target bundleno = 4 (0x4), region = 87 }
 0xc90   :  { %7338 = vsyncpa [#allocation3], 1 }
 0xc91   :  { %7340 = vsyncpa [#allocation3 + $0x1], 1 }
 0xc92   :  { %7341 = vsyncpa [#allocation5], 1 }

</bundles_post_ra>
